<compile_context>
chip_gen: v6e
topology: v6e:2x2x1
jax: 0.10.0
libtpu: 0.0.40
codegen_flags: <defaults>
</compile_context>

<pallas_src>
import jax
import jax.numpy as jnp
from jax import lax
from jax.experimental import pallas as pl
from jax.experimental.pallas import tpu as pltpu


def net_kernel(img_ref, w2_ref, wlin_ref, blin_ref, out_ref, p_ref, pooled_ref):
    # img_ref:    (32, 28*B_t) bf16  raw image tile; row y (28 real + 4 zero rows),
    #                                 lane = x*B_t + b
    # w2_ref:     (256, 160)   bf16  banded conv weight,
    #                                 row = wi*64 + c*6 + pi, col = kj*32 + y_in
    # wlin_ref:   (10, 384)    f32   linear weight, col = pj*64 + c*6 + pi
    # blin_ref:   (10, 1)      f32   linear bias with conv bias folded in
    # out_ref:    (10, B_t)    f32   log-softmax; classes on sublanes, batch on lanes
    # p_ref:      (160, 24*B_t) bf16 scratch: in-kernel im2col over kj
    # pooled_ref: (384, B_t)   f32   scratch: pooled activations, row = pj*64 + c*6 + pi
    bt = out_ref.shape[-1]

    # ---- In-kernel im2col over the 5 kj taps (vreg-aligned copies only). ----
    # p_ref[kj*32 + y, x*bt + b] = image[b, y, x + kj]   (rows 28..31 are zeros)
    for kj in range(5):
        p_ref[kj * 32:(kj + 1) * 32, :] = img_ref[:, kj * bt:(kj + 24) * bt]

    # ---- Conv2d(1,10,5): one bf16 MXU matmul with a banded weight. ----------
    # conv[wi*64 + c*6 + pi, x*bt + b] = conv_out[b, c, 4*pi + wi, x]  (no bias)
    conv = jnp.dot(w2_ref[...], p_ref[...],
                   preferred_element_type=jnp.float32)            # (256, 24*bt) f32

    # ---- MaxPool over y (wi): tree max of 4 aligned 64-row blocks. ----------
    ry = jnp.maximum(jnp.maximum(conv[0:64], conv[64:128]),
                     jnp.maximum(conv[128:192], conv[192:256]))   # (64, 24*bt)

    # ---- MaxPool over x (wj): tree max of 4 aligned bt-lane blocks per pj. --
    for pj in range(6):
        a = jnp.maximum(ry[:, (4 * pj + 0) * bt:(4 * pj + 1) * bt],
                        ry[:, (4 * pj + 1) * bt:(4 * pj + 2) * bt])
        b = jnp.maximum(ry[:, (4 * pj + 2) * bt:(4 * pj + 3) * bt],
                        ry[:, (4 * pj + 3) * bt:(4 * pj + 4) * bt])
        pooled_ref[pj * 64:(pj + 1) * 64, :] = jnp.maximum(a, b)  # (64, bt)

    # ---- Linear(360 -> 10) in f32 (columns pre-permuted on the host). -------
    logits = jnp.dot(wlin_ref[...], pooled_ref[...],
                     preferred_element_type=jnp.float32) + blin_ref[...]  # (10, bt)

    # ---- log_softmax over the class dim (10 sublane rows -> cheap). ---------
    m = jnp.max(logits, axis=0, keepdims=True)
    e = jnp.exp(logits - m)
    out_ref[...] = logits - m - jnp.log(jnp.sum(e, axis=0, keepdims=True))


def net_forward(x, wconv, bconv, wlin, blin, *, batch_tile=256):
    """x: (B, 1, 28, 28) float32 (NCHW). Returns (B, 10) log-probs."""
    assert batch_tile % 128 == 0, "batch_tile must be a multiple of 128 (lane alignment)"
    B = x.shape[0]
    n_tiles = pl.cdiv(B, batch_tile)
    b_pad = n_tiles * batch_tile

    # Raw image, cast to bf16 FIRST (review item 2), rows padded 28 -> 32 with
    # zeros so in-kernel im2col uses only 8-aligned 32-row sublane blocks.
    # Final layout (32, n_tiles*28*batch_tile): lane = (tile, x, batch-in-tile).
    xb = x.reshape(B, 28, 28).astype(jnp.bfloat16)
    xb = jnp.pad(xb, ((0, b_pad - B), (0, 4), (0, 0)))             # (b_pad, 32, 28)
    img = xb.reshape(n_tiles, batch_tile, 32, 28)
    img = img.transpose(2, 0, 3, 1).reshape(32, n_tiles * 28 * batch_tile)

    # Banded conv weight (256, 160):
    #   W2[wi*64 + c*6 + pi, kj*32 + y_in] = wconv[c, y_in - 4*pi - wi, kj]
    # (zero outside the 0 <= ki < 5 band; rows c*6+pi in [60,64) are zero pad).
    wc = wconv.reshape(10, 5, 5).astype(jnp.float32)
    wi_g, c_g, pi_g, ki_g, kj_g = jnp.meshgrid(
        jnp.arange(4), jnp.arange(10), jnp.arange(6), jnp.arange(5), jnp.arange(5),
        indexing="ij")
    rows = (wi_g * 64 + c_g * 6 + pi_g).ravel()
    cols = (kj_g * 32 + pi_g * 4 + wi_g + ki_g).ravel()
    vals = wc[c_g.ravel(), ki_g.ravel(), kj_g.ravel()]
    w2 = jnp.zeros((256, 160), jnp.float32).at[rows, cols].set(vals)
    w2 = w2.astype(jnp.bfloat16)

    # Linear weight with columns permuted to the in-kernel pooled-row order
    # row = pj*64 + c*6 + pi  (torch flatten order is c*36 + pi*6 + pj).
    wlin32 = wlin.astype(jnp.float32)
    c_g2, pi_g2, pj_g2 = jnp.meshgrid(jnp.arange(10), jnp.arange(6), jnp.arange(6),
                                      indexing="ij")
    src = (c_g2 * 36 + pi_g2 * 6 + pj_g2).ravel()
    dst = (pj_g2 * 64 + c_g2 * 6 + pi_g2).ravel()
    wlin_arr = jnp.zeros((10, 384), jnp.float32).at[:, dst].set(wlin32[:, src])

    # Fold the conv bias into the linear bias: max(conv + b_c) == max(conv) + b_c.
    bias_flat = jnp.repeat(bconv.astype(jnp.float32), 36)          # (360,)
    blin_eff = (blin.astype(jnp.float32) +
                jnp.dot(wlin32, bias_flat, precision=lax.Precision.HIGHEST))
    blin_col = blin_eff.reshape(10, 1)

    out = pl.pallas_call(
        net_kernel,
        out_shape=jax.ShapeDtypeStruct((10, b_pad), jnp.float32),
        grid=(n_tiles,),
        in_specs=[
            pl.BlockSpec((32, 28 * batch_tile), lambda i: (0, i)),
            pl.BlockSpec((256, 160), lambda i: (0, 0)),
            pl.BlockSpec((10, 384), lambda i: (0, 0)),
            pl.BlockSpec((10, 1), lambda i: (0, 0)),
        ],
        out_specs=pl.BlockSpec((10, batch_tile), lambda i: (0, i)),
        scratch_shapes=[
            pltpu.VMEM((160, 24 * batch_tile), jnp.bfloat16),      # im2col patches
            pltpu.VMEM((384, batch_tile), jnp.float32),            # pooled activations
        ],
        compiler_params=pltpu.CompilerParams(
            dimension_semantics=("parallel",),
            vmem_limit_bytes=32 * 1024 * 1024,
        ),
    )(img, w2, wlin_arr, blin_col)

    return out[:, :B].T                                            # (B, 10)


def net_reference(x, wconv, bconv, wlin, blin):
    """Pure-JAX f32 reference mirroring the PyTorch forward."""
    conv = lax.conv_general_dilated(
        x, wconv, window_strides=(1, 1), padding="VALID",
        dimension_numbers=("NCHW", "OIHW", "NCHW"),
        precision=lax.Precision.HIGHEST)
    conv = conv + bconv[None, :, None, None]                       # (B, 10, 24, 24)
    B = x.shape[0]
    pooled = conv.reshape(B, 10, 6, 4, 6, 4).max(axis=(3, 5))      # (B, 10, 6, 6)
    flat = pooled.reshape(B, 360)
    logits = jnp.dot(flat, wlin.T, precision=lax.Precision.HIGHEST) + blin
    return jax.nn.log_softmax(logits, axis=-1)


if __name__ == "__main__":
    key = jax.random.PRNGKey(0)
    kx, k1, k2, k3, k4, kx2 = jax.random.split(key, 6)

    # MNIST-sized input (forced by Linear(360, 10)); small batch for the test.
    x = jax.random.normal(kx, (2, 1, 28, 28), dtype=jnp.float32)

    wconv = 0.1 * jax.random.normal(k1, (10, 1, 5, 5), dtype=jnp.float32)
    bconv = 0.1 * jax.random.normal(k2, (10,), dtype=jnp.float32)
    wlin = 0.1 * jax.random.normal(k3, (10, 360), dtype=jnp.float32)
    blin = 0.1 * jax.random.normal(k4, (10,), dtype=jnp.float32)

    out = jax.block_until_ready(net_forward(x, wconv, bconv, wlin, blin))
    assert out.shape == (2, 10)

    # The kernel quantizes image + conv weight to bf16 (f32 accumulation):
    # compare tightly vs a reference fed bf16-rounded inputs, loosely vs f32.
    def q(v):
        return v.astype(jnp.bfloat16).astype(jnp.float32)

    ref_q = net_reference(q(x), q(wconv), bconv, wlin, blin)
    ref_f = net_reference(x, wconv, bconv, wlin, blin)
    assert jnp.max(jnp.abs(out - ref_q)) < 2e-2, "mismatch vs bf16-input reference"
    assert jnp.max(jnp.abs(out - ref_f)) < 1e-1, "mismatch vs f32 reference"

    # Multi-tile check: batch > batch_tile exercises the grid index maps and
    # the batch-padding path (3 tiles at batch_tile=128).
    x2 = jax.random.normal(kx2, (260, 1, 28, 28), dtype=jnp.float32)
    out2 = jax.block_until_ready(
        net_forward(x2, wconv, bconv, wlin, blin, batch_tile=128))
    ref2_q = net_reference(q(x2), q(wconv), bconv, wlin, blin)
    assert out2.shape == (260, 10)
    assert jnp.max(jnp.abs(out2 - ref2_q)) < 2e-2, "multi-tile mismatch"

    print("KERNEL_OK")
</pallas_src>

<mosaic_0001>
module attributes {stable_mosaic.version = 11 : i64} {
  func.func @net_kernel(%arg0: i32, %arg1: memref<32x7168xbf16, #tpu.memory_space<vmem>>, %arg2: memref<256x160xbf16, #tpu.memory_space<vmem>>, %arg3: memref<10x384xf32, #tpu.memory_space<vmem>>, %arg4: memref<10x1xf32, #tpu.memory_space<vmem>>, %arg5: memref<10x256xf32, #tpu.memory_space<vmem>>, %arg6: memref<160x6144xbf16, #tpu.memory_space<vmem>>, %arg7: memref<384x256xf32, #tpu.memory_space<vmem>>) attributes {dimension_semantics = [#tpu.dimension_semantics<parallel>], iteration_bounds = array<i64: 1>, scalar_prefetch = 0 : i64, scratch_operands = 2 : i64, tpu.core_type = #tpu.core_type<tc>, window_params = [{transform_indices = @transform_0, window_bounds = array<i64: 32, 7168>}, {pipeline_mode = #tpu.pipeline_mode<synchronous>, transform_indices = @transform_1, window_bounds = array<i64: 256, 160>}, {pipeline_mode = #tpu.pipeline_mode<synchronous>, transform_indices = @transform_2, window_bounds = array<i64: 10, 384>}, {pipeline_mode = #tpu.pipeline_mode<synchronous>, transform_indices = @transform_3, window_bounds = array<i64: 10, 1>}, {transform_indices = @transform_4, window_bounds = array<i64: 10, 256>}]} {
    %c0 = arith.constant 0 : index
    %c0_0 = arith.constant 0 : index
    %0 = vector.load %arg1[%c0, %c0_0] : memref<32x7168xbf16, #tpu.memory_space<vmem>>, vector<32x6144xbf16>
    %c0_1 = arith.constant 0 : index
    %c0_2 = arith.constant 0 : index
    %1 = vector.load %arg6[%c0_1, %c0_2] : memref<160x6144xbf16, #tpu.memory_space<vmem>>, vector<32x6144xbf16>
    tpu.vector_store %arg6[%c0_1, %c0_2], %0 {strides = array<i32>} : memref<160x6144xbf16, #tpu.memory_space<vmem>>, vector<32x6144xbf16>,
    %c0_3 = arith.constant 0 : index
    %c256 = arith.constant 256 : index
    %2 = vector.load %arg1[%c0_3, %c256] : memref<32x7168xbf16, #tpu.memory_space<vmem>>, vector<32x6144xbf16>
    %c32 = arith.constant 32 : index
    %c0_4 = arith.constant 0 : index
    %3 = vector.load %arg6[%c32, %c0_4] : memref<160x6144xbf16, #tpu.memory_space<vmem>>, vector<32x6144xbf16>
    tpu.vector_store %arg6[%c32, %c0_4], %2 {strides = array<i32>} : memref<160x6144xbf16, #tpu.memory_space<vmem>>, vector<32x6144xbf16>,
    %c0_5 = arith.constant 0 : index
    %c512 = arith.constant 512 : index
    %4 = vector.load %arg1[%c0_5, %c512] : memref<32x7168xbf16, #tpu.memory_space<vmem>>, vector<32x6144xbf16>
    %c64 = arith.constant 64 : index
    %c0_6 = arith.constant 0 : index
    %5 = vector.load %arg6[%c64, %c0_6] : memref<160x6144xbf16, #tpu.memory_space<vmem>>, vector<32x6144xbf16>
    tpu.vector_store %arg6[%c64, %c0_6], %4 {strides = array<i32>} : memref<160x6144xbf16, #tpu.memory_space<vmem>>, vector<32x6144xbf16>,
    %c0_7 = arith.constant 0 : index
    %c768 = arith.constant 768 : index
    %6 = vector.load %arg1[%c0_7, %c768] : memref<32x7168xbf16, #tpu.memory_space<vmem>>, vector<32x6144xbf16>
    %c96 = arith.constant 96 : index
    %c0_8 = arith.constant 0 : index
    %7 = vector.load %arg6[%c96, %c0_8] : memref<160x6144xbf16, #tpu.memory_space<vmem>>, vector<32x6144xbf16>
    tpu.vector_store %arg6[%c96, %c0_8], %6 {strides = array<i32>} : memref<160x6144xbf16, #tpu.memory_space<vmem>>, vector<32x6144xbf16>,
    %c0_9 = arith.constant 0 : index
    %c1024 = arith.constant 1024 : index
    %8 = vector.load %arg1[%c0_9, %c1024] : memref<32x7168xbf16, #tpu.memory_space<vmem>>, vector<32x6144xbf16>
    %c128 = arith.constant 128 : index
    %c0_10 = arith.constant 0 : index
    %9 = vector.load %arg6[%c128, %c0_10] : memref<160x6144xbf16, #tpu.memory_space<vmem>>, vector<32x6144xbf16>
    tpu.vector_store %arg6[%c128, %c0_10], %8 {strides = array<i32>} : memref<160x6144xbf16, #tpu.memory_space<vmem>>, vector<32x6144xbf16>,
    %c0_11 = arith.constant 0 : index
    %c0_12 = arith.constant 0 : index
    %10 = vector.load %arg2[%c0_11, %c0_12] : memref<256x160xbf16, #tpu.memory_space<vmem>>, vector<256x160xbf16>
    %c0_13 = arith.constant 0 : index
    %c0_14 = arith.constant 0 : index
    %11 = vector.load %arg6[%c0_13, %c0_14] : memref<160x6144xbf16, #tpu.memory_space<vmem>>, vector<160x6144xbf16>
    %cst = arith.constant dense<0.000000e+00> : vector<256x6144xf32>
    %12 = tpu.matmul %10, %11, %cst {dimension_numbers = #tpu.dot_dimension_numbers<[1], [0], [0], [1], [0, 0, 1, 1], [], []>} : vector<256x160xbf16>, vector<160x6144xbf16>, vector<256x6144xf32> -> vector<256x6144xf32>
    %13 = vector.extract_strided_slice %12 {offsets = [0, 0], sizes = [64, 6144], strides = [1, 1]} : vector<256x6144xf32> to vector<64x6144xf32>
    %14 = vector.extract_strided_slice %12 {offsets = [64, 0], sizes = [64, 6144], strides = [1, 1]} : vector<256x6144xf32> to vector<64x6144xf32>
    %15 = arith.maximumf %13, %14 : vector<64x6144xf32>
    %16 = vector.extract_strided_slice %12 {offsets = [128, 0], sizes = [64, 6144], strides = [1, 1]} : vector<256x6144xf32> to vector<64x6144xf32>
    %17 = vector.extract_strided_slice %12 {offsets = [192, 0], sizes = [64, 6144], strides = [1, 1]} : vector<256x6144xf32> to vector<64x6144xf32>
    %18 = arith.maximumf %16, %17 : vector<64x6144xf32>
    %19 = arith.maximumf %15, %18 : vector<64x6144xf32>
    %20 = vector.extract_strided_slice %19 {offsets = [0, 0], sizes = [64, 256], strides = [1, 1]} : vector<64x6144xf32> to vector<64x256xf32>
    %21 = vector.extract_strided_slice %19 {offsets = [0, 256], sizes = [64, 256], strides = [1, 1]} : vector<64x6144xf32> to vector<64x256xf32>
    %22 = arith.maximumf %20, %21 : vector<64x256xf32>
    %23 = vector.extract_strided_slice %19 {offsets = [0, 512], sizes = [64, 256], strides = [1, 1]} : vector<64x6144xf32> to vector<64x256xf32>
    %24 = vector.extract_strided_slice %19 {offsets = [0, 768], sizes = [64, 256], strides = [1, 1]} : vector<64x6144xf32> to vector<64x256xf32>
    %25 = arith.maximumf %23, %24 : vector<64x256xf32>
    %26 = arith.maximumf %22, %25 : vector<64x256xf32>
    %c0_15 = arith.constant 0 : index
    %c0_16 = arith.constant 0 : index
    %27 = vector.load %arg7[%c0_15, %c0_16] : memref<384x256xf32, #tpu.memory_space<vmem>>, vector<64x256xf32>
    tpu.vector_store %arg7[%c0_15, %c0_16], %26 {strides = array<i32>} : memref<384x256xf32, #tpu.memory_space<vmem>>, vector<64x256xf32>,
    %28 = vector.extract_strided_slice %19 {offsets = [0, 1024], sizes = [64, 256], strides = [1, 1]} : vector<64x6144xf32> to vector<64x256xf32>
    %29 = vector.extract_strided_slice %19 {offsets = [0, 1280], sizes = [64, 256], strides = [1, 1]} : vector<64x6144xf32> to vector<64x256xf32>
    %30 = arith.maximumf %28, %29 : vector<64x256xf32>
    %31 = vector.extract_strided_slice %19 {offsets = [0, 1536], sizes = [64, 256], strides = [1, 1]} : vector<64x6144xf32> to vector<64x256xf32>
    %32 = vector.extract_strided_slice %19 {offsets = [0, 1792], sizes = [64, 256], strides = [1, 1]} : vector<64x6144xf32> to vector<64x256xf32>
    %33 = arith.maximumf %31, %32 : vector<64x256xf32>
    %34 = arith.maximumf %30, %33 : vector<64x256xf32>
    %c64_17 = arith.constant 64 : index
    %c0_18 = arith.constant 0 : index
    %35 = vector.load %arg7[%c64_17, %c0_18] : memref<384x256xf32, #tpu.memory_space<vmem>>, vector<64x256xf32>
    tpu.vector_store %arg7[%c64_17, %c0_18], %34 {strides = array<i32>} : memref<384x256xf32, #tpu.memory_space<vmem>>, vector<64x256xf32>,
    %36 = vector.extract_strided_slice %19 {offsets = [0, 2048], sizes = [64, 256], strides = [1, 1]} : vector<64x6144xf32> to vector<64x256xf32>
    %37 = vector.extract_strided_slice %19 {offsets = [0, 2304], sizes = [64, 256], strides = [1, 1]} : vector<64x6144xf32> to vector<64x256xf32>
    %38 = arith.maximumf %36, %37 : vector<64x256xf32>
    %39 = vector.extract_strided_slice %19 {offsets = [0, 2560], sizes = [64, 256], strides = [1, 1]} : vector<64x6144xf32> to vector<64x256xf32>
    %40 = vector.extract_strided_slice %19 {offsets = [0, 2816], sizes = [64, 256], strides = [1, 1]} : vector<64x6144xf32> to vector<64x256xf32>
    %41 = arith.maximumf %39, %40 : vector<64x256xf32>
    %42 = arith.maximumf %38, %41 : vector<64x256xf32>
    %c128_19 = arith.constant 128 : index
    %c0_20 = arith.constant 0 : index
    %43 = vector.load %arg7[%c128_19, %c0_20] : memref<384x256xf32, #tpu.memory_space<vmem>>, vector<64x256xf32>
    tpu.vector_store %arg7[%c128_19, %c0_20], %42 {strides = array<i32>} : memref<384x256xf32, #tpu.memory_space<vmem>>, vector<64x256xf32>,
    %44 = vector.extract_strided_slice %19 {offsets = [0, 3072], sizes = [64, 256], strides = [1, 1]} : vector<64x6144xf32> to vector<64x256xf32>
    %45 = vector.extract_strided_slice %19 {offsets = [0, 3328], sizes = [64, 256], strides = [1, 1]} : vector<64x6144xf32> to vector<64x256xf32>
    %46 = arith.maximumf %44, %45 : vector<64x256xf32>
    %47 = vector.extract_strided_slice %19 {offsets = [0, 3584], sizes = [64, 256], strides = [1, 1]} : vector<64x6144xf32> to vector<64x256xf32>
    %48 = vector.extract_strided_slice %19 {offsets = [0, 3840], sizes = [64, 256], strides = [1, 1]} : vector<64x6144xf32> to vector<64x256xf32>
    %49 = arith.maximumf %47, %48 : vector<64x256xf32>
    %50 = arith.maximumf %46, %49 : vector<64x256xf32>
    %c192 = arith.constant 192 : index
    %c0_21 = arith.constant 0 : index
    %51 = vector.load %arg7[%c192, %c0_21] : memref<384x256xf32, #tpu.memory_space<vmem>>, vector<64x256xf32>
    tpu.vector_store %arg7[%c192, %c0_21], %50 {strides = array<i32>} : memref<384x256xf32, #tpu.memory_space<vmem>>, vector<64x256xf32>,
    %52 = vector.extract_strided_slice %19 {offsets = [0, 4096], sizes = [64, 256], strides = [1, 1]} : vector<64x6144xf32> to vector<64x256xf32>
    %53 = vector.extract_strided_slice %19 {offsets = [0, 4352], sizes = [64, 256], strides = [1, 1]} : vector<64x6144xf32> to vector<64x256xf32>
    %54 = arith.maximumf %52, %53 : vector<64x256xf32>
    %55 = vector.extract_strided_slice %19 {offsets = [0, 4608], sizes = [64, 256], strides = [1, 1]} : vector<64x6144xf32> to vector<64x256xf32>
    %56 = vector.extract_strided_slice %19 {offsets = [0, 4864], sizes = [64, 256], strides = [1, 1]} : vector<64x6144xf32> to vector<64x256xf32>
    %57 = arith.maximumf %55, %56 : vector<64x256xf32>
    %58 = arith.maximumf %54, %57 : vector<64x256xf32>
    %c256_22 = arith.constant 256 : index
    %c0_23 = arith.constant 0 : index
    %59 = vector.load %arg7[%c256_22, %c0_23] : memref<384x256xf32, #tpu.memory_space<vmem>>, vector<64x256xf32>
    tpu.vector_store %arg7[%c256_22, %c0_23], %58 {strides = array<i32>} : memref<384x256xf32, #tpu.memory_space<vmem>>, vector<64x256xf32>,
    %60 = vector.extract_strided_slice %19 {offsets = [0, 5120], sizes = [64, 256], strides = [1, 1]} : vector<64x6144xf32> to vector<64x256xf32>
    %61 = vector.extract_strided_slice %19 {offsets = [0, 5376], sizes = [64, 256], strides = [1, 1]} : vector<64x6144xf32> to vector<64x256xf32>
    %62 = arith.maximumf %60, %61 : vector<64x256xf32>
    %63 = vector.extract_strided_slice %19 {offsets = [0, 5632], sizes = [64, 256], strides = [1, 1]} : vector<64x6144xf32> to vector<64x256xf32>
    %64 = vector.extract_strided_slice %19 {offsets = [0, 5888], sizes = [64, 256], strides = [1, 1]} : vector<64x6144xf32> to vector<64x256xf32>
    %65 = arith.maximumf %63, %64 : vector<64x256xf32>
    %66 = arith.maximumf %62, %65 : vector<64x256xf32>
    %c320 = arith.constant 320 : index
    %c0_24 = arith.constant 0 : index
    %67 = vector.load %arg7[%c320, %c0_24] : memref<384x256xf32, #tpu.memory_space<vmem>>, vector<64x256xf32>
    tpu.vector_store %arg7[%c320, %c0_24], %66 {strides = array<i32>} : memref<384x256xf32, #tpu.memory_space<vmem>>, vector<64x256xf32>,
    %c0_25 = arith.constant 0 : index
    %c0_26 = arith.constant 0 : index
    %68 = vector.load %arg3[%c0_25, %c0_26] : memref<10x384xf32, #tpu.memory_space<vmem>>, vector<10x384xf32>
    %c0_27 = arith.constant 0 : index
    %c0_28 = arith.constant 0 : index
    %69 = vector.load %arg7[%c0_27, %c0_28] : memref<384x256xf32, #tpu.memory_space<vmem>>, vector<384x256xf32>
    %cst_29 = arith.constant dense<0.000000e+00> : vector<10x256xf32>
    %70 = tpu.matmul %68, %69, %cst_29 {dimension_numbers = #tpu.dot_dimension_numbers<[1], [0], [0], [1], [0, 0, 1, 1], [], []>} : vector<10x384xf32>, vector<384x256xf32>, vector<10x256xf32> -> vector<10x256xf32>
    %c0_30 = arith.constant 0 : index
    %c0_31 = arith.constant 0 : index
    %71 = vector.load %arg4[%c0_30, %c0_31] : memref<10x1xf32, #tpu.memory_space<vmem>>, vector<10x1xf32>
    %72 = vector.broadcast %71 : vector<10x1xf32> to vector<10x256xf32>
    %73 = arith.addf %70, %72 : vector<10x256xf32>
    %cst_32 = arith.constant dense<0xFF800000> : vector<256xf32>
    %74 = vector.multi_reduction <maximumf>, %73, %cst_32 [0] : vector<10x256xf32> to vector<256xf32>
    %75 = vector.shape_cast %74 : vector<256xf32> to vector<1x256xf32>
    %76 = vector.broadcast %75 : vector<1x256xf32> to vector<10x256xf32>
    %77 = arith.subf %73, %76 : vector<10x256xf32>
    %78 = math.exp %77 : vector<10x256xf32>
    %79 = vector.broadcast %75 : vector<1x256xf32> to vector<10x256xf32>
    %80 = arith.subf %73, %79 : vector<10x256xf32>
    %cst_33 = arith.constant dense<0.000000e+00> : vector<256xf32>
    %81 = vector.multi_reduction <add>, %78, %cst_33 [0] : vector<10x256xf32> to vector<256xf32>
    %82 = vector.shape_cast %81 : vector<256xf32> to vector<1x256xf32>
    %83 = math.log %82 : vector<1x256xf32>
    %84 = vector.broadcast %83 : vector<1x256xf32> to vector<10x256xf32>
    %85 = arith.subf %80, %84 : vector<10x256xf32>
    %c0_34 = arith.constant 0 : index
    %c0_35 = arith.constant 0 : index
    %86 = vector.load %arg5[%c0_34, %c0_35] : memref<10x256xf32, #tpu.memory_space<vmem>>, vector<10x256xf32>
    tpu.vector_store %arg5[%c0_34, %c0_35], %85 {strides = array<i32>} : memref<10x256xf32, #tpu.memory_space<vmem>>, vector<10x256xf32>,
    return
  }
  func.func @transform_0(%arg0: i32) -> (i32, i32) {
    %c0_i32 = arith.constant 0 : i32
    %c0_i32_0 = arith.constant 0 : i32
    return %c0_i32, %arg0 : i32, i32
  }
  func.func @transform_1(%arg0: i32) -> (i32, i32) {
    %c0_i32 = arith.constant 0 : i32
    %c0_i32_0 = arith.constant 0 : i32
    %c0_i32_1 = arith.constant 0 : i32
    return %c0_i32, %c0_i32_0 : i32, i32
  }
  func.func @transform_2(%arg0: i32) -> (i32, i32) {
    %c0_i32 = arith.constant 0 : i32
    %c0_i32_0 = arith.constant 0 : i32
    %c0_i32_1 = arith.constant 0 : i32
    return %c0_i32, %c0_i32_0 : i32, i32
  }
  func.func @transform_3(%arg0: i32) -> (i32, i32) {
    %c0_i32 = arith.constant 0 : i32
    %c0_i32_0 = arith.constant 0 : i32
    %c0_i32_1 = arith.constant 0 : i32
    return %c0_i32, %c0_i32_0 : i32, i32
  }
  func.func @transform_4(%arg0: i32) -> (i32, i32) {
    %c0_i32 = arith.constant 0 : i32
    %c0_i32_0 = arith.constant 0 : i32
    return %c0_i32, %arg0 : i32, i32
  }
}

</mosaic_0001>

<bundles_post_ra>
// kernel: tpu_custom_call.1
= control target key start
LH: loop header
LB: loop body
LE: loop exit
PB: predicated region body
PF: predicated region fallthrough
CT: control target
= control target key end

     0   :  { %9 = vsyncpa [#allocation5], 0  ;;  %s20686_s0 = inlined_call_operand.hbm [shape: bf16[32,7168], index: 0, kind: input, shape index: {}]   ;;  %s20687_s1 = inlined_call_operand.vmem [shape: bf16[256,160], index: 1, kind: input, shape index: {}]   ;;  %s20688_s2 = inlined_call_operand.vmem [shape: f32[10,384], index: 2, kind: input, shape index: {}]   ;;  %s20689_s3 = inlined_call_operand.vmem [shape: f32[10,1], index: 3, kind: input, shape index: {}]   ;;  %s20690_s4 = inlined_call_operand.hbm [shape: f32[10,256], index: 4, kind: output, shape index: {}]  }
   0x1   :  { %10 = vsyncpa [#allocation6], 0  ;;  %s11777_s15 = smov [#allocation4]  }
   0x2   :  { %s16_s16 = sshll.u32 %s11777_s15, 4  ;;  %s17_s16 = int_to_ptr.vmem [resolvable:$true] %s16_s16 }
   0x3   :  { %s11741_s17 = scalar_lea.vmem %s17_s16, 14336  ;;  %p11746_p1 = scmp.lt.s32.totalorder %s17_s16, %s17_s16 }
   0x4   :  { %p11742_p0 = scmp.ne.s32.totalorder %s17_s16, %s11741_s17  ;;  %p11747_p2 = scmp.lt.s32.totalorder %s11741_s17, %s11741_s17 }
   0x6   :  { %p11748_p3 = por %p11747_p2, %p11746_p1 }
   0x8   :  { %p11749_p4 = pnand %p11748_p3, %p11742_p0 }
   0xa   :  { %11752 = shalt.err (!%p11749_p4)
}
   0xb   :  { %s11778_s18 = smov 3584   ;;  %s11779_s19 = smov 224  }
   0xc   :  { %22 = dma.hbm_to_vmem [thread:$0]  %s20686_s0, 14336, %s17_s16, [#allocation5], %s11778_s18, %s11778_s18, %s11779_s19  }
   0xd   :  { %11773 = dma.done.wait [#allocation5], 14336  }
   0xe   :  { %11774 = vsyncadd [#allocation5], 4294952960  ;;  %v657_v0 = vld [vmem:[#allocation4 + $0x1d8] sm:$0xff]  ;;  %v658_v2 = vld [vmem:[#allocation4 + $0x1e0] sm:$0xff]  ;;  %vm4049_vm0 = vcmask 261120   ;;  %vm10534_vm1 = vcmask 1041408  }
   0xf   :  { %v681_v1 = vld [vmem:[#allocation4 + $0x2b8] sm:$0xff]  ;;  %v682_v4 = vld [vmem:[#allocation4 + $0x2c0] sm:$0xff]  ;;  %v465_v13 = vld [vmem:[#allocation4 + $0x1d0] sm:$0xff] }
  0x10   :  { %v11813_v3 = vcombine.high %v657_v0, %v681_v1  ;;  %v11815_v5 = vcombine.low %v657_v0, %v681_v1  ;;  %v609_v6 = vld [vmem:[#allocation4 + $0x18] sm:$0xff]  ;;  %v11817_v8 = vcombine.high %v658_v2, %v682_v4  ;;  %v11819_v9 = vcombine.low %v658_v2, %v682_v4  ;;  %v610_v11 = vld [vmem:[#allocation4 + $0x20] sm:$0xff]  ;;  %v489_v15 = vld [vmem:[#allocation4 + $0x2b0] sm:$0xff] }
  0x11   :  { %v633_v7 = vld [vmem:[#allocation4 + $0xf8] sm:$0xff]  ;;  %v634_v12 = vld [vmem:[#allocation4 + $0x100] sm:$0xff]  ;;  %v11834_v18 = vcombine.high %v465_v13, %v489_v15  ;;  %v417_v19 = vld [vmem:[#allocation4 + $0x10] sm:$0xff]  ;;  %v11838_v21 = vcombine.low %v465_v13, %v489_v15 }
  0x12   :  { %v11821_v10 = vcombine.high %v609_v6, %v633_v7  ;;  %4098 = vmatprep.subr.bf16.mxu0 %v11813_v3  ;;  %v11824_v14 = vcombine.high %v610_v11, %v634_v12  ;;  %4291 = vmatprep.subr.bf16.mxu1 %v11817_v8  ;;  %v11828_v16 = vcombine.low %v609_v6, %v633_v7  ;;  %v441_v20 = vld [vmem:[#allocation4 + $0xf0] sm:$0xff]  ;;  %v11843_v22 = vld [vmem:[%s20687_s1 + $0x4] ss:$8 sps:$4 sm:$0xff]   ;;  %v11885_v52 = vld [vmem:[%s20687_s1] ss:$8 sps:$4 sm:$0xff]  }
  0x13   :  { %4099 = vmatpush1.bf16.msra.mxu0 %v11815_v5  ;;  %4292 = vmatpush1.bf16.msra.mxu1 %v11819_v9  ;;  %v11832_v17 = vcombine.low %v610_v11, %v634_v12  ;;  %v11847_v23 = vcombine.high %v417_v19, %v441_v20  ;;  %v273_v24 = vld [vmem:[#allocation4 + $0x1c8] sm:$0xff]  ;;  %v11855_v26 = vcombine.low %v417_v19, %v441_v20  ;;  %v81_v32 = vld [vmem:[#allocation4 + $0x1c0] sm:$0xff]  ;;  %v660_v48 = vld [vmem:[#allocation4 + $0x1f0] sm:$0xff] }
  0x14   :  { %4100 = vmatprep.subr.bf16.mxu0 %v11821_v10  ;;  %4293 = vmatprep.subr.bf16.mxu1 %v11824_v14  ;;  %v297_v25 = vld [vmem:[#allocation4 + $0x2a8] sm:$0xff]  ;;  %v105_v33 = vld [vmem:[#allocation4 + $0x2a0] sm:$0xff]  ;;  %v684_v49 = vld [vmem:[#allocation4 + $0x2d0] sm:$0xff] }
  0x15   :  { %11120 = vmatprep.mubr.msk.bf16.mxu0 %vm4049_vm0, %v11843_v22  ;;  %11136 = vmatprep.mubr.msk.bf16.mxu1 %vm4049_vm0, %v11843_v22  ;;  %v10785_v27 = vcombine.high %v273_v24, %v297_v25  ;;  %v225_v28 = vld [vmem:[#allocation4 + $0x8] sm:$0xff]  ;;  %v10784_v30 = vcombine.low %v273_v24, %v297_v25  ;;  %v10689_v35 = vcombine.high %v81_v32, %v105_v33  ;;  %v33_v36 = vld [vmem:[#allocation4] sm:$0xff]  ;;  %v11891_v53 = vld [vmem:[%s20687_s1 + $0x14] ss:$8 sps:$4 sm:$0xff]  }
  0x16   :  { %v249_v29 = vld [vmem:[#allocation4 + $0xe8] sm:$0xff]  ;;  %v57_v37 = vld [vmem:[#allocation4 + $0xe0] sm:$0xff]  ;;  %v10688_v38 = vcombine.low %v81_v32, %v105_v33  ;;  %v11880_v51 = vcombine.high %v660_v48, %v684_v49  ;;  %v612_v54 = vld [vmem:[#allocation4 + $0x30] sm:$0xff]  ;;  %v11895_v56 = vcombine.low %v660_v48, %v684_v49 }
  0x17   :  { %4101 = vmatpush1.bf16.msra.mxu0 %v11828_v16  ;;  %4294 = vmatpush1.bf16.msra.mxu1 %v11832_v17  ;;  %v10737_v31 = vcombine.high %v225_v28, %v249_v29  ;;  %v10736_v34 = vcombine.low %v225_v28, %v249_v29  ;;  %v10641_v39 = vcombine.high %v33_v36, %v57_v37  ;;  %v850_v40 = vld [vmem:[#allocation4 + $0x1e8] sm:$0xff]  ;;  %v636_v55 = vld [vmem:[#allocation4 + $0x110] sm:$0xff]  ;;  %v852_v1 = vld [vmem:[#allocation4 + $0x1f8] sm:$0xff] }
  0x18   :  { %4102 = vmatprep.subr.bf16.mxu0 %v11834_v18  ;;  %4295 = vmatprep.subr.bf16.mxu1 %v11813_v3  ;;  %v874_v41 = vld [vmem:[#allocation4 + $0x2c8] sm:$0xff]  ;;  %v10640_v42 = vcombine.low %v33_v36, %v57_v37  ;;  %v11899_v57 = vcombine.high %v612_v54, %v636_v55  ;;  %v11909_v58 = vcombine.low %v612_v54, %v636_v55  ;;  %v11914_v59 = vld [vmem:[%s20687_s1 + $0x10] ss:$8 sps:$4 sm:$0xff]   ;;  %v11944_v62 = vld [vmem:[%s20687_s1 + $0x34] ss:$8 sps:$4 sm:$0xff]  }
  0x19   :  { %v11866_v43 = vcombine.high %v850_v40, %v874_v41  ;;  %v802_v44 = vld [vmem:[#allocation4 + $0x28] sm:$0xff]  ;;  %v11869_v46 = vcombine.low %v850_v40, %v874_v41  ;;  %v11962_v63 = vld [vmem:[%s20687_s1 + $0x30] ss:$8 sps:$4 sm:$0xff]   ;;  %v11994_v6 = vld [vmem:[%s20687_s1 + $0x54] ss:$8 sps:$4 sm:$0xff]  }
  0x1a   :  { %v826_v45 = vld [vmem:[#allocation4 + $0x108] sm:$0xff]  ;;  %21125 = vst [vmem:[#allocation10_spill] sm:$0xff] %v11962_v63  ;;  %v876_v2 = vld [vmem:[#allocation4 + $0x2d8] sm:$0xff]  ;;  %21128 = vst [vmem:[#allocation13_spill] sm:$0xff] %v11994_v6 }
  0x1b   :  { %4103 = vmatpush1.bf16.msra.mxu0 %v11838_v21  ;;  %4296 = vmatpush1.bf16.msra.mxu1 %v11815_v5  ;;  %v11872_v47 = vcombine.high %v802_v44, %v826_v45  ;;  %v11877_v50 = vcombine.low %v802_v44, %v826_v45  ;;  %v11920_v60 = vld [vmem:[%s20687_s1 + $0x24] ss:$8 sps:$4 sm:$0xff]   ;;  %v11938_v61 = vld [vmem:[%s20687_s1 + $0x20] ss:$8 sps:$4 sm:$0xff]   ;;  %v11989_v4 = vcombine.high %v852_v1, %v876_v2  ;;  %v804_v7 = vld [vmem:[#allocation4 + $0x38] sm:$0xff] }
  0x1c   :  { %4104 = vmatprep.subr.bf16.mxu0 %v11847_v23  ;;  %4297 = vmatprep.subr.bf16.mxu1 %v11821_v10  ;;  %v11968_v0 = vld [vmem:[%s20687_s1 + $0x44] ss:$8 sps:$4 sm:$0xff]   ;;  %v12018_v11 = vld [vmem:[%s20687_s1 + $0x50] ss:$8 sps:$4 sm:$0xff]   ;;  %v12038_v13 = vld [vmem:[%s20687_s1 + $0x60] ss:$8 sps:$4 sm:$0xff]  }
  0x1d   :  { %21126 = vst [vmem:[#allocation11_spill] sm:$0xff] %v11968_v0  ;;  %21129 = vst [vmem:[#allocation14_spill] sm:$0xff] %v12018_v11  ;;  %v12024_v12 = vld [vmem:[%s20687_s1 + $0x64] ss:$8 sps:$4 sm:$0xff]   ;;  %v12054_v15 = vld [vmem:[%s20687_s1 + $0x70] ss:$8 sps:$4 sm:$0xff]  }
  0x1e   :  { %21130 = vst [vmem:[#allocation15_spill] sm:$0xff] %v12024_v12  ;;  %21131 = vst [vmem:[#allocation16_spill] sm:$0xff] %v12038_v13  ;;  %v12086_v19 = vld [vmem:[%s20687_s1 + $0x90] ss:$8 sps:$4 sm:$0xff]   ;;  %v12091_v20 = vld [vmem:[%s20687_s1 + $0xa4] ss:$8 sps:$4 sm:$0xff]  }
  0x1f   :  { %4105 = vmatpush1.bf16.msra.mxu0 %v11855_v26  ;;  %4298 = vmatpush1.bf16.msra.mxu1 %v11828_v16  ;;  %21133 = vst [vmem:[#allocation18_spill] sm:$0xff] %v12054_v15  ;;  %v12118_v24 = vld [vmem:[%s20687_s1 + $0xb0] ss:$8 sps:$4 sm:$0xff]   ;;  %v12123_v25 = vld [vmem:[%s20687_s1 + $0xc4] ss:$8 sps:$4 sm:$0xff]  }
  0x20   :  { %4106 = vmatprep.subr.bf16.mxu0 %v10785_v27  ;;  %4299 = vmatprep.subr.bf16.mxu1 %v11834_v18  ;;  %v12137_v29 = vld [vmem:[%s20687_s1 + $0xc0] ss:$8 sps:$4 sm:$0xff]   ;;  %v12158_v32 = vld [vmem:[%s20687_s1 + $0xe4] ss:$8 sps:$4 sm:$0xff]  }
  0x21   :  { %v12169_v33 = vld [vmem:[%s20687_s1 + $0xe0] ss:$8 sps:$4 sm:$0xff]  }
  0x22   :  { %v614_v36 = vld [vmem:[#allocation4 + $0x40] sm:$0xff]  ;;  %v854_v54 = vld [vmem:[#allocation4 + $0x208] sm:$0xff] }
  0x23   :  { %4107 = vmatpush1.bf16.msra.mxu0 %v10784_v30  ;;  %4300 = vmatpush1.bf16.msra.mxu1 %v11838_v21  ;;  %v638_v37 = vld [vmem:[#allocation4 + $0x120] sm:$0xff]  ;;  %v878_v55 = vld [vmem:[#allocation4 + $0x2e8] sm:$0xff] }
  0x24   :  { %4108 = vmatprep.subr.bf16.mxu0 %v10737_v31  ;;  %4301 = vmatprep.subr.bf16.mxu1 %v11847_v23  ;;  %v12206_v40 = vcombine.low %v614_v36, %v638_v37  ;;  %v85_v41 = vld [vmem:[#allocation4 + $0x1e0] sm:$0xff] }
  0x25   :  { %v37_v45 = vld [vmem:[#allocation4 + $0x20] sm:$0xff] }
  0x26   :  { %v61_v48 = vld [vmem:[#allocation4 + $0x100] sm:$0xff] }
  0x27   :  { %4109 = vmatpush1.bf16.msra.mxu0 %v10736_v34  ;;  %4302 = vmatpush1.bf16.msra.mxu1 %v11855_v26 }
  0x28   :  { %4110 = vmatprep.subr.bf16.mxu0 %v10689_v35  ;;  %4303 = vmatprep.subr.bf16.mxu1 %v10785_v27  ;;  %v686_v27 = vld [vmem:[#allocation4 + $0x2e0] sm:$0xff]  ;;  %v12185_v35 = vld [vmem:[%s20687_s1 + $0xf0] ss:$8 sps:$4 sm:$0xff]  }
  0x2b   :  { %4111 = vmatpush1.bf16.msra.mxu0 %v10688_v38  ;;  %4304 = vmatpush1.bf16.msra.mxu1 %v10784_v30  ;;  %v12142_v30 = vld [vmem:[%s20687_s1 + $0xd4] ss:$8 sps:$4 sm:$0xff]  }
  0x2c   :  { %4112 = vmatprep.subr.bf16.mxu0 %v10641_v39  ;;  %4305 = vmatprep.subr.bf16.mxu1 %v10737_v31  ;;  %v12153_v31 = vld [vmem:[%s20687_s1 + $0xd0] ss:$8 sps:$4 sm:$0xff]   ;;  %v12196_v39 = vcombine.high %v614_v36, %v638_v37 }
  0x2f   :  { %4113 = vmatpush1.bf16.msra.mxu0 %v10640_v42  ;;  %4306 = vmatpush1.bf16.msra.mxu1 %v10736_v34  ;;  %v12174_v34 = vld [vmem:[%s20687_s1 + $0xf4] ss:$8 sps:$4 sm:$0xff]   ;;  %v109_v42 = vld [vmem:[#allocation4 + $0x2c0] sm:$0xff] }
  0x30   :  { %4126 = vmatprep.subr.bf16.mxu0 %v11817_v8  ;;  %4319 = vmatprep.subr.bf16.mxu1 %v11866_v43  ;;  %v10697_v44 = vcombine.high %v85_v41, %v109_v42  ;;  %v10696_v49 = vcombine.low %v85_v41, %v109_v42 }
  0x33   :  { %4127 = vmatpush2.bf16.msra.mxu0 %v11819_v9  ;;  %4320 = vmatpush2.bf16.msra.mxu1 %v11869_v46 }
  0x34   :  { %4128 = vmatprep.subr.bf16.mxu0 %v11824_v14  ;;  %4321 = vmatprep.subr.bf16.mxu1 %v11872_v47 }
  0x37   :  { %4129 = vmatpush2.bf16.msra.mxu0 %v11832_v17  ;;  %4322 = vmatpush2.bf16.msra.mxu1 %v11877_v50 }
  0x38   :  { %4484 = vmatprep.subr.bf16.mxu0 %v11866_v43  ;;  %4677 = vmatprep.subr.bf16.mxu1 %v11880_v51 }
  0x3a   :  { %4131 = vmatmul.mubr.bf16.vlgmr.msra.gmra.mxu0 %v11885_v52  ;;  %4324 = vmatmul.mubr.bf16.vlgmr.msra.gmra.mxu1 %v11885_v52 }
  0x3b   :  { %11121 = vmatprep.mubr.msk.bf16.mxu0 %vm4049_vm0, %v11891_v53  ;;  %11137 = vmatprep.mubr.msk.bf16.mxu1 %vm4049_vm0, %v11891_v53 }
  0x3c   :  { %4485 = vmatpush1.bf16.msra.mxu0 %v11869_v46  ;;  %4678 = vmatpush1.bf16.msra.mxu1 %v11895_v56 }
  0x3d   :  { %4486 = vmatprep.subr.bf16.mxu0 %v11872_v47  ;;  %4679 = vmatprep.subr.bf16.mxu1 %v11899_v57 }
  0x40   :  { %4487 = vmatpush1.bf16.msra.mxu0 %v11877_v50  ;;  %4680 = vmatpush1.bf16.msra.mxu1 %v11909_v58 }
  0x41   :  { %4488 = vmatprep.subr.bf16.mxu0 %v11817_v8  ;;  %4681 = vmatprep.subr.bf16.mxu1 %v11866_v43 }
  0x42   :  { %4141 = vmatmul.mubr.bf16.gmra.mxu0 %v11914_v59  ;;  %4334 = vmatmul.mubr.bf16.gmra.mxu1 %v11914_v59 }
  0x43   :  { %11122 = vmatprep.mubr.msk.bf16.mxu0 %vm4049_vm0, %v11920_v60  ;;  %11138 = vmatprep.mubr.msk.bf16.mxu1 %vm4049_vm0, %v11920_v60 }
  0x44   :  { %4489 = vmatpush1.bf16.msra.mxu0 %v11819_v9  ;;  %4682 = vmatpush1.bf16.msra.mxu1 %v11869_v46 }
  0x45   :  { %4490 = vmatprep.subr.bf16.mxu0 %v11824_v14  ;;  %4683 = vmatprep.subr.bf16.mxu1 %v11872_v47 }
  0x48   :  { %4491 = vmatpush1.bf16.msra.mxu0 %v11832_v17  ;;  %4684 = vmatpush1.bf16.msra.mxu1 %v11877_v50 }
  0x49   :  { %4492 = vmatprep.subr.bf16.mxu0 %v11813_v3  ;;  %4685 = vmatprep.subr.bf16.mxu1 %v11817_v8  ;;  %v828_v8 = vld [vmem:[#allocation4 + $0x118] sm:$0xff] }
  0x4a   :  { %4151 = vmatmul.mubr.bf16.gmra.mxu0 %v11938_v61  ;;  %4344 = vmatmul.mubr.bf16.gmra.mxu1 %v11938_v61 }
  0x4b   :  { %11123 = vmatprep.mubr.msk.bf16.mxu0 %vm4049_vm0, %v11944_v62  ;;  %11139 = vmatprep.mubr.msk.bf16.mxu1 %vm4049_vm0, %v11944_v62 }
  0x4c   :  { %4493 = vmatpush1.bf16.msra.mxu0 %v11815_v5  ;;  %4686 = vmatpush1.bf16.msra.mxu1 %v11819_v9  ;;  %v12003_v9 = vcombine.high %v804_v7, %v828_v8 }
  0x4d   :  { %4494 = vmatprep.subr.bf16.mxu0 %v11821_v10  ;;  %4687 = vmatprep.subr.bf16.mxu1 %v11824_v14  ;;  %v12043_v14 = vld [vmem:[%s20687_s1 + $0x74] ss:$8 sps:$4 sm:$0xff]  }
  0x4e   :  { %21132 = vst [vmem:[#allocation17_spill] sm:$0xff] %v12043_v14 }
  0x50   :  { %4495 = vmatpush1.bf16.msra.mxu0 %v11828_v16  ;;  %4688 = vmatpush1.bf16.msra.mxu1 %v11832_v17  ;;  %v12070_v17 = vld [vmem:[%s20687_s1 + $0x80] ss:$8 sps:$4 sm:$0xff]  }
  0x51   :  { %4496 = vmatprep.subr.bf16.mxu0 %v11834_v18  ;;  %4689 = vmatprep.subr.bf16.mxu1 %v11813_v3  ;;  %v11986_v3 = vld [vmem:[%s20687_s1 + $0x40] ss:$8 sps:$4 sm:$0xff]   ;;  %v12075_v18 = vld [vmem:[%s20687_s1 + $0x94] ss:$8 sps:$4 sm:$0xff]  }
  0x52   :  { %4161 = vmatmul.mubr.bf16.gmra.mxu0 %v11962_v63  ;;  %4354 = vmatmul.mubr.bf16.gmra.mxu1 %v11962_v63  ;;  %21127 = vst [vmem:[#allocation12_spill] sm:$0xff] %v11986_v3 }
  0x53   :  { %11124 = vmatprep.mubr.msk.bf16.mxu0 %vm4049_vm0, %v11968_v0  ;;  %11140 = vmatprep.mubr.msk.bf16.mxu1 %vm4049_vm0, %v11968_v0 }
  0x54   :  { %4497 = vmatpush1.bf16.msra.mxu0 %v11838_v21  ;;  %4690 = vmatpush1.bf16.msra.mxu1 %v11815_v5  ;;  %v11999_v5 = vcombine.low %v852_v1, %v876_v2  ;;  %v12102_v21 = vld [vmem:[%s20687_s1 + $0xa0] ss:$8 sps:$4 sm:$0xff]   ;;  %v12252_v1 = vcombine.low %v854_v54, %v878_v55 }
  0x55   :  { %4498 = vmatprep.subr.bf16.mxu0 %v11847_v23  ;;  %4691 = vmatprep.subr.bf16.mxu1 %v11821_v10  ;;  %v12013_v10 = vcombine.low %v804_v7, %v828_v8  ;;  %v12107_v23 = vld [vmem:[%s20687_s1 + $0xb4] ss:$8 sps:$4 sm:$0xff]  }
  0x58   :  { %4499 = vmatpush1.bf16.msra.mxu0 %v11855_v26  ;;  %4692 = vmatpush1.bf16.msra.mxu1 %v11828_v16  ;;  %v12059_v16 = vld [vmem:[%s20687_s1 + $0x84] ss:$8 sps:$4 sm:$0xff]  }
  0x59   :  { %4512 = vmatprep.subr.bf16.mxu0 %v11880_v51  ;;  %4705 = vmatprep.subr.bf16.mxu1 %v11989_v4  ;;  %21134 = vst [vmem:[#allocation19_spill] sm:$0xff] %v12059_v16  ;;  %v662_v26 = vld [vmem:[#allocation4 + $0x200] sm:$0xff] }
  0x5a   :  { %4171 = vmatmul.mubr.bf16.gmra.mxu0 %v11986_v3  ;;  %4364 = vmatmul.mubr.bf16.gmra.mxu1 %v11986_v3  ;;  %v12125_v28 = vcombine.high %v662_v26, %v686_v27  ;;  %v12193_v38 = vcombine.low %v662_v26, %v686_v27  ;;  %v12376_v27 = vld [vmem:[#allocation4 + $0x2f0] sm:$0xff] }
  0x5b   :  { %11125 = vmatprep.mubr.msk.bf16.mxu0 %vm4049_vm0, %v11994_v6  ;;  %11141 = vmatprep.mubr.msk.bf16.mxu1 %vm4049_vm0, %v11994_v6 }
  0x5c   :  { %4513 = vmatpush2.bf16.msra.mxu0 %v11895_v56  ;;  %4706 = vmatpush2.bf16.msra.mxu1 %v11999_v5 }
  0x5d   :  { %4514 = vmatprep.subr.bf16.mxu0 %v11899_v57  ;;  %4707 = vmatprep.subr.bf16.mxu1 %v12003_v9 }
  0x60   :  { %4515 = vmatpush2.bf16.msra.mxu0 %v11909_v58  ;;  %4708 = vmatpush2.bf16.msra.mxu1 %v12013_v10 }
  0x61   :  { %4870 = vmatprep.subr.bf16.mxu0 %v11989_v4  ;;  %5063 = vmatprep.subr.bf16.mxu1 %v12125_v28 }
  0x62   :  { %4181 = vmatmul.mubr.bf16.gmra.mxu0 %v12018_v11  ;;  %4374 = vmatmul.mubr.bf16.gmra.mxu1 %v12018_v11 }
  0x63   :  { %11126 = vmatprep.mubr.msk.bf16.mxu0 %vm4049_vm0, %v12024_v12  ;;  %11142 = vmatprep.mubr.msk.bf16.mxu1 %vm4049_vm0, %v12024_v12 }
  0x6a   :  { %4191 = vmatmul.mubr.bf16.gmra.mxu0 %v12038_v13  ;;  %4384 = vmatmul.mubr.bf16.gmra.mxu1 %v12038_v13 }
  0x6b   :  { %11127 = vmatprep.mubr.msk.bf16.mxu0 %vm4049_vm0, %v12043_v14  ;;  %11143 = vmatprep.mubr.msk.bf16.mxu1 %vm4049_vm0, %v12043_v14 }
  0x72   :  { %4201 = vmatmul.mubr.bf16.gmra.mxu0 %v12054_v15  ;;  %4394 = vmatmul.mubr.bf16.gmra.mxu1 %v12054_v15 }
  0x73   :  { %11128 = vmatprep.mubr.msk.bf16.mxu0 %vm4049_vm0, %v12059_v16  ;;  %11144 = vmatprep.mubr.msk.bf16.mxu1 %vm4049_vm0, %v12059_v16 }
  0x7a   :  { %4211 = vmatmul.mubr.bf16.gmra.mxu0 %v12070_v17  ;;  %4404 = vmatmul.mubr.bf16.gmra.mxu1 %v12070_v17 }
  0x7b   :  { %11129 = vmatprep.mubr.msk.bf16.mxu0 %vm4049_vm0, %v12075_v18  ;;  %11145 = vmatprep.mubr.msk.bf16.mxu1 %vm4049_vm0, %v12075_v18 }
  0x82   :  { %4221 = vmatmul.mubr.bf16.gmra.mxu0 %v12086_v19  ;;  %4414 = vmatmul.mubr.bf16.gmra.mxu1 %v12086_v19 }
  0x83   :  { %11130 = vmatprep.mubr.msk.bf16.mxu0 %vm4049_vm0, %v12091_v20  ;;  %11146 = vmatprep.mubr.msk.bf16.mxu1 %vm4049_vm0, %v12091_v20 }
  0x8a   :  { %4231 = vmatmul.mubr.bf16.gmra.mxu0 %v12102_v21  ;;  %4424 = vmatmul.mubr.bf16.gmra.mxu1 %v12102_v21 }
  0x8b   :  { %11131 = vmatprep.mubr.msk.bf16.mxu0 %vm4049_vm0, %v12107_v23  ;;  %11147 = vmatprep.mubr.msk.bf16.mxu1 %vm4049_vm0, %v12107_v23 }
  0x92   :  { %4241 = vmatmul.mubr.bf16.gmra.mxu0 %v12118_v24  ;;  %4434 = vmatmul.mubr.bf16.gmra.mxu1 %v12118_v24 }
  0x93   :  { %11132 = vmatprep.mubr.msk.bf16.mxu0 %vm4049_vm0, %v12123_v25  ;;  %11148 = vmatprep.mubr.msk.bf16.mxu1 %vm4049_vm0, %v12123_v25 }
  0x9a   :  { %4251 = vmatmul.mubr.bf16.gmra.mxu0 %v12137_v29  ;;  %4444 = vmatmul.mubr.bf16.gmra.mxu1 %v12137_v29 }
  0x9b   :  { %11133 = vmatprep.mubr.msk.bf16.mxu0 %vm4049_vm0, %v12142_v30  ;;  %11149 = vmatprep.mubr.msk.bf16.mxu1 %vm4049_vm0, %v12142_v30 }
  0xa2   :  { %4261 = vmatmul.mubr.bf16.gmra.mxu0 %v12153_v31  ;;  %4454 = vmatmul.mubr.bf16.gmra.mxu1 %v12153_v31 }
  0xa3   :  { %11134 = vmatprep.mubr.msk.bf16.mxu0 %vm4049_vm0, %v12158_v32  ;;  %11150 = vmatprep.mubr.msk.bf16.mxu1 %vm4049_vm0, %v12158_v32 }
  0xaa   :  { %4271 = vmatmul.mubr.bf16.gmra.mxu0 %v12169_v33  ;;  %4464 = vmatmul.mubr.bf16.gmra.mxu1 %v12169_v33 }
  0xab   :  { %11135 = vmatprep.mubr.msk.bf16.mxu0 %vm4049_vm0, %v12174_v34  ;;  %11151 = vmatprep.mubr.msk.bf16.mxu1 %vm4049_vm0, %v12174_v34 }
  0xb2   :  { %4281 = vmatmul.mubr.bf16.gmra.mxu0 %v12185_v35  ;;  %4474 = vmatmul.mubr.bf16.gmra.mxu1 %v12185_v35 }
  0xb3   :  { %11152 = vmatprep.mubr.msk.bf16.mxu0 %vm4049_vm0, %v11843_v22  ;;  %11168 = vmatprep.mubr.msk.bf16.mxu1 %vm4049_vm0, %v11843_v22 }
  0xba   :  { %4517 = vmatmul.mubr.bf16.vlgmr.msra.gmra.mxu0 %v11885_v52  ;;  %4710 = vmatmul.mubr.bf16.vlgmr.msra.gmra.mxu1 %v11885_v52 }
  0xbb   :  { %11153 = vmatprep.mubr.msk.bf16.mxu0 %vm4049_vm0, %v11891_v53  ;;  %11169 = vmatprep.mubr.msk.bf16.mxu1 %vm4049_vm0, %v11891_v53 }
  0xbc   :  { %4871 = vmatpush1.bf16.msra.mxu0 %v11999_v5  ;;  %5064 = vmatpush1.bf16.msra.mxu1 %v12193_v38 }
  0xbd   :  { %4872 = vmatprep.subr.bf16.mxu0 %v12003_v9  ;;  %5065 = vmatprep.subr.bf16.mxu1 %v12196_v39 }
  0xc0   :  { %4873 = vmatpush1.bf16.msra.mxu0 %v12013_v10  ;;  %5066 = vmatpush1.bf16.msra.mxu1 %v12206_v40 }
  0xc1   :  { %4874 = vmatprep.subr.bf16.mxu0 %v11880_v51  ;;  %5067 = vmatprep.subr.bf16.mxu1 %v11989_v4 }
  0xc2   :  { %4527 = vmatmul.mubr.bf16.gmra.mxu0 %v11914_v59  ;;  %4720 = vmatmul.mubr.bf16.gmra.mxu1 %v11914_v59 }
  0xc3   :  { %11154 = vmatprep.mubr.msk.bf16.mxu0 %vm4049_vm0, %v11920_v60  ;;  %11170 = vmatprep.mubr.msk.bf16.mxu1 %vm4049_vm0, %v11920_v60 }
  0xc4   :  { %4875 = vmatpush1.bf16.msra.mxu0 %v11895_v56  ;;  %5068 = vmatpush1.bf16.msra.mxu1 %v11999_v5 }
  0xc5   :  { %4876 = vmatprep.subr.bf16.mxu0 %v11899_v57  ;;  %5069 = vmatprep.subr.bf16.mxu1 %v12003_v9 }
  0xc8   :  { %4877 = vmatpush1.bf16.msra.mxu0 %v11909_v58  ;;  %5070 = vmatpush1.bf16.msra.mxu1 %v12013_v10 }
  0xc9   :  { %4878 = vmatprep.subr.bf16.mxu0 %v11866_v43  ;;  %5071 = vmatprep.subr.bf16.mxu1 %v11880_v51  ;;  %v10649_v51 = vcombine.high %v37_v45, %v61_v48 }
  0xca   :  { %4537 = vmatmul.mubr.bf16.gmra.mxu0 %v11938_v61  ;;  %4730 = vmatmul.mubr.bf16.gmra.mxu1 %v11938_v61 }
  0xcb   :  { %11155 = vmatprep.mubr.msk.bf16.mxu0 %vm4049_vm0, %v11944_v62  ;;  %11171 = vmatprep.mubr.msk.bf16.mxu1 %vm4049_vm0, %v11944_v62 }
  0xcc   :  { %4879 = vmatpush1.bf16.msra.mxu0 %v11869_v46  ;;  %5072 = vmatpush1.bf16.msra.mxu1 %v11895_v56  ;;  %v10648_v56 = vcombine.low %v37_v45, %v61_v48 }
  0xcd   :  { %4880 = vmatprep.subr.bf16.mxu0 %v11872_v47  ;;  %5073 = vmatprep.subr.bf16.mxu1 %v11899_v57  ;;  %v12248_v57 = vcombine.high %v854_v54, %v878_v55 }
  0xd0   :  { %4881 = vmatpush1.bf16.msra.mxu0 %v11877_v50  ;;  %5074 = vmatpush1.bf16.msra.mxu1 %v11909_v58  ;;  %v830_v58 = vld [vmem:[#allocation4 + $0x128] sm:$0xff] }
  0xd1   :  { %4882 = vmatprep.subr.bf16.mxu0 %v10697_v44  ;;  %5075 = vmatprep.subr.bf16.mxu1 %v11866_v43  ;;  %v806_v43 = vld [vmem:[#allocation4 + $0x48] sm:$0xff] }
  0xd2   :  { %4547 = vmatmul.mubr.bf16.gmra.mxu0 %v11962_v63  ;;  %4740 = vmatmul.mubr.bf16.gmra.mxu1 %v11962_v63  ;;  %v12256_v2 = vcombine.high %v806_v43, %v830_v58 }
  0xd3   :  { %11156 = vmatprep.mubr.msk.bf16.mxu0 %vm4049_vm0, %v11968_v0  ;;  %11172 = vmatprep.mubr.msk.bf16.mxu1 %vm4049_vm0, %v11968_v0 }
  0xd4   :  { %4883 = vmatpush1.bf16.msra.mxu0 %v10696_v49  ;;  %5076 = vmatpush1.bf16.msra.mxu1 %v11869_v46  ;;  %v12266_v46 = vcombine.low %v806_v43, %v830_v58 }
  0xd5   :  { %4884 = vmatprep.subr.bf16.mxu0 %v10649_v51  ;;  %5077 = vmatprep.subr.bf16.mxu1 %v11872_v47 }
  0xd8   :  { %4885 = vmatpush1.bf16.msra.mxu0 %v10648_v56  ;;  %5078 = vmatpush1.bf16.msra.mxu1 %v11877_v50  ;;  %v12374_v56 = vld [vmem:[#allocation4 + $0x210] sm:$0xff] }
  0xd9   :  { %4898 = vmatprep.subr.bf16.mxu0 %v12125_v28  ;;  %5091 = vmatprep.subr.bf16.mxu1 %v12248_v57 }
  0xda   :  { %4557 = vmatmul.mubr.bf16.gmra.mxu0 %v11986_v3  ;;  %4750 = vmatmul.mubr.bf16.gmra.mxu1 %v11986_v3 }
  0xdb   :  { %11157 = vmatprep.mubr.msk.bf16.mxu0 %vm4049_vm0, %v11994_v6  ;;  %11173 = vmatprep.mubr.msk.bf16.mxu1 %vm4049_vm0, %v11994_v6 }
  0xdc   :  { %4899 = vmatpush2.bf16.msra.mxu0 %v12193_v38  ;;  %5092 = vmatpush2.bf16.msra.mxu1 %v12252_v1 }
  0xdd   :  { %4900 = vmatprep.subr.bf16.mxu0 %v12196_v39  ;;  %5093 = vmatprep.subr.bf16.mxu1 %v12256_v2 }
  0xe0   :  { %4901 = vmatpush2.bf16.msra.mxu0 %v12206_v40  ;;  %5094 = vmatpush2.bf16.msra.mxu1 %v12266_v46 }
  0xe1   :  { %5256 = vmatprep.subr.bf16.mxu0 %v12248_v57 }
  0xe2   :  { %4567 = vmatmul.mubr.bf16.gmra.mxu0 %v12018_v11  ;;  %4760 = vmatmul.mubr.bf16.gmra.mxu1 %v12018_v11 }
  0xe3   :  { %11158 = vmatprep.mubr.msk.bf16.mxu0 %vm4049_vm0, %v12024_v12  ;;  %11174 = vmatprep.mubr.msk.bf16.mxu1 %vm4049_vm0, %v12024_v12 }
  0xea   :  { %4577 = vmatmul.mubr.bf16.gmra.mxu0 %v12038_v13  ;;  %4770 = vmatmul.mubr.bf16.gmra.mxu1 %v12038_v13 }
  0xeb   :  { %11159 = vmatprep.mubr.msk.bf16.mxu0 %vm4049_vm0, %v12043_v14  ;;  %11175 = vmatprep.mubr.msk.bf16.mxu1 %vm4049_vm0, %v12043_v14 }
  0xf2   :  { %4587 = vmatmul.mubr.bf16.gmra.mxu0 %v12054_v15  ;;  %4780 = vmatmul.mubr.bf16.gmra.mxu1 %v12054_v15 }
  0xf3   :  { %11160 = vmatprep.mubr.msk.bf16.mxu0 %vm4049_vm0, %v12059_v16  ;;  %11176 = vmatprep.mubr.msk.bf16.mxu1 %vm4049_vm0, %v12059_v16 }
  0xfa   :  { %v12290_v47 = vpop.f32.mrf.mxu0  ;;  %4597 = vmatmul.mubr.bf16.gmra.mxu0 %v12070_v17  ;;  %v12293_v50 = vpop.f32.mrf.mxu1  ;;  %4790 = vmatmul.mubr.bf16.gmra.mxu1 %v12070_v17 }
  0xfb   :  { %21135 = vst [vmem:[#allocation20_spill] sm:$0xff] %v12290_v47  ;;  %11161 = vmatprep.mubr.msk.bf16.mxu0 %vm4049_vm0, %v12075_v18  ;;  %11177 = vmatprep.mubr.msk.bf16.mxu1 %vm4049_vm0, %v12075_v18 }
  0xfc   :  { %v12298_v4 = vpop.f32.mrf.mxu0  ;;  %v12302_v7 = vpop.f32.mrf.mxu1 }
  0xfe   :  { %v12306_v5 = vpop.f32.mrf.mxu0  ;;  %v12308_v9 = vpop.f32.mrf.mxu1 }
  0xff   :  { %v21140_v47 = vmax.f32 %v12306_v5, %v12308_v9 }
 0x100   :  { %v12312_v17 = vpop.f32.mrf.mxu0  ;;  %v12314_v26 = vpop.f32.mrf.mxu1 }
 0x102   :  { %v12318_v18 = vpop.f32.mrf.mxu0  ;;  %4607 = vmatmul.mubr.bf16.gmra.mxu0 %v12086_v19  ;;  %v12321_v36 = vpop.f32.mrf.mxu1  ;;  %4800 = vmatmul.mubr.bf16.gmra.mxu1 %v12086_v19 }
 0x103   :  { %11162 = vmatprep.mubr.msk.bf16.mxu0 %vm4049_vm0, %v12091_v20  ;;  %11178 = vmatprep.mubr.msk.bf16.mxu1 %vm4049_vm0, %v12091_v20 }
 0x104   :  { %v12328_v41 = vpop.f32.mrf.mxu0  ;;  %v12332_v42 = vpop.f32.mrf.mxu1 }
 0x106   :  { %v12336_v45 = vpop.f32.mrf.mxu0  ;;  %v12338_v48 = vpop.f32.mrf.mxu1 }
 0x108   :  { %v12342_v49 = vpop.f32.mrf.mxu0  ;;  %v12344_v51 = vpop.f32.mrf.mxu1 }
 0x10a   :  { %v12348_v20 = vpop.f32.mrf.mxu0  ;;  %4617 = vmatmul.mubr.bf16.gmra.mxu0 %v12102_v21  ;;  %v12351_v55 = vpop.f32.mrf.mxu1  ;;  %4810 = vmatmul.mubr.bf16.gmra.mxu1 %v12102_v21 }
 0x10b   :  { %11163 = vmatprep.mubr.msk.bf16.mxu0 %vm4049_vm0, %v12107_v23  ;;  %11179 = vmatprep.mubr.msk.bf16.mxu1 %vm4049_vm0, %v12107_v23  ;;  %v12382_v23 = vcombine.high %v12374_v56, %v12376_v27 }
 0x10c   :  { %v12358_v43 = vpop.f32.mrf.mxu0  ;;  %v12362_v58 = vpop.f32.mrf.mxu1 }
 0x10d   :  { %21136 = vst [vmem:[#allocation21_spill] sm:$0xff] %v12382_v23  ;;  %5449 = vmatprep.subr.bf16.mxu1 %v12382_v23 }
 0x10e   :  { %v12366_v19 = vpop.f32.mrf.mxu0  ;;  %v12368_v44 = vpop.f32.mrf.mxu1 }
 0x110   :  { %v12372_v37 = vpop.f32.mrf.mxu0  ;;  %v12378_v10 = vpop.f32.mrf.mxu1 }
 0x112   :  { %v12386_v8 = vpop.f32.mrf.mxu0  ;;  %4627 = vmatmul.mubr.bf16.gmra.mxu0 %v12118_v24  ;;  %v12389_v21 = vpop.f32.mrf.mxu1  ;;  %4820 = vmatmul.mubr.bf16.gmra.mxu1 %v12118_v24 }
 0x113   :  { %11164 = vmatprep.mubr.msk.bf16.mxu0 %vm4049_vm0, %v12123_v25  ;;  %11180 = vmatprep.mubr.msk.bf16.mxu1 %vm4049_vm0, %v12123_v25  ;;  %v21139_v25 = vmax.f32 %v12298_v4, %v12302_v7  ;;  %v21141_v4 = vmax.f32 %v12312_v17, %v12314_v26  ;;  %v21143_v26 = vmax.f32 %v12328_v41, %v12332_v42 }
 0x114   :  { %v12396_v15 = vpop.f32.mrf.mxu0  ;;  %v12401_v54 = vpop.f32.mrf.mxu1  ;;  %v21145_v41 = vmax.f32 %v12342_v49, %v12344_v51 }
 0x116   :  { %v12405_v13 = vpop.f32.mrf.mxu0  ;;  %v12407_v24 = vpop.f32.mrf.mxu1 }
 0x118   :  { %v12411_v16 = vpop.f32.mrf.mxu0  ;;  %v12413_v11 = vpop.f32.mrf.mxu1 }
 0x11a   :  { %v12417_v6 = vpop.f32.mrf.mxu0  ;;  %4637 = vmatmul.mubr.bf16.gmra.mxu0 %v12137_v29  ;;  %v12422_v3 = vpop.f32.mrf.mxu1  ;;  %4830 = vmatmul.mubr.bf16.gmra.mxu1 %v12137_v29 }
 0x11b   :  { %21137 = vst [vmem:[#allocation22_spill] sm:$0xff] %v12417_v6  ;;  %21138 = vst [vmem:[#allocation23_spill] sm:$0xff] %v12422_v3  ;;  %11165 = vmatprep.mubr.msk.bf16.mxu0 %vm4049_vm0, %v12142_v30  ;;  %11181 = vmatprep.mubr.msk.bf16.mxu1 %vm4049_vm0, %v12142_v30 }
 0x11c   :  { %v4174_v23 = vpop.f32.mrf.mxu0  ;;  %v12436_v14 = vpop.f32.mrf.mxu1 }
 0x11d   :  { %v12434_v0 = vmax.f32 %v4174_v23, %v21139_v25 }
 0x11e   :  { %v4176_v6 = vpop.f32.mrf.mxu0  ;;  %v12445_v12 = vpop.f32.mrf.mxu1 }
 0x11f   :  { %v12443_v63 = vmax.f32 %v4176_v6, %v21140_v47  ;;  %v21142_v47 = vmax.f32 %v12318_v18, %v12321_v36 }
 0x120   :  { %v4178_v3 = vpop.f32.mrf.mxu0  ;;  %v12454_v23 = vpop.f32.mrf.mxu1 }
 0x121   :  { %v12452_v7 = vmax.f32 %v4178_v3, %v21141_v4 }
 0x122   :  { %v4182_v25 = vpop.f32.mrf.mxu0  ;;  %4647 = vmatmul.mubr.bf16.gmra.mxu0 %v12153_v31  ;;  %v12464_v9 = vpop.f32.mrf.mxu1  ;;  %4840 = vmatmul.mubr.bf16.gmra.mxu1 %v12153_v31 }
 0x123   :  { %v9547_v6 = vmax.f32 %v12454_v23, %v12452_v7  ;;  %v12462_v5 = vmax.f32 %v4182_v25, %v21142_v47  ;;  %11166 = vmatprep.mubr.msk.bf16.mxu0 %vm4049_vm0, %v12158_v32  ;;  %11182 = vmatprep.mubr.msk.bf16.mxu1 %vm4049_vm0, %v12158_v32  ;;  %v21144_v25 = vmax.f32 %v12336_v45, %v12338_v48 }
 0x124   :  { %v4184_v3 = vpop.f32.mrf.mxu0  ;;  %v12478_v36 = vpop.f32.mrf.mxu1  ;;  %v21146_v48 = vmax.f32 %v12348_v20, %v12351_v55 }
 0x125   :  { %v9210_v17 = vmax.f32 %v12464_v9, %v12462_v5  ;;  %v12476_v18 = vmax.f32 %v4184_v3, %v21143_v26  ;;  %v255_v9 = vld [vmem:[#allocation4 + $0x118] sm:$0xff] }
 0x126   :  { %v4186_v4 = vpop.f32.mrf.mxu0  ;;  %v12487_v32 = vpop.f32.mrf.mxu1 }
 0x127   :  { %v9211_v31 = vmax.f32 %v12478_v36, %v12476_v18  ;;  %v12485_v47 = vmax.f32 %v4186_v4, %v21144_v25 }
 0x128   :  { %v4188_v30 = vpop.f32.mrf.mxu0  ;;  %v12496_v3 = vpop.f32.mrf.mxu1 }
 0x129   :  { %v9258_v29 = vmax.f32 %v12487_v32, %v12485_v47  ;;  %v12494_v42 = vmax.f32 %v4188_v30, %v21145_v41  ;;  %v21147_v30 = vmax.f32 %v12358_v43, %v12362_v58  ;;  %v21149_v43 = vmax.f32 %v12372_v37, %v12378_v10  ;;  %v640_v37 = vld [vmem:[#allocation4 + $0x130] sm:$0xff] }
 0x12a   :  { %v4192_v26 = vpop.f32.mrf.mxu0  ;;  %4657 = vmatmul.mubr.bf16.gmra.mxu0 %v12169_v33  ;;  %v12506_v25 = vpop.f32.mrf.mxu1  ;;  %4850 = vmatmul.mubr.bf16.gmra.mxu1 %v12169_v33  ;;  %v87_v32 = vld [vmem:[#allocation4 + $0x1f0] sm:$0xff] }
 0x12b   :  { %v12504_v4 = vmax.f32 %v4192_v26, %v21146_v48  ;;  %11167 = vmatprep.mubr.msk.bf16.mxu0 %vm4049_vm0, %v12174_v34  ;;  %11183 = vmatprep.mubr.msk.bf16.mxu1 %vm4049_vm0, %v12174_v34  ;;  %v21148_v26 = vmax.f32 %v12366_v19, %v12368_v44  ;;  %v21150_v19 = vmax.f32 %v12386_v8, %v12389_v21  ;;  %v616_v44 = vld [vmem:[#allocation4 + $0x50] sm:$0xff] }
 0x12c   :  { %v4194_v49 = vpop.f32.mrf.mxu0  ;;  %v12520_v55 = vpop.f32.mrf.mxu1 }
 0x12d   :  { %v12518_v20 = vmax.f32 %v4194_v49, %v21147_v30 }
 0x12e   :  { %v4196_v41 = vpop.f32.mrf.mxu0  ;;  %v12529_v34 = vpop.f32.mrf.mxu1 }
 0x12f   :  { %v12527_v48 = vmax.f32 %v4196_v41, %v21148_v26 }
 0x130   :  { %v4198_v45 = vpop.f32.mrf.mxu0  ;;  %v12538_v49 = vpop.f32.mrf.mxu1 }
 0x131   :  { %v12536_v58 = vmax.f32 %v4198_v45, %v21149_v43  ;;  %v21151_v45 = vmax.f32 %v12396_v15, %v12401_v54  ;;  %v21153_v54 = vmax.f32 %v12411_v16, %v12413_v11 }
 0x132   :  { %v4202_v30 = vpop.f32.mrf.mxu0  ;;  %4667 = vmatmul.mubr.bf16.gmra.mxu0 %v12185_v35  ;;  %v12548_v26 = vpop.f32.mrf.mxu1  ;;  %4860 = vmatmul.mubr.bf16.gmra.mxu1 %v12185_v35 }
 0x133   :  { %v12546_v41 = vmax.f32 %v4202_v30, %v21150_v19  ;;  %11184 = vmatprep.mubr.msk.bf16.mxu0 %vm4049_vm0, %v11843_v22  ;;  %11200 = vmatprep.mubr.msk.bf16.mxu1 %vm4049_vm0, %v11843_v22  ;;  %v21152_v30 = vmax.f32 %v12405_v13, %v12407_v24  ;;  %v12584_v13 = vcombine.low %v12374_v56, %v12376_v27 }
 0x134   :  { %v4204_v10 = vpop.f32.mrf.mxu0  ;;  %v12562_v21 = vpop.f32.mrf.mxu1  ;;  %v12607_v27 = vcombine.low %v616_v44, %v640_v37 }
 0x135   :  { %v12560_v8 = vmax.f32 %v4204_v10, %v21151_v45 }
 0x136   :  { %v4206_v43 = vpop.f32.mrf.mxu0  ;;  %v12571_v22 = vpop.f32.mrf.mxu1 }
 0x137   :  { %v12569_v19 = vmax.f32 %v4206_v43, %v21152_v30  ;;  %v12589_v43 = vcombine.high %v616_v44, %v640_v37  ;;  %v303_v30 = vld [vmem:[#allocation4 + $0x2d8] sm:$0xff] }
 0x138   :  { %v4208_v51 = vpop.f32.mrf.mxu0  ;;  %v12580_v45 = vpop.f32.mrf.mxu1 }
 0x139   :  { %v12578_v10 = vmax.f32 %v4208_v51, %v21153_v54  ;;  %v279_v54 = vld [vmem:[#allocation4 + $0x1f8] sm:$0xff] }
 0x13a   :  { %v12586_v24 = vpop.f32.mrf.mxu0  ;;  %4903 = vmatmul.mubr.bf16.vlgmr.msra.gmra.mxu0 %v11885_v52  ;;  %v12593_v15 = vpop.f32.mrf.mxu1  ;;  %5096 = vmatmul.mubr.bf16.vlgmr.msra.gmra.mxu1 %v11885_v52 }
 0x13b   :  { %11185 = vmatprep.mubr.msk.bf16.mxu0 %vm4049_vm0, %v11891_v53  ;;  %11201 = vmatprep.mubr.msk.bf16.mxu1 %vm4049_vm0, %v11891_v53 }
 0x13c   :  { %v12598_v11 = vpop.f32.mrf.mxu0  ;;  %5257 = vmatpush1.bf16.msra.mxu0 %v12252_v1  ;;  %v12603_v16 = vpop.f32.mrf.mxu1  ;;  %5450 = vmatpush1.bf16.msra.mxu1 %v12584_v13 }
 0x13d   :  { %5258 = vmatprep.subr.bf16.mxu0 %v12256_v2  ;;  %5451 = vmatprep.subr.bf16.mxu1 %v12589_v43 }
 0x13e   :  { %v12609_v56 = vpop.f32.mrf.mxu0  ;;  %v12612_v52 = vpop.f32.mrf.mxu1 }
 0x140   :  { %v12614_v51 = vpop.f32.mrf.mxu0  ;;  %5259 = vmatpush1.bf16.msra.mxu0 %v12266_v46  ;;  %v4411_v53 = vpop.f32.mrf.mxu1  ;;  %5452 = vmatpush1.bf16.msra.mxu1 %v12607_v27 }
 0x141   :  { %5260 = vmatprep.subr.bf16.mxu0 %v12125_v28  ;;  %v12622_v44 = vmax.f32 %v4411_v53, %v9547_v6  ;;  %5453 = vmatprep.subr.bf16.mxu1 %v12248_v57 }
 0x142   :  { %v4222_v37 = vpop.f32.mrf.mxu0  ;;  %4913 = vmatmul.mubr.bf16.gmra.mxu0 %v11914_v59  ;;  %v12631_v33 = vpop.f32.mrf.mxu1  ;;  %5106 = vmatmul.mubr.bf16.gmra.mxu1 %v11914_v59  ;;  %v10797_v59 = vcombine.high %v279_v54, %v303_v30 }
 0x143   :  { %v12629_v35 = vmax.f32 %v4222_v37, %v9210_v17  ;;  %11186 = vmatprep.mubr.msk.bf16.mxu0 %vm4049_vm0, %v11920_v60  ;;  %11202 = vmatprep.mubr.msk.bf16.mxu1 %vm4049_vm0, %v11920_v60  ;;  %v231_v60 = vld [vmem:[#allocation4 + $0x38] sm:$0xff] }
 0x144   :  { %v4224_v7 = vpop.f32.mrf.mxu0  ;;  %5261 = vmatpush1.bf16.msra.mxu0 %v12193_v38  ;;  %v12646_v6 = vpop.f32.mrf.mxu1  ;;  %5454 = vmatpush1.bf16.msra.mxu1 %v12252_v1  ;;  %v10796_v1 = vcombine.low %v279_v54, %v303_v30  ;;  %v111_v30 = vld [vmem:[#allocation4 + $0x2d0] sm:$0xff] }
 0x145   :  { %v9212_v57 = vmax.f32 %v12631_v33, %v12629_v35  ;;  %v12644_v23 = vmax.f32 %v4224_v7, %v9211_v31  ;;  %5262 = vmatprep.subr.bf16.mxu0 %v12196_v39  ;;  %5455 = vmatprep.subr.bf16.mxu1 %v12256_v2  ;;  %v21154_v2 = vmax.f32 %v12496_v3, %v12494_v42 }
 0x146   :  { %v4226_v5 = vpop.f32.mrf.mxu0  ;;  %v12658_v36 = vpop.f32.mrf.mxu1  ;;  %v21155_v42 = vmax.f32 %v12506_v25, %v12504_v4  ;;  %v21156_v4 = vmax.f32 %v12520_v55, %v12518_v20 }
 0x147   :  { %v9213_v17 = vmax.f32 %v12646_v6, %v12644_v23  ;;  %v12656_v18 = vmax.f32 %v4226_v5, %v9258_v29  ;;  %v10749_v29 = vcombine.high %v231_v60, %v255_v9 }
 0x148   :  { %v4228_v31 = vpop.f32.mrf.mxu0  ;;  %5263 = vmatpush1.bf16.msra.mxu0 %v12206_v40  ;;  %v12668_v7 = vpop.f32.mrf.mxu1  ;;  %5456 = vmatpush1.bf16.msra.mxu1 %v12266_v46 }
 0x149   :  { %v9260_v53 = vmax.f32 %v12658_v36, %v12656_v18  ;;  %v12666_v37 = vmax.f32 %v4228_v31, %v21154_v2  ;;  %5264 = vmatprep.subr.bf16.mxu0 %v10797_v59  ;;  %5457 = vmatprep.subr.bf16.mxu1 %v12125_v28  ;;  %v10748_v28 = vcombine.low %v231_v60, %v255_v9 }
 0x14a   :  { %v4232_v47 = vpop.f32.mrf.mxu0  ;;  %4923 = vmatmul.mubr.bf16.gmra.mxu0 %v11938_v61  ;;  %v12680_v5 = vpop.f32.mrf.mxu1  ;;  %5116 = vmatmul.mubr.bf16.gmra.mxu1 %v11938_v61  ;;  %v10701_v61 = vcombine.high %v87_v32, %v111_v30  ;;  %v21157_v9 = vmax.f32 %v12529_v34, %v12527_v48 }
 0x14b   :  { %v12678_v3 = vmax.f32 %v4232_v47, %v21155_v42  ;;  %11187 = vmatprep.mubr.msk.bf16.mxu0 %vm4049_vm0, %v11944_v62  ;;  %11203 = vmatprep.mubr.msk.bf16.mxu1 %vm4049_vm0, %v11944_v62  ;;  %v39_v62 = vld [vmem:[#allocation4 + $0x30] sm:$0xff]  ;;  %v21177_v23 = vmax.f32 %v12668_v7, %v12666_v37  ;;  %v21180_v37 = vld [vmem:[#allocation17_spill] sm:$0xff] }
 0x14c   :  { %v4234_v46 = vpop.f32.mrf.mxu0  ;;  %5265 = vmatpush1.bf16.msra.mxu0 %v10796_v1  ;;  %v12694_v2 = vpop.f32.mrf.mxu1  ;;  %5458 = vmatpush1.bf16.msra.mxu1 %v12193_v38  ;;  %v63_v42 = vld [vmem:[#allocation4 + $0x110] sm:$0xff]  ;;  %v10700_v38 = vcombine.low %v87_v32, %v111_v30  ;;  %v21160_v30 = vmax.f32 %v12548_v26, %v12546_v41  ;;  %v21162_v26 = vmax.f32 %v12562_v21, %v12560_v8  ;;  %v808_v8 = vld [vmem:[#allocation4 + $0x58] sm:$0xff] }
 0x14d   :  { %v12692_v25 = vmax.f32 %v4234_v46, %v21156_v4  ;;  %5266 = vmatprep.subr.bf16.mxu0 %v10749_v29  ;;  %5459 = vmatprep.subr.bf16.mxu1 %v12196_v39  ;;  %v21158_v39 = vmax.f32 %v12538_v49, %v12536_v58  ;;  %v10653_v48 = vcombine.high %v39_v62, %v63_v42  ;;  %v21161_v49 = vld [vmem:[#allocation11_spill] sm:$0xff]  ;;  %v832_v21 = vld [vmem:[#allocation4 + $0x138] sm:$0xff] }
 0x14e   :  { %v4236_v47 = vpop.f32.mrf.mxu0  ;;  %v12705_v55 = vpop.f32.mrf.mxu1  ;;  %v21179_v36 = vmax.f32 %v12680_v5, %v12678_v3 }
 0x14f   :  { %v9309_v60 = vmax.f32 %v12694_v2, %v12692_v25  ;;  %v12703_v20 = vmax.f32 %v4236_v47, %v21157_v9  ;;  %v21159_v47 = vld [vmem:[#allocation10_spill] sm:$0xff] }
 0x150   :  { %v4238_v46 = vpop.f32.mrf.mxu0  ;;  %5267 = vmatpush1.bf16.msra.mxu0 %v10748_v28  ;;  %v12714_v54 = vpop.f32.mrf.mxu1  ;;  %5460 = vmatpush1.bf16.msra.mxu1 %v12206_v40  ;;  %v856_v40 = vld [vmem:[#allocation4 + $0x218] sm:$0xff] }
 0x151   :  { %v9356_v4 = vmax.f32 %v12705_v55, %v12703_v20  ;;  %v12712_v31 = vmax.f32 %v4238_v46, %v21158_v39  ;;  %5268 = vmatprep.subr.bf16.mxu0 %v10701_v61  ;;  %5461 = vmatprep.subr.bf16.mxu1 %v10797_v59  ;;  %v880_v61 = vld [vmem:[#allocation4 + $0x2f8] sm:$0xff]  ;;  %v10652_v59 = vcombine.low %v39_v62, %v63_v42 }
 0x152   :  { %v4242_v34 = vpop.f32.mrf.mxu0  ;;  %4933 = vmatmul.mubr.bf16.gmra.mxu0 %v21159_v47  ;;  %v12725_v58 = vpop.f32.mrf.mxu1  ;;  %5126 = vmatmul.mubr.bf16.gmra.mxu1 %v21159_v47  ;;  %v21163_v62 = vmax.f32 %v12571_v22, %v12569_v19  ;;  %v21165_v19 = vld [vmem:[#allocation21_spill] sm:$0xff]  ;;  %v12762_v22 = vcombine.low %v856_v40, %v880_v61 }
 0x153   :  { %v12723_v9 = vmax.f32 %v4242_v34, %v21160_v30  ;;  %11188 = vmatprep.mubr.msk.bf16.mxu0 %vm4049_vm0, %v21161_v49  ;;  %11204 = vmatprep.mubr.msk.bf16.mxu1 %vm4049_vm0, %v21161_v49  ;;  %v12741_v30 = vcombine.high %v856_v40, %v880_v61  ;;  %v21181_v25 = vmax.f32 %v12714_v54, %v12712_v31  ;;  %v21184_v54 = vld [vmem:[#allocation19_spill] sm:$0xff] }
 0x154   :  { %v4244_v46 = vpop.f32.mrf.mxu0  ;;  %5269 = vmatpush1.bf16.msra.mxu0 %v10700_v38  ;;  %v12739_v34 = vpop.f32.mrf.mxu1  ;;  %5462 = vmatpush1.bf16.msra.mxu1 %v10796_v1 }
 0x155   :  { %v12737_v39 = vmax.f32 %v4244_v46, %v21162_v26  ;;  %5270 = vmatprep.subr.bf16.mxu0 %v10653_v48  ;;  %5463 = vmatprep.subr.bf16.mxu1 %v10749_v29  ;;  %v21164_v29 = vmax.f32 %v12580_v45, %v12578_v10  ;;  %v21183_v55 = vmax.f32 %v12725_v58, %v12723_v9 }
 0x156   :  { %v4246_v47 = vpop.f32.mrf.mxu0  ;;  %v12750_v49 = vpop.f32.mrf.mxu1 }
 0x157   :  { %v12748_v42 = vmax.f32 %v4246_v47, %v21163_v62  ;;  %v21166_v62 = vld [vmem:[#allocation12_spill] sm:$0xff] }
 0x158   :  { %v4248_v46 = vpop.f32.mrf.mxu0  ;;  %5271 = vmatpush1.bf16.msra.mxu0 %v10652_v59  ;;  %v12759_v26 = vpop.f32.mrf.mxu1  ;;  %5464 = vmatpush1.bf16.msra.mxu1 %v10748_v28  ;;  %v12766_v59 = vcombine.high %v808_v8, %v832_v21  ;;  %v21167_v28 = vld [vmem:[#allocation13_spill] sm:$0xff] }
 0x159   :  { %v12757_v48 = vmax.f32 %v4248_v46, %v21164_v29  ;;  %5284 = vmatprep.subr.bf16.mxu0 %v21165_v19  ;;  %5477 = vmatprep.subr.bf16.mxu1 %v12741_v30  ;;  %v21168_v46 = vld [vmem:[#allocation20_spill] sm:$0xff]  ;;  %v21169_v29 = vld [vmem:[#allocation22_spill] sm:$0xff] }
 0x15a   :  { %v4252_v47 = vpop.f32.mrf.mxu0  ;;  %4943 = vmatmul.mubr.bf16.gmra.mxu0 %v21166_v62  ;;  %v4445_v45 = vpop.f32.mrf.mxu1  ;;  %5136 = vmatmul.mubr.bf16.gmra.mxu1 %v21166_v62  ;;  %v21170_v38 = vmax.f32 %v21168_v46, %v21169_v29  ;;  %v12786_v62 = vcombine.low %v808_v8, %v832_v21 }
 0x15b   :  { %v9114_v10 = vmax.f32 %v12586_v24, %v4252_v47  ;;  %11189 = vmatprep.mubr.msk.bf16.mxu0 %vm4049_vm0, %v21167_v28  ;;  %v9116_v40 = vmax.f32 %v12593_v15, %v4445_v45  ;;  %11205 = vmatprep.mubr.msk.bf16.mxu1 %vm4049_vm0, %v21167_v28  ;;  %v21171_v15 = vld [vmem:[#allocation23_spill] sm:$0xff] }
 0x15c   :  { %v4254_v61 = vpop.f32.mrf.mxu0  ;;  %5285 = vmatpush2.bf16.msra.mxu0 %v12584_v13  ;;  %v4447_v47 = vpop.f32.mrf.mxu1  ;;  %5478 = vmatpush2.bf16.msra.mxu1 %v12762_v22  ;;  %v21172_v45 = vmax.f32 %v12293_v50, %v21171_v15 }
 0x15d   :  { %v12781_v1 = vmax.f32 %v21170_v38, %v9114_v10  ;;  %v9115_v24 = vmax.f32 %v12598_v11, %v4254_v61  ;;  %5286 = vmatprep.subr.bf16.mxu0 %v12589_v43  ;;  %v9117_v41 = vmax.f32 %v12603_v16, %v4447_v47  ;;  %5479 = vmatprep.subr.bf16.mxu1 %v12766_v59 }
 0x15e   :  { %v12791_v28 = vmax.f32 %v21172_v45, %v9116_v40  ;;  %v4256_v32 = vpop.f32.mrf.mxu0  ;;  %v21173_v11 = vmax.f32 %v12436_v14, %v12434_v0  ;;  %v4449_v61 = vpop.f32.mrf.mxu1  ;;  %v21174_v16 = vmax.f32 %v12445_v12, %v12443_v63 }
 0x15f   :  { %v9162_v10 = vmax.f32 %v12609_v56, %v4256_v32  ;;  %v9164_v21 = vmax.f32 %v12612_v52, %v4449_v61  ;;  %v21175_v32 = vld [vmem:[#allocation14_spill] sm:$0xff]  ;;  %v21178_v61 = vld [vmem:[#allocation16_spill] sm:$0xff] }
 0x160   :  { %v9501_v38 = vmax.f32 %v9115_v24, %v21173_v11  ;;  %v4258_v50 = vpop.f32.mrf.mxu0  ;;  %5287 = vmatpush2.bf16.msra.mxu0 %v12607_v27  ;;  %v12809_v14 = vpop.f32.mrf.mxu1  ;;  %5480 = vmatpush2.bf16.msra.mxu1 %v12786_v62 }
 0x161   :  { %v9548_v46 = vmax.f32 %v9162_v10, %v21174_v16  ;;  %v9163_v0 = vmax.f32 %v12614_v51, %v4258_v50  ;;  %5642 = vmatprep.subr.bf16.mxu0 %v12741_v30  ;;  %v21176_v51 = vld [vmem:[#allocation15_spill] sm:$0xff] }
 0x162   :  { %v12803_v40 = vmax.f32 %v9117_v41, %v9501_v38  ;;  %v4262_v56 = vpop.f32.mrf.mxu0  ;;  %4953 = vmatmul.mubr.bf16.gmra.mxu0 %v21175_v32  ;;  %v12824_v12 = vpop.f32.mrf.mxu1  ;;  %5146 = vmatmul.mubr.bf16.gmra.mxu1 %v21175_v32 }
 0x163   :  { %v12814_v52 = vmax.f32 %v9164_v21, %v9548_v46  ;;  %v12817_v41 = vmax.f32 %v9163_v0, %v12622_v44  ;;  %v12822_v63 = vmax.f32 %v4262_v56, %v9212_v57  ;;  %11190 = vmatprep.mubr.msk.bf16.mxu0 %vm4049_vm0, %v21176_v51  ;;  %11206 = vmatprep.mubr.msk.bf16.mxu1 %vm4049_vm0, %v21176_v51 }
 0x164   :  { %v4264_v29 = vpop.f32.mrf.mxu0  ;;  %v12840_v35 = vpop.f32.mrf.mxu1 }
 0x165   :  { %v9885_v44 = vmax.f32 %v12809_v14, %v12817_v41  ;;  %v9886_v24 = vmax.f32 %v12824_v12, %v12822_v63  ;;  %v12838_v33 = vmax.f32 %v4264_v29, %v9213_v17  ;;  %v12998_v41 = vld [vmem:[%s20687_s1 + $0xa4] ss:$8 sps:$4 sm:$0xff]  }
 0x166   :  { %v4266_v57 = vpop.f32.mrf.mxu0  ;;  %v12849_v45 = vpop.f32.mrf.mxu1  ;;  %21191 = vst [vmem:[#allocation12_spill] sm:$0xff] %v12998_v41 }
 0x167   :  { %v9887_v47 = vmax.f32 %v12840_v35, %v12838_v33  ;;  %v12847_v15 = vmax.f32 %v4266_v57, %v9260_v53  ;;  %v21182_v57 = vld [vmem:[#allocation18_spill] sm:$0xff] }
 0x168   :  { %v4268_v11 = vpop.f32.mrf.mxu0  ;;  %v12858_v17 = vpop.f32.mrf.mxu1 }
 0x169   :  { %v9888_v38 = vmax.f32 %v12849_v45, %v12847_v15  ;;  %v12856_v6 = vmax.f32 %v4268_v11, %v21177_v23  ;;  %v13034_v15 = vld [vmem:[%s20687_s1 + $0xa0] ss:$8 sps:$4 sm:$0xff]  }
 0x16a   :  { %v4272_v10 = vpop.f32.mrf.mxu0  ;;  %4963 = vmatmul.mubr.bf16.gmra.mxu0 %v21178_v61  ;;  %v12868_v21 = vpop.f32.mrf.mxu1  ;;  %5156 = vmatmul.mubr.bf16.gmra.mxu1 %v21178_v61  ;;  %21192 = vst [vmem:[#allocation13_spill] sm:$0xff] %v13034_v15  ;;  %v13076_v45 = vld [vmem:[#allocation4 + $0x300] sm:$0xff] }
 0x16b   :  { %v9889_v18 = vmax.f32 %v12858_v17, %v12856_v6  ;;  %v12866_v53 = vmax.f32 %v4272_v10, %v21179_v36  ;;  %11191 = vmatprep.mubr.msk.bf16.mxu0 %vm4049_vm0, %v21180_v37  ;;  %11207 = vmatprep.mubr.msk.bf16.mxu1 %vm4049_vm0, %v21180_v37  ;;  %v21185_v10 = vmax.f32 %v12739_v34, %v12737_v39  ;;  %v13050_v17 = vld [vmem:[%s20687_s1 + $0xb4] ss:$8 sps:$4 sm:$0xff]  }
 0x16c   :  { %v4274_v7 = vpop.f32.mrf.mxu0  ;;  %v12882_v5 = vpop.f32.mrf.mxu1  ;;  %v21186_v37 = vmax.f32 %v12750_v49, %v12748_v42  ;;  %v21187_v39 = vmax.f32 %v12759_v26, %v12757_v48  ;;  %v12949_v42 = vld [vmem:[%s20687_s1 + $0x80] ss:$8 sps:$4 sm:$0xff]   ;;  %v12960_v48 = vld [vmem:[%s20687_s1 + $0x94] ss:$8 sps:$4 sm:$0xff]   ;;  %21193 = vst [vmem:[#allocation20_spill] sm:$0xff] %v13050_v17 }
 0x16d   :  { %v9890_v50 = vmax.f32 %v12868_v21, %v12866_v53  ;;  %v12880_v3 = vmax.f32 %v4274_v7, %v9309_v60  ;;  %21188 = vst [vmem:[#allocation10_spill] sm:$0xff] %v12949_v42  ;;  %21189 = vst [vmem:[#allocation11_spill] sm:$0xff] %v12960_v48  ;;  %v13074_v53 = vld [vmem:[#allocation4 + $0x220] sm:$0xff] }
 0x16e   :  { %v4276_v16 = vpop.f32.mrf.mxu0  ;;  %v12891_v56 = vpop.f32.mrf.mxu1 }
 0x16f   :  { %v9891_v46 = vmax.f32 %v12882_v5, %v12880_v3  ;;  %v12889_v0 = vmax.f32 %v4276_v16, %v9356_v4 }
 0x170   :  { %v4278_v32 = vpop.f32.mrf.mxu0  ;;  %v12900_v60 = vpop.f32.mrf.mxu1 }
 0x171   :  { %v9892_v51 = vmax.f32 %v12891_v56, %v12889_v0  ;;  %v12898_v2 = vmax.f32 %v4278_v32, %v21181_v25  ;;  %v13089_v0 = vcombine.high %v13074_v53, %v13076_v45 }
 0x172   :  { %v4282_v29 = vpop.f32.mrf.mxu0  ;;  %4973 = vmatmul.mubr.bf16.gmra.mxu0 %v21182_v57  ;;  %v12910_v11 = vpop.f32.mrf.mxu1  ;;  %5166 = vmatmul.mubr.bf16.gmra.mxu1 %v21182_v57 }
 0x173   :  { %v9893_v20 = vmax.f32 %v12900_v60, %v12898_v2  ;;  %v12908_v4 = vmax.f32 %v4282_v29, %v21183_v55  ;;  %11192 = vmatprep.mubr.msk.bf16.mxu0 %vm4049_vm0, %v21184_v54  ;;  %11208 = vmatprep.mubr.msk.bf16.mxu1 %vm4049_vm0, %v21184_v54 }
 0x174   :  { %v4284_v31 = vpop.f32.mrf.mxu0  ;;  %v12924_v58 = vpop.f32.mrf.mxu1  ;;  %5835 = vmatprep.subr.bf16.mxu1 %v13089_v0 }
 0x175   :  { %v9894_v23 = vmax.f32 %v12910_v11, %v12908_v4  ;;  %v12922_v9 = vmax.f32 %v4284_v31, %v21185_v10 }
 0x176   :  { %v4286_v61 = vpop.f32.mrf.mxu0  ;;  %v12933_v16 = vpop.f32.mrf.mxu1 }
 0x177   :  { %v12931_v7 = vmax.f32 %v4286_v61, %v21186_v37  ;;  %v21196_v11 = vmax.f32 %v12924_v58, %v12922_v9 }
 0x178   :  { %v4288_v32 = vpop.f32.mrf.mxu0  ;;  %v12942_v29 = vpop.f32.mrf.mxu1 }
 0x179   :  { %v12940_v34 = vmax.f32 %v4288_v32, %v21187_v39  ;;  %v21197_v3 = vmax.f32 %v12933_v16, %v12931_v7  ;;  %v13149_v7 = vld [vmem:[%s20687_s1 + $0xc0] ss:$8 sps:$4 sm:$0xff]  }
 0x17a   :  { %v12944_v57 = vpop.f32.mrf.mxu0  ;;  %4983 = vmatmul.mubr.bf16.gmra.mxu0 %v12949_v42  ;;  %v12954_v55 = vpop.f32.mrf.mxu1  ;;  %5176 = vmatmul.mubr.bf16.gmra.mxu1 %v12949_v42  ;;  %21199 = vst [vmem:[#allocation14_spill] sm:$0xff] %v13149_v7 }
 0x17b   :  { %11193 = vmatprep.mubr.msk.bf16.mxu0 %vm4049_vm0, %v12960_v48  ;;  %11209 = vmatprep.mubr.msk.bf16.mxu1 %vm4049_vm0, %v12960_v48  ;;  %v21198_v9 = vmax.f32 %v12942_v29, %v12940_v34  ;;  %v13162_v29 = vld [vmem:[%s20687_s1 + $0xd4] ss:$8 sps:$4 sm:$0xff]  }
 0x17c   :  { %v4520_v26 = vpop.f32.mrf.mxu0  ;;  %v4713_v31 = vpop.f32.mrf.mxu1  ;;  %21200 = vst [vmem:[#allocation15_spill] sm:$0xff] %v13162_v29 }
 0x17d   :  { %v8735_v54 = vmax.f32 %v4520_v26, %v12803_v40  ;;  %v12982_v40 = vld [vmem:[%s20687_s1 + $0x90] ss:$8 sps:$4 sm:$0xff]  }
 0x17e   :  { %v4522_v10 = vpop.f32.mrf.mxu0  ;;  %v4715_v32 = vpop.f32.mrf.mxu1  ;;  %21190 = vst [vmem:[#allocation21_spill] sm:$0xff] %v12982_v40 }
 0x17f   :  { %v12967_v61 = vmax.f32 %v4713_v31, %v8735_v54  ;;  %v8782_v37 = vmax.f32 %v4522_v10, %v12814_v52 }
 0x180   :  { %v4524_v39 = vpop.f32.mrf.mxu0  ;;  %v12977_v25 = vpop.f32.mrf.mxu1 }
 0x181   :  { %v12970_v8 = vmax.f32 %v4715_v32, %v8782_v37  ;;  %v12975_v49 = vmax.f32 %v4524_v39, %v9885_v44 }
 0x182   :  { %v4528_v36 = vpop.f32.mrf.mxu0  ;;  %4993 = vmatmul.mubr.bf16.gmra.mxu0 %v12982_v40  ;;  %v12992_v14 = vpop.f32.mrf.mxu1  ;;  %5186 = vmatmul.mubr.bf16.gmra.mxu1 %v12982_v40 }
 0x183   :  { %v12990_v26 = vmax.f32 %v4528_v36, %v9886_v24  ;;  %11194 = vmatprep.mubr.msk.bf16.mxu0 %vm4049_vm0, %v12998_v41  ;;  %11210 = vmatprep.mubr.msk.bf16.mxu1 %vm4049_vm0, %v12998_v41  ;;  %v306_v41 = vld [vmem:[#allocation4 + $0x2f0] sm:$0xff] }
 0x184   :  { %v4530_v44 = vpop.f32.mrf.mxu0  ;;  %v13011_v24 = vpop.f32.mrf.mxu1 }
 0x185   :  { %v13009_v12 = vmax.f32 %v4530_v44, %v9887_v47 }
 0x186   :  { %v4532_v36 = vpop.f32.mrf.mxu0  ;;  %v13020_v10 = vpop.f32.mrf.mxu1 }
 0x187   :  { %v13018_v31 = vmax.f32 %v4532_v36, %v9888_v38 }
 0x188   :  { %v4534_v37 = vpop.f32.mrf.mxu0  ;;  %v13029_v35 = vpop.f32.mrf.mxu1 }
 0x189   :  { %v13027_v33 = vmax.f32 %v4534_v37, %v9889_v18 }
 0x18a   :  { %v4538_v47 = vpop.f32.mrf.mxu0  ;;  %5003 = vmatmul.mubr.bf16.gmra.mxu0 %v13034_v15  ;;  %v13044_v6 = vpop.f32.mrf.mxu1  ;;  %5196 = vmatmul.mubr.bf16.gmra.mxu1 %v13034_v15  ;;  %v13411_v15 = vld [vmem:[%s20687_s1 + $0x24] ss:$8 sps:$4 sm:$0xff]  }
 0x18b   :  { %v13042_v38 = vmax.f32 %v4538_v47, %v9890_v50  ;;  %11195 = vmatprep.mubr.msk.bf16.mxu0 %vm4049_vm0, %v13050_v17  ;;  %11211 = vmatprep.mubr.msk.bf16.mxu1 %vm4049_vm0, %v13050_v17  ;;  %v281_v17 = vld [vmem:[#allocation4 + $0x208] sm:$0xff]  ;;  %21226 = vst [vmem:[#allocation30_spill] sm:$0xff] %v13411_v15 }
 0x18c   :  { %v4540_v18 = vpop.f32.mrf.mxu0  ;;  %v13063_v50 = vpop.f32.mrf.mxu1 }
 0x18d   :  { %v13061_v21 = vmax.f32 %v4540_v18, %v9891_v46 }
 0x18e   :  { %v4542_v39 = vpop.f32.mrf.mxu0  ;;  %v13072_v37 = vpop.f32.mrf.mxu1 }
 0x18f   :  { %v13070_v36 = vmax.f32 %v4542_v39, %v9892_v51  ;;  %v13094_v51 = vld [vmem:[%s20687_s1 + $0xb0] ss:$8 sps:$4 sm:$0xff]  }
 0x190   :  { %v4544_v47 = vpop.f32.mrf.mxu0  ;;  %v13085_v46 = vpop.f32.mrf.mxu1  ;;  %21194 = vst [vmem:[#allocation22_spill] sm:$0xff] %v13094_v51 }
 0x191   :  { %v13083_v5 = vmax.f32 %v4544_v47, %v9893_v20  ;;  %v13110_v20 = vld [vmem:[%s20687_s1 + $0xc4] ss:$8 sps:$4 sm:$0xff]  }
 0x192   :  { %v4548_v56 = vpop.f32.mrf.mxu0  ;;  %5013 = vmatmul.mubr.bf16.gmra.mxu0 %v13094_v51  ;;  %v13104_v60 = vpop.f32.mrf.mxu1  ;;  %5206 = vmatmul.mubr.bf16.gmra.mxu1 %v13094_v51  ;;  %21195 = vst [vmem:[#allocation23_spill] sm:$0xff] %v13110_v20 }
 0x193   :  { %v13102_v2 = vmax.f32 %v4548_v56, %v9894_v23  ;;  %11196 = vmatprep.mubr.msk.bf16.mxu0 %vm4049_vm0, %v13110_v20  ;;  %11212 = vmatprep.mubr.msk.bf16.mxu1 %vm4049_vm0, %v13110_v20  ;;  %v21201_v20 = vmax.f32 %v12977_v25, %v12975_v49  ;;  %v13202_v49 = vld [vmem:[%s20687_s1 + $0xe4] ss:$8 sps:$4 sm:$0xff]  }
 0x194   :  { %v4550_v39 = vpop.f32.mrf.mxu0  ;;  %v13124_v47 = vpop.f32.mrf.mxu1  ;;  %21204 = vst [vmem:[#allocation17_spill] sm:$0xff] %v13202_v49 }
 0x195   :  { %v13122_v23 = vmax.f32 %v4550_v39, %v21196_v11 }
 0x196   :  { %v4552_v56 = vpop.f32.mrf.mxu0  ;;  %v13133_v32 = vpop.f32.mrf.mxu1 }
 0x197   :  { %v13131_v44 = vmax.f32 %v4552_v56, %v21197_v3 }
 0x198   :  { %v4554_v54 = vpop.f32.mrf.mxu0  ;;  %v13142_v39 = vpop.f32.mrf.mxu1 }
 0x199   :  { %v13140_v58 = vmax.f32 %v4554_v54, %v21198_v9 }
 0x19a   :  { %v13144_v11 = vpop.f32.mrf.mxu0  ;;  %5023 = vmatmul.mubr.bf16.gmra.mxu0 %v13149_v7  ;;  %v13156_v34 = vpop.f32.mrf.mxu1  ;;  %5216 = vmatmul.mubr.bf16.gmra.mxu1 %v13149_v7 }
 0x19b   :  { %11197 = vmatprep.mubr.msk.bf16.mxu0 %vm4049_vm0, %v13162_v29  ;;  %11213 = vmatprep.mubr.msk.bf16.mxu1 %vm4049_vm0, %v13162_v29 }
 0x19c   :  { %v4560_v56 = vpop.f32.mrf.mxu0  ;;  %v4753_v3 = vpop.f32.mrf.mxu1 }
 0x19d   :  { %v9503_v9 = vmax.f32 %v4560_v56, %v12967_v61  ;;  %v13186_v61 = vld [vmem:[%s20687_s1 + $0xd0] ss:$8 sps:$4 sm:$0xff]   ;;  %v21206_v56 = vmax.f32 %v13020_v10, %v13018_v31  ;;  %v13238_v31 = vld [vmem:[%s20687_s1 + $0xe0] ss:$8 sps:$4 sm:$0xff]  }
 0x19e   :  { %v4562_v16 = vpop.f32.mrf.mxu0  ;;  %v4755_v63 = vpop.f32.mrf.mxu1  ;;  %21202 = vst [vmem:[#allocation16_spill] sm:$0xff] %v13186_v61  ;;  %21208 = vst [vmem:[#allocation18_spill] sm:$0xff] %v13238_v31 }
 0x19f   :  { %v13171_v4 = vmax.f32 %v4753_v3, %v9503_v9  ;;  %v9550_v18 = vmax.f32 %v4562_v16, %v12970_v8 }
 0x1a0   :  { %v4564_v52 = vpop.f32.mrf.mxu0  ;;  %v13181_v51 = vpop.f32.mrf.mxu1 }
 0x1a1   :  { %v13174_v7 = vmax.f32 %v4755_v63, %v9550_v18  ;;  %v13179_v54 = vmax.f32 %v4564_v52, %v21201_v20  ;;  %v21203_v63 = vmax.f32 %v12992_v14, %v12990_v26  ;;  %v21205_v14 = vmax.f32 %v13011_v24, %v13009_v12 }
 0x1a2   :  { %v4568_v29 = vpop.f32.mrf.mxu0  ;;  %5033 = vmatmul.mubr.bf16.gmra.mxu0 %v13186_v61  ;;  %v13196_v25 = vpop.f32.mrf.mxu1  ;;  %5226 = vmatmul.mubr.bf16.gmra.mxu1 %v13186_v61  ;;  %v21207_v12 = vmax.f32 %v13029_v35, %v13027_v33  ;;  %v13254_v35 = vld [vmem:[%s20687_s1 + $0xf4] ss:$8 sps:$4 sm:$0xff]   ;;  %v21212_v26 = vmax.f32 %v13072_v37, %v13070_v36  ;;  %v13290_v36 = vld [vmem:[%s20687_s1 + $0xf0] ss:$8 sps:$4 sm:$0xff]  }
 0x1a3   :  { %v13194_v18 = vmax.f32 %v4568_v29, %v21203_v63  ;;  %11198 = vmatprep.mubr.msk.bf16.mxu0 %vm4049_vm0, %v13202_v49  ;;  %11214 = vmatprep.mubr.msk.bf16.mxu1 %vm4049_vm0, %v13202_v49  ;;  %21210 = vst [vmem:[#allocation19_spill] sm:$0xff] %v13254_v35  ;;  %21214 = vst [vmem:[#allocation24_spill] sm:$0xff] %v13290_v36 }
 0x1a4   :  { %v4570_v52 = vpop.f32.mrf.mxu0  ;;  %v13215_v16 = vpop.f32.mrf.mxu1 }
 0x1a5   :  { %v13213_v20 = vmax.f32 %v4570_v52, %v21205_v14 }
 0x1a6   :  { %v4572_v3 = vpop.f32.mrf.mxu0  ;;  %v13224_v63 = vpop.f32.mrf.mxu1 }
 0x1a7   :  { %v13222_v9 = vmax.f32 %v4572_v3, %v21206_v56  ;;  %v21209_v3 = vmax.f32 %v13044_v6, %v13042_v38  ;;  %v21211_v6 = vmax.f32 %v13063_v50, %v13061_v21  ;;  %v21213_v21 = vmax.f32 %v13085_v46, %v13083_v5  ;;  %v13306_v46 = vld [vmem:[%s20687_s1 + $0x4] ss:$8 sps:$4 sm:$0xff]  }
 0x1a8   :  { %v4574_v8 = vpop.f32.mrf.mxu0  ;;  %v13233_v52 = vpop.f32.mrf.mxu1  ;;  %21216 = vst [vmem:[#allocation25_spill] sm:$0xff] %v13306_v46  ;;  %v21218_v38 = vmax.f32 %v13133_v32, %v13131_v44  ;;  %v13341_v32 = vcombine.low %v13074_v53, %v13076_v45  ;;  %v13361_v45 = vld [vmem:[%s20687_s1 + $0x14] ss:$8 sps:$4 sm:$0xff]  }
 0x1a9   :  { %v13231_v24 = vmax.f32 %v4574_v8, %v21207_v12  ;;  %21221 = vst [vmem:[#allocation27_spill] sm:$0xff] %v13361_v45 }
 0x1aa   :  { %v4578_v14 = vpop.f32.mrf.mxu0  ;;  %5043 = vmatmul.mubr.bf16.gmra.mxu0 %v13238_v31  ;;  %v13248_v33 = vpop.f32.mrf.mxu1  ;;  %5236 = vmatmul.mubr.bf16.gmra.mxu1 %v13238_v31 }
 0x1ab   :  { %v13246_v56 = vmax.f32 %v4578_v14, %v21209_v3  ;;  %11199 = vmatprep.mubr.msk.bf16.mxu0 %vm4049_vm0, %v13254_v35  ;;  %11215 = vmatprep.mubr.msk.bf16.mxu1 %vm4049_vm0, %v13254_v35 }
 0x1ac   :  { %v4580_v8 = vpop.f32.mrf.mxu0  ;;  %v13267_v14 = vpop.f32.mrf.mxu1 }
 0x1ad   :  { %v13265_v12 = vmax.f32 %v4580_v8, %v21211_v6 }
 0x1ae   :  { %v4582_v3 = vpop.f32.mrf.mxu0  ;;  %v13276_v35 = vpop.f32.mrf.mxu1 }
 0x1af   :  { %v13274_v29 = vmax.f32 %v4582_v3, %v21212_v26  ;;  %v21215_v26 = vmax.f32 %v13104_v60, %v13102_v2  ;;  %v21217_v60 = vmax.f32 %v13124_v47, %v13122_v23  ;;  %v642_v2 = vld [vmem:[#allocation4 + $0x140] sm:$0xff]  ;;  %v21219_v47 = vmax.f32 %v13142_v39, %v13140_v58 }
 0x1b0   :  { %v4584_v31 = vpop.f32.mrf.mxu0  ;;  %v13285_v8 = vpop.f32.mrf.mxu1 }
 0x1b1   :  { %v13283_v50 = vmax.f32 %v4584_v31, %v21213_v21 }
 0x1b2   :  { %v4588_v6 = vpop.f32.mrf.mxu0  ;;  %5053 = vmatmul.mubr.bf16.gmra.mxu0 %v13290_v36  ;;  %v13300_v5 = vpop.f32.mrf.mxu1  ;;  %5246 = vmatmul.mubr.bf16.gmra.mxu1 %v13290_v36  ;;  %v618_v36 = vld [vmem:[#allocation4 + $0x60] sm:$0xff] }
 0x1b3   :  { %v13298_v3 = vmax.f32 %v4588_v6, %v21215_v26  ;;  %11216 = vmatprep.mubr.msk.bf16.mxu0 %vm4049_vm0, %v13306_v46  ;;  %11232 = vmatprep.mubr.msk.bf16.mxu1 %vm4049_vm0, %v13306_v46 }
 0x1b4   :  { %v4590_v31 = vpop.f32.mrf.mxu0  ;;  %v13319_v6 = vpop.f32.mrf.mxu1 }
 0x1b5   :  { %v13317_v21 = vmax.f32 %v4590_v31, %v21217_v60 }
 0x1b6   :  { %v4592_v26 = vpop.f32.mrf.mxu0  ;;  %v13328_v46 = vpop.f32.mrf.mxu1 }
 0x1b7   :  { %v13326_v10 = vmax.f32 %v4592_v26, %v21218_v38  ;;  %v13348_v38 = vld [vmem:[%s20687_s1] ss:$8 sps:$4 sm:$0xff]   ;;  %v13351_v26 = vcombine.high %v618_v36, %v642_v2 }
 0x1b8   :  { %v4594_v49 = vpop.f32.mrf.mxu0  ;;  %v13337_v60 = vpop.f32.mrf.mxu1  ;;  %21220 = vst [vmem:[#allocation26_spill] sm:$0xff] %v13348_v38 }
 0x1b9   :  { %v13335_v31 = vmax.f32 %v4594_v49, %v21219_v47  ;;  %v13374_v47 = vcombine.low %v618_v36, %v642_v2  ;;  %v13394_v2 = vld [vmem:[%s20687_s1 + $0x10] ss:$8 sps:$4 sm:$0xff]  }
 0x1ba   :  { %v13343_v44 = vpop.f32.mrf.mxu0  ;;  %5289 = vmatmul.mubr.bf16.vlgmr.msra.gmra.mxu0 %v13348_v38  ;;  %v13355_v39 = vpop.f32.mrf.mxu1  ;;  %5482 = vmatmul.mubr.bf16.vlgmr.msra.gmra.mxu1 %v13348_v38  ;;  %21223 = vst [vmem:[#allocation28_spill] sm:$0xff] %v13394_v2 }
 0x1bb   :  { %11217 = vmatprep.mubr.msk.bf16.mxu0 %vm4049_vm0, %v13361_v45  ;;  %11233 = vmatprep.mubr.msk.bf16.mxu1 %vm4049_vm0, %v13361_v45  ;;  %v21222_v45 = vmax.f32 %v13181_v51, %v13179_v54  ;;  %v305_v51 = vld [vmem:[#allocation4 + $0x2e8] sm:$0xff] }
 0x1bc   :  { %v13365_v53 = vpop.f32.mrf.mxu0  ;;  %5643 = vmatpush1.bf16.msra.mxu0 %v12762_v22  ;;  %v13370_v49 = vpop.f32.mrf.mxu1  ;;  %5836 = vmatpush1.bf16.msra.mxu1 %v13341_v32 }
 0x1bd   :  { %5644 = vmatprep.subr.bf16.mxu0 %v12766_v59  ;;  %5837 = vmatprep.subr.bf16.mxu1 %v13351_v26 }
 0x1be   :  { %v13376_v58 = vpop.f32.mrf.mxu0  ;;  %v13379_v23 = vpop.f32.mrf.mxu1 }
 0x1c0   :  { %v4604_v37 = vpop.f32.mrf.mxu0  ;;  %5645 = vmatpush1.bf16.msra.mxu0 %v12786_v62  ;;  %v13387_v61 = vpop.f32.mrf.mxu1  ;;  %5838 = vmatpush1.bf16.msra.mxu1 %v13374_v47 }
 0x1c1   :  { %v13385_v38 = vmax.f32 %v4604_v37, %v21222_v45  ;;  %5646 = vmatprep.subr.bf16.mxu0 %v21165_v19  ;;  %5839 = vmatprep.subr.bf16.mxu1 %v12741_v30  ;;  %v21224_v37 = vmax.f32 %v13196_v25, %v13194_v18  ;;  %v282_v30 = vld [vmem:[#allocation4 + $0x210] sm:$0xff]  ;;  %v21227_v25 = vmax.f32 %v13215_v16, %v13213_v20  ;;  %v257_v18 = vld [vmem:[#allocation4 + $0x128] sm:$0xff] }
 0x1c2   :  { %v4608_v36 = vpop.f32.mrf.mxu0  ;;  %5299 = vmatmul.mubr.bf16.gmra.mxu0 %v13394_v2  ;;  %v13405_v19 = vpop.f32.mrf.mxu1  ;;  %5492 = vmatmul.mubr.bf16.gmra.mxu1 %v13394_v2  ;;  %v13429_v2 = vcombine.high %v281_v17, %v305_v51  ;;  %v21229_v16 = vmax.f32 %v13224_v63, %v13222_v9  ;;  %v13446_v42 = vcombine.low %v282_v30, %v306_v41 }
 0x1c3   :  { %v13403_v45 = vmax.f32 %v4608_v36, %v21224_v37  ;;  %11218 = vmatprep.mubr.msk.bf16.mxu0 %vm4049_vm0, %v13411_v15  ;;  %11234 = vmatprep.mubr.msk.bf16.mxu1 %vm4049_vm0, %v13411_v15  ;;  %v233_v15 = vld [vmem:[#allocation4 + $0x48] sm:$0xff]  ;;  %v21231_v20 = vmax.f32 %v13233_v52, %v13231_v24  ;;  %v113_v24 = vld [vmem:[#allocation4 + $0x2e0] sm:$0xff]  ;;  %v21234_v52 = vmax.f32 %v13248_v33, %v13246_v56 }
 0x1c4   :  { %v4610_v54 = vpop.f32.mrf.mxu0  ;;  %5647 = vmatpush1.bf16.msra.mxu0 %v12584_v13  ;;  %v13425_v37 = vpop.f32.mrf.mxu1  ;;  %5840 = vmatpush1.bf16.msra.mxu1 %v12762_v22  ;;  %v13432_v13 = vcombine.high %v282_v30, %v306_v41  ;;  %21230 = vst [vmem:[#allocation32_spill] sm:$0xff] %v13446_v42  ;;  %v10753_v63 = vcombine.high %v233_v15, %v257_v18  ;;  %v13462_v41 = vld [vmem:[%s20687_s1 + $0x20] ss:$8 sps:$4 sm:$0xff]  }
 0x1c5   :  { %21225 = vst [vmem:[#allocation29_spill] sm:$0xff] %v13403_v45  ;;  %v13423_v36 = vmax.f32 %v4610_v54, %v21227_v25  ;;  %5648 = vmatprep.subr.bf16.mxu0 %v12589_v43  ;;  %5841 = vmatprep.subr.bf16.mxu1 %v12766_v59  ;;  %v234_v43 = vld [vmem:[#allocation4 + $0x50] sm:$0xff]  ;;  %v13444_v59 = vcombine.low %v281_v17, %v305_v51  ;;  %21232 = vst [vmem:[#allocation33_spill] sm:$0xff] %v13462_v41 }
 0x1c6   :  { %v4612_v40 = vpop.f32.mrf.mxu0  ;;  %21228 = vst [vmem:[#allocation31_spill] sm:$0xff] %v13432_v13  ;;  %v13441_v22 = vpop.f32.mrf.mxu1  ;;  %v258_v25 = vld [vmem:[#allocation4 + $0x130] sm:$0xff]  ;;  %v10752_v56 = vcombine.low %v233_v15, %v257_v18  ;;  %v41_v15 = vld [vmem:[#allocation4 + $0x40] sm:$0xff] }
 0x1c7   :  { %v13439_v54 = vmax.f32 %v4612_v40, %v21229_v16  ;;  %v13466_v17 = vcombine.high %v234_v43, %v258_v25  ;;  %v13488_v33 = vcombine.low %v234_v43, %v258_v25  ;;  %v65_v18 = vld [vmem:[#allocation4 + $0x120] sm:$0xff]  ;;  %v21237_v25 = vmax.f32 %v13276_v35, %v13274_v29 }
 0x1c8   :  { %v4614_v48 = vpop.f32.mrf.mxu0  ;;  %5649 = vmatpush1.bf16.msra.mxu0 %v12607_v27  ;;  %v13455_v40 = vpop.f32.mrf.mxu1  ;;  %5842 = vmatpush1.bf16.msra.mxu1 %v12786_v62  ;;  %v10657_v29 = vcombine.high %v41_v15, %v65_v18 }
 0x1c9   :  { %v13453_v9 = vmax.f32 %v4614_v48, %v21231_v20  ;;  %5650 = vmatprep.subr.bf16.mxu0 %v13429_v2  ;;  %5843 = vmatprep.subr.bf16.mxu1 %v13432_v13  ;;  %21233 = vst [vmem:[#allocation34_spill] sm:$0xff] %v13466_v17  ;;  %v89_v48 = vld [vmem:[#allocation4 + $0x200] sm:$0xff]  ;;  %v13481_v20 = vld [vmem:[%s20687_s1 + $0x34] ss:$8 sps:$4 sm:$0xff]  }
 0x1ca   :  { %v4618_v27 = vpop.f32.mrf.mxu0  ;;  %5309 = vmatmul.mubr.bf16.gmra.mxu0 %v13462_v41  ;;  %v13475_v30 = vpop.f32.mrf.mxu1  ;;  %5502 = vmatmul.mubr.bf16.gmra.mxu1 %v13462_v41  ;;  %21235 = vst [vmem:[#allocation35_spill] sm:$0xff] %v13481_v20  ;;  %v10705_v13 = vcombine.high %v89_v48, %v113_v24 }
 0x1cb   :  { %v13473_v51 = vmax.f32 %v4618_v27, %v21234_v52  ;;  %11219 = vmatprep.mubr.msk.bf16.mxu0 %vm4049_vm0, %v13481_v20  ;;  %11235 = vmatprep.mubr.msk.bf16.mxu1 %vm4049_vm0, %v13481_v20  ;;  %v21236_v52 = vmax.f32 %v13267_v14, %v13265_v12 }
 0x1cc   :  { %v4620_v16 = vpop.f32.mrf.mxu0  ;;  %5651 = vmatpush1.bf16.msra.mxu0 %v13444_v59  ;;  %v13497_v45 = vpop.f32.mrf.mxu1  ;;  %5844 = vmatpush1.bf16.msra.mxu1 %v13446_v42 }
 0x1cd   :  { %v13495_v62 = vmax.f32 %v4620_v16, %v21236_v52  ;;  %5652 = vmatprep.subr.bf16.mxu0 %v10753_v63  ;;  %5845 = vmatprep.subr.bf16.mxu1 %v13466_v17  ;;  %v10704_v52 = vcombine.low %v89_v48, %v113_v24  ;;  %v21238_v17 = vmax.f32 %v13285_v8, %v13283_v50  ;;  %v13540_v48 = vld [vmem:[%s20687_s1 + $0x44] ss:$8 sps:$4 sm:$0xff]  }
 0x1ce   :  { %v4622_v20 = vpop.f32.mrf.mxu0  ;;  %v13508_v14 = vpop.f32.mrf.mxu1  ;;  %v21239_v8 = vmax.f32 %v13300_v5, %v13298_v3  ;;  %v882_v24 = vld [vmem:[#allocation4 + $0x308] sm:$0xff]  ;;  %v10656_v3 = vcombine.low %v41_v15, %v65_v18  ;;  %v21241_v18 = vmax.f32 %v13328_v46, %v13326_v10 }
 0x1cf   :  { %v9697_v43 = vmax.f32 %v13497_v45, %v13495_v62  ;;  %v13506_v12 = vmax.f32 %v4622_v20, %v21237_v25  ;;  %v13523_v20 = vld [vmem:[%s20687_s1 + $0x30] ss:$8 sps:$4 sm:$0xff]  }
 0x1d0   :  { %v4624_v16 = vpop.f32.mrf.mxu0  ;;  %5653 = vmatpush1.bf16.msra.mxu0 %v10752_v56  ;;  %v13517_v41 = vpop.f32.mrf.mxu1  ;;  %5846 = vmatpush1.bf16.msra.mxu1 %v13488_v33 }
 0x1d1   :  { %v13515_v42 = vmax.f32 %v4624_v16, %v21238_v17  ;;  %5654 = vmatprep.subr.bf16.mxu0 %v10705_v13  ;;  %5847 = vmatprep.subr.bf16.mxu1 %v13429_v2  ;;  %v858_v2 = vld [vmem:[#allocation4 + $0x228] sm:$0xff]  ;;  %v21240_v16 = vmax.f32 %v13319_v6, %v13317_v21 }
 0x1d2   :  { %v4628_v35 = vpop.f32.mrf.mxu0  ;;  %5319 = vmatmul.mubr.bf16.gmra.mxu0 %v13523_v20  ;;  %v13534_v13 = vpop.f32.mrf.mxu1  ;;  %5512 = vmatmul.mubr.bf16.gmra.mxu1 %v13523_v20  ;;  %v13556_v27 = vcombine.high %v858_v2, %v882_v24  ;;  %v810_v6 = vld [vmem:[#allocation4 + $0x68] sm:$0xff]  ;;  %v13577_v10 = vcombine.low %v858_v2, %v882_v24  ;;  %v13595_v2 = vld [vmem:[%s20687_s1 + $0x54] ss:$8 sps:$4 sm:$0xff]  }
 0x1d3   :  { %v13532_v17 = vmax.f32 %v4628_v35, %v21239_v8  ;;  %11220 = vmatprep.mubr.msk.bf16.mxu0 %vm4049_vm0, %v13540_v48  ;;  %11236 = vmatprep.mubr.msk.bf16.mxu1 %vm4049_vm0, %v13540_v48  ;;  %v21277_v45 = vmax.f32 %v13517_v41, %v13515_v42  ;;  %v13762_v41 = vld [vmem:[%s20687_s1 + $0x84] ss:$8 sps:$4 sm:$0xff]  }
 0x1d4   :  { %v4630_v25 = vpop.f32.mrf.mxu0  ;;  %5655 = vmatpush1.bf16.msra.mxu0 %v10704_v52  ;;  %v13553_v8 = vpop.f32.mrf.mxu1  ;;  %5848 = vmatpush1.bf16.msra.mxu1 %v13444_v59  ;;  %21284 = vst [vmem:[#allocation63_spill] sm:$0xff] %v13762_v41 }
 0x1d5   :  { %v13551_v35 = vmax.f32 %v4630_v25, %v21240_v16  ;;  %5656 = vmatprep.subr.bf16.mxu0 %v10657_v29  ;;  %5849 = vmatprep.subr.bf16.mxu1 %v10753_v63  ;;  %v834_v25 = vld [vmem:[#allocation4 + $0x148] sm:$0xff]  ;;  %v21242_v63 = vmax.f32 %v13337_v60, %v13335_v31 }
 0x1d6   :  { %v4632_v50 = vpop.f32.mrf.mxu0  ;;  %v13565_v21 = vpop.f32.mrf.mxu1  ;;  %v13586_v31 = vcombine.high %v810_v6, %v834_v25  ;;  %v13609_v60 = vcombine.low %v810_v6, %v834_v25 }
 0x1d7   :  { %v13563_v52 = vmax.f32 %v4632_v50, %v21241_v18  ;;  %v13582_v50 = vld [vmem:[%s20687_s1 + $0x40] ss:$8 sps:$4 sm:$0xff]  }
 0x1d8   :  { %v4634_v16 = vpop.f32.mrf.mxu0  ;;  %5657 = vmatpush1.bf16.msra.mxu0 %v10656_v3  ;;  %v13574_v15 = vpop.f32.mrf.mxu1  ;;  %5850 = vmatpush1.bf16.msra.mxu1 %v10752_v56 }
 0x1d9   :  { %v13572_v29 = vmax.f32 %v4634_v16, %v21242_v63  ;;  %5670 = vmatprep.subr.bf16.mxu0 %v13089_v0  ;;  %5863 = vmatprep.subr.bf16.mxu1 %v13556_v27 }
 0x1da   :  { %v4638_v46 = vpop.f32.mrf.mxu0  ;;  %5329 = vmatmul.mubr.bf16.gmra.mxu0 %v13582_v50  ;;  %v4831_v3 = vpop.f32.mrf.mxu1  ;;  %5522 = vmatmul.mubr.bf16.gmra.mxu1 %v13582_v50 }
 0x1db   :  { %v9118_v56 = vmax.f32 %v13343_v44, %v4638_v46  ;;  %11221 = vmatprep.mubr.msk.bf16.mxu0 %vm4049_vm0, %v13595_v2  ;;  %v9120_v24 = vmax.f32 %v13355_v39, %v4831_v3  ;;  %11237 = vmatprep.mubr.msk.bf16.mxu1 %vm4049_vm0, %v13595_v2  ;;  %v21243_v44 = vmax.f32 %v12944_v57, %v13144_v11 }
 0x1dc   :  { %v4640_v18 = vpop.f32.mrf.mxu0  ;;  %5671 = vmatpush2.bf16.msra.mxu0 %v13341_v32  ;;  %v4833_v46 = vpop.f32.mrf.mxu1  ;;  %5864 = vmatpush2.bf16.msra.mxu1 %v13577_v10  ;;  %v21244_v39 = vmax.f32 %v12954_v55, %v13156_v34  ;;  %v21246_v34 = vmax.f32 %v13387_v61, %v13385_v38  ;;  %v21288_v38 = vmax.f32 %v13565_v21, %v13563_v52 }
 0x1dd   :  { %v9502_v16 = vmax.f32 %v21243_v44, %v9118_v56  ;;  %v9119_v63 = vmax.f32 %v13365_v53, %v4640_v18  ;;  %5672 = vmatprep.subr.bf16.mxu0 %v13351_v26  ;;  %v9121_v59 = vmax.f32 %v13370_v49, %v4833_v46  ;;  %5865 = vmatprep.subr.bf16.mxu1 %v13586_v31 }
 0x1de   :  { %v9504_v3 = vmax.f32 %v21244_v39, %v9120_v24  ;;  %v4642_v5 = vpop.f32.mrf.mxu0  ;;  %v4835_v53 = vpop.f32.mrf.mxu1 }
 0x1df   :  { %v9899_v57 = vmax.f32 %v9119_v63, %v13171_v4  ;;  %v9166_v11 = vmax.f32 %v13376_v58, %v4642_v5  ;;  %v9168_v18 = vmax.f32 %v13379_v23, %v4835_v53  ;;  %v21249_v4 = vmax.f32 %v12781_v1, %v12791_v28  ;;  %v21253_v5 = vld [vmem:[#allocation29_spill] sm:$0xff]  ;;  %v13658_v28 = vld [vmem:[%s20687_s1 + $0x64] ss:$8 sps:$4 sm:$0xff]  }
 0x1e0   :  { %v9898_v56 = vmax.f32 %v9502_v16, %v9504_v3  ;;  %v4644_v44 = vpop.f32.mrf.mxu0  ;;  %5673 = vmatpush2.bf16.msra.mxu0 %v13374_v47  ;;  %v13628_v25 = vpop.f32.mrf.mxu1  ;;  %5866 = vmatpush2.bf16.msra.mxu1 %v13609_v60  ;;  %21257 = vst [vmem:[#allocation43_spill] sm:$0xff] %v13658_v28  ;;  %v21258_v63 = vmax.f32 %v13425_v37, %v13423_v36 }
 0x1e1   :  { %v13620_v6 = vmax.f32 %v9121_v59, %v9899_v57  ;;  %v9900_v55 = vmax.f32 %v9166_v11, %v13174_v7  ;;  %v13626_v49 = vmax.f32 %v4644_v44, %v21246_v34  ;;  %21248 = vst [vmem:[#allocation38_spill] sm:$0xff] %v13628_v25  ;;  %6028 = vmatprep.subr.bf16.mxu0 %v13556_v27  ;;  %v13640_v7 = vld [vmem:[%s20687_s1 + $0x50] ss:$8 sps:$4 sm:$0xff]  }
 0x1e2   :  { %v13635_v23 = vmax.f32 %v21249_v4, %v9898_v56  ;;  %v4648_v58 = vpop.f32.mrf.mxu0  ;;  %21251 = vst [vmem:[#allocation40_spill] sm:$0xff] %v13640_v7  ;;  %5339 = vmatmul.mubr.bf16.gmra.mxu0 %v13640_v7  ;;  %v21254_v59 = vmax.f32 %v13405_v19, %v21253_v5  ;;  %v13652_v1 = vpop.f32.mrf.mxu1  ;;  %5532 = vmatmul.mubr.bf16.gmra.mxu1 %v13640_v7  ;;  %v21298_v25 = vld [vmem:[#allocation13_spill] sm:$0xff] }
 0x1e3   :  { %21245 = vst [vmem:[#allocation36_spill] sm:$0xff] %v13620_v6  ;;  %21247 = vst [vmem:[#allocation37_spill] sm:$0xff] %v13626_v49  ;;  %v13643_v61 = vmax.f32 %v9168_v18, %v9900_v55  ;;  %11222 = vmatprep.mubr.msk.bf16.mxu0 %vm4049_vm0, %v13658_v28  ;;  %11238 = vmatprep.mubr.msk.bf16.mxu1 %vm4049_vm0, %v13658_v28  ;;  %v21261_v11 = vmax.f32 %v13441_v22, %v13439_v54  ;;  %v13694_v54 = vld [vmem:[%s20687_s1 + $0x60] ss:$8 sps:$4 sm:$0xff]   ;;  %v21297_v22 = vld [vmem:[#allocation12_spill] sm:$0xff] }
 0x1e4   :  { %21250 = vst [vmem:[#allocation39_spill] sm:$0xff] %v13635_v23  ;;  %v13650_v24 = vmax.f32 %v4648_v58, %v21254_v59  ;;  %21256 = vst [vmem:[#allocation42_spill] sm:$0xff] %v13652_v1  ;;  %v4650_v16 = vpop.f32.mrf.mxu0  ;;  %v13671_v39 = vpop.f32.mrf.mxu1  ;;  %v21264_v36 = vmax.f32 %v13455_v40, %v13453_v9  ;;  %v21268_v4 = vmax.f32 %v13475_v30, %v13473_v51  ;;  %v13710_v40 = vld [vmem:[%s20687_s1 + $0x74] ss:$8 sps:$4 sm:$0xff]   ;;  %v21294_v51 = vld [vmem:[#allocation10_spill] sm:$0xff] }
 0x1e5   :  { %21252 = vst [vmem:[#allocation41_spill] sm:$0xff] %v13643_v61  ;;  %v13669_v46 = vmax.f32 %v4650_v16, %v21258_v63  ;;  %21260 = vst [vmem:[#allocation45_spill] sm:$0xff] %v13671_v39  ;;  %v21333_v28 = vld [vmem:[#allocation28_spill] sm:$0xff]  ;;  %v283_v7 = vld [vmem:[#allocation4 + $0x218] sm:$0xff] }
 0x1e6   :  { %21255 = vst [vmem:[#allocation29_spill] sm:$0xff] %v13650_v24  ;;  %v4652_v3 = vpop.f32.mrf.mxu0  ;;  %v13680_v56 = vpop.f32.mrf.mxu1  ;;  %21267 = vst [vmem:[#allocation50_spill] sm:$0xff] %v13694_v54 }
 0x1e7   :  { %21259 = vst [vmem:[#allocation44_spill] sm:$0xff] %v13669_v46  ;;  %v13678_v53 = vmax.f32 %v4652_v3, %v21261_v11  ;;  %21263 = vst [vmem:[#allocation47_spill] sm:$0xff] %v13680_v56  ;;  %v21274_v3 = vmax.f32 %v13508_v14, %v13506_v12  ;;  %v13746_v12 = vld [vmem:[%s20687_s1 + $0x70] ss:$8 sps:$4 sm:$0xff]  }
 0x1e8   :  { %v4654_v18 = vpop.f32.mrf.mxu0  ;;  %v13689_v55 = vpop.f32.mrf.mxu1  ;;  %21271 = vst [vmem:[#allocation53_spill] sm:$0xff] %v13710_v40  ;;  %21280 = vst [vmem:[#allocation60_spill] sm:$0xff] %v13746_v12 }
 0x1e9   :  { %21262 = vst [vmem:[#allocation46_spill] sm:$0xff] %v13678_v53  ;;  %v13687_v37 = vmax.f32 %v4654_v18, %v21264_v36  ;;  %21266 = vst [vmem:[#allocation49_spill] sm:$0xff] %v13689_v55 }
 0x1ea   :  { %v4658_v34 = vpop.f32.mrf.mxu0  ;;  %5349 = vmatmul.mubr.bf16.gmra.mxu0 %v13694_v54  ;;  %v13704_v9 = vpop.f32.mrf.mxu1  ;;  %5542 = vmatmul.mubr.bf16.gmra.mxu1 %v13694_v54 }
 0x1eb   :  { %21265 = vst [vmem:[#allocation48_spill] sm:$0xff] %v13687_v37  ;;  %v13702_v58 = vmax.f32 %v4658_v34, %v21268_v4  ;;  %21270 = vst [vmem:[#allocation52_spill] sm:$0xff] %v13704_v9  ;;  %11223 = vmatprep.mubr.msk.bf16.mxu0 %vm4049_vm0, %v13710_v40  ;;  %11239 = vmatprep.mubr.msk.bf16.mxu1 %vm4049_vm0, %v13710_v40  ;;  %v13883_v37 = vld [vmem:[#allocation4 + $0x310] sm:$0xff]  ;;  %v21300_v9 = vld [vmem:[#allocation22_spill] sm:$0xff] }
 0x1ec   :  { %v4660_v5 = vpop.f32.mrf.mxu0  ;;  %v13723_v59 = vpop.f32.mrf.mxu1 }
 0x1ed   :  { %21269 = vst [vmem:[#allocation51_spill] sm:$0xff] %v13702_v58  ;;  %v13721_v30 = vmax.f32 %v4660_v5, %v9697_v43  ;;  %21273 = vst [vmem:[#allocation55_spill] sm:$0xff] %v13723_v59  ;;  %v21281_v5 = vmax.f32 %v13534_v13, %v13532_v17  ;;  %v21285_v13 = vmax.f32 %v13553_v8, %v13551_v35  ;;  %v21296_v17 = vld [vmem:[#allocation21_spill] sm:$0xff] }
 0x1ee   :  { %v4662_v16 = vpop.f32.mrf.mxu0  ;;  %v13732_v18 = vpop.f32.mrf.mxu1  ;;  %v21291_v35 = vmax.f32 %v13574_v15, %v13572_v29  ;;  %v21299_v29 = vld [vmem:[#allocation20_spill] sm:$0xff] }
 0x1ef   :  { %21272 = vst [vmem:[#allocation54_spill] sm:$0xff] %v13721_v30  ;;  %v13730_v11 = vmax.f32 %v4662_v16, %v21274_v3  ;;  %21276 = vst [vmem:[#allocation57_spill] sm:$0xff] %v13732_v18  ;;  %v21301_v30 = vld [vmem:[#allocation23_spill] sm:$0xff] }
 0x1f0   :  { %v4664_v36 = vpop.f32.mrf.mxu0  ;;  %v13741_v43 = vpop.f32.mrf.mxu1 }
 0x1f1   :  { %21275 = vst [vmem:[#allocation56_spill] sm:$0xff] %v13730_v11  ;;  %v13739_v62 = vmax.f32 %v4664_v36, %v21277_v45  ;;  %21279 = vst [vmem:[#allocation59_spill] sm:$0xff] %v13741_v43 }
 0x1f2   :  { %v4668_v4 = vpop.f32.mrf.mxu0  ;;  %5359 = vmatmul.mubr.bf16.gmra.mxu0 %v13746_v12  ;;  %v13756_v42 = vpop.f32.mrf.mxu1  ;;  %5552 = vmatmul.mubr.bf16.gmra.mxu1 %v13746_v12 }
 0x1f3   :  { %21278 = vst [vmem:[#allocation58_spill] sm:$0xff] %v13739_v62  ;;  %v13754_v16 = vmax.f32 %v4668_v4, %v21281_v5  ;;  %21283 = vst [vmem:[#allocation62_spill] sm:$0xff] %v13756_v42  ;;  %11224 = vmatprep.mubr.msk.bf16.mxu0 %vm4049_vm0, %v13762_v41  ;;  %11240 = vmatprep.mubr.msk.bf16.mxu1 %vm4049_vm0, %v13762_v41 }
 0x1f4   :  { %v4670_v3 = vpop.f32.mrf.mxu0  ;;  %v13775_v45 = vpop.f32.mrf.mxu1 }
 0x1f5   :  { %21282 = vst [vmem:[#allocation61_spill] sm:$0xff] %v13754_v16  ;;  %v13773_v36 = vmax.f32 %v4670_v3, %v21285_v13  ;;  %21287 = vst [vmem:[#allocation65_spill] sm:$0xff] %v13775_v45 }
 0x1f6   :  { %v4672_v4 = vpop.f32.mrf.mxu0  ;;  %v13784_v57 = vpop.f32.mrf.mxu1 }
 0x1f7   :  { %21286 = vst [vmem:[#allocation64_spill] sm:$0xff] %v13773_v36  ;;  %v13782_v19 = vmax.f32 %v4672_v4, %v21288_v38  ;;  %21290 = vst [vmem:[#allocation67_spill] sm:$0xff] %v13784_v57  ;;  %v21295_v38 = vld [vmem:[#allocation11_spill] sm:$0xff]  ;;  %v21302_v36 = vld [vmem:[#allocation14_spill] sm:$0xff] }
 0x1f8   :  { %v4674_v44 = vpop.f32.mrf.mxu0  ;;  %v13793_v3 = vpop.f32.mrf.mxu1 }
 0x1f9   :  { %21289 = vst [vmem:[#allocation66_spill] sm:$0xff] %v13782_v19  ;;  %v13791_v8 = vmax.f32 %v4674_v44, %v21291_v35  ;;  %21293 = vst [vmem:[#allocation69_spill] sm:$0xff] %v13793_v3  ;;  %v21303_v19 = vld [vmem:[#allocation15_spill] sm:$0xff] }
 0x1fa   :  { %v13795_v13 = vpop.f32.mrf.mxu0  ;;  %5369 = vmatmul.mubr.bf16.gmra.mxu0 %v21294_v51  ;;  %v13800_v21 = vpop.f32.mrf.mxu1  ;;  %5562 = vmatmul.mubr.bf16.gmra.mxu1 %v21294_v51 }
 0x1fb   :  { %21292 = vst [vmem:[#allocation68_spill] sm:$0xff] %v13791_v8  ;;  %11225 = vmatprep.mubr.msk.bf16.mxu0 %vm4049_vm0, %v21295_v38  ;;  %11241 = vmatprep.mubr.msk.bf16.mxu1 %vm4049_vm0, %v21295_v38 }
 0x1fc   :  { %v13805_v4 = vpop.f32.mrf.mxu0  ;;  %v13809_v15 = vpop.f32.mrf.mxu1 }
 0x1fe   :  { %v13813_v44 = vpop.f32.mrf.mxu0  ;;  %v13815_v35 = vpop.f32.mrf.mxu1 }
 0x1ff   :  { %v21305_v41 = vmax.f32 %v13813_v44, %v13815_v35 }
 0x200   :  { %v13819_v63 = vpop.f32.mrf.mxu0  ;;  %v13821_v34 = vpop.f32.mrf.mxu1 }
 0x202   :  { %v13825_v38 = vpop.f32.mrf.mxu0  ;;  %5379 = vmatmul.mubr.bf16.gmra.mxu0 %v21296_v17  ;;  %v13828_v5 = vpop.f32.mrf.mxu1  ;;  %5572 = vmatmul.mubr.bf16.gmra.mxu1 %v21296_v17  ;;  %v13881_v17 = vld [vmem:[#allocation4 + $0x230] sm:$0xff] }
 0x203   :  { %11226 = vmatprep.mubr.msk.bf16.mxu0 %vm4049_vm0, %v21297_v22  ;;  %11242 = vmatprep.mubr.msk.bf16.mxu1 %vm4049_vm0, %v21297_v22 }
 0x204   :  { %v13835_v51 = vpop.f32.mrf.mxu0  ;;  %v13839_v14 = vpop.f32.mrf.mxu1 }
 0x206   :  { %v13843_v23 = vpop.f32.mrf.mxu0  ;;  %v13845_v6 = vpop.f32.mrf.mxu1 }
 0x208   :  { %v13849_v61 = vpop.f32.mrf.mxu0  ;;  %v13851_v52 = vpop.f32.mrf.mxu1 }
 0x20a   :  { %v13855_v22 = vpop.f32.mrf.mxu0  ;;  %5389 = vmatmul.mubr.bf16.gmra.mxu0 %v21298_v25  ;;  %v13858_v24 = vpop.f32.mrf.mxu1  ;;  %5582 = vmatmul.mubr.bf16.gmra.mxu1 %v21298_v25 }
 0x20b   :  { %11227 = vmatprep.mubr.msk.bf16.mxu0 %vm4049_vm0, %v21299_v29  ;;  %11243 = vmatprep.mubr.msk.bf16.mxu1 %vm4049_vm0, %v21299_v29  ;;  %v13889_v29 = vcombine.high %v13881_v17, %v13883_v37 }
 0x20c   :  { %v13865_v1 = vpop.f32.mrf.mxu0  ;;  %v13869_v49 = vpop.f32.mrf.mxu1 }
 0x20d   :  { %6221 = vmatprep.subr.bf16.mxu1 %v13889_v29 }
 0x20e   :  { %v13873_v39 = vpop.f32.mrf.mxu0  ;;  %v13875_v53 = vpop.f32.mrf.mxu1 }
 0x210   :  { %v13879_v56 = vpop.f32.mrf.mxu0  ;;  %v13885_v55 = vpop.f32.mrf.mxu1 }
 0x212   :  { %v13893_v58 = vpop.f32.mrf.mxu0  ;;  %5399 = vmatmul.mubr.bf16.gmra.mxu0 %v21300_v9  ;;  %v13896_v25 = vpop.f32.mrf.mxu1  ;;  %5592 = vmatmul.mubr.bf16.gmra.mxu1 %v21300_v9 }
 0x213   :  { %11228 = vmatprep.mubr.msk.bf16.mxu0 %vm4049_vm0, %v21301_v30  ;;  %11244 = vmatprep.mubr.msk.bf16.mxu1 %vm4049_vm0, %v21301_v30  ;;  %v21304_v30 = vmax.f32 %v13805_v4, %v13809_v15 }
 0x214   :  { %v13903_v11 = vpop.f32.mrf.mxu0  ;;  %v13908_v46 = vpop.f32.mrf.mxu1 }
 0x216   :  { %v13912_v62 = vpop.f32.mrf.mxu0  ;;  %v13914_v9 = vpop.f32.mrf.mxu1 }
 0x218   :  { %v13918_v59 = vpop.f32.mrf.mxu0  ;;  %v13920_v16 = vpop.f32.mrf.mxu1 }
 0x21a   :  { %v13924_v42 = vpop.f32.mrf.mxu0  ;;  %5409 = vmatmul.mubr.bf16.gmra.mxu0 %v21302_v36  ;;  %v13929_v45 = vpop.f32.mrf.mxu1  ;;  %5602 = vmatmul.mubr.bf16.gmra.mxu1 %v21302_v36  ;;  %v21309_v36 = vld [vmem:[#allocation16_spill] sm:$0xff] }
 0x21b   :  { %11229 = vmatprep.mubr.msk.bf16.mxu0 %vm4049_vm0, %v21303_v19  ;;  %11245 = vmatprep.mubr.msk.bf16.mxu1 %vm4049_vm0, %v21303_v19 }
 0x21c   :  { %v4946_v57 = vpop.f32.mrf.mxu0  ;;  %v13943_v18 = vpop.f32.mrf.mxu1 }
 0x21d   :  { %v13941_v8 = vmax.f32 %v4946_v57, %v21304_v30  ;;  %v21308_v57 = vmax.f32 %v13819_v63, %v13821_v34  ;;  %v21311_v63 = vld [vmem:[#allocation17_spill] sm:$0xff] }
 0x21e   :  { %v4948_v3 = vpop.f32.mrf.mxu0  ;;  %v13952_v43 = vpop.f32.mrf.mxu1 }
 0x21f   :  { %v13950_v12 = vmax.f32 %v4948_v3, %v21305_v41  ;;  %21307 = vst [vmem:[#allocation11_spill] sm:$0xff] %v13952_v43  ;;  %v21310_v3 = vmax.f32 %v13825_v38, %v13828_v5 }
 0x220   :  { %v4950_v40 = vpop.f32.mrf.mxu0  ;;  %v13961_v15 = vpop.f32.mrf.mxu1 }
 0x221   :  { %21306 = vst [vmem:[#allocation10_spill] sm:$0xff] %v13950_v12  ;;  %v13959_v4 = vmax.f32 %v4950_v40, %v21308_v57  ;;  %v21312_v57 = vmax.f32 %v13835_v51, %v13839_v14  ;;  %v21314_v14 = vmax.f32 %v13849_v61, %v13851_v52  ;;  %v21317_v61 = vld [vmem:[#allocation19_spill] sm:$0xff]  ;;  %v307_v12 = vld [vmem:[#allocation4 + $0x2f8] sm:$0xff] }
 0x222   :  { %v4954_v30 = vpop.f32.mrf.mxu0  ;;  %5419 = vmatmul.mubr.bf16.gmra.mxu0 %v21309_v36  ;;  %v13971_v35 = vpop.f32.mrf.mxu1  ;;  %5612 = vmatmul.mubr.bf16.gmra.mxu1 %v21309_v36  ;;  %v21315_v36 = vld [vmem:[#allocation18_spill] sm:$0xff] }
 0x223   :  { %v13969_v44 = vmax.f32 %v4954_v30, %v21310_v3  ;;  %11230 = vmatprep.mubr.msk.bf16.mxu0 %vm4049_vm0, %v21311_v63  ;;  %11246 = vmatprep.mubr.msk.bf16.mxu1 %vm4049_vm0, %v21311_v63  ;;  %v21313_v3 = vmax.f32 %v13843_v23, %v13845_v6  ;;  %v21316_v23 = vmax.f32 %v13855_v22, %v13858_v24 }
 0x224   :  { %v4956_v40 = vpop.f32.mrf.mxu0  ;;  %v13985_v38 = vpop.f32.mrf.mxu1 }
 0x225   :  { %v13983_v5 = vmax.f32 %v4956_v40, %v21312_v57 }
 0x226   :  { %v4958_v30 = vpop.f32.mrf.mxu0  ;;  %v13994_v63 = vpop.f32.mrf.mxu1 }
 0x227   :  { %v13992_v19 = vmax.f32 %v4958_v30, %v21313_v3 }
 0x228   :  { %v4960_v41 = vpop.f32.mrf.mxu0  ;;  %v14003_v40 = vpop.f32.mrf.mxu1 }
 0x229   :  { %v14001_v51 = vmax.f32 %v4960_v41, %v21314_v14  ;;  %v21318_v14 = vmax.f32 %v13865_v1, %v13869_v49  ;;  %v21320_v49 = vmax.f32 %v13879_v56, %v13885_v55  ;;  %v21323_v56 = vld [vmem:[#allocation25_spill] sm:$0xff]  ;;  %v620_v41 = vld [vmem:[#allocation4 + $0x70] sm:$0xff] }
 0x22a   :  { %v4964_v57 = vpop.f32.mrf.mxu0  ;;  %5429 = vmatmul.mubr.bf16.gmra.mxu0 %v21315_v36  ;;  %v14013_v3 = vpop.f32.mrf.mxu1  ;;  %5622 = vmatmul.mubr.bf16.gmra.mxu1 %v21315_v36  ;;  %v21321_v36 = vld [vmem:[#allocation24_spill] sm:$0xff] }
 0x22b   :  { %v14011_v30 = vmax.f32 %v4964_v57, %v21316_v23  ;;  %11231 = vmatprep.mubr.msk.bf16.mxu0 %vm4049_vm0, %v21317_v61  ;;  %11247 = vmatprep.mubr.msk.bf16.mxu1 %vm4049_vm0, %v21317_v61  ;;  %v21319_v23 = vmax.f32 %v13873_v39, %v13875_v53  ;;  %v21322_v53 = vmax.f32 %v13893_v58, %v13896_v25 }
 0x22c   :  { %v4966_v52 = vpop.f32.mrf.mxu0  ;;  %v14027_v22 = vpop.f32.mrf.mxu1 }
 0x22d   :  { %v14025_v24 = vmax.f32 %v4966_v52, %v21318_v14 }
 0x22e   :  { %v4968_v57 = vpop.f32.mrf.mxu0  ;;  %v14036_v61 = vpop.f32.mrf.mxu1 }
 0x22f   :  { %v14034_v6 = vmax.f32 %v4968_v57, %v21319_v23 }
 0x230   :  { %v4970_v34 = vpop.f32.mrf.mxu0  ;;  %v14045_v52 = vpop.f32.mrf.mxu1 }
 0x231   :  { %v14043_v1 = vmax.f32 %v4970_v34, %v21320_v49  ;;  %v21324_v49 = vmax.f32 %v13903_v11, %v13908_v46  ;;  %v644_v34 = vld [vmem:[#allocation4 + $0x150] sm:$0xff]  ;;  %v21326_v11 = vmax.f32 %v13918_v59, %v13920_v16  ;;  %v21332_v46 = vmax.f32 %v13961_v15, %v13959_v4 }
 0x232   :  { %v4974_v14 = vpop.f32.mrf.mxu0  ;;  %5439 = vmatmul.mubr.bf16.gmra.mxu0 %v21321_v36  ;;  %v14055_v23 = vpop.f32.mrf.mxu1  ;;  %5632 = vmatmul.mubr.bf16.gmra.mxu1 %v21321_v36  ;;  %v14114_v16 = vcombine.low %v620_v41, %v644_v34  ;;  %v21336_v15 = vmax.f32 %v13985_v38, %v13983_v5  ;;  %v21337_v5 = vmax.f32 %v13994_v63, %v13992_v19 }
 0x233   :  { %v14053_v57 = vmax.f32 %v4974_v14, %v21322_v53  ;;  %11248 = vmatprep.mubr.msk.bf16.mxu0 %vm4049_vm0, %v21323_v56  ;;  %11264 = vmatprep.mubr.msk.bf16.mxu1 %vm4049_vm0, %v21323_v56  ;;  %v21325_v53 = vmax.f32 %v13912_v62, %v13914_v9  ;;  %v14091_v62 = vcombine.low %v13881_v17, %v13883_v37 }
 0x234   :  { %v4976_v55 = vpop.f32.mrf.mxu0  ;;  %v14069_v25 = vpop.f32.mrf.mxu1  ;;  %21329 = vst [vmem:[#allocation21_spill] sm:$0xff] %v14114_v16 }
 0x235   :  { %v14067_v58 = vmax.f32 %v4976_v55, %v21324_v49 }
 0x236   :  { %v4978_v14 = vpop.f32.mrf.mxu0  ;;  %v14078_v56 = vpop.f32.mrf.mxu1 }
 0x237   :  { %v14076_v39 = vmax.f32 %v4978_v14, %v21325_v53  ;;  %v21327_v14 = vld [vmem:[#allocation26_spill] sm:$0xff]  ;;  %v14096_v53 = vcombine.high %v620_v41, %v644_v34 }
 0x238   :  { %v4980_v54 = vpop.f32.mrf.mxu0  ;;  %v14087_v49 = vpop.f32.mrf.mxu1 }
 0x239   :  { %v14085_v55 = vmax.f32 %v4980_v54, %v21326_v11  ;;  %v21328_v54 = vld [vmem:[#allocation27_spill] sm:$0xff] }
 0x23a   :  { %v14093_v9 = vpop.f32.mrf.mxu0  ;;  %5675 = vmatmul.mubr.bf16.vlgmr.msra.gmra.mxu0 %v21327_v14  ;;  %v14100_v36 = vpop.f32.mrf.mxu1  ;;  %5868 = vmatmul.mubr.bf16.vlgmr.msra.gmra.mxu1 %v21327_v14 }
 0x23b   :  { %11249 = vmatprep.mubr.msk.bf16.mxu0 %vm4049_vm0, %v21328_v54  ;;  %11265 = vmatprep.mubr.msk.bf16.mxu1 %vm4049_vm0, %v21328_v54 }
 0x23c   :  { %v14105_v59 = vpop.f32.mrf.mxu0  ;;  %6029 = vmatpush1.bf16.msra.mxu0 %v13577_v10  ;;  %v14110_v37 = vpop.f32.mrf.mxu1  ;;  %6222 = vmatpush1.bf16.msra.mxu1 %v14091_v62 }
 0x23d   :  { %6030 = vmatprep.subr.bf16.mxu0 %v13586_v31  ;;  %6223 = vmatprep.subr.bf16.mxu1 %v14096_v53 }
 0x23e   :  { %v14116_v17 = vpop.f32.mrf.mxu0  ;;  %v14119_v11 = vpop.f32.mrf.mxu1 }
 0x23f   :  { %21330 = vst [vmem:[#allocation12_spill] sm:$0xff] %v14119_v11  ;;  %v21335_v11 = vld [vmem:[#allocation30_spill] sm:$0xff] }
 0x240   :  { %v14121_v14 = vpop.f32.mrf.mxu0  ;;  %6031 = vmatpush1.bf16.msra.mxu0 %v13609_v60  ;;  %v5183_v54 = vpop.f32.mrf.mxu1  ;;  %6224 = vmatpush1.bf16.msra.mxu1 %v14114_v16 }
 0x241   :  { %21331 = vst [vmem:[#allocation13_spill] sm:$0xff] %v14121_v14  ;;  %6032 = vmatprep.subr.bf16.mxu0 %v13089_v0  ;;  %v14129_v41 = vmax.f32 %v5183_v54, %v21332_v46  ;;  %6225 = vmatprep.subr.bf16.mxu1 %v13556_v27  ;;  %v21334_v14 = vmax.f32 %v13971_v35, %v13969_v44 }
 0x242   :  { %v4994_v34 = vpop.f32.mrf.mxu0  ;;  %5685 = vmatmul.mubr.bf16.gmra.mxu0 %v21333_v28  ;;  %v14138_v16 = vpop.f32.mrf.mxu1  ;;  %5878 = vmatmul.mubr.bf16.gmra.mxu1 %v21333_v28  ;;  %v10805_v28 = vcombine.high %v283_v7, %v307_v12 }
 0x243   :  { %v14136_v43 = vmax.f32 %v4994_v34, %v21334_v14  ;;  %11250 = vmatprep.mubr.msk.bf16.mxu0 %vm4049_vm0, %v21335_v11  ;;  %11266 = vmatprep.mubr.msk.bf16.mxu1 %vm4049_vm0, %v21335_v11  ;;  %v235_v11 = vld [vmem:[#allocation4 + $0x58] sm:$0xff] }
 0x244   :  { %v4996_v4 = vpop.f32.mrf.mxu0  ;;  %6033 = vmatpush1.bf16.msra.mxu0 %v13341_v32  ;;  %v14153_v35 = vpop.f32.mrf.mxu1  ;;  %6226 = vmatpush1.bf16.msra.mxu1 %v13577_v10  ;;  %v259_v14 = vld [vmem:[#allocation4 + $0x138] sm:$0xff]  ;;  %v10804_v10 = vcombine.low %v283_v7, %v307_v12  ;;  %v21340_v12 = vmax.f32 %v14013_v3, %v14011_v30  ;;  %v21342_v30 = vmax.f32 %v14027_v22, %v14025_v24 }
 0x245   :  { %v14151_v44 = vmax.f32 %v4996_v4, %v21336_v15  ;;  %6034 = vmatprep.subr.bf16.mxu0 %v13351_v26  ;;  %6227 = vmatprep.subr.bf16.mxu1 %v13586_v31  ;;  %v21338_v31 = vmax.f32 %v14003_v40, %v14001_v51  ;;  %v10757_v19 = vcombine.high %v235_v11, %v259_v14 }
 0x246   :  { %v4998_v46 = vpop.f32.mrf.mxu0  ;;  %v14165_v34 = vpop.f32.mrf.mxu1 }
 0x247   :  { %v14163_v38 = vmax.f32 %v4998_v46, %v21337_v5  ;;  %v21339_v46 = vld [vmem:[#allocation33_spill] sm:$0xff] }
 0x248   :  { %v5000_v4 = vpop.f32.mrf.mxu0  ;;  %6035 = vmatpush1.bf16.msra.mxu0 %v13374_v47  ;;  %v14175_v54 = vpop.f32.mrf.mxu1  ;;  %6228 = vmatpush1.bf16.msra.mxu1 %v13609_v60  ;;  %v21341_v60 = vld [vmem:[#allocation35_spill] sm:$0xff] }
 0x249   :  { %v9268_v15 = vmax.f32 %v14165_v34, %v14163_v38  ;;  %v14173_v27 = vmax.f32 %v5000_v4, %v21338_v31  ;;  %6036 = vmatprep.subr.bf16.mxu0 %v10805_v28  ;;  %6229 = vmatprep.subr.bf16.mxu1 %v13089_v0  ;;  %v10756_v0 = vcombine.low %v235_v11, %v259_v14 }
 0x24a   :  { %v5004_v63 = vpop.f32.mrf.mxu0  ;;  %5695 = vmatmul.mubr.bf16.gmra.mxu0 %v21339_v46  ;;  %v14187_v40 = vpop.f32.mrf.mxu1  ;;  %5888 = vmatmul.mubr.bf16.gmra.mxu1 %v21339_v46  ;;  %v21343_v11 = vmax.f32 %v14036_v61, %v14034_v6 }
 0x24b   :  { %v9269_v7 = vmax.f32 %v14175_v54, %v14173_v27  ;;  %v14185_v51 = vmax.f32 %v5004_v63, %v21340_v12  ;;  %11251 = vmatprep.mubr.msk.bf16.mxu0 %vm4049_vm0, %v21341_v60  ;;  %11267 = vmatprep.mubr.msk.bf16.mxu1 %vm4049_vm0, %v21341_v60  ;;  %v21366_v27 = vld [vmem:[#allocation53_spill] sm:$0xff] }
 0x24c   :  { %v5006_v5 = vpop.f32.mrf.mxu0  ;;  %6037 = vmatpush1.bf16.msra.mxu0 %v10804_v10  ;;  %v14201_v31 = vpop.f32.mrf.mxu1  ;;  %6230 = vmatpush1.bf16.msra.mxu1 %v13341_v32  ;;  %v21344_v32 = vmax.f32 %v14045_v52, %v14043_v1  ;;  %v884_v52 = vld [vmem:[#allocation4 + $0x318] sm:$0xff] }
 0x24d   :  { %v9316_v4 = vmax.f32 %v14187_v40, %v14185_v51  ;;  %v14199_v3 = vmax.f32 %v5006_v5, %v21342_v30  ;;  %6038 = vmatprep.subr.bf16.mxu0 %v10757_v19  ;;  %6231 = vmatprep.subr.bf16.mxu1 %v13351_v26  ;;  %v21345_v5 = vld [vmem:[#allocation31_spill] sm:$0xff]  ;;  %v21346_v30 = vmax.f32 %v14055_v23, %v14053_v57 }
 0x24e   :  { %v5008_v63 = vpop.f32.mrf.mxu0  ;;  %v14212_v12 = vpop.f32.mrf.mxu1  ;;  %v21348_v23 = vmax.f32 %v14069_v25, %v14067_v58  ;;  %v812_v25 = vld [vmem:[#allocation4 + $0x78] sm:$0xff] }
 0x24f   :  { %v9317_v46 = vmax.f32 %v14201_v31, %v14199_v3  ;;  %v14210_v14 = vmax.f32 %v5008_v63, %v21343_v11 }
 0x250   :  { %v5010_v24 = vpop.f32.mrf.mxu0  ;;  %6039 = vmatpush1.bf16.msra.mxu0 %v10756_v0  ;;  %v14221_v26 = vpop.f32.mrf.mxu1  ;;  %6232 = vmatpush1.bf16.msra.mxu1 %v13374_v47  ;;  %v860_v47 = vld [vmem:[#allocation4 + $0x238] sm:$0xff] }
 0x251   :  { %v9364_v22 = vmax.f32 %v14212_v12, %v14210_v14  ;;  %v14219_v60 = vmax.f32 %v5010_v24, %v21344_v32  ;;  %6040 = vmatprep.subr.bf16.mxu0 %v21345_v5  ;;  %6233 = vmatprep.subr.bf16.mxu1 %v10805_v28  ;;  %v21347_v28 = vld [vmem:[#allocation32_spill] sm:$0xff]  ;;  %v21349_v32 = vld [vmem:[#allocation34_spill] sm:$0xff] }
 0x252   :  { %v5014_v6 = vpop.f32.mrf.mxu0  ;;  %5705 = vmatmul.mubr.bf16.gmra.mxu0 %v13523_v20  ;;  %v14233_v1 = vpop.f32.mrf.mxu1  ;;  %5898 = vmatmul.mubr.bf16.gmra.mxu1 %v13523_v20 }
 0x253   :  { %v9365_v61 = vmax.f32 %v14221_v26, %v14219_v60  ;;  %v14231_v63 = vmax.f32 %v5014_v6, %v21346_v30  ;;  %11252 = vmatprep.mubr.msk.bf16.mxu0 %vm4049_vm0, %v13540_v48  ;;  %11268 = vmatprep.mubr.msk.bf16.mxu1 %vm4049_vm0, %v13540_v48  ;;  %v14251_v6 = vcombine.high %v860_v47, %v884_v52  ;;  %v21368_v60 = vld [vmem:[#allocation63_spill] sm:$0xff] }
 0x254   :  { %v5016_v11 = vpop.f32.mrf.mxu0  ;;  %6041 = vmatpush1.bf16.msra.mxu0 %v21347_v28  ;;  %v14248_v20 = vpop.f32.mrf.mxu1  ;;  %6234 = vmatpush1.bf16.msra.mxu1 %v10804_v10  ;;  %v21350_v30 = vmax.f32 %v14078_v56, %v14076_v39  ;;  %v14273_v39 = vcombine.low %v860_v47, %v884_v52  ;;  %v21352_v52 = vmax.f32 %v13795_v13, %v13924_v42 }
 0x255   :  { %v9412_v57 = vmax.f32 %v14233_v1, %v14231_v63  ;;  %v14246_v24 = vmax.f32 %v5016_v11, %v21348_v23  ;;  %6042 = vmatprep.subr.bf16.mxu0 %v21349_v32  ;;  %6235 = vmatprep.subr.bf16.mxu1 %v10757_v19  ;;  %v836_v11 = vld [vmem:[#allocation4 + $0x158] sm:$0xff]  ;;  %v21351_v19 = vmax.f32 %v14087_v49, %v14085_v55 }
 0x256   :  { %v5018_v5 = vpop.f32.mrf.mxu0  ;;  %v14260_v58 = vpop.f32.mrf.mxu1  ;;  %v21354_v42 = vmax.f32 %v13943_v18, %v13941_v8 }
 0x257   :  { %v14258_v28 = vmax.f32 %v5018_v5, %v21350_v30 }
 0x258   :  { %v5020_v23 = vpop.f32.mrf.mxu0  ;;  %6043 = vmatpush1.bf16.msra.mxu0 %v13488_v33  ;;  %v14270_v48 = vpop.f32.mrf.mxu1  ;;  %6236 = vmatpush1.bf16.msra.mxu1 %v10756_v0  ;;  %v14277_v33 = vcombine.high %v812_v25, %v836_v11 }
 0x259   :  { %v9460_v10 = vmax.f32 %v14260_v58, %v14258_v28  ;;  %v14268_v32 = vmax.f32 %v5020_v23, %v21351_v19  ;;  %6056 = vmatprep.subr.bf16.mxu0 %v13889_v29  ;;  %6249 = vmatprep.subr.bf16.mxu1 %v14251_v6  ;;  %v14460_v28 = vld [vmem:[%s20687_s1 + $0x80] ss:$8 sps:$4 sm:$0xff]  }
 0x25a   :  { %v5024_v56 = vpop.f32.mrf.mxu0  ;;  %5715 = vmatmul.mubr.bf16.gmra.mxu0 %v13582_v50  ;;  %v5217_v49 = vpop.f32.mrf.mxu1  ;;  %5908 = vmatmul.mubr.bf16.gmra.mxu1 %v13582_v50  ;;  %v14297_v50 = vcombine.low %v812_v25, %v836_v11  ;;  %v21355_v11 = vld [vmem:[#allocation12_spill] sm:$0xff]  ;;  %21370 = vst [vmem:[#allocation20_spill] sm:$0xff] %v14460_v28 }
 0x25b   :  { %v9461_v5 = vmax.f32 %v14270_v48, %v14268_v32  ;;  %v9122_v55 = vmax.f32 %v14093_v9, %v5024_v56  ;;  %11253 = vmatprep.mubr.msk.bf16.mxu0 %vm4049_vm0, %v13595_v2  ;;  %v9124_v0 = vmax.f32 %v14100_v36, %v5217_v49  ;;  %11269 = vmatprep.mubr.msk.bf16.mxu1 %vm4049_vm0, %v13595_v2  ;;  %v14471_v48 = vld [vmem:[%s20687_s1 + $0x94] ss:$8 sps:$4 sm:$0xff]  }
 0x25c   :  { %v5026_v47 = vpop.f32.mrf.mxu0  ;;  %6057 = vmatpush2.bf16.msra.mxu0 %v14091_v62  ;;  %v5219_v23 = vpop.f32.mrf.mxu1  ;;  %6250 = vmatpush2.bf16.msra.mxu1 %v14273_v39  ;;  %v21353_v36 = vmax.f32 %v13800_v21, %v13929_v45  ;;  %v21356_v21 = vld [vmem:[#allocation21_spill] sm:$0xff]  ;;  %21371 = vst [vmem:[#allocation22_spill] sm:$0xff] %v14471_v48 }
 0x25d   :  { %v14292_v30 = vmax.f32 %v21352_v52, %v9122_v55  ;;  %v9123_v9 = vmax.f32 %v14105_v59, %v5026_v47  ;;  %6058 = vmatprep.subr.bf16.mxu0 %v14096_v53  ;;  %v9125_v19 = vmax.f32 %v14110_v37, %v5219_v23  ;;  %6251 = vmatprep.subr.bf16.mxu1 %v14277_v33  ;;  %v21357_v37 = vld [vmem:[#allocation11_spill] sm:$0xff]  ;;  %v21358_v47 = vld [vmem:[#allocation10_spill] sm:$0xff] }
 0x25e   :  { %v14302_v2 = vmax.f32 %v21353_v36, %v9124_v0  ;;  %v5028_v56 = vpop.f32.mrf.mxu0  ;;  %v5221_v55 = vpop.f32.mrf.mxu1  ;;  %v21359_v52 = vmax.f32 %v21357_v37, %v21358_v47  ;;  %v21360_v36 = vld [vmem:[#allocation13_spill] sm:$0xff] }
 0x25f   :  { %v9509_v13 = vmax.f32 %v9123_v9, %v21354_v42  ;;  %v9170_v59 = vmax.f32 %v14116_v17, %v5028_v56  ;;  %v9172_v49 = vmax.f32 %v21355_v11, %v5221_v55  ;;  %v21361_v9 = vld [vmem:[#allocation40_spill] sm:$0xff]  ;;  %v21362_v42 = vmax.f32 %v14138_v16, %v14136_v43  ;;  %v21363_v55 = vld [vmem:[#allocation43_spill] sm:$0xff] }
 0x260   :  { %v5030_v45 = vpop.f32.mrf.mxu0  ;;  %6059 = vmatpush2.bf16.msra.mxu0 %v21356_v21  ;;  %v14320_v8 = vpop.f32.mrf.mxu1  ;;  %6252 = vmatpush2.bf16.msra.mxu1 %v14297_v50  ;;  %v21364_v43 = vmax.f32 %v14153_v35, %v14151_v44 }
 0x261   :  { %v14314_v0 = vmax.f32 %v9125_v19, %v9509_v13  ;;  %v9556_v23 = vmax.f32 %v9170_v59, %v21359_v52  ;;  %v9171_v18 = vmax.f32 %v21360_v36, %v5030_v45  ;;  %6414 = vmatprep.subr.bf16.mxu0 %v14251_v6 }
 0x262   :  { %v5034_v17 = vpop.f32.mrf.mxu0  ;;  %5725 = vmatmul.mubr.bf16.gmra.mxu0 %v21361_v9  ;;  %v14335_v59 = vpop.f32.mrf.mxu1  ;;  %5918 = vmatmul.mubr.bf16.gmra.mxu1 %v21361_v9  ;;  %v21365_v9 = vld [vmem:[#allocation50_spill] sm:$0xff] }
 0x263   :  { %v14325_v56 = vmax.f32 %v9172_v49, %v9556_v23  ;;  %v14328_v19 = vmax.f32 %v9171_v18, %v14129_v41  ;;  %v14333_v13 = vmax.f32 %v5034_v17, %v21362_v42  ;;  %11254 = vmatprep.mubr.msk.bf16.mxu0 %vm4049_vm0, %v21363_v55  ;;  %11270 = vmatprep.mubr.msk.bf16.mxu1 %vm4049_vm0, %v21363_v55 }
 0x264   :  { %v5036_v11 = vpop.f32.mrf.mxu0  ;;  %v14351_v45 = vpop.f32.mrf.mxu1 }
 0x265   :  { %v9949_v41 = vmax.f32 %v14320_v8, %v14328_v19  ;;  %v9950_v49 = vmax.f32 %v14335_v59, %v14333_v13  ;;  %v14349_v16 = vmax.f32 %v5036_v11, %v21364_v43  ;;  %v14509_v19 = vld [vmem:[%s20687_s1 + $0xa4] ss:$8 sps:$4 sm:$0xff]  }
 0x266   :  { %v5038_v37 = vpop.f32.mrf.mxu0  ;;  %v14360_v23 = vpop.f32.mrf.mxu1  ;;  %21373 = vst [vmem:[#allocation14_spill] sm:$0xff] %v14509_v19 }
 0x267   :  { %v9951_v47 = vmax.f32 %v14351_v45, %v14349_v16  ;;  %v14358_v52 = vmax.f32 %v5038_v37, %v9268_v15 }
 0x268   :  { %v5040_v36 = vpop.f32.mrf.mxu0  ;;  %v14369_v35 = vpop.f32.mrf.mxu1 }
 0x269   :  { %v9952_v18 = vmax.f32 %v14360_v23, %v14358_v52  ;;  %v14367_v44 = vmax.f32 %v5040_v36, %v9269_v7  ;;  %v21367_v36 = vld [vmem:[#allocation60_spill] sm:$0xff]  ;;  %v14545_v52 = vld [vmem:[%s20687_s1 + $0xa0] ss:$8 sps:$4 sm:$0xff]  }
 0x26a   :  { %v5044_v17 = vpop.f32.mrf.mxu0  ;;  %5735 = vmatmul.mubr.bf16.gmra.mxu0 %v21365_v9  ;;  %v14379_v15 = vpop.f32.mrf.mxu1  ;;  %5928 = vmatmul.mubr.bf16.gmra.mxu1 %v21365_v9  ;;  %21374 = vst [vmem:[#allocation15_spill] sm:$0xff] %v14545_v52  ;;  %v14587_v23 = vld [vmem:[#allocation4 + $0x320] sm:$0xff] }
 0x26b   :  { %v9953_v38 = vmax.f32 %v14369_v35, %v14367_v44  ;;  %v14377_v34 = vmax.f32 %v5044_v17, %v9316_v4  ;;  %11255 = vmatprep.mubr.msk.bf16.mxu0 %vm4049_vm0, %v21366_v27  ;;  %11271 = vmatprep.mubr.msk.bf16.mxu1 %vm4049_vm0, %v21366_v27  ;;  %v21369_v17 = vmax.f32 %v14248_v20, %v14246_v24  ;;  %v14561_v35 = vld [vmem:[%s20687_s1 + $0xb4] ss:$8 sps:$4 sm:$0xff]  }
 0x26c   :  { %v5046_v54 = vpop.f32.mrf.mxu0  ;;  %v14393_v40 = vpop.f32.mrf.mxu1  ;;  %21375 = vst [vmem:[#allocation16_spill] sm:$0xff] %v14561_v35 }
 0x26d   :  { %v9954_v7 = vmax.f32 %v14379_v15, %v14377_v34  ;;  %v14391_v51 = vmax.f32 %v5046_v54, %v9317_v46  ;;  %v14585_v34 = vld [vmem:[#allocation4 + $0x240] sm:$0xff] }
 0x26e   :  { %v5048_v4 = vpop.f32.mrf.mxu0  ;;  %v14402_v11 = vpop.f32.mrf.mxu1 }
 0x26f   :  { %v9955_v42 = vmax.f32 %v14393_v40, %v14391_v51  ;;  %v14400_v55 = vmax.f32 %v5048_v4, %v9364_v22 }
 0x270   :  { %v5050_v43 = vpop.f32.mrf.mxu0  ;;  %v14411_v31 = vpop.f32.mrf.mxu1 }
 0x271   :  { %v9956_v37 = vmax.f32 %v14402_v11, %v14400_v55  ;;  %v14409_v3 = vmax.f32 %v5050_v43, %v9365_v61  ;;  %v14600_v55 = vcombine.high %v14585_v34, %v14587_v23 }
 0x272   :  { %v5054_v46 = vpop.f32.mrf.mxu0  ;;  %5745 = vmatmul.mubr.bf16.gmra.mxu0 %v21367_v36  ;;  %v14421_v22 = vpop.f32.mrf.mxu1  ;;  %5938 = vmatmul.mubr.bf16.gmra.mxu1 %v21367_v36 }
 0x273   :  { %v9957_v14 = vmax.f32 %v14411_v31, %v14409_v3  ;;  %v14419_v12 = vmax.f32 %v5054_v46, %v9412_v57  ;;  %11256 = vmatprep.mubr.msk.bf16.mxu0 %vm4049_vm0, %v21368_v60  ;;  %11272 = vmatprep.mubr.msk.bf16.mxu1 %vm4049_vm0, %v21368_v60 }
 0x274   :  { %v5056_v26 = vpop.f32.mrf.mxu0  ;;  %v14435_v1 = vpop.f32.mrf.mxu1  ;;  %6607 = vmatprep.subr.bf16.mxu1 %v14600_v55 }
 0x275   :  { %v9958_v61 = vmax.f32 %v14421_v22, %v14419_v12  ;;  %v14433_v63 = vmax.f32 %v5056_v26, %v21369_v17 }
 0x276   :  { %v5058_v57 = vpop.f32.mrf.mxu0  ;;  %v14444_v54 = vpop.f32.mrf.mxu1 }
 0x277   :  { %v14442_v27 = vmax.f32 %v5058_v57, %v9460_v10  ;;  %v21378_v22 = vmax.f32 %v14435_v1, %v14433_v63 }
 0x278   :  { %v5060_v4 = vpop.f32.mrf.mxu0  ;;  %v14453_v20 = vpop.f32.mrf.mxu1 }
 0x279   :  { %v14451_v24 = vmax.f32 %v5060_v4, %v9461_v5  ;;  %v21379_v51 = vmax.f32 %v14444_v54, %v14442_v27  ;;  %v14660_v27 = vld [vmem:[%s20687_s1 + $0xc0] ss:$8 sps:$4 sm:$0xff]  }
 0x27a   :  { %v14455_v46 = vpop.f32.mrf.mxu0  ;;  %5755 = vmatmul.mubr.bf16.gmra.mxu0 %v14460_v28  ;;  %v14465_v10 = vpop.f32.mrf.mxu1  ;;  %5948 = vmatmul.mubr.bf16.gmra.mxu1 %v14460_v28  ;;  %21381 = vst [vmem:[#allocation19_spill] sm:$0xff] %v14660_v27 }
 0x27b   :  { %11257 = vmatprep.mubr.msk.bf16.mxu0 %vm4049_vm0, %v14471_v48  ;;  %11273 = vmatprep.mubr.msk.bf16.mxu1 %vm4049_vm0, %v14471_v48  ;;  %v21380_v63 = vmax.f32 %v14453_v20, %v14451_v24  ;;  %v14673_v20 = vld [vmem:[%s20687_s1 + $0xd4] ss:$8 sps:$4 sm:$0xff]  }
 0x27c   :  { %v5292_v32 = vpop.f32.mrf.mxu0  ;;  %v5485_v36 = vpop.f32.mrf.mxu1  ;;  %21382 = vst [vmem:[#allocation24_spill] sm:$0xff] %v14673_v20 }
 0x27d   :  { %v8743_v5 = vmax.f32 %v5292_v32, %v14314_v0  ;;  %v14493_v0 = vld [vmem:[%s20687_s1 + $0x90] ss:$8 sps:$4 sm:$0xff]  }
 0x27e   :  { %v5294_v60 = vpop.f32.mrf.mxu0  ;;  %v5487_v57 = vpop.f32.mrf.mxu1  ;;  %21372 = vst [vmem:[#allocation23_spill] sm:$0xff] %v14493_v0 }
 0x27f   :  { %v14478_v26 = vmax.f32 %v5485_v36, %v8743_v5  ;;  %v8790_v17 = vmax.f32 %v5294_v60, %v14325_v56 }
 0x280   :  { %v5296_v4 = vpop.f32.mrf.mxu0  ;;  %v14488_v43 = vpop.f32.mrf.mxu1 }
 0x281   :  { %v14481_v25 = vmax.f32 %v5487_v57, %v8790_v17  ;;  %v14486_v58 = vmax.f32 %v5296_v4, %v9949_v41 }
 0x282   :  { %v5300_v9 = vpop.f32.mrf.mxu0  ;;  %5765 = vmatmul.mubr.bf16.gmra.mxu0 %v14493_v0  ;;  %v14503_v8 = vpop.f32.mrf.mxu1  ;;  %5958 = vmatmul.mubr.bf16.gmra.mxu1 %v14493_v0 }
 0x283   :  { %v14501_v32 = vmax.f32 %v5300_v9, %v9950_v49  ;;  %11258 = vmatprep.mubr.msk.bf16.mxu0 %vm4049_vm0, %v14509_v19  ;;  %11274 = vmatprep.mubr.msk.bf16.mxu1 %vm4049_vm0, %v14509_v19  ;;  %v310_v19 = vld [vmem:[#allocation4 + $0x310] sm:$0xff] }
 0x284   :  { %v5302_v41 = vpop.f32.mrf.mxu0  ;;  %v14522_v49 = vpop.f32.mrf.mxu1 }
 0x285   :  { %v14520_v59 = vmax.f32 %v5302_v41, %v9951_v47 }
 0x286   :  { %v5304_v9 = vpop.f32.mrf.mxu0  ;;  %v14531_v60 = vpop.f32.mrf.mxu1 }
 0x287   :  { %v14529_v36 = vmax.f32 %v5304_v9, %v9952_v18 }
 0x288   :  { %v5306_v17 = vpop.f32.mrf.mxu0  ;;  %v14540_v45 = vpop.f32.mrf.mxu1 }
 0x289   :  { %v14538_v16 = vmax.f32 %v5306_v17, %v9953_v38 }
 0x28a   :  { %v5310_v47 = vpop.f32.mrf.mxu0  ;;  %5775 = vmatmul.mubr.bf16.gmra.mxu0 %v14545_v52  ;;  %v14555_v44 = vpop.f32.mrf.mxu1  ;;  %5968 = vmatmul.mubr.bf16.gmra.mxu1 %v14545_v52  ;;  %v14922_v52 = vld [vmem:[%s20687_s1 + $0x24] ss:$8 sps:$4 sm:$0xff]  }
 0x28b   :  { %v14553_v18 = vmax.f32 %v5310_v47, %v9954_v7  ;;  %11259 = vmatprep.mubr.msk.bf16.mxu0 %vm4049_vm0, %v14561_v35  ;;  %11275 = vmatprep.mubr.msk.bf16.mxu1 %vm4049_vm0, %v14561_v35  ;;  %v285_v35 = vld [vmem:[#allocation4 + $0x228] sm:$0xff]  ;;  %21408 = vst [vmem:[#allocation12_spill] sm:$0xff] %v14922_v52 }
 0x28c   :  { %v5312_v38 = vpop.f32.mrf.mxu0  ;;  %v14574_v7 = vpop.f32.mrf.mxu1 }
 0x28d   :  { %v14572_v15 = vmax.f32 %v5312_v38, %v9955_v42 }
 0x28e   :  { %v5314_v4 = vpop.f32.mrf.mxu0  ;;  %v14583_v17 = vpop.f32.mrf.mxu1 }
 0x28f   :  { %v14581_v9 = vmax.f32 %v5314_v4, %v9956_v37  ;;  %v14605_v37 = vld [vmem:[%s20687_s1 + $0xb0] ss:$8 sps:$4 sm:$0xff]  }
 0x290   :  { %v5316_v47 = vpop.f32.mrf.mxu0  ;;  %v14596_v42 = vpop.f32.mrf.mxu1  ;;  %21376 = vst [vmem:[#allocation17_spill] sm:$0xff] %v14605_v37 }
 0x291   :  { %v14594_v40 = vmax.f32 %v5316_v47, %v9957_v14  ;;  %v14621_v14 = vld [vmem:[%s20687_s1 + $0xc4] ss:$8 sps:$4 sm:$0xff]  }
 0x292   :  { %v5320_v11 = vpop.f32.mrf.mxu0  ;;  %5785 = vmatmul.mubr.bf16.gmra.mxu0 %v14605_v37  ;;  %v14615_v31 = vpop.f32.mrf.mxu1  ;;  %5978 = vmatmul.mubr.bf16.gmra.mxu1 %v14605_v37  ;;  %21377 = vst [vmem:[#allocation18_spill] sm:$0xff] %v14621_v14 }
 0x293   :  { %v14613_v3 = vmax.f32 %v5320_v11, %v9958_v61  ;;  %11260 = vmatprep.mubr.msk.bf16.mxu0 %vm4049_vm0, %v14621_v14  ;;  %11276 = vmatprep.mubr.msk.bf16.mxu1 %vm4049_vm0, %v14621_v14  ;;  %v21383_v14 = vmax.f32 %v14488_v43, %v14486_v58  ;;  %v14713_v58 = vld [vmem:[%s20687_s1 + $0xe4] ss:$8 sps:$4 sm:$0xff]  }
 0x294   :  { %v5322_v4 = vpop.f32.mrf.mxu0  ;;  %v14635_v47 = vpop.f32.mrf.mxu1  ;;  %21386 = vst [vmem:[#allocation26_spill] sm:$0xff] %v14713_v58 }
 0x295   :  { %v14633_v61 = vmax.f32 %v5322_v4, %v21378_v22 }
 0x296   :  { %v5324_v11 = vpop.f32.mrf.mxu0  ;;  %v14644_v57 = vpop.f32.mrf.mxu1 }
 0x297   :  { %v14642_v41 = vmax.f32 %v5324_v11, %v21379_v51 }
 0x298   :  { %v5326_v5 = vpop.f32.mrf.mxu0  ;;  %v14653_v4 = vpop.f32.mrf.mxu1 }
 0x299   :  { %v14651_v1 = vmax.f32 %v5326_v5, %v21380_v63 }
 0x29a   :  { %v14655_v22 = vpop.f32.mrf.mxu0  ;;  %5795 = vmatmul.mubr.bf16.gmra.mxu0 %v14660_v27  ;;  %v14667_v24 = vpop.f32.mrf.mxu1  ;;  %5988 = vmatmul.mubr.bf16.gmra.mxu1 %v14660_v27 }
 0x29b   :  { %11261 = vmatprep.mubr.msk.bf16.mxu0 %vm4049_vm0, %v14673_v20  ;;  %11277 = vmatprep.mubr.msk.bf16.mxu1 %vm4049_vm0, %v14673_v20 }
 0x29c   :  { %v5332_v11 = vpop.f32.mrf.mxu0  ;;  %v5525_v51 = vpop.f32.mrf.mxu1 }
 0x29d   :  { %v9511_v63 = vmax.f32 %v5332_v11, %v14478_v26  ;;  %v14697_v26 = vld [vmem:[%s20687_s1 + $0xd0] ss:$8 sps:$4 sm:$0xff]   ;;  %v21388_v11 = vmax.f32 %v14531_v60, %v14529_v36  ;;  %v14749_v36 = vld [vmem:[%s20687_s1 + $0xe0] ss:$8 sps:$4 sm:$0xff]  }
 0x29e   :  { %v5334_v54 = vpop.f32.mrf.mxu0  ;;  %v5527_v13 = vpop.f32.mrf.mxu1  ;;  %21384 = vst [vmem:[#allocation25_spill] sm:$0xff] %v14697_v26  ;;  %21390 = vst [vmem:[#allocation27_spill] sm:$0xff] %v14749_v36 }
 0x29f   :  { %v14682_v12 = vmax.f32 %v5525_v51, %v9511_v63  ;;  %v9558_v38 = vmax.f32 %v5334_v54, %v14481_v25 }
 0x2a0   :  { %v5336_v56 = vpop.f32.mrf.mxu0  ;;  %v14692_v37 = vpop.f32.mrf.mxu1 }
 0x2a1   :  { %v14685_v27 = vmax.f32 %v5527_v13, %v9558_v38  ;;  %v14690_v5 = vmax.f32 %v5336_v56, %v21383_v14  ;;  %v21385_v13 = vmax.f32 %v14503_v8, %v14501_v32  ;;  %v21387_v8 = vmax.f32 %v14522_v49, %v14520_v59 }
 0x2a2   :  { %v5340_v20 = vpop.f32.mrf.mxu0  ;;  %5805 = vmatmul.mubr.bf16.gmra.mxu0 %v14697_v26  ;;  %v14707_v43 = vpop.f32.mrf.mxu1  ;;  %5998 = vmatmul.mubr.bf16.gmra.mxu1 %v14697_v26  ;;  %v21389_v59 = vmax.f32 %v14540_v45, %v14538_v16  ;;  %v14765_v45 = vld [vmem:[%s20687_s1 + $0xf4] ss:$8 sps:$4 sm:$0xff]   ;;  %v21394_v32 = vmax.f32 %v14583_v17, %v14581_v9  ;;  %v14801_v9 = vld [vmem:[%s20687_s1 + $0xf0] ss:$8 sps:$4 sm:$0xff]  }
 0x2a3   :  { %v14705_v38 = vmax.f32 %v5340_v20, %v21385_v13  ;;  %11262 = vmatprep.mubr.msk.bf16.mxu0 %vm4049_vm0, %v14713_v58  ;;  %11278 = vmatprep.mubr.msk.bf16.mxu1 %vm4049_vm0, %v14713_v58  ;;  %21392 = vst [vmem:[#allocation28_spill] sm:$0xff] %v14765_v45  ;;  %21396 = vst [vmem:[#allocation30_spill] sm:$0xff] %v14801_v9 }
 0x2a4   :  { %v5342_v56 = vpop.f32.mrf.mxu0  ;;  %v14726_v54 = vpop.f32.mrf.mxu1 }
 0x2a5   :  { %v14724_v14 = vmax.f32 %v5342_v56, %v21387_v8 }
 0x2a6   :  { %v5344_v51 = vpop.f32.mrf.mxu0  ;;  %v14735_v13 = vpop.f32.mrf.mxu1 }
 0x2a7   :  { %v14733_v63 = vmax.f32 %v5344_v51, %v21388_v11  ;;  %v21391_v51 = vmax.f32 %v14555_v44, %v14553_v18  ;;  %v21393_v44 = vmax.f32 %v14574_v7, %v14572_v15  ;;  %v21395_v15 = vmax.f32 %v14596_v42, %v14594_v40  ;;  %v14817_v42 = vld [vmem:[%s20687_s1 + $0x4] ss:$8 sps:$4 sm:$0xff]  }
 0x2a8   :  { %v5346_v25 = vpop.f32.mrf.mxu0  ;;  %v14744_v56 = vpop.f32.mrf.mxu1  ;;  %21398 = vst [vmem:[#allocation33_spill] sm:$0xff] %v14817_v42  ;;  %v21400_v18 = vmax.f32 %v14644_v57, %v14642_v41  ;;  %v14852_v57 = vcombine.low %v14585_v34, %v14587_v23  ;;  %v14872_v23 = vld [vmem:[%s20687_s1 + $0x14] ss:$8 sps:$4 sm:$0xff]  }
 0x2a9   :  { %v14742_v49 = vmax.f32 %v5346_v25, %v21389_v59  ;;  %21403 = vst [vmem:[#allocation31_spill] sm:$0xff] %v14872_v23 }
 0x2aa   :  { %v5350_v8 = vpop.f32.mrf.mxu0  ;;  %5815 = vmatmul.mubr.bf16.gmra.mxu0 %v14749_v36  ;;  %v14759_v16 = vpop.f32.mrf.mxu1  ;;  %6008 = vmatmul.mubr.bf16.gmra.mxu1 %v14749_v36 }
 0x2ab   :  { %v14757_v11 = vmax.f32 %v5350_v8, %v21391_v51  ;;  %11263 = vmatprep.mubr.msk.bf16.mxu0 %vm4049_vm0, %v14765_v45  ;;  %11279 = vmatprep.mubr.msk.bf16.mxu1 %vm4049_vm0, %v14765_v45 }
 0x2ac   :  { %v5352_v25 = vpop.f32.mrf.mxu0  ;;  %v14778_v8 = vpop.f32.mrf.mxu1 }
 0x2ad   :  { %v14776_v59 = vmax.f32 %v5352_v25, %v21393_v44 }
 0x2ae   :  { %v5354_v51 = vpop.f32.mrf.mxu0  ;;  %v14787_v45 = vpop.f32.mrf.mxu1 }
 0x2af   :  { %v14785_v20 = vmax.f32 %v5354_v51, %v21394_v32  ;;  %v21397_v32 = vmax.f32 %v14615_v31, %v14613_v3  ;;  %v21399_v31 = vmax.f32 %v14635_v47, %v14633_v61  ;;  %v646_v3 = vld [vmem:[#allocation4 + $0x160] sm:$0xff]  ;;  %v21401_v47 = vmax.f32 %v14653_v4, %v14651_v1 }
 0x2b0   :  { %v5356_v36 = vpop.f32.mrf.mxu0  ;;  %v14796_v25 = vpop.f32.mrf.mxu1 }
 0x2b1   :  { %v14794_v7 = vmax.f32 %v5356_v36, %v21395_v15 }
 0x2b2   :  { %v5360_v44 = vpop.f32.mrf.mxu0  ;;  %5825 = vmatmul.mubr.bf16.gmra.mxu0 %v14801_v9  ;;  %v14811_v40 = vpop.f32.mrf.mxu1  ;;  %6018 = vmatmul.mubr.bf16.gmra.mxu1 %v14801_v9  ;;  %v622_v9 = vld [vmem:[#allocation4 + $0x80] sm:$0xff] }
 0x2b3   :  { %v14809_v51 = vmax.f32 %v5360_v44, %v21397_v32  ;;  %11280 = vmatprep.mubr.msk.bf16.mxu0 %vm4049_vm0, %v14817_v42  ;;  %11296 = vmatprep.mubr.msk.bf16.mxu1 %vm4049_vm0, %v14817_v42 }
 0x2b4   :  { %v5362_v36 = vpop.f32.mrf.mxu0  ;;  %v14830_v44 = vpop.f32.mrf.mxu1 }
 0x2b5   :  { %v14828_v15 = vmax.f32 %v5362_v36, %v21399_v31 }
 0x2b6   :  { %v5364_v32 = vpop.f32.mrf.mxu0  ;;  %v14839_v42 = vpop.f32.mrf.mxu1 }
 0x2b7   :  { %v14837_v60 = vmax.f32 %v5364_v32, %v21400_v18  ;;  %v14859_v18 = vld [vmem:[%s20687_s1] ss:$8 sps:$4 sm:$0xff]   ;;  %v14862_v32 = vcombine.high %v622_v9, %v646_v3 }
 0x2b8   :  { %v5366_v58 = vpop.f32.mrf.mxu0  ;;  %v14848_v31 = vpop.f32.mrf.mxu1  ;;  %21402 = vst [vmem:[#allocation35_spill] sm:$0xff] %v14859_v18 }
 0x2b9   :  { %v14846_v36 = vmax.f32 %v5366_v58, %v21401_v47  ;;  %v14885_v47 = vcombine.low %v622_v9, %v646_v3  ;;  %v14905_v3 = vld [vmem:[%s20687_s1 + $0x10] ss:$8 sps:$4 sm:$0xff]  }
 0x2ba   :  { %v14854_v41 = vpop.f32.mrf.mxu0  ;;  %6061 = vmatmul.mubr.bf16.vlgmr.msra.gmra.mxu0 %v14859_v18  ;;  %v14866_v4 = vpop.f32.mrf.mxu1  ;;  %6254 = vmatmul.mubr.bf16.vlgmr.msra.gmra.mxu1 %v14859_v18  ;;  %21405 = vst [vmem:[#allocation32_spill] sm:$0xff] %v14905_v3 }
 0x2bb   :  { %11281 = vmatprep.mubr.msk.bf16.mxu0 %vm4049_vm0, %v14872_v23  ;;  %11297 = vmatprep.mubr.msk.bf16.mxu1 %vm4049_vm0, %v14872_v23  ;;  %v21404_v23 = vmax.f32 %v14692_v37, %v14690_v5  ;;  %v309_v37 = vld [vmem:[#allocation4 + $0x308] sm:$0xff] }
 0x2bc   :  { %v14876_v34 = vpop.f32.mrf.mxu0  ;;  %6415 = vmatpush1.bf16.msra.mxu0 %v14273_v39  ;;  %v14881_v58 = vpop.f32.mrf.mxu1  ;;  %6608 = vmatpush1.bf16.msra.mxu1 %v14852_v57 }
 0x2bd   :  { %6416 = vmatprep.subr.bf16.mxu0 %v14277_v33  ;;  %6609 = vmatprep.subr.bf16.mxu1 %v14862_v32 }
 0x2be   :  { %v14887_v1 = vpop.f32.mrf.mxu0  ;;  %v14890_v61 = vpop.f32.mrf.mxu1 }
 0x2c0   :  { %v5376_v17 = vpop.f32.mrf.mxu0  ;;  %6417 = vmatpush1.bf16.msra.mxu0 %v14297_v50  ;;  %v14898_v26 = vpop.f32.mrf.mxu1  ;;  %6610 = vmatpush1.bf16.msra.mxu1 %v14885_v47 }
 0x2c1   :  { %v14896_v18 = vmax.f32 %v5376_v17, %v21404_v23  ;;  %6418 = vmatprep.subr.bf16.mxu0 %v13889_v29  ;;  %6611 = vmatprep.subr.bf16.mxu1 %v14251_v6  ;;  %v21406_v17 = vmax.f32 %v14707_v43, %v14705_v38  ;;  %v286_v6 = vld [vmem:[#allocation4 + $0x230] sm:$0xff]  ;;  %v21409_v43 = vmax.f32 %v14726_v54, %v14724_v14  ;;  %v261_v38 = vld [vmem:[#allocation4 + $0x148] sm:$0xff] }
 0x2c2   :  { %v5380_v9 = vpop.f32.mrf.mxu0  ;;  %6071 = vmatmul.mubr.bf16.gmra.mxu0 %v14905_v3  ;;  %v14916_v29 = vpop.f32.mrf.mxu1  ;;  %6264 = vmatmul.mubr.bf16.gmra.mxu1 %v14905_v3  ;;  %v14940_v3 = vcombine.high %v285_v35, %v309_v37  ;;  %v21411_v54 = vmax.f32 %v14735_v13, %v14733_v63  ;;  %v14957_v28 = vcombine.low %v286_v6, %v310_v19 }
 0x2c3   :  { %v14914_v23 = vmax.f32 %v5380_v9, %v21406_v17  ;;  %11282 = vmatprep.mubr.msk.bf16.mxu0 %vm4049_vm0, %v14922_v52  ;;  %11298 = vmatprep.mubr.msk.bf16.mxu1 %vm4049_vm0, %v14922_v52  ;;  %v237_v52 = vld [vmem:[#allocation4 + $0x68] sm:$0xff]  ;;  %v21413_v14 = vmax.f32 %v14744_v56, %v14742_v49  ;;  %v117_v49 = vld [vmem:[#allocation4 + $0x300] sm:$0xff]  ;;  %v21416_v56 = vmax.f32 %v14759_v16, %v14757_v11 }
 0x2c4   :  { %v5382_v5 = vpop.f32.mrf.mxu0  ;;  %6419 = vmatpush1.bf16.msra.mxu0 %v14091_v62  ;;  %v14936_v17 = vpop.f32.mrf.mxu1  ;;  %6612 = vmatpush1.bf16.msra.mxu1 %v14273_v39  ;;  %v14943_v62 = vcombine.high %v286_v6, %v310_v19  ;;  %21412 = vst [vmem:[#allocation11_spill] sm:$0xff] %v14957_v28  ;;  %v10761_v13 = vcombine.high %v237_v52, %v261_v38  ;;  %v14973_v19 = vld [vmem:[%s20687_s1 + $0x20] ss:$8 sps:$4 sm:$0xff]  }
 0x2c5   :  { %21407 = vst [vmem:[#allocation34_spill] sm:$0xff] %v14914_v23  ;;  %v14934_v9 = vmax.f32 %v5382_v5, %v21409_v43  ;;  %6420 = vmatprep.subr.bf16.mxu0 %v14096_v53  ;;  %6613 = vmatprep.subr.bf16.mxu1 %v14277_v33  ;;  %v238_v53 = vld [vmem:[#allocation4 + $0x70] sm:$0xff]  ;;  %v14955_v33 = vcombine.low %v285_v35, %v309_v37  ;;  %21414 = vst [vmem:[#allocation10_spill] sm:$0xff] %v14973_v19 }
 0x2c6   :  { %v5384_v0 = vpop.f32.mrf.mxu0  ;;  %21410 = vst [vmem:[#allocation21_spill] sm:$0xff] %v14943_v62  ;;  %v14952_v39 = vpop.f32.mrf.mxu1  ;;  %v262_v43 = vld [vmem:[#allocation4 + $0x150] sm:$0xff]  ;;  %v10760_v11 = vcombine.low %v237_v52, %v261_v38  ;;  %v45_v52 = vld [vmem:[#allocation4 + $0x60] sm:$0xff] }
 0x2c7   :  { %v14950_v5 = vmax.f32 %v5384_v0, %v21411_v54  ;;  %v14977_v35 = vcombine.high %v238_v53, %v262_v43  ;;  %v14999_v16 = vcombine.low %v238_v53, %v262_v43  ;;  %v69_v38 = vld [vmem:[#allocation4 + $0x140] sm:$0xff]  ;;  %v21419_v43 = vmax.f32 %v14787_v45, %v14785_v20 }
 0x2c8   :  { %v5386_v48 = vpop.f32.mrf.mxu0  ;;  %6421 = vmatpush1.bf16.msra.mxu0 %v21356_v21  ;;  %v14966_v0 = vpop.f32.mrf.mxu1  ;;  %6614 = vmatpush1.bf16.msra.mxu1 %v14297_v50  ;;  %v10665_v20 = vcombine.high %v45_v52, %v69_v38 }
 0x2c9   :  { %v14964_v63 = vmax.f32 %v5386_v48, %v21413_v14  ;;  %6422 = vmatprep.subr.bf16.mxu0 %v14940_v3  ;;  %6615 = vmatprep.subr.bf16.mxu1 %v14943_v62  ;;  %21415 = vst [vmem:[#allocation13_spill] sm:$0xff] %v14977_v35  ;;  %v93_v48 = vld [vmem:[#allocation4 + $0x220] sm:$0xff]  ;;  %v14992_v14 = vld [vmem:[%s20687_s1 + $0x34] ss:$8 sps:$4 sm:$0xff]  }
 0x2ca   :  { %v5390_v21 = vpop.f32.mrf.mxu0  ;;  %6081 = vmatmul.mubr.bf16.gmra.mxu0 %v14973_v19  ;;  %v14986_v6 = vpop.f32.mrf.mxu1  ;;  %6274 = vmatmul.mubr.bf16.gmra.mxu1 %v14973_v19  ;;  %21417 = vst [vmem:[#allocation40_spill] sm:$0xff] %v14992_v14  ;;  %v10713_v62 = vcombine.high %v93_v48, %v117_v49 }
 0x2cb   :  { %v14984_v37 = vmax.f32 %v5390_v21, %v21416_v56  ;;  %11283 = vmatprep.mubr.msk.bf16.mxu0 %vm4049_vm0, %v14992_v14  ;;  %11299 = vmatprep.mubr.msk.bf16.mxu1 %vm4049_vm0, %v14992_v14  ;;  %v21418_v56 = vmax.f32 %v14778_v8, %v14776_v59 }
 0x2cc   :  { %v5392_v54 = vpop.f32.mrf.mxu0  ;;  %6423 = vmatpush1.bf16.msra.mxu0 %v14955_v33  ;;  %v15008_v23 = vpop.f32.mrf.mxu1  ;;  %6616 = vmatpush1.bf16.msra.mxu1 %v14957_v28 }
 0x2cd   :  { %v15006_v50 = vmax.f32 %v5392_v54, %v21418_v56  ;;  %6424 = vmatprep.subr.bf16.mxu0 %v10761_v13  ;;  %6617 = vmatprep.subr.bf16.mxu1 %v14977_v35  ;;  %v10712_v56 = vcombine.low %v93_v48, %v117_v49  ;;  %v21420_v35 = vmax.f32 %v14796_v25, %v14794_v7  ;;  %v15051_v48 = vld [vmem:[%s20687_s1 + $0x44] ss:$8 sps:$4 sm:$0xff]  }
 0x2ce   :  { %v5394_v14 = vpop.f32.mrf.mxu0  ;;  %v15019_v8 = vpop.f32.mrf.mxu1  ;;  %v21421_v25 = vmax.f32 %v14811_v40, %v14809_v51  ;;  %v886_v49 = vld [vmem:[#allocation4 + $0x328] sm:$0xff]  ;;  %v10664_v51 = vcombine.low %v45_v52, %v69_v38  ;;  %v21423_v38 = vmax.f32 %v14839_v42, %v14837_v60 }
 0x2cf   :  { %v9705_v53 = vmax.f32 %v15008_v23, %v15006_v50  ;;  %v15017_v59 = vmax.f32 %v5394_v14, %v21419_v43  ;;  %v15034_v14 = vld [vmem:[%s20687_s1 + $0x30] ss:$8 sps:$4 sm:$0xff]  }
 0x2d0   :  { %v5396_v54 = vpop.f32.mrf.mxu0  ;;  %6425 = vmatpush1.bf16.msra.mxu0 %v10760_v11  ;;  %v15028_v19 = vpop.f32.mrf.mxu1  ;;  %6618 = vmatpush1.bf16.msra.mxu1 %v14999_v16 }
 0x2d1   :  { %v15026_v28 = vmax.f32 %v5396_v54, %v21420_v35  ;;  %6426 = vmatprep.subr.bf16.mxu0 %v10713_v62  ;;  %6619 = vmatprep.subr.bf16.mxu1 %v14940_v3  ;;  %v862_v3 = vld [vmem:[#allocation4 + $0x248] sm:$0xff]  ;;  %v21422_v54 = vmax.f32 %v14830_v44, %v14828_v15 }
 0x2d2   :  { %v5400_v45 = vpop.f32.mrf.mxu0  ;;  %6091 = vmatmul.mubr.bf16.gmra.mxu0 %v15034_v14  ;;  %v15045_v62 = vpop.f32.mrf.mxu1  ;;  %6284 = vmatmul.mubr.bf16.gmra.mxu1 %v15034_v14  ;;  %v15067_v21 = vcombine.high %v862_v3, %v886_v49  ;;  %v814_v44 = vld [vmem:[#allocation4 + $0x88] sm:$0xff]  ;;  %v15088_v60 = vcombine.low %v862_v3, %v886_v49  ;;  %v15106_v3 = vld [vmem:[%s20687_s1 + $0x54] ss:$8 sps:$4 sm:$0xff]  }
 0x2d3   :  { %v15043_v35 = vmax.f32 %v5400_v45, %v21421_v25  ;;  %11284 = vmatprep.mubr.msk.bf16.mxu0 %vm4049_vm0, %v15051_v48  ;;  %11300 = vmatprep.mubr.msk.bf16.mxu1 %vm4049_vm0, %v15051_v48  ;;  %v21459_v23 = vmax.f32 %v15028_v19, %v15026_v28  ;;  %v15273_v19 = vld [vmem:[%s20687_s1 + $0x84] ss:$8 sps:$4 sm:$0xff]  }
 0x2d4   :  { %v5402_v43 = vpop.f32.mrf.mxu0  ;;  %6427 = vmatpush1.bf16.msra.mxu0 %v10712_v56  ;;  %v15064_v25 = vpop.f32.mrf.mxu1  ;;  %6620 = vmatpush1.bf16.msra.mxu1 %v14955_v33  ;;  %21466 = vst [vmem:[#allocation92_spill] sm:$0xff] %v15273_v19 }
 0x2d5   :  { %v15062_v45 = vmax.f32 %v5402_v43, %v21422_v54  ;;  %6428 = vmatprep.subr.bf16.mxu0 %v10665_v20  ;;  %6621 = vmatprep.subr.bf16.mxu1 %v10761_v13  ;;  %v838_v43 = vld [vmem:[#allocation4 + $0x168] sm:$0xff]  ;;  %v21424_v13 = vmax.f32 %v14848_v31, %v14846_v36 }
 0x2d6   :  { %v5404_v7 = vpop.f32.mrf.mxu0  ;;  %v15076_v15 = vpop.f32.mrf.mxu1  ;;  %v15097_v36 = vcombine.high %v814_v44, %v838_v43  ;;  %v15120_v31 = vcombine.low %v814_v44, %v838_v43 }
 0x2d7   :  { %v15074_v56 = vmax.f32 %v5404_v7, %v21423_v38  ;;  %v15093_v7 = vld [vmem:[%s20687_s1 + $0x40] ss:$8 sps:$4 sm:$0xff]  }
 0x2d8   :  { %v5406_v54 = vpop.f32.mrf.mxu0  ;;  %6429 = vmatpush1.bf16.msra.mxu0 %v10664_v51  ;;  %v15085_v52 = vpop.f32.mrf.mxu1  ;;  %6622 = vmatpush1.bf16.msra.mxu1 %v10760_v11 }
 0x2d9   :  { %v15083_v20 = vmax.f32 %v5406_v54, %v21424_v13  ;;  %6442 = vmatprep.subr.bf16.mxu0 %v14600_v55  ;;  %6635 = vmatprep.subr.bf16.mxu1 %v15067_v21 }
 0x2da   :  { %v5410_v42 = vpop.f32.mrf.mxu0  ;;  %6101 = vmatmul.mubr.bf16.gmra.mxu0 %v15093_v7  ;;  %v5603_v51 = vpop.f32.mrf.mxu1  ;;  %6294 = vmatmul.mubr.bf16.gmra.mxu1 %v15093_v7 }
 0x2db   :  { %v9126_v11 = vmax.f32 %v14854_v41, %v5410_v42  ;;  %11285 = vmatprep.mubr.msk.bf16.mxu0 %vm4049_vm0, %v15106_v3  ;;  %v9128_v49 = vmax.f32 %v14866_v4, %v5603_v51  ;;  %11301 = vmatprep.mubr.msk.bf16.mxu1 %vm4049_vm0, %v15106_v3  ;;  %v21425_v41 = vmax.f32 %v14455_v46, %v14655_v22 }
 0x2dc   :  { %v5412_v38 = vpop.f32.mrf.mxu0  ;;  %6443 = vmatpush2.bf16.msra.mxu0 %v14852_v57  ;;  %v5605_v42 = vpop.f32.mrf.mxu1  ;;  %6636 = vmatpush2.bf16.msra.mxu1 %v15088_v60  ;;  %v21426_v4 = vmax.f32 %v14465_v10, %v14667_v24  ;;  %v21428_v24 = vmax.f32 %v14898_v26, %v14896_v18  ;;  %v21470_v18 = vmax.f32 %v15076_v15, %v15074_v56 }
 0x2dd   :  { %v9510_v54 = vmax.f32 %v21425_v41, %v9126_v11  ;;  %v9127_v13 = vmax.f32 %v14876_v34, %v5412_v38  ;;  %6444 = vmatprep.subr.bf16.mxu0 %v14862_v32  ;;  %v9129_v33 = vmax.f32 %v14881_v58, %v5605_v42  ;;  %6637 = vmatprep.subr.bf16.mxu1 %v15097_v36 }
 0x2de   :  { %v9512_v51 = vmax.f32 %v21426_v4, %v9128_v49  ;;  %v5414_v40 = vpop.f32.mrf.mxu0  ;;  %v5607_v34 = vpop.f32.mrf.mxu1 }
 0x2df   :  { %v9963_v46 = vmax.f32 %v9127_v13, %v14682_v12  ;;  %v9174_v22 = vmax.f32 %v14887_v1, %v5414_v40  ;;  %v9176_v38 = vmax.f32 %v14890_v61, %v5607_v34  ;;  %v21431_v12 = vmax.f32 %v14292_v30, %v14302_v2  ;;  %v21435_v40 = vld [vmem:[#allocation34_spill] sm:$0xff] }
 0x2e0   :  { %v9962_v11 = vmax.f32 %v9510_v54, %v9512_v51  ;;  %v5416_v41 = vpop.f32.mrf.mxu0  ;;  %6445 = vmatpush2.bf16.msra.mxu0 %v14885_v47  ;;  %v15139_v43 = vpop.f32.mrf.mxu1  ;;  %6638 = vmatpush2.bf16.msra.mxu1 %v15120_v31  ;;  %v15169_v2 = vld [vmem:[%s20687_s1 + $0x64] ss:$8 sps:$4 sm:$0xff]   ;;  %v21440_v13 = vmax.f32 %v14936_v17, %v14934_v9  ;;  %v21446_v9 = vmax.f32 %v14966_v0, %v14964_v63  ;;  %v15221_v0 = vld [vmem:[%s20687_s1 + $0x74] ss:$8 sps:$4 sm:$0xff]  }
 0x2e1   :  { %v15131_v44 = vmax.f32 %v9129_v33, %v9963_v46  ;;  %v9964_v10 = vmax.f32 %v9174_v22, %v14685_v27  ;;  %v15137_v58 = vmax.f32 %v5416_v41, %v21428_v24  ;;  %21430 = vst [vmem:[#allocation53_spill] sm:$0xff] %v15139_v43  ;;  %6800 = vmatprep.subr.bf16.mxu0 %v15067_v21  ;;  %v15151_v27 = vld [vmem:[%s20687_s1 + $0x50] ss:$8 sps:$4 sm:$0xff]   ;;  %21439 = vst [vmem:[#allocation72_spill] sm:$0xff] %v15169_v2  ;;  %v21480_v43 = vld [vmem:[#allocation15_spill] sm:$0xff] }
 0x2e2   :  { %v15146_v61 = vmax.f32 %v21431_v12, %v9962_v11  ;;  %v5420_v1 = vpop.f32.mrf.mxu0  ;;  %21433 = vst [vmem:[#allocation63_spill] sm:$0xff] %v15151_v27  ;;  %6111 = vmatmul.mubr.bf16.gmra.mxu0 %v15151_v27  ;;  %v21436_v33 = vmax.f32 %v14916_v29, %v21435_v40  ;;  %v15163_v30 = vpop.f32.mrf.mxu1  ;;  %6304 = vmatmul.mubr.bf16.gmra.mxu1 %v15151_v27  ;;  %21453 = vst [vmem:[#allocation82_spill] sm:$0xff] %v15221_v0  ;;  %v287_v27 = vld [vmem:[#allocation4 + $0x238] sm:$0xff] }
 0x2e3   :  { %21427 = vst [vmem:[#allocation43_spill] sm:$0xff] %v15131_v44  ;;  %21429 = vst [vmem:[#allocation50_spill] sm:$0xff] %v15137_v58  ;;  %v15154_v26 = vmax.f32 %v9176_v38, %v9964_v10  ;;  %11286 = vmatprep.mubr.msk.bf16.mxu0 %vm4049_vm0, %v15169_v2  ;;  %11302 = vmatprep.mubr.msk.bf16.mxu1 %vm4049_vm0, %v15169_v2  ;;  %v21443_v22 = vmax.f32 %v14952_v39, %v14950_v5  ;;  %v15205_v5 = vld [vmem:[%s20687_s1 + $0x60] ss:$8 sps:$4 sm:$0xff]   ;;  %v21515_v2 = vld [vmem:[#allocation32_spill] sm:$0xff] }
 0x2e4   :  { %21432 = vst [vmem:[#allocation60_spill] sm:$0xff] %v15146_v61  ;;  %v15161_v49 = vmax.f32 %v5420_v1, %v21436_v33  ;;  %21438 = vst [vmem:[#allocation71_spill] sm:$0xff] %v15163_v30  ;;  %v5422_v54 = vpop.f32.mrf.mxu0  ;;  %v15182_v4 = vpop.f32.mrf.mxu1  ;;  %v21450_v12 = vmax.f32 %v14986_v6, %v14984_v37  ;;  %v21476_v37 = vld [vmem:[#allocation20_spill] sm:$0xff]  ;;  %v21479_v39 = vld [vmem:[#allocation14_spill] sm:$0xff] }
 0x2e5   :  { %21434 = vst [vmem:[#allocation70_spill] sm:$0xff] %v15154_v26  ;;  %v15180_v42 = vmax.f32 %v5422_v54, %v21440_v13  ;;  %21442 = vst [vmem:[#allocation74_spill] sm:$0xff] %v15182_v4 }
 0x2e6   :  { %21437 = vst [vmem:[#allocation34_spill] sm:$0xff] %v15161_v49  ;;  %v5424_v51 = vpop.f32.mrf.mxu0  ;;  %v15191_v11 = vpop.f32.mrf.mxu1  ;;  %21449 = vst [vmem:[#allocation79_spill] sm:$0xff] %v15205_v5 }
 0x2e7   :  { %21441 = vst [vmem:[#allocation73_spill] sm:$0xff] %v15180_v42  ;;  %v15189_v34 = vmax.f32 %v5424_v51, %v21443_v22  ;;  %21445 = vst [vmem:[#allocation76_spill] sm:$0xff] %v15191_v11  ;;  %v21456_v51 = vmax.f32 %v15019_v8, %v15017_v59  ;;  %v15257_v59 = vld [vmem:[%s20687_s1 + $0x70] ss:$8 sps:$4 sm:$0xff]  }
 0x2e8   :  { %v5426_v38 = vpop.f32.mrf.mxu0  ;;  %v15200_v10 = vpop.f32.mrf.mxu1  ;;  %21462 = vst [vmem:[#allocation89_spill] sm:$0xff] %v15257_v59 }
 0x2e9   :  { %21444 = vst [vmem:[#allocation75_spill] sm:$0xff] %v15189_v34  ;;  %v15198_v17 = vmax.f32 %v5426_v38, %v21446_v9  ;;  %21448 = vst [vmem:[#allocation78_spill] sm:$0xff] %v15200_v10 }
 0x2ea   :  { %v5430_v24 = vpop.f32.mrf.mxu0  ;;  %6121 = vmatmul.mubr.bf16.gmra.mxu0 %v15205_v5  ;;  %v15215_v63 = vpop.f32.mrf.mxu1  ;;  %6314 = vmatmul.mubr.bf16.gmra.mxu1 %v15205_v5 }
 0x2eb   :  { %21447 = vst [vmem:[#allocation77_spill] sm:$0xff] %v15198_v17  ;;  %v15213_v1 = vmax.f32 %v5430_v24, %v21450_v12  ;;  %21452 = vst [vmem:[#allocation81_spill] sm:$0xff] %v15215_v63  ;;  %11287 = vmatprep.mubr.msk.bf16.mxu0 %vm4049_vm0, %v15221_v0  ;;  %11303 = vmatprep.mubr.msk.bf16.mxu1 %vm4049_vm0, %v15221_v0  ;;  %v15394_v17 = vld [vmem:[#allocation4 + $0x330] sm:$0xff]  ;;  %v21482_v63 = vld [vmem:[#allocation17_spill] sm:$0xff] }
 0x2ec   :  { %v5432_v40 = vpop.f32.mrf.mxu0  ;;  %v15234_v33 = vpop.f32.mrf.mxu1 }
 0x2ed   :  { %21451 = vst [vmem:[#allocation80_spill] sm:$0xff] %v15213_v1  ;;  %v15232_v6 = vmax.f32 %v5432_v40, %v9705_v53  ;;  %21455 = vst [vmem:[#allocation84_spill] sm:$0xff] %v15234_v33  ;;  %v21463_v40 = vmax.f32 %v15045_v62, %v15043_v35  ;;  %v21467_v62 = vmax.f32 %v15064_v25, %v15062_v45  ;;  %v21478_v35 = vld [vmem:[#allocation23_spill] sm:$0xff] }
 0x2ee   :  { %v5434_v54 = vpop.f32.mrf.mxu0  ;;  %v15243_v38 = vpop.f32.mrf.mxu1  ;;  %v21473_v45 = vmax.f32 %v15085_v52, %v15083_v20  ;;  %v21481_v20 = vld [vmem:[#allocation16_spill] sm:$0xff] }
 0x2ef   :  { %21454 = vst [vmem:[#allocation83_spill] sm:$0xff] %v15232_v6  ;;  %v15241_v22 = vmax.f32 %v5434_v54, %v21456_v51  ;;  %21458 = vst [vmem:[#allocation86_spill] sm:$0xff] %v15243_v38  ;;  %v21483_v6 = vld [vmem:[#allocation18_spill] sm:$0xff] }
 0x2f0   :  { %v5436_v9 = vpop.f32.mrf.mxu0  ;;  %v15252_v53 = vpop.f32.mrf.mxu1 }
 0x2f1   :  { %21457 = vst [vmem:[#allocation85_spill] sm:$0xff] %v15241_v22  ;;  %v15250_v50 = vmax.f32 %v5436_v9, %v21459_v23  ;;  %21461 = vst [vmem:[#allocation88_spill] sm:$0xff] %v15252_v53 }
 0x2f2   :  { %v5440_v12 = vpop.f32.mrf.mxu0  ;;  %6131 = vmatmul.mubr.bf16.gmra.mxu0 %v15257_v59  ;;  %v15267_v28 = vpop.f32.mrf.mxu1  ;;  %6324 = vmatmul.mubr.bf16.gmra.mxu1 %v15257_v59 }
 0x2f3   :  { %21460 = vst [vmem:[#allocation87_spill] sm:$0xff] %v15250_v50  ;;  %v15265_v54 = vmax.f32 %v5440_v12, %v21463_v40  ;;  %21465 = vst [vmem:[#allocation91_spill] sm:$0xff] %v15267_v28  ;;  %11288 = vmatprep.mubr.msk.bf16.mxu0 %vm4049_vm0, %v15273_v19  ;;  %11304 = vmatprep.mubr.msk.bf16.mxu1 %vm4049_vm0, %v15273_v19 }
 0x2f4   :  { %v5442_v51 = vpop.f32.mrf.mxu0  ;;  %v15286_v23 = vpop.f32.mrf.mxu1 }
 0x2f5   :  { %21464 = vst [vmem:[#allocation90_spill] sm:$0xff] %v15265_v54  ;;  %v15284_v9 = vmax.f32 %v5442_v51, %v21467_v62  ;;  %21469 = vst [vmem:[#allocation94_spill] sm:$0xff] %v15286_v23 }
 0x2f6   :  { %v5444_v12 = vpop.f32.mrf.mxu0  ;;  %v15295_v46 = vpop.f32.mrf.mxu1 }
 0x2f7   :  { %21468 = vst [vmem:[#allocation93_spill] sm:$0xff] %v15284_v9  ;;  %v15293_v29 = vmax.f32 %v5444_v12, %v21470_v18  ;;  %21472 = vst [vmem:[#allocation96_spill] sm:$0xff] %v15295_v46  ;;  %v21477_v18 = vld [vmem:[#allocation22_spill] sm:$0xff]  ;;  %v21484_v9 = vld [vmem:[#allocation19_spill] sm:$0xff] }
 0x2f8   :  { %v5446_v41 = vpop.f32.mrf.mxu0  ;;  %v15304_v51 = vpop.f32.mrf.mxu1 }
 0x2f9   :  { %21471 = vst [vmem:[#allocation95_spill] sm:$0xff] %v15293_v29  ;;  %v15302_v25 = vmax.f32 %v5446_v41, %v21473_v45  ;;  %21475 = vst [vmem:[#allocation98_spill] sm:$0xff] %v15304_v51  ;;  %v21485_v29 = vld [vmem:[#allocation24_spill] sm:$0xff] }
 0x2fa   :  { %v15306_v62 = vpop.f32.mrf.mxu0  ;;  %6141 = vmatmul.mubr.bf16.gmra.mxu0 %v21476_v37  ;;  %v15311_v15 = vpop.f32.mrf.mxu1  ;;  %6334 = vmatmul.mubr.bf16.gmra.mxu1 %v21476_v37 }
 0x2fb   :  { %21474 = vst [vmem:[#allocation97_spill] sm:$0xff] %v15302_v25  ;;  %11289 = vmatprep.mubr.msk.bf16.mxu0 %vm4049_vm0, %v21477_v18  ;;  %11305 = vmatprep.mubr.msk.bf16.mxu1 %vm4049_vm0, %v21477_v18 }
 0x2fc   :  { %v15316_v12 = vpop.f32.mrf.mxu0  ;;  %v15320_v52 = vpop.f32.mrf.mxu1 }
 0x2fe   :  { %v15324_v41 = vpop.f32.mrf.mxu0  ;;  %v15326_v45 = vpop.f32.mrf.mxu1 }
 0x2ff   :  { %v21487_v19 = vmax.f32 %v15324_v41, %v15326_v45 }
 0x300   :  { %v15330_v13 = vpop.f32.mrf.mxu0  ;;  %v15332_v24 = vpop.f32.mrf.mxu1 }
 0x302   :  { %v15336_v18 = vpop.f32.mrf.mxu0  ;;  %6151 = vmatmul.mubr.bf16.gmra.mxu0 %v21478_v35  ;;  %v15339_v40 = vpop.f32.mrf.mxu1  ;;  %6344 = vmatmul.mubr.bf16.gmra.mxu1 %v21478_v35  ;;  %v15392_v35 = vld [vmem:[#allocation4 + $0x250] sm:$0xff] }
 0x303   :  { %11290 = vmatprep.mubr.msk.bf16.mxu0 %vm4049_vm0, %v21479_v39  ;;  %11306 = vmatprep.mubr.msk.bf16.mxu1 %vm4049_vm0, %v21479_v39 }
 0x304   :  { %v15346_v37 = vpop.f32.mrf.mxu0  ;;  %v15350_v8 = vpop.f32.mrf.mxu1 }
 0x306   :  { %v15354_v61 = vpop.f32.mrf.mxu0  ;;  %v15356_v44 = vpop.f32.mrf.mxu1 }
 0x308   :  { %v15360_v26 = vpop.f32.mrf.mxu0  ;;  %v15362_v56 = vpop.f32.mrf.mxu1 }
 0x30a   :  { %v15366_v39 = vpop.f32.mrf.mxu0  ;;  %6161 = vmatmul.mubr.bf16.gmra.mxu0 %v21480_v43  ;;  %v15369_v49 = vpop.f32.mrf.mxu1  ;;  %6354 = vmatmul.mubr.bf16.gmra.mxu1 %v21480_v43 }
 0x30b   :  { %11291 = vmatprep.mubr.msk.bf16.mxu0 %vm4049_vm0, %v21481_v20  ;;  %11307 = vmatprep.mubr.msk.bf16.mxu1 %vm4049_vm0, %v21481_v20  ;;  %v15400_v20 = vcombine.high %v15392_v35, %v15394_v17 }
 0x30c   :  { %v15376_v30 = vpop.f32.mrf.mxu0  ;;  %v15380_v58 = vpop.f32.mrf.mxu1 }
 0x30d   :  { %6993 = vmatprep.subr.bf16.mxu1 %v15400_v20 }
 0x30e   :  { %v15384_v4 = vpop.f32.mrf.mxu0  ;;  %v15386_v34 = vpop.f32.mrf.mxu1 }
 0x310   :  { %v15390_v11 = vpop.f32.mrf.mxu0  ;;  %v15396_v10 = vpop.f32.mrf.mxu1 }
 0x312   :  { %v15404_v1 = vpop.f32.mrf.mxu0  ;;  %6171 = vmatmul.mubr.bf16.gmra.mxu0 %v21482_v63  ;;  %v15407_v43 = vpop.f32.mrf.mxu1  ;;  %6364 = vmatmul.mubr.bf16.gmra.mxu1 %v21482_v63 }
 0x313   :  { %11292 = vmatprep.mubr.msk.bf16.mxu0 %vm4049_vm0, %v21483_v6  ;;  %11308 = vmatprep.mubr.msk.bf16.mxu1 %vm4049_vm0, %v21483_v6  ;;  %v21486_v6 = vmax.f32 %v15316_v12, %v15320_v52 }
 0x314   :  { %v15414_v22 = vpop.f32.mrf.mxu0  ;;  %v15419_v42 = vpop.f32.mrf.mxu1 }
 0x316   :  { %v15423_v50 = vpop.f32.mrf.mxu0  ;;  %v15425_v63 = vpop.f32.mrf.mxu1 }
 0x318   :  { %v15429_v33 = vpop.f32.mrf.mxu0  ;;  %v15431_v54 = vpop.f32.mrf.mxu1 }
 0x31a   :  { %v15435_v28 = vpop.f32.mrf.mxu0  ;;  %6181 = vmatmul.mubr.bf16.gmra.mxu0 %v21484_v9  ;;  %v15440_v23 = vpop.f32.mrf.mxu1  ;;  %6374 = vmatmul.mubr.bf16.gmra.mxu1 %v21484_v9  ;;  %v21491_v9 = vld [vmem:[#allocation25_spill] sm:$0xff] }
 0x31b   :  { %11293 = vmatprep.mubr.msk.bf16.mxu0 %vm4049_vm0, %v21485_v29  ;;  %11309 = vmatprep.mubr.msk.bf16.mxu1 %vm4049_vm0, %v21485_v29 }
 0x31c   :  { %v5718_v46 = vpop.f32.mrf.mxu0  ;;  %v15454_v38 = vpop.f32.mrf.mxu1 }
 0x31d   :  { %v15452_v25 = vmax.f32 %v5718_v46, %v21486_v6  ;;  %v21490_v46 = vmax.f32 %v15330_v13, %v15332_v24  ;;  %v21493_v13 = vld [vmem:[#allocation26_spill] sm:$0xff] }
 0x31e   :  { %v5720_v51 = vpop.f32.mrf.mxu0  ;;  %v15463_v53 = vpop.f32.mrf.mxu1 }
 0x31f   :  { %v15461_v59 = vmax.f32 %v5720_v51, %v21487_v19  ;;  %21489 = vst [vmem:[#allocation22_spill] sm:$0xff] %v15463_v53  ;;  %v21492_v51 = vmax.f32 %v15336_v18, %v15339_v40 }
 0x320   :  { %v5722_v0 = vpop.f32.mrf.mxu0  ;;  %v15472_v52 = vpop.f32.mrf.mxu1 }
 0x321   :  { %21488 = vst [vmem:[#allocation20_spill] sm:$0xff] %v15461_v59  ;;  %v15470_v12 = vmax.f32 %v5722_v0, %v21490_v46  ;;  %v21494_v46 = vmax.f32 %v15346_v37, %v15350_v8  ;;  %v21496_v8 = vmax.f32 %v15360_v26, %v15362_v56  ;;  %v21499_v26 = vld [vmem:[#allocation28_spill] sm:$0xff]  ;;  %v311_v59 = vld [vmem:[#allocation4 + $0x318] sm:$0xff] }
 0x322   :  { %v5726_v6 = vpop.f32.mrf.mxu0  ;;  %6191 = vmatmul.mubr.bf16.gmra.mxu0 %v21491_v9  ;;  %v15482_v45 = vpop.f32.mrf.mxu1  ;;  %6384 = vmatmul.mubr.bf16.gmra.mxu1 %v21491_v9  ;;  %v21497_v9 = vld [vmem:[#allocation27_spill] sm:$0xff] }
 0x323   :  { %v15480_v41 = vmax.f32 %v5726_v6, %v21492_v51  ;;  %11294 = vmatprep.mubr.msk.bf16.mxu0 %vm4049_vm0, %v21493_v13  ;;  %11310 = vmatprep.mubr.msk.bf16.mxu1 %vm4049_vm0, %v21493_v13  ;;  %v21495_v51 = vmax.f32 %v15354_v61, %v15356_v44  ;;  %v21498_v61 = vmax.f32 %v15366_v39, %v15369_v49 }
 0x324   :  { %v5728_v0 = vpop.f32.mrf.mxu0  ;;  %v15496_v18 = vpop.f32.mrf.mxu1 }
 0x325   :  { %v15494_v40 = vmax.f32 %v5728_v0, %v21494_v46 }
 0x326   :  { %v5730_v6 = vpop.f32.mrf.mxu0  ;;  %v15505_v13 = vpop.f32.mrf.mxu1 }
 0x327   :  { %v15503_v29 = vmax.f32 %v5730_v6, %v21495_v51 }
 0x328   :  { %v5732_v19 = vpop.f32.mrf.mxu0  ;;  %v15514_v0 = vpop.f32.mrf.mxu1 }
 0x329   :  { %v15512_v37 = vmax.f32 %v5732_v19, %v21496_v8  ;;  %v21500_v8 = vmax.f32 %v15376_v30, %v15380_v58  ;;  %v21502_v58 = vmax.f32 %v15390_v11, %v15396_v10  ;;  %v21505_v11 = vld [vmem:[#allocation33_spill] sm:$0xff]  ;;  %v624_v19 = vld [vmem:[#allocation4 + $0x90] sm:$0xff] }
 0x32a   :  { %v5736_v46 = vpop.f32.mrf.mxu0  ;;  %6201 = vmatmul.mubr.bf16.gmra.mxu0 %v21497_v9  ;;  %v15524_v51 = vpop.f32.mrf.mxu1  ;;  %6394 = vmatmul.mubr.bf16.gmra.mxu1 %v21497_v9  ;;  %v21503_v9 = vld [vmem:[#allocation30_spill] sm:$0xff] }
 0x32b   :  { %v15522_v6 = vmax.f32 %v5736_v46, %v21498_v61  ;;  %11295 = vmatprep.mubr.msk.bf16.mxu0 %vm4049_vm0, %v21499_v26  ;;  %11311 = vmatprep.mubr.msk.bf16.mxu1 %vm4049_vm0, %v21499_v26  ;;  %v21501_v61 = vmax.f32 %v15384_v4, %v15386_v34  ;;  %v21504_v34 = vmax.f32 %v15404_v1, %v15407_v43 }
 0x32c   :  { %v5738_v56 = vpop.f32.mrf.mxu0  ;;  %v15538_v39 = vpop.f32.mrf.mxu1 }
 0x32d   :  { %v15536_v49 = vmax.f32 %v5738_v56, %v21500_v8 }
 0x32e   :  { %v5740_v46 = vpop.f32.mrf.mxu0  ;;  %v15547_v26 = vpop.f32.mrf.mxu1 }
 0x32f   :  { %v15545_v44 = vmax.f32 %v5740_v46, %v21501_v61 }
 0x330   :  { %v5742_v24 = vpop.f32.mrf.mxu0  ;;  %v15556_v56 = vpop.f32.mrf.mxu1 }
 0x331   :  { %v15554_v30 = vmax.f32 %v5742_v24, %v21502_v58  ;;  %v21506_v58 = vmax.f32 %v15414_v22, %v15419_v42  ;;  %v648_v24 = vld [vmem:[#allocation4 + $0x170] sm:$0xff]  ;;  %v21508_v22 = vmax.f32 %v15429_v33, %v15431_v54  ;;  %v21514_v42 = vmax.f32 %v15472_v52, %v15470_v12 }
 0x332   :  { %v5746_v8 = vpop.f32.mrf.mxu0  ;;  %6211 = vmatmul.mubr.bf16.gmra.mxu0 %v21503_v9  ;;  %v15566_v61 = vpop.f32.mrf.mxu1  ;;  %6404 = vmatmul.mubr.bf16.gmra.mxu1 %v21503_v9  ;;  %v15625_v54 = vcombine.low %v624_v19, %v648_v24  ;;  %v21518_v52 = vmax.f32 %v15496_v18, %v15494_v40  ;;  %v21519_v40 = vmax.f32 %v15505_v13, %v15503_v29 }
 0x333   :  { %v15564_v46 = vmax.f32 %v5746_v8, %v21504_v34  ;;  %11312 = vmatprep.mubr.msk.bf16.mxu0 %vm4049_vm0, %v21505_v11  ;;  %11328 = vmatprep.mubr.msk.bf16.mxu1 %vm4049_vm0, %v21505_v11  ;;  %v21507_v34 = vmax.f32 %v15423_v50, %v15425_v63  ;;  %v15602_v50 = vcombine.low %v15392_v35, %v15394_v17 }
 0x334   :  { %v5748_v10 = vpop.f32.mrf.mxu0  ;;  %v15580_v43 = vpop.f32.mrf.mxu1  ;;  %21511 = vst [vmem:[#allocation23_spill] sm:$0xff] %v15625_v54 }
 0x335   :  { %v15578_v1 = vmax.f32 %v5748_v10, %v21506_v58 }
 0x336   :  { %v5750_v8 = vpop.f32.mrf.mxu0  ;;  %v15589_v11 = vpop.f32.mrf.mxu1 }
 0x337   :  { %v15587_v4 = vmax.f32 %v5750_v8, %v21507_v34  ;;  %v21509_v8 = vld [vmem:[#allocation35_spill] sm:$0xff]  ;;  %v15607_v34 = vcombine.high %v624_v19, %v648_v24 }
 0x338   :  { %v5752_v5 = vpop.f32.mrf.mxu0  ;;  %v15598_v58 = vpop.f32.mrf.mxu1 }
 0x339   :  { %v15596_v10 = vmax.f32 %v5752_v5, %v21508_v22  ;;  %v21510_v5 = vld [vmem:[#allocation31_spill] sm:$0xff] }
 0x33a   :  { %v15604_v63 = vpop.f32.mrf.mxu0  ;;  %6447 = vmatmul.mubr.bf16.vlgmr.msra.gmra.mxu0 %v21509_v8  ;;  %v15611_v9 = vpop.f32.mrf.mxu1  ;;  %6640 = vmatmul.mubr.bf16.vlgmr.msra.gmra.mxu1 %v21509_v8 }
 0x33b   :  { %11313 = vmatprep.mubr.msk.bf16.mxu0 %vm4049_vm0, %v21510_v5  ;;  %11329 = vmatprep.mubr.msk.bf16.mxu1 %vm4049_vm0, %v21510_v5 }
 0x33c   :  { %v15616_v33 = vpop.f32.mrf.mxu0  ;;  %6801 = vmatpush1.bf16.msra.mxu0 %v15088_v60  ;;  %v15621_v17 = vpop.f32.mrf.mxu1  ;;  %6994 = vmatpush1.bf16.msra.mxu1 %v15602_v50 }
 0x33d   :  { %6802 = vmatprep.subr.bf16.mxu0 %v15097_v36  ;;  %6995 = vmatprep.subr.bf16.mxu1 %v15607_v34 }
 0x33e   :  { %v15627_v35 = vpop.f32.mrf.mxu0  ;;  %v15630_v22 = vpop.f32.mrf.mxu1 }
 0x33f   :  { %21512 = vst [vmem:[#allocation14_spill] sm:$0xff] %v15630_v22  ;;  %v21517_v22 = vld [vmem:[#allocation12_spill] sm:$0xff] }
 0x340   :  { %v15632_v8 = vpop.f32.mrf.mxu0  ;;  %6803 = vmatpush1.bf16.msra.mxu0 %v15120_v31  ;;  %v5955_v5 = vpop.f32.mrf.mxu1  ;;  %6996 = vmatpush1.bf16.msra.mxu1 %v15625_v54 }
 0x341   :  { %21513 = vst [vmem:[#allocation15_spill] sm:$0xff] %v15632_v8  ;;  %6804 = vmatprep.subr.bf16.mxu0 %v14600_v55  ;;  %v15640_v19 = vmax.f32 %v5955_v5, %v21514_v42  ;;  %6997 = vmatprep.subr.bf16.mxu1 %v15067_v21  ;;  %v21516_v8 = vmax.f32 %v15482_v45, %v15480_v41 }
 0x342   :  { %v5766_v24 = vpop.f32.mrf.mxu0  ;;  %6457 = vmatmul.mubr.bf16.gmra.mxu0 %v21515_v2  ;;  %v15649_v54 = vpop.f32.mrf.mxu1  ;;  %6650 = vmatmul.mubr.bf16.gmra.mxu1 %v21515_v2  ;;  %v10813_v2 = vcombine.high %v287_v27, %v311_v59 }
 0x343   :  { %v15647_v53 = vmax.f32 %v5766_v24, %v21516_v8  ;;  %11314 = vmatprep.mubr.msk.bf16.mxu0 %vm4049_vm0, %v21517_v22  ;;  %11330 = vmatprep.mubr.msk.bf16.mxu1 %vm4049_vm0, %v21517_v22  ;;  %v239_v22 = vld [vmem:[#allocation4 + $0x78] sm:$0xff] }
 0x344   :  { %v5768_v12 = vpop.f32.mrf.mxu0  ;;  %6805 = vmatpush1.bf16.msra.mxu0 %v14852_v57  ;;  %v15664_v45 = vpop.f32.mrf.mxu1  ;;  %6998 = vmatpush1.bf16.msra.mxu1 %v15088_v60  ;;  %v263_v8 = vld [vmem:[#allocation4 + $0x158] sm:$0xff]  ;;  %v10812_v60 = vcombine.low %v287_v27, %v311_v59  ;;  %v21522_v59 = vmax.f32 %v15524_v51, %v15522_v6  ;;  %v21524_v6 = vmax.f32 %v15538_v39, %v15536_v49 }
 0x345   :  { %v15662_v41 = vmax.f32 %v5768_v12, %v21518_v52  ;;  %6806 = vmatprep.subr.bf16.mxu0 %v14862_v32  ;;  %6999 = vmatprep.subr.bf16.mxu1 %v15097_v36  ;;  %v21520_v36 = vmax.f32 %v15514_v0, %v15512_v37  ;;  %v10765_v29 = vcombine.high %v239_v22, %v263_v8 }
 0x346   :  { %v5770_v42 = vpop.f32.mrf.mxu0  ;;  %v15676_v24 = vpop.f32.mrf.mxu1 }
 0x347   :  { %v15674_v18 = vmax.f32 %v5770_v42, %v21519_v40  ;;  %v21521_v42 = vld [vmem:[#allocation10_spill] sm:$0xff] }
 0x348   :  { %v5772_v12 = vpop.f32.mrf.mxu0  ;;  %6807 = vmatpush1.bf16.msra.mxu0 %v14885_v47  ;;  %v15686_v5 = vpop.f32.mrf.mxu1  ;;  %7000 = vmatpush1.bf16.msra.mxu1 %v15120_v31  ;;  %v21523_v31 = vld [vmem:[#allocation40_spill] sm:$0xff] }
 0x349   :  { %v9276_v52 = vmax.f32 %v15676_v24, %v15674_v18  ;;  %v15684_v21 = vmax.f32 %v5772_v12, %v21520_v36  ;;  %6808 = vmatprep.subr.bf16.mxu0 %v10813_v2  ;;  %7001 = vmatprep.subr.bf16.mxu1 %v14600_v55  ;;  %v10764_v55 = vcombine.low %v239_v22, %v263_v8 }
 0x34a   :  { %v5776_v13 = vpop.f32.mrf.mxu0  ;;  %6467 = vmatmul.mubr.bf16.gmra.mxu0 %v21521_v42  ;;  %v15698_v0 = vpop.f32.mrf.mxu1  ;;  %6660 = vmatmul.mubr.bf16.gmra.mxu1 %v21521_v42  ;;  %v21525_v22 = vmax.f32 %v15547_v26, %v15545_v44 }
 0x34b   :  { %v9277_v27 = vmax.f32 %v15686_v5, %v15684_v21  ;;  %v15696_v37 = vmax.f32 %v5776_v13, %v21522_v59  ;;  %11315 = vmatprep.mubr.msk.bf16.mxu0 %vm4049_vm0, %v21523_v31  ;;  %11331 = vmatprep.mubr.msk.bf16.mxu1 %vm4049_vm0, %v21523_v31  ;;  %v21548_v21 = vld [vmem:[#allocation82_spill] sm:$0xff] }
 0x34c   :  { %v5778_v40 = vpop.f32.mrf.mxu0  ;;  %6809 = vmatpush1.bf16.msra.mxu0 %v10812_v60  ;;  %v15712_v36 = vpop.f32.mrf.mxu1  ;;  %7002 = vmatpush1.bf16.msra.mxu1 %v14852_v57  ;;  %v21526_v57 = vmax.f32 %v15556_v56, %v15554_v30  ;;  %v888_v56 = vld [vmem:[#allocation4 + $0x338] sm:$0xff] }
 0x34d   :  { %v9324_v12 = vmax.f32 %v15698_v0, %v15696_v37  ;;  %v15710_v51 = vmax.f32 %v5778_v40, %v21524_v6  ;;  %6810 = vmatprep.subr.bf16.mxu0 %v10765_v29  ;;  %7003 = vmatprep.subr.bf16.mxu1 %v14862_v32  ;;  %v21527_v40 = vld [vmem:[#allocation21_spill] sm:$0xff]  ;;  %v21528_v6 = vmax.f32 %v15566_v61, %v15564_v46 }
 0x34e   :  { %v5780_v13 = vpop.f32.mrf.mxu0  ;;  %v15723_v59 = vpop.f32.mrf.mxu1  ;;  %v21530_v61 = vmax.f32 %v15580_v43, %v15578_v1  ;;  %v816_v43 = vld [vmem:[#allocation4 + $0x98] sm:$0xff] }
 0x34f   :  { %v9325_v42 = vmax.f32 %v15712_v36, %v15710_v51  ;;  %v15721_v8 = vmax.f32 %v5780_v13, %v21525_v22 }
 0x350   :  { %v5782_v49 = vpop.f32.mrf.mxu0  ;;  %6811 = vmatpush1.bf16.msra.mxu0 %v10764_v55  ;;  %v15732_v32 = vpop.f32.mrf.mxu1  ;;  %7004 = vmatpush1.bf16.msra.mxu1 %v14885_v47  ;;  %v864_v47 = vld [vmem:[#allocation4 + $0x258] sm:$0xff] }
 0x351   :  { %v9372_v39 = vmax.f32 %v15723_v59, %v15721_v8  ;;  %v15730_v31 = vmax.f32 %v5782_v49, %v21526_v57  ;;  %6812 = vmatprep.subr.bf16.mxu0 %v21527_v40  ;;  %7005 = vmatprep.subr.bf16.mxu1 %v10813_v2  ;;  %v21529_v2 = vld [vmem:[#allocation11_spill] sm:$0xff]  ;;  %v21531_v57 = vld [vmem:[#allocation13_spill] sm:$0xff] }
 0x352   :  { %v5786_v44 = vpop.f32.mrf.mxu0  ;;  %6477 = vmatmul.mubr.bf16.gmra.mxu0 %v15034_v14  ;;  %v15744_v30 = vpop.f32.mrf.mxu1  ;;  %6670 = vmatmul.mubr.bf16.gmra.mxu1 %v15034_v14 }
 0x353   :  { %v9373_v26 = vmax.f32 %v15732_v32, %v15730_v31  ;;  %v15742_v13 = vmax.f32 %v5786_v44, %v21528_v6  ;;  %11316 = vmatprep.mubr.msk.bf16.mxu0 %vm4049_vm0, %v15051_v48  ;;  %11332 = vmatprep.mubr.msk.bf16.mxu1 %vm4049_vm0, %v15051_v48  ;;  %v15762_v44 = vcombine.high %v864_v47, %v888_v56  ;;  %v21550_v31 = vld [vmem:[#allocation92_spill] sm:$0xff] }
 0x354   :  { %v5788_v22 = vpop.f32.mrf.mxu0  ;;  %6813 = vmatpush1.bf16.msra.mxu0 %v21529_v2  ;;  %v15759_v14 = vpop.f32.mrf.mxu1  ;;  %7006 = vmatpush1.bf16.msra.mxu1 %v10812_v60  ;;  %v21532_v6 = vmax.f32 %v15589_v11, %v15587_v4  ;;  %v15784_v4 = vcombine.low %v864_v47, %v888_v56  ;;  %v21534_v56 = vmax.f32 %v15306_v62, %v15435_v28 }
 0x355   :  { %v9420_v46 = vmax.f32 %v15744_v30, %v15742_v13  ;;  %v15757_v49 = vmax.f32 %v5788_v22, %v21530_v61  ;;  %6814 = vmatprep.subr.bf16.mxu0 %v21531_v57  ;;  %7007 = vmatprep.subr.bf16.mxu1 %v10765_v29  ;;  %v840_v22 = vld [vmem:[#allocation4 + $0x178] sm:$0xff]  ;;  %v21533_v29 = vmax.f32 %v15598_v58, %v15596_v10 }
 0x356   :  { %v5790_v40 = vpop.f32.mrf.mxu0  ;;  %v15771_v1 = vpop.f32.mrf.mxu1  ;;  %v21536_v28 = vmax.f32 %v15454_v38, %v15452_v25 }
 0x357   :  { %v15769_v2 = vmax.f32 %v5790_v40, %v21532_v6 }
 0x358   :  { %v5792_v61 = vpop.f32.mrf.mxu0  ;;  %6815 = vmatpush1.bf16.msra.mxu0 %v14999_v16  ;;  %v15781_v48 = vpop.f32.mrf.mxu1  ;;  %7008 = vmatpush1.bf16.msra.mxu1 %v10764_v55  ;;  %v15788_v16 = vcombine.high %v816_v43, %v840_v22 }
 0x359   :  { %v9468_v60 = vmax.f32 %v15771_v1, %v15769_v2  ;;  %v15779_v57 = vmax.f32 %v5792_v61, %v21533_v29  ;;  %6828 = vmatprep.subr.bf16.mxu0 %v15400_v20  ;;  %7021 = vmatprep.subr.bf16.mxu1 %v15762_v44  ;;  %v15971_v2 = vld [vmem:[%s20687_s1 + $0x80] ss:$8 sps:$4 sm:$0xff]  }
 0x35a   :  { %v5796_v11 = vpop.f32.mrf.mxu0  ;;  %6487 = vmatmul.mubr.bf16.gmra.mxu0 %v15093_v7  ;;  %v5989_v58 = vpop.f32.mrf.mxu1  ;;  %6680 = vmatmul.mubr.bf16.gmra.mxu1 %v15093_v7  ;;  %v15808_v7 = vcombine.low %v816_v43, %v840_v22  ;;  %v21537_v22 = vld [vmem:[#allocation14_spill] sm:$0xff]  ;;  %21552 = vst [vmem:[#allocation16_spill] sm:$0xff] %v15971_v2 }
 0x35b   :  { %v9469_v40 = vmax.f32 %v15781_v48, %v15779_v57  ;;  %v9130_v10 = vmax.f32 %v15604_v63, %v5796_v11  ;;  %11317 = vmatprep.mubr.msk.bf16.mxu0 %vm4049_vm0, %v15106_v3  ;;  %v9132_v55 = vmax.f32 %v15611_v9, %v5989_v58  ;;  %11333 = vmatprep.mubr.msk.bf16.mxu1 %vm4049_vm0, %v15106_v3  ;;  %v15982_v48 = vld [vmem:[%s20687_s1 + $0x94] ss:$8 sps:$4 sm:$0xff]  }
 0x35c   :  { %v5798_v47 = vpop.f32.mrf.mxu0  ;;  %6829 = vmatpush2.bf16.msra.mxu0 %v15602_v50  ;;  %v5991_v61 = vpop.f32.mrf.mxu1  ;;  %7022 = vmatpush2.bf16.msra.mxu1 %v15784_v4  ;;  %v21535_v9 = vmax.f32 %v15311_v15, %v15440_v23  ;;  %v21538_v15 = vld [vmem:[#allocation23_spill] sm:$0xff]  ;;  %21553 = vst [vmem:[#allocation17_spill] sm:$0xff] %v15982_v48 }
 0x35d   :  { %v15803_v6 = vmax.f32 %v21534_v56, %v9130_v10  ;;  %v9131_v63 = vmax.f32 %v15616_v33, %v5798_v47  ;;  %6830 = vmatprep.subr.bf16.mxu0 %v15607_v34  ;;  %v9133_v29 = vmax.f32 %v15621_v17, %v5991_v61  ;;  %7023 = vmatprep.subr.bf16.mxu1 %v15788_v16  ;;  %v21539_v17 = vld [vmem:[#allocation22_spill] sm:$0xff]  ;;  %v21540_v47 = vld [vmem:[#allocation20_spill] sm:$0xff] }
 0x35e   :  { %v15813_v3 = vmax.f32 %v21535_v9, %v9132_v55  ;;  %v5800_v11 = vpop.f32.mrf.mxu0  ;;  %v5993_v10 = vpop.f32.mrf.mxu1  ;;  %v21541_v56 = vmax.f32 %v21539_v17, %v21540_v47  ;;  %v21542_v9 = vld [vmem:[#allocation15_spill] sm:$0xff] }
 0x35f   :  { %v9517_v62 = vmax.f32 %v9131_v63, %v21536_v28  ;;  %v9178_v33 = vmax.f32 %v15627_v35, %v5800_v11  ;;  %v9180_v58 = vmax.f32 %v21537_v22, %v5993_v10  ;;  %v21543_v63 = vld [vmem:[#allocation63_spill] sm:$0xff]  ;;  %v21544_v28 = vmax.f32 %v15649_v54, %v15647_v53  ;;  %v21545_v10 = vld [vmem:[#allocation72_spill] sm:$0xff] }
 0x360   :  { %v5802_v23 = vpop.f32.mrf.mxu0  ;;  %6831 = vmatpush2.bf16.msra.mxu0 %v21538_v15  ;;  %v15831_v25 = vpop.f32.mrf.mxu1  ;;  %7024 = vmatpush2.bf16.msra.mxu1 %v15808_v7  ;;  %v21546_v53 = vmax.f32 %v15664_v45, %v15662_v41 }
 0x361   :  { %v15825_v55 = vmax.f32 %v9133_v29, %v9517_v62  ;;  %v9564_v61 = vmax.f32 %v9178_v33, %v21541_v56  ;;  %v9179_v38 = vmax.f32 %v21542_v9, %v5802_v23  ;;  %7186 = vmatprep.subr.bf16.mxu0 %v15762_v44 }
 0x362   :  { %v5806_v35 = vpop.f32.mrf.mxu0  ;;  %6497 = vmatmul.mubr.bf16.gmra.mxu0 %v21543_v63  ;;  %v15846_v33 = vpop.f32.mrf.mxu1  ;;  %6690 = vmatmul.mubr.bf16.gmra.mxu1 %v21543_v63  ;;  %v21547_v63 = vld [vmem:[#allocation79_spill] sm:$0xff] }
 0x363   :  { %v15836_v11 = vmax.f32 %v9180_v58, %v9564_v61  ;;  %v15839_v29 = vmax.f32 %v9179_v38, %v15640_v19  ;;  %v15844_v62 = vmax.f32 %v5806_v35, %v21544_v28  ;;  %11318 = vmatprep.mubr.msk.bf16.mxu0 %vm4049_vm0, %v21545_v10  ;;  %11334 = vmatprep.mubr.msk.bf16.mxu1 %vm4049_vm0, %v21545_v10 }
 0x364   :  { %v5808_v22 = vpop.f32.mrf.mxu0  ;;  %v15862_v23 = vpop.f32.mrf.mxu1 }
 0x365   :  { %v10013_v19 = vmax.f32 %v15831_v25, %v15839_v29  ;;  %v10014_v58 = vmax.f32 %v15846_v33, %v15844_v62  ;;  %v15860_v54 = vmax.f32 %v5808_v22, %v21546_v53  ;;  %v16020_v29 = vld [vmem:[%s20687_s1 + $0xa4] ss:$8 sps:$4 sm:$0xff]  }
 0x366   :  { %v5810_v17 = vpop.f32.mrf.mxu0  ;;  %v15871_v61 = vpop.f32.mrf.mxu1  ;;  %21555 = vst [vmem:[#allocation19_spill] sm:$0xff] %v16020_v29 }
 0x367   :  { %v10015_v47 = vmax.f32 %v15862_v23, %v15860_v54  ;;  %v15869_v56 = vmax.f32 %v5810_v17, %v9276_v52 }
 0x368   :  { %v5812_v9 = vpop.f32.mrf.mxu0  ;;  %v15880_v45 = vpop.f32.mrf.mxu1 }
 0x369   :  { %v10016_v38 = vmax.f32 %v15871_v61, %v15869_v56  ;;  %v15878_v41 = vmax.f32 %v5812_v9, %v9277_v27  ;;  %v21549_v9 = vld [vmem:[#allocation89_spill] sm:$0xff]  ;;  %v16056_v56 = vld [vmem:[%s20687_s1 + $0xa0] ss:$8 sps:$4 sm:$0xff]  }
 0x36a   :  { %v5816_v35 = vpop.f32.mrf.mxu0  ;;  %6507 = vmatmul.mubr.bf16.gmra.mxu0 %v21547_v63  ;;  %v15890_v52 = vpop.f32.mrf.mxu1  ;;  %6700 = vmatmul.mubr.bf16.gmra.mxu1 %v21547_v63  ;;  %21556 = vst [vmem:[#allocation24_spill] sm:$0xff] %v16056_v56  ;;  %v16098_v61 = vld [vmem:[#allocation4 + $0x340] sm:$0xff] }
 0x36b   :  { %v10017_v18 = vmax.f32 %v15880_v45, %v15878_v41  ;;  %v15888_v24 = vmax.f32 %v5816_v35, %v9324_v12  ;;  %11319 = vmatprep.mubr.msk.bf16.mxu0 %vm4049_vm0, %v21548_v21  ;;  %11335 = vmatprep.mubr.msk.bf16.mxu1 %vm4049_vm0, %v21548_v21  ;;  %v21551_v35 = vmax.f32 %v15759_v14, %v15757_v49  ;;  %v16072_v45 = vld [vmem:[%s20687_s1 + $0xb4] ss:$8 sps:$4 sm:$0xff]  }
 0x36c   :  { %v5818_v5 = vpop.f32.mrf.mxu0  ;;  %v15904_v0 = vpop.f32.mrf.mxu1  ;;  %21557 = vst [vmem:[#allocation25_spill] sm:$0xff] %v16072_v45 }
 0x36d   :  { %v10018_v27 = vmax.f32 %v15890_v52, %v15888_v24  ;;  %v15902_v37 = vmax.f32 %v5818_v5, %v9325_v42  ;;  %v16096_v24 = vld [vmem:[#allocation4 + $0x260] sm:$0xff] }
 0x36e   :  { %v5820_v12 = vpop.f32.mrf.mxu0  ;;  %v15913_v22 = vpop.f32.mrf.mxu1 }
 0x36f   :  { %v10019_v28 = vmax.f32 %v15904_v0, %v15902_v37  ;;  %v15911_v10 = vmax.f32 %v5820_v12, %v9372_v39 }
 0x370   :  { %v5822_v53 = vpop.f32.mrf.mxu0  ;;  %v15922_v36 = vpop.f32.mrf.mxu1 }
 0x371   :  { %v10020_v17 = vmax.f32 %v15913_v22, %v15911_v10  ;;  %v15920_v51 = vmax.f32 %v5822_v53, %v9373_v26  ;;  %v16111_v10 = vcombine.high %v16096_v24, %v16098_v61 }
 0x372   :  { %v5826_v42 = vpop.f32.mrf.mxu0  ;;  %6517 = vmatmul.mubr.bf16.gmra.mxu0 %v21549_v9  ;;  %v15932_v39 = vpop.f32.mrf.mxu1  ;;  %6710 = vmatmul.mubr.bf16.gmra.mxu1 %v21549_v9 }
 0x373   :  { %v10021_v8 = vmax.f32 %v15922_v36, %v15920_v51  ;;  %v15930_v59 = vmax.f32 %v5826_v42, %v9420_v46  ;;  %11320 = vmatprep.mubr.msk.bf16.mxu0 %vm4049_vm0, %v21550_v31  ;;  %11336 = vmatprep.mubr.msk.bf16.mxu1 %vm4049_vm0, %v21550_v31 }
 0x374   :  { %v5828_v32 = vpop.f32.mrf.mxu0  ;;  %v15946_v30 = vpop.f32.mrf.mxu1  ;;  %7379 = vmatprep.subr.bf16.mxu1 %v16111_v10 }
 0x375   :  { %v10022_v26 = vmax.f32 %v15932_v39, %v15930_v59  ;;  %v15944_v13 = vmax.f32 %v5828_v32, %v21551_v35 }
 0x376   :  { %v5830_v46 = vpop.f32.mrf.mxu0  ;;  %v15955_v5 = vpop.f32.mrf.mxu1 }
 0x377   :  { %v15953_v21 = vmax.f32 %v5830_v46, %v9468_v60  ;;  %v21560_v39 = vmax.f32 %v15946_v30, %v15944_v13 }
 0x378   :  { %v5832_v12 = vpop.f32.mrf.mxu0  ;;  %v15964_v14 = vpop.f32.mrf.mxu1 }
 0x379   :  { %v15962_v49 = vmax.f32 %v5832_v12, %v9469_v40  ;;  %v21561_v37 = vmax.f32 %v15955_v5, %v15953_v21  ;;  %v16171_v21 = vld [vmem:[%s20687_s1 + $0xc0] ss:$8 sps:$4 sm:$0xff]  }
 0x37a   :  { %v15966_v42 = vpop.f32.mrf.mxu0  ;;  %6527 = vmatmul.mubr.bf16.gmra.mxu0 %v15971_v2  ;;  %v15976_v60 = vpop.f32.mrf.mxu1  ;;  %6720 = vmatmul.mubr.bf16.gmra.mxu1 %v15971_v2  ;;  %21563 = vst [vmem:[#allocation28_spill] sm:$0xff] %v16171_v21 }
 0x37b   :  { %11321 = vmatprep.mubr.msk.bf16.mxu0 %vm4049_vm0, %v15982_v48  ;;  %11337 = vmatprep.mubr.msk.bf16.mxu1 %vm4049_vm0, %v15982_v48  ;;  %v21562_v13 = vmax.f32 %v15964_v14, %v15962_v49  ;;  %v16184_v14 = vld [vmem:[%s20687_s1 + $0xd4] ss:$8 sps:$4 sm:$0xff]  }
 0x37c   :  { %v6064_v57 = vpop.f32.mrf.mxu0  ;;  %v6257_v9 = vpop.f32.mrf.mxu1  ;;  %21564 = vst [vmem:[#allocation30_spill] sm:$0xff] %v16184_v14 }
 0x37d   :  { %v8751_v40 = vmax.f32 %v6064_v57, %v15825_v55  ;;  %v16004_v55 = vld [vmem:[%s20687_s1 + $0x90] ss:$8 sps:$4 sm:$0xff]  }
 0x37e   :  { %v6066_v31 = vpop.f32.mrf.mxu0  ;;  %v6259_v46 = vpop.f32.mrf.mxu1  ;;  %21554 = vst [vmem:[#allocation18_spill] sm:$0xff] %v16004_v55 }
 0x37f   :  { %v15989_v32 = vmax.f32 %v6257_v9, %v8751_v40  ;;  %v8798_v35 = vmax.f32 %v6066_v31, %v15836_v11 }
 0x380   :  { %v6068_v12 = vpop.f32.mrf.mxu0  ;;  %v15999_v53 = vpop.f32.mrf.mxu1 }
 0x381   :  { %v15992_v43 = vmax.f32 %v6259_v46, %v8798_v35  ;;  %v15997_v1 = vmax.f32 %v6068_v12, %v10013_v19 }
 0x382   :  { %v6072_v63 = vpop.f32.mrf.mxu0  ;;  %6537 = vmatmul.mubr.bf16.gmra.mxu0 %v16004_v55  ;;  %v16014_v25 = vpop.f32.mrf.mxu1  ;;  %6730 = vmatmul.mubr.bf16.gmra.mxu1 %v16004_v55 }
 0x383   :  { %v16012_v57 = vmax.f32 %v6072_v63, %v10014_v58  ;;  %11322 = vmatprep.mubr.msk.bf16.mxu0 %vm4049_vm0, %v16020_v29  ;;  %11338 = vmatprep.mubr.msk.bf16.mxu1 %vm4049_vm0, %v16020_v29  ;;  %v314_v29 = vld [vmem:[#allocation4 + $0x330] sm:$0xff] }
 0x384   :  { %v6074_v19 = vpop.f32.mrf.mxu0  ;;  %v16033_v58 = vpop.f32.mrf.mxu1 }
 0x385   :  { %v16031_v33 = vmax.f32 %v6074_v19, %v10015_v47 }
 0x386   :  { %v6076_v63 = vpop.f32.mrf.mxu0  ;;  %v16042_v31 = vpop.f32.mrf.mxu1 }
 0x387   :  { %v16040_v9 = vmax.f32 %v6076_v63, %v10016_v38 }
 0x388   :  { %v6078_v35 = vpop.f32.mrf.mxu0  ;;  %v16051_v23 = vpop.f32.mrf.mxu1 }
 0x389   :  { %v16049_v54 = vmax.f32 %v6078_v35, %v10017_v18 }
 0x38a   :  { %v6082_v47 = vpop.f32.mrf.mxu0  ;;  %6547 = vmatmul.mubr.bf16.gmra.mxu0 %v16056_v56  ;;  %v16066_v41 = vpop.f32.mrf.mxu1  ;;  %6740 = vmatmul.mubr.bf16.gmra.mxu1 %v16056_v56  ;;  %v16433_v56 = vld [vmem:[%s20687_s1 + $0x24] ss:$8 sps:$4 sm:$0xff]  }
 0x38b   :  { %v16064_v38 = vmax.f32 %v6082_v47, %v10018_v27  ;;  %11323 = vmatprep.mubr.msk.bf16.mxu0 %vm4049_vm0, %v16072_v45  ;;  %11339 = vmatprep.mubr.msk.bf16.mxu1 %vm4049_vm0, %v16072_v45  ;;  %v289_v45 = vld [vmem:[#allocation4 + $0x248] sm:$0xff]  ;;  %21590 = vst [vmem:[#allocation14_spill] sm:$0xff] %v16433_v56 }
 0x38c   :  { %v6084_v18 = vpop.f32.mrf.mxu0  ;;  %v16085_v27 = vpop.f32.mrf.mxu1 }
 0x38d   :  { %v16083_v52 = vmax.f32 %v6084_v18, %v10019_v28 }
 0x38e   :  { %v6086_v12 = vpop.f32.mrf.mxu0  ;;  %v16094_v35 = vpop.f32.mrf.mxu1 }
 0x38f   :  { %v16092_v63 = vmax.f32 %v6086_v12, %v10020_v17  ;;  %v16116_v17 = vld [vmem:[%s20687_s1 + $0xb0] ss:$8 sps:$4 sm:$0xff]  }
 0x390   :  { %v6088_v47 = vpop.f32.mrf.mxu0  ;;  %v16107_v28 = vpop.f32.mrf.mxu1  ;;  %21558 = vst [vmem:[#allocation26_spill] sm:$0xff] %v16116_v17 }
 0x391   :  { %v16105_v0 = vmax.f32 %v6088_v47, %v10021_v8  ;;  %v16132_v8 = vld [vmem:[%s20687_s1 + $0xc4] ss:$8 sps:$4 sm:$0xff]  }
 0x392   :  { %v6092_v22 = vpop.f32.mrf.mxu0  ;;  %6557 = vmatmul.mubr.bf16.gmra.mxu0 %v16116_v17  ;;  %v16126_v36 = vpop.f32.mrf.mxu1  ;;  %6750 = vmatmul.mubr.bf16.gmra.mxu1 %v16116_v17  ;;  %21559 = vst [vmem:[#allocation27_spill] sm:$0xff] %v16132_v8 }
 0x393   :  { %v16124_v51 = vmax.f32 %v6092_v22, %v10022_v26  ;;  %11324 = vmatprep.mubr.msk.bf16.mxu0 %vm4049_vm0, %v16132_v8  ;;  %11340 = vmatprep.mubr.msk.bf16.mxu1 %vm4049_vm0, %v16132_v8  ;;  %v21565_v8 = vmax.f32 %v15999_v53, %v15997_v1  ;;  %v16224_v1 = vld [vmem:[%s20687_s1 + $0xe4] ss:$8 sps:$4 sm:$0xff]  }
 0x394   :  { %v6094_v12 = vpop.f32.mrf.mxu0  ;;  %v16146_v47 = vpop.f32.mrf.mxu1  ;;  %21568 = vst [vmem:[#allocation35_spill] sm:$0xff] %v16224_v1 }
 0x395   :  { %v16144_v26 = vmax.f32 %v6094_v12, %v21560_v39 }
 0x396   :  { %v6096_v22 = vpop.f32.mrf.mxu0  ;;  %v16155_v46 = vpop.f32.mrf.mxu1 }
 0x397   :  { %v16153_v19 = vmax.f32 %v6096_v22, %v21561_v37 }
 0x398   :  { %v6098_v40 = vpop.f32.mrf.mxu0  ;;  %v16164_v12 = vpop.f32.mrf.mxu1 }
 0x399   :  { %v16162_v30 = vmax.f32 %v6098_v40, %v21562_v13 }
 0x39a   :  { %v16166_v39 = vpop.f32.mrf.mxu0  ;;  %6567 = vmatmul.mubr.bf16.gmra.mxu0 %v16171_v21  ;;  %v16178_v49 = vpop.f32.mrf.mxu1  ;;  %6760 = vmatmul.mubr.bf16.gmra.mxu1 %v16171_v21 }
 0x39b   :  { %11325 = vmatprep.mubr.msk.bf16.mxu0 %vm4049_vm0, %v16184_v14  ;;  %11341 = vmatprep.mubr.msk.bf16.mxu1 %vm4049_vm0, %v16184_v14 }
 0x39c   :  { %v6104_v22 = vpop.f32.mrf.mxu0  ;;  %v6297_v37 = vpop.f32.mrf.mxu1 }
 0x39d   :  { %v9519_v13 = vmax.f32 %v6104_v22, %v15989_v32  ;;  %v16208_v32 = vld [vmem:[%s20687_s1 + $0xd0] ss:$8 sps:$4 sm:$0xff]   ;;  %v21570_v22 = vmax.f32 %v16042_v31, %v16040_v9  ;;  %v16260_v9 = vld [vmem:[%s20687_s1 + $0xe0] ss:$8 sps:$4 sm:$0xff]  }
 0x39e   :  { %v6106_v5 = vpop.f32.mrf.mxu0  ;;  %v6299_v62 = vpop.f32.mrf.mxu1  ;;  %21566 = vst [vmem:[#allocation33_spill] sm:$0xff] %v16208_v32  ;;  %21572 = vst [vmem:[#allocation31_spill] sm:$0xff] %v16260_v9 }
 0x39f   :  { %v16193_v59 = vmax.f32 %v6297_v37, %v9519_v13  ;;  %v9566_v18 = vmax.f32 %v6106_v5, %v15992_v43 }
 0x3a0   :  { %v6108_v11 = vpop.f32.mrf.mxu0  ;;  %v16203_v17 = vpop.f32.mrf.mxu1 }
 0x3a1   :  { %v16196_v21 = vmax.f32 %v6299_v62, %v9566_v18  ;;  %v16201_v40 = vmax.f32 %v6108_v11, %v21565_v8  ;;  %v21567_v62 = vmax.f32 %v16014_v25, %v16012_v57  ;;  %v21569_v25 = vmax.f32 %v16033_v58, %v16031_v33 }
 0x3a2   :  { %v6112_v14 = vpop.f32.mrf.mxu0  ;;  %6577 = vmatmul.mubr.bf16.gmra.mxu0 %v16208_v32  ;;  %v16218_v53 = vpop.f32.mrf.mxu1  ;;  %6770 = vmatmul.mubr.bf16.gmra.mxu1 %v16208_v32  ;;  %v21571_v33 = vmax.f32 %v16051_v23, %v16049_v54  ;;  %v16276_v23 = vld [vmem:[%s20687_s1 + $0xf4] ss:$8 sps:$4 sm:$0xff]   ;;  %v21576_v57 = vmax.f32 %v16094_v35, %v16092_v63  ;;  %v16312_v63 = vld [vmem:[%s20687_s1 + $0xf0] ss:$8 sps:$4 sm:$0xff]  }
 0x3a3   :  { %v16216_v18 = vmax.f32 %v6112_v14, %v21567_v62  ;;  %11326 = vmatprep.mubr.msk.bf16.mxu0 %vm4049_vm0, %v16224_v1  ;;  %11342 = vmatprep.mubr.msk.bf16.mxu1 %vm4049_vm0, %v16224_v1  ;;  %21574 = vst [vmem:[#allocation32_spill] sm:$0xff] %v16276_v23  ;;  %21578 = vst [vmem:[#allocation12_spill] sm:$0xff] %v16312_v63 }
 0x3a4   :  { %v6114_v11 = vpop.f32.mrf.mxu0  ;;  %v16237_v5 = vpop.f32.mrf.mxu1 }
 0x3a5   :  { %v16235_v8 = vmax.f32 %v6114_v11, %v21569_v25 }
 0x3a6   :  { %v6116_v37 = vpop.f32.mrf.mxu0  ;;  %v16246_v62 = vpop.f32.mrf.mxu1 }
 0x3a7   :  { %v16244_v13 = vmax.f32 %v6116_v37, %v21570_v22  ;;  %v21573_v37 = vmax.f32 %v16066_v41, %v16064_v38  ;;  %v21575_v41 = vmax.f32 %v16085_v27, %v16083_v52  ;;  %v21577_v52 = vmax.f32 %v16107_v28, %v16105_v0  ;;  %v16328_v28 = vld [vmem:[%s20687_s1 + $0x4] ss:$8 sps:$4 sm:$0xff]  }
 0x3a8   :  { %v6118_v43 = vpop.f32.mrf.mxu0  ;;  %v16255_v11 = vpop.f32.mrf.mxu1  ;;  %21580 = vst [vmem:[#allocation10_spill] sm:$0xff] %v16328_v28  ;;  %v21582_v38 = vmax.f32 %v16155_v46, %v16153_v19  ;;  %v16363_v46 = vcombine.low %v16096_v24, %v16098_v61  ;;  %v16383_v61 = vld [vmem:[%s20687_s1 + $0x14] ss:$8 sps:$4 sm:$0xff]  }
 0x3a9   :  { %v16253_v58 = vmax.f32 %v6118_v43, %v21571_v33  ;;  %21585 = vst [vmem:[#allocation21_spill] sm:$0xff] %v16383_v61 }
 0x3aa   :  { %v6122_v25 = vpop.f32.mrf.mxu0  ;;  %6587 = vmatmul.mubr.bf16.gmra.mxu0 %v16260_v9  ;;  %v16270_v54 = vpop.f32.mrf.mxu1  ;;  %6780 = vmatmul.mubr.bf16.gmra.mxu1 %v16260_v9 }
 0x3ab   :  { %v16268_v22 = vmax.f32 %v6122_v25, %v21573_v37  ;;  %11327 = vmatprep.mubr.msk.bf16.mxu0 %vm4049_vm0, %v16276_v23  ;;  %11343 = vmatprep.mubr.msk.bf16.mxu1 %vm4049_vm0, %v16276_v23 }
 0x3ac   :  { %v6124_v43 = vpop.f32.mrf.mxu0  ;;  %v16289_v25 = vpop.f32.mrf.mxu1 }
 0x3ad   :  { %v16287_v33 = vmax.f32 %v6124_v43, %v21575_v41 }
 0x3ae   :  { %v6126_v37 = vpop.f32.mrf.mxu0  ;;  %v16298_v23 = vpop.f32.mrf.mxu1 }
 0x3af   :  { %v16296_v14 = vmax.f32 %v6126_v37, %v21576_v57  ;;  %v21579_v57 = vmax.f32 %v16126_v36, %v16124_v51  ;;  %v21581_v36 = vmax.f32 %v16146_v47, %v16144_v26  ;;  %v650_v51 = vld [vmem:[#allocation4 + $0x180] sm:$0xff]  ;;  %v21583_v47 = vmax.f32 %v16164_v12, %v16162_v30 }
 0x3b0   :  { %v6128_v9 = vpop.f32.mrf.mxu0  ;;  %v16307_v43 = vpop.f32.mrf.mxu1 }
 0x3b1   :  { %v16305_v27 = vmax.f32 %v6128_v9, %v21577_v52 }
 0x3b2   :  { %v6132_v41 = vpop.f32.mrf.mxu0  ;;  %6597 = vmatmul.mubr.bf16.gmra.mxu0 %v16312_v63  ;;  %v16322_v0 = vpop.f32.mrf.mxu1  ;;  %6790 = vmatmul.mubr.bf16.gmra.mxu1 %v16312_v63  ;;  %v626_v63 = vld [vmem:[#allocation4 + $0xa0] sm:$0xff] }
 0x3b3   :  { %v16320_v37 = vmax.f32 %v6132_v41, %v21579_v57  ;;  %11344 = vmatprep.mubr.msk.bf16.mxu0 %vm4049_vm0, %v16328_v28  ;;  %11360 = vmatprep.mubr.msk.bf16.mxu1 %vm4049_vm0, %v16328_v28 }
 0x3b4   :  { %v6134_v9 = vpop.f32.mrf.mxu0  ;;  %v16341_v41 = vpop.f32.mrf.mxu1 }
 0x3b5   :  { %v16339_v52 = vmax.f32 %v6134_v9, %v21581_v36 }
 0x3b6   :  { %v6136_v57 = vpop.f32.mrf.mxu0  ;;  %v16350_v28 = vpop.f32.mrf.mxu1 }
 0x3b7   :  { %v16348_v31 = vmax.f32 %v6136_v57, %v21582_v38  ;;  %v16370_v38 = vld [vmem:[%s20687_s1] ss:$8 sps:$4 sm:$0xff]   ;;  %v16373_v57 = vcombine.high %v626_v63, %v650_v51 }
 0x3b8   :  { %v6138_v1 = vpop.f32.mrf.mxu0  ;;  %v16359_v36 = vpop.f32.mrf.mxu1  ;;  %21584 = vst [vmem:[#allocation40_spill] sm:$0xff] %v16370_v38 }
 0x3b9   :  { %v16357_v9 = vmax.f32 %v6138_v1, %v21583_v47  ;;  %v16396_v47 = vcombine.low %v626_v63, %v650_v51  ;;  %v16416_v51 = vld [vmem:[%s20687_s1 + $0x10] ss:$8 sps:$4 sm:$0xff]  }
 0x3ba   :  { %v16365_v19 = vpop.f32.mrf.mxu0  ;;  %6833 = vmatmul.mubr.bf16.vlgmr.msra.gmra.mxu0 %v16370_v38  ;;  %v16377_v12 = vpop.f32.mrf.mxu1  ;;  %7026 = vmatmul.mubr.bf16.vlgmr.msra.gmra.mxu1 %v16370_v38  ;;  %21587 = vst [vmem:[#allocation11_spill] sm:$0xff] %v16416_v51 }
 0x3bb   :  { %11345 = vmatprep.mubr.msk.bf16.mxu0 %vm4049_vm0, %v16383_v61  ;;  %11361 = vmatprep.mubr.msk.bf16.mxu1 %vm4049_vm0, %v16383_v61  ;;  %v21586_v61 = vmax.f32 %v16203_v17, %v16201_v40  ;;  %v313_v17 = vld [vmem:[#allocation4 + $0x328] sm:$0xff] }
 0x3bc   :  { %v16387_v24 = vpop.f32.mrf.mxu0  ;;  %7187 = vmatpush1.bf16.msra.mxu0 %v15784_v4  ;;  %v16392_v1 = vpop.f32.mrf.mxu1  ;;  %7380 = vmatpush1.bf16.msra.mxu1 %v16363_v46 }
 0x3bd   :  { %7188 = vmatprep.subr.bf16.mxu0 %v15788_v16  ;;  %7381 = vmatprep.subr.bf16.mxu1 %v16373_v57 }
 0x3be   :  { %v16398_v30 = vpop.f32.mrf.mxu0  ;;  %v16401_v26 = vpop.f32.mrf.mxu1 }
 0x3c0   :  { %v6148_v35 = vpop.f32.mrf.mxu0  ;;  %7189 = vmatpush1.bf16.msra.mxu0 %v15808_v7  ;;  %v16409_v32 = vpop.f32.mrf.mxu1  ;;  %7382 = vmatpush1.bf16.msra.mxu1 %v16396_v47 }
 0x3c1   :  { %v16407_v38 = vmax.f32 %v6148_v35, %v21586_v61  ;;  %7190 = vmatprep.subr.bf16.mxu0 %v15400_v20  ;;  %7383 = vmatprep.subr.bf16.mxu1 %v15762_v44  ;;  %v21588_v35 = vmax.f32 %v16218_v53, %v16216_v18  ;;  %v290_v44 = vld [vmem:[#allocation4 + $0x250] sm:$0xff]  ;;  %v21591_v53 = vmax.f32 %v16237_v5, %v16235_v8  ;;  %v265_v18 = vld [vmem:[#allocation4 + $0x168] sm:$0xff] }
 0x3c2   :  { %v6152_v63 = vpop.f32.mrf.mxu0  ;;  %6843 = vmatmul.mubr.bf16.gmra.mxu0 %v16416_v51  ;;  %v16427_v20 = vpop.f32.mrf.mxu1  ;;  %7036 = vmatmul.mubr.bf16.gmra.mxu1 %v16416_v51  ;;  %v16451_v51 = vcombine.high %v289_v45, %v313_v17  ;;  %v21593_v5 = vmax.f32 %v16246_v62, %v16244_v13  ;;  %v16468_v2 = vcombine.low %v290_v44, %v314_v29 }
 0x3c3   :  { %v16425_v61 = vmax.f32 %v6152_v63, %v21588_v35  ;;  %11346 = vmatprep.mubr.msk.bf16.mxu0 %vm4049_vm0, %v16433_v56  ;;  %11362 = vmatprep.mubr.msk.bf16.mxu1 %vm4049_vm0, %v16433_v56  ;;  %v241_v56 = vld [vmem:[#allocation4 + $0x88] sm:$0xff]  ;;  %v21595_v8 = vmax.f32 %v16255_v11, %v16253_v58  ;;  %v121_v58 = vld [vmem:[#allocation4 + $0x320] sm:$0xff]  ;;  %v21598_v11 = vmax.f32 %v16270_v54, %v16268_v22 }
 0x3c4   :  { %v6154_v40 = vpop.f32.mrf.mxu0  ;;  %7191 = vmatpush1.bf16.msra.mxu0 %v15602_v50  ;;  %v16447_v35 = vpop.f32.mrf.mxu1  ;;  %7384 = vmatpush1.bf16.msra.mxu1 %v15784_v4  ;;  %v16454_v50 = vcombine.high %v290_v44, %v314_v29  ;;  %21594 = vst [vmem:[#allocation22_spill] sm:$0xff] %v16468_v2  ;;  %v10769_v62 = vcombine.high %v241_v56, %v265_v18  ;;  %v16484_v29 = vld [vmem:[%s20687_s1 + $0x20] ss:$8 sps:$4 sm:$0xff]  }
 0x3c5   :  { %21589 = vst [vmem:[#allocation13_spill] sm:$0xff] %v16425_v61  ;;  %v16445_v63 = vmax.f32 %v6154_v40, %v21591_v53  ;;  %7192 = vmatprep.subr.bf16.mxu0 %v15607_v34  ;;  %7385 = vmatprep.subr.bf16.mxu1 %v15788_v16  ;;  %v242_v34 = vld [vmem:[#allocation4 + $0x90] sm:$0xff]  ;;  %v16466_v16 = vcombine.low %v289_v45, %v313_v17  ;;  %21596 = vst [vmem:[#allocation20_spill] sm:$0xff] %v16484_v29 }
 0x3c6   :  { %v6156_v55 = vpop.f32.mrf.mxu0  ;;  %21592 = vst [vmem:[#allocation23_spill] sm:$0xff] %v16454_v50  ;;  %v16463_v4 = vpop.f32.mrf.mxu1  ;;  %v266_v53 = vld [vmem:[#allocation4 + $0x170] sm:$0xff]  ;;  %v10768_v22 = vcombine.low %v241_v56, %v265_v18  ;;  %v49_v56 = vld [vmem:[#allocation4 + $0x80] sm:$0xff] }
 0x3c7   :  { %v16461_v40 = vmax.f32 %v6156_v55, %v21593_v5  ;;  %v16488_v45 = vcombine.high %v242_v34, %v266_v53  ;;  %v16510_v54 = vcombine.low %v242_v34, %v266_v53  ;;  %v73_v18 = vld [vmem:[#allocation4 + $0x160] sm:$0xff]  ;;  %v21601_v53 = vmax.f32 %v16298_v23, %v16296_v14 }
 0x3c8   :  { %v6158_v48 = vpop.f32.mrf.mxu0  ;;  %7193 = vmatpush1.bf16.msra.mxu0 %v21538_v15  ;;  %v16477_v55 = vpop.f32.mrf.mxu1  ;;  %7386 = vmatpush1.bf16.msra.mxu1 %v15808_v7  ;;  %v10673_v14 = vcombine.high %v49_v56, %v73_v18 }
 0x3c9   :  { %v16475_v13 = vmax.f32 %v6158_v48, %v21595_v8  ;;  %7194 = vmatprep.subr.bf16.mxu0 %v16451_v51  ;;  %7387 = vmatprep.subr.bf16.mxu1 %v16454_v50  ;;  %21597 = vst [vmem:[#allocation15_spill] sm:$0xff] %v16488_v45  ;;  %v97_v48 = vld [vmem:[#allocation4 + $0x240] sm:$0xff]  ;;  %v16503_v8 = vld [vmem:[%s20687_s1 + $0x34] ss:$8 sps:$4 sm:$0xff]  }
 0x3ca   :  { %v6162_v15 = vpop.f32.mrf.mxu0  ;;  %6853 = vmatmul.mubr.bf16.gmra.mxu0 %v16484_v29  ;;  %v16497_v44 = vpop.f32.mrf.mxu1  ;;  %7046 = vmatmul.mubr.bf16.gmra.mxu1 %v16484_v29  ;;  %21599 = vst [vmem:[#allocation63_spill] sm:$0xff] %v16503_v8  ;;  %v10721_v50 = vcombine.high %v97_v48, %v121_v58 }
 0x3cb   :  { %v16495_v17 = vmax.f32 %v6162_v15, %v21598_v11  ;;  %11347 = vmatprep.mubr.msk.bf16.mxu0 %vm4049_vm0, %v16503_v8  ;;  %11363 = vmatprep.mubr.msk.bf16.mxu1 %vm4049_vm0, %v16503_v8  ;;  %v21600_v11 = vmax.f32 %v16289_v25, %v16287_v33 }
 0x3cc   :  { %v6164_v5 = vpop.f32.mrf.mxu0  ;;  %7195 = vmatpush1.bf16.msra.mxu0 %v16466_v16  ;;  %v16519_v61 = vpop.f32.mrf.mxu1  ;;  %7388 = vmatpush1.bf16.msra.mxu1 %v16468_v2 }
 0x3cd   :  { %v16517_v7 = vmax.f32 %v6164_v5, %v21600_v11  ;;  %7196 = vmatprep.subr.bf16.mxu0 %v10769_v62  ;;  %7389 = vmatprep.subr.bf16.mxu1 %v16488_v45  ;;  %v10720_v11 = vcombine.low %v97_v48, %v121_v58  ;;  %v21602_v45 = vmax.f32 %v16307_v43, %v16305_v27  ;;  %v16562_v48 = vld [vmem:[%s20687_s1 + $0x44] ss:$8 sps:$4 sm:$0xff]  }
 0x3ce   :  { %v6166_v8 = vpop.f32.mrf.mxu0  ;;  %v16530_v25 = vpop.f32.mrf.mxu1  ;;  %v21603_v43 = vmax.f32 %v16322_v0, %v16320_v37  ;;  %v890_v58 = vld [vmem:[#allocation4 + $0x348] sm:$0xff]  ;;  %v10672_v37 = vcombine.low %v49_v56, %v73_v18  ;;  %v21605_v18 = vmax.f32 %v16350_v28, %v16348_v31 }
 0x3cf   :  { %v9713_v34 = vmax.f32 %v16519_v61, %v16517_v7  ;;  %v16528_v33 = vmax.f32 %v6166_v8, %v21601_v53  ;;  %v16545_v8 = vld [vmem:[%s20687_s1 + $0x30] ss:$8 sps:$4 sm:$0xff]  }
 0x3d0   :  { %v6168_v5 = vpop.f32.mrf.mxu0  ;;  %7197 = vmatpush1.bf16.msra.mxu0 %v10768_v22  ;;  %v16539_v29 = vpop.f32.mrf.mxu1  ;;  %7390 = vmatpush1.bf16.msra.mxu1 %v16510_v54 }
 0x3d1   :  { %v16537_v2 = vmax.f32 %v6168_v5, %v21602_v45  ;;  %7198 = vmatprep.subr.bf16.mxu0 %v10721_v50  ;;  %7391 = vmatprep.subr.bf16.mxu1 %v16451_v51  ;;  %v866_v51 = vld [vmem:[#allocation4 + $0x268] sm:$0xff]  ;;  %v21604_v5 = vmax.f32 %v16341_v41, %v16339_v52 }
 0x3d2   :  { %v6172_v23 = vpop.f32.mrf.mxu0  ;;  %6863 = vmatmul.mubr.bf16.gmra.mxu0 %v16545_v8  ;;  %v16556_v50 = vpop.f32.mrf.mxu1  ;;  %7056 = vmatmul.mubr.bf16.gmra.mxu1 %v16545_v8  ;;  %v16578_v15 = vcombine.high %v866_v51, %v890_v58  ;;  %v818_v41 = vld [vmem:[#allocation4 + $0xa8] sm:$0xff]  ;;  %v16599_v31 = vcombine.low %v866_v51, %v890_v58  ;;  %v16617_v51 = vld [vmem:[%s20687_s1 + $0x54] ss:$8 sps:$4 sm:$0xff]  }
 0x3d3   :  { %v16554_v45 = vmax.f32 %v6172_v23, %v21603_v43  ;;  %11348 = vmatprep.mubr.msk.bf16.mxu0 %vm4049_vm0, %v16562_v48  ;;  %11364 = vmatprep.mubr.msk.bf16.mxu1 %vm4049_vm0, %v16562_v48  ;;  %v21641_v61 = vmax.f32 %v16539_v29, %v16537_v2  ;;  %v16784_v29 = vld [vmem:[%s20687_s1 + $0x84] ss:$8 sps:$4 sm:$0xff]  }
 0x3d4   :  { %v6174_v53 = vpop.f32.mrf.mxu0  ;;  %7199 = vmatpush1.bf16.msra.mxu0 %v10720_v11  ;;  %v16575_v43 = vpop.f32.mrf.mxu1  ;;  %7392 = vmatpush1.bf16.msra.mxu1 %v16466_v16  ;;  %21648 = vst [vmem:[#allocation121_spill] sm:$0xff] %v16784_v29 }
 0x3d5   :  { %v16573_v23 = vmax.f32 %v6174_v53, %v21604_v5  ;;  %7200 = vmatprep.subr.bf16.mxu0 %v10673_v14  ;;  %7393 = vmatprep.subr.bf16.mxu1 %v10769_v62  ;;  %v842_v53 = vld [vmem:[#allocation4 + $0x188] sm:$0xff]  ;;  %v21606_v62 = vmax.f32 %v16359_v36, %v16357_v9 }
 0x3d6   :  { %v6176_v27 = vpop.f32.mrf.mxu0  ;;  %v16587_v52 = vpop.f32.mrf.mxu1  ;;  %v16608_v9 = vcombine.high %v818_v41, %v842_v53  ;;  %v16631_v36 = vcombine.low %v818_v41, %v842_v53 }
 0x3d7   :  { %v16585_v11 = vmax.f32 %v6176_v27, %v21605_v18  ;;  %v16604_v27 = vld [vmem:[%s20687_s1 + $0x40] ss:$8 sps:$4 sm:$0xff]  }
 0x3d8   :  { %v6178_v5 = vpop.f32.mrf.mxu0  ;;  %7201 = vmatpush1.bf16.msra.mxu0 %v10672_v37  ;;  %v16596_v56 = vpop.f32.mrf.mxu1  ;;  %7394 = vmatpush1.bf16.msra.mxu1 %v10768_v22 }
 0x3d9   :  { %v16594_v14 = vmax.f32 %v6178_v5, %v21606_v62  ;;  %7214 = vmatprep.subr.bf16.mxu0 %v16111_v10  ;;  %7407 = vmatprep.subr.bf16.mxu1 %v16578_v15 }
 0x3da   :  { %v6182_v28 = vpop.f32.mrf.mxu0  ;;  %6873 = vmatmul.mubr.bf16.gmra.mxu0 %v16604_v27  ;;  %v6375_v37 = vpop.f32.mrf.mxu1  ;;  %7066 = vmatmul.mubr.bf16.gmra.mxu1 %v16604_v27 }
 0x3db   :  { %v9134_v22 = vmax.f32 %v16365_v19, %v6182_v28  ;;  %11349 = vmatprep.mubr.msk.bf16.mxu0 %vm4049_vm0, %v16617_v51  ;;  %v9136_v58 = vmax.f32 %v16377_v12, %v6375_v37  ;;  %11365 = vmatprep.mubr.msk.bf16.mxu1 %vm4049_vm0, %v16617_v51  ;;  %v21607_v19 = vmax.f32 %v15966_v42, %v16166_v39 }
 0x3dc   :  { %v6184_v18 = vpop.f32.mrf.mxu0  ;;  %7215 = vmatpush2.bf16.msra.mxu0 %v16363_v46  ;;  %v6377_v28 = vpop.f32.mrf.mxu1  ;;  %7408 = vmatpush2.bf16.msra.mxu1 %v16599_v31  ;;  %v21608_v12 = vmax.f32 %v15976_v60, %v16178_v49  ;;  %v21610_v49 = vmax.f32 %v16409_v32, %v16407_v38  ;;  %v21652_v38 = vmax.f32 %v16587_v52, %v16585_v11 }
 0x3dd   :  { %v9518_v5 = vmax.f32 %v21607_v19, %v9134_v22  ;;  %v9135_v62 = vmax.f32 %v16387_v24, %v6184_v18  ;;  %7216 = vmatprep.subr.bf16.mxu0 %v16373_v57  ;;  %v9137_v16 = vmax.f32 %v16392_v1, %v6377_v28  ;;  %7409 = vmatprep.subr.bf16.mxu1 %v16608_v9 }
 0x3de   :  { %v9520_v37 = vmax.f32 %v21608_v12, %v9136_v58  ;;  %v6186_v0 = vpop.f32.mrf.mxu0  ;;  %v6379_v24 = vpop.f32.mrf.mxu1 }
 0x3df   :  { %v10027_v42 = vmax.f32 %v9135_v62, %v16193_v59  ;;  %v9182_v39 = vmax.f32 %v16398_v30, %v6186_v0  ;;  %v9184_v18 = vmax.f32 %v16401_v26, %v6379_v24  ;;  %v21613_v59 = vmax.f32 %v15803_v6, %v15813_v3  ;;  %v21617_v0 = vld [vmem:[#allocation13_spill] sm:$0xff]  ;;  %v16680_v3 = vld [vmem:[%s20687_s1 + $0x64] ss:$8 sps:$4 sm:$0xff]  }
 0x3e0   :  { %v10026_v22 = vmax.f32 %v9518_v5, %v9520_v37  ;;  %v6188_v19 = vpop.f32.mrf.mxu0  ;;  %7217 = vmatpush2.bf16.msra.mxu0 %v16396_v47  ;;  %v16650_v53 = vpop.f32.mrf.mxu1  ;;  %7410 = vmatpush2.bf16.msra.mxu1 %v16631_v36  ;;  %21621 = vst [vmem:[#allocation101_spill] sm:$0xff] %v16680_v3  ;;  %v21622_v62 = vmax.f32 %v16447_v35, %v16445_v63 }
 0x3e1   :  { %v16642_v41 = vmax.f32 %v9137_v16, %v10027_v42  ;;  %v10028_v60 = vmax.f32 %v9182_v39, %v16196_v21  ;;  %v16648_v1 = vmax.f32 %v6188_v19, %v21610_v49  ;;  %21612 = vst [vmem:[#allocation82_spill] sm:$0xff] %v16650_v53  ;;  %7572 = vmatprep.subr.bf16.mxu0 %v16578_v15  ;;  %v16662_v21 = vld [vmem:[%s20687_s1 + $0x50] ss:$8 sps:$4 sm:$0xff]  }
 0x3e2   :  { %v16657_v26 = vmax.f32 %v21613_v59, %v10026_v22  ;;  %v6192_v30 = vpop.f32.mrf.mxu0  ;;  %21615 = vst [vmem:[#allocation92_spill] sm:$0xff] %v16662_v21  ;;  %6883 = vmatmul.mubr.bf16.gmra.mxu0 %v16662_v21  ;;  %v21618_v16 = vmax.f32 %v16427_v20, %v21617_v0  ;;  %v16674_v6 = vpop.f32.mrf.mxu1  ;;  %7076 = vmatmul.mubr.bf16.gmra.mxu1 %v16662_v21  ;;  %v21662_v53 = vld [vmem:[#allocation24_spill] sm:$0xff]  ;;  %v291_v21 = vld [vmem:[#allocation4 + $0x258] sm:$0xff] }
 0x3e3   :  { %21609 = vst [vmem:[#allocation72_spill] sm:$0xff] %v16642_v41  ;;  %21611 = vst [vmem:[#allocation79_spill] sm:$0xff] %v16648_v1  ;;  %v16665_v32 = vmax.f32 %v9184_v18, %v10028_v60  ;;  %11350 = vmatprep.mubr.msk.bf16.mxu0 %vm4049_vm0, %v16680_v3  ;;  %11366 = vmatprep.mubr.msk.bf16.mxu1 %vm4049_vm0, %v16680_v3  ;;  %v21625_v39 = vmax.f32 %v16463_v4, %v16461_v40  ;;  %v16716_v40 = vld [vmem:[%s20687_s1 + $0x60] ss:$8 sps:$4 sm:$0xff]  }
 0x3e4   :  { %21614 = vst [vmem:[#allocation89_spill] sm:$0xff] %v16657_v26  ;;  %v16672_v58 = vmax.f32 %v6192_v30, %v21618_v16  ;;  %21620 = vst [vmem:[#allocation100_spill] sm:$0xff] %v16674_v6  ;;  %v6194_v5 = vpop.f32.mrf.mxu0  ;;  %v16693_v12 = vpop.f32.mrf.mxu1  ;;  %v21628_v63 = vmax.f32 %v16477_v55, %v16475_v13  ;;  %v21632_v59 = vmax.f32 %v16497_v44, %v16495_v17  ;;  %v16732_v55 = vld [vmem:[%s20687_s1 + $0x74] ss:$8 sps:$4 sm:$0xff]   ;;  %v21661_v4 = vld [vmem:[#allocation19_spill] sm:$0xff] }
 0x3e5   :  { %21616 = vst [vmem:[#allocation99_spill] sm:$0xff] %v16665_v32  ;;  %v16691_v28 = vmax.f32 %v6194_v5, %v21622_v62  ;;  %21624 = vst [vmem:[#allocation103_spill] sm:$0xff] %v16693_v12  ;;  %v21658_v17 = vld [vmem:[#allocation16_spill] sm:$0xff]  ;;  %v21697_v3 = vld [vmem:[#allocation11_spill] sm:$0xff] }
 0x3e6   :  { %21619 = vst [vmem:[#allocation13_spill] sm:$0xff] %v16672_v58  ;;  %v6196_v37 = vpop.f32.mrf.mxu0  ;;  %v16702_v22 = vpop.f32.mrf.mxu1  ;;  %21631 = vst [vmem:[#allocation108_spill] sm:$0xff] %v16716_v40 }
 0x3e7   :  { %21623 = vst [vmem:[#allocation102_spill] sm:$0xff] %v16691_v28  ;;  %v16700_v24 = vmax.f32 %v6196_v37, %v21625_v39  ;;  %21627 = vst [vmem:[#allocation105_spill] sm:$0xff] %v16702_v22  ;;  %v21638_v37 = vmax.f32 %v16530_v25, %v16528_v33  ;;  %v16768_v33 = vld [vmem:[%s20687_s1 + $0x70] ss:$8 sps:$4 sm:$0xff]  }
 0x3e8   :  { %v6198_v18 = vpop.f32.mrf.mxu0  ;;  %v16711_v60 = vpop.f32.mrf.mxu1  ;;  %21635 = vst [vmem:[#allocation111_spill] sm:$0xff] %v16732_v55  ;;  %21644 = vst [vmem:[#allocation118_spill] sm:$0xff] %v16768_v33 }
 0x3e9   :  { %21626 = vst [vmem:[#allocation104_spill] sm:$0xff] %v16700_v24  ;;  %v16709_v35 = vmax.f32 %v6198_v18, %v21628_v63  ;;  %21630 = vst [vmem:[#allocation107_spill] sm:$0xff] %v16711_v60 }
 0x3ea   :  { %v6202_v49 = vpop.f32.mrf.mxu0  ;;  %6893 = vmatmul.mubr.bf16.gmra.mxu0 %v16716_v40  ;;  %v16726_v13 = vpop.f32.mrf.mxu1  ;;  %7086 = vmatmul.mubr.bf16.gmra.mxu1 %v16716_v40 }
 0x3eb   :  { %21629 = vst [vmem:[#allocation106_spill] sm:$0xff] %v16709_v35  ;;  %v16724_v30 = vmax.f32 %v6202_v49, %v21632_v59  ;;  %21634 = vst [vmem:[#allocation110_spill] sm:$0xff] %v16726_v13  ;;  %11351 = vmatprep.mubr.msk.bf16.mxu0 %vm4049_vm0, %v16732_v55  ;;  %11367 = vmatprep.mubr.msk.bf16.mxu1 %vm4049_vm0, %v16732_v55  ;;  %v16905_v35 = vld [vmem:[#allocation4 + $0x350] sm:$0xff]  ;;  %v21664_v13 = vld [vmem:[#allocation26_spill] sm:$0xff] }
 0x3ec   :  { %v6204_v0 = vpop.f32.mrf.mxu0  ;;  %v16745_v16 = vpop.f32.mrf.mxu1 }
 0x3ed   :  { %21633 = vst [vmem:[#allocation109_spill] sm:$0xff] %v16724_v30  ;;  %v16743_v44 = vmax.f32 %v6204_v0, %v9713_v34  ;;  %21637 = vst [vmem:[#allocation113_spill] sm:$0xff] %v16745_v16  ;;  %v21645_v0 = vmax.f32 %v16556_v50, %v16554_v45  ;;  %v21649_v50 = vmax.f32 %v16575_v43, %v16573_v23  ;;  %v21660_v45 = vld [vmem:[#allocation18_spill] sm:$0xff] }
 0x3ee   :  { %v6206_v5 = vpop.f32.mrf.mxu0  ;;  %v16754_v18 = vpop.f32.mrf.mxu1  ;;  %v21655_v23 = vmax.f32 %v16596_v56, %v16594_v14  ;;  %v21663_v14 = vld [vmem:[#allocation25_spill] sm:$0xff] }
 0x3ef   :  { %21636 = vst [vmem:[#allocation112_spill] sm:$0xff] %v16743_v44  ;;  %v16752_v39 = vmax.f32 %v6206_v5, %v21638_v37  ;;  %21640 = vst [vmem:[#allocation115_spill] sm:$0xff] %v16754_v18  ;;  %v21665_v44 = vld [vmem:[#allocation27_spill] sm:$0xff] }
 0x3f0   :  { %v6208_v63 = vpop.f32.mrf.mxu0  ;;  %v16763_v34 = vpop.f32.mrf.mxu1 }
 0x3f1   :  { %21639 = vst [vmem:[#allocation114_spill] sm:$0xff] %v16752_v39  ;;  %v16761_v7 = vmax.f32 %v6208_v63, %v21641_v61  ;;  %21643 = vst [vmem:[#allocation117_spill] sm:$0xff] %v16763_v34 }
 0x3f2   :  { %v6212_v59 = vpop.f32.mrf.mxu0  ;;  %6903 = vmatmul.mubr.bf16.gmra.mxu0 %v16768_v33  ;;  %v16778_v2 = vpop.f32.mrf.mxu1  ;;  %7096 = vmatmul.mubr.bf16.gmra.mxu1 %v16768_v33 }
 0x3f3   :  { %21642 = vst [vmem:[#allocation116_spill] sm:$0xff] %v16761_v7  ;;  %v16776_v5 = vmax.f32 %v6212_v59, %v21645_v0  ;;  %21647 = vst [vmem:[#allocation120_spill] sm:$0xff] %v16778_v2  ;;  %11352 = vmatprep.mubr.msk.bf16.mxu0 %vm4049_vm0, %v16784_v29  ;;  %11368 = vmatprep.mubr.msk.bf16.mxu1 %vm4049_vm0, %v16784_v29 }
 0x3f4   :  { %v6214_v37 = vpop.f32.mrf.mxu0  ;;  %v16797_v61 = vpop.f32.mrf.mxu1 }
 0x3f5   :  { %21646 = vst [vmem:[#allocation119_spill] sm:$0xff] %v16776_v5  ;;  %v16795_v63 = vmax.f32 %v6214_v37, %v21649_v50  ;;  %21651 = vst [vmem:[#allocation123_spill] sm:$0xff] %v16797_v61 }
 0x3f6   :  { %v6216_v59 = vpop.f32.mrf.mxu0  ;;  %v16806_v42 = vpop.f32.mrf.mxu1 }
 0x3f7   :  { %21650 = vst [vmem:[#allocation122_spill] sm:$0xff] %v16795_v63  ;;  %v16804_v20 = vmax.f32 %v6216_v59, %v21652_v38  ;;  %21654 = vst [vmem:[#allocation125_spill] sm:$0xff] %v16806_v42  ;;  %v21659_v38 = vld [vmem:[#allocation17_spill] sm:$0xff]  ;;  %v21666_v63 = vld [vmem:[#allocation28_spill] sm:$0xff] }
 0x3f8   :  { %v6218_v19 = vpop.f32.mrf.mxu0  ;;  %v16815_v37 = vpop.f32.mrf.mxu1 }
 0x3f9   :  { %21653 = vst [vmem:[#allocation124_spill] sm:$0xff] %v16804_v20  ;;  %v16813_v43 = vmax.f32 %v6218_v19, %v21655_v23  ;;  %21657 = vst [vmem:[#allocation127_spill] sm:$0xff] %v16815_v37  ;;  %v21667_v20 = vld [vmem:[#allocation30_spill] sm:$0xff] }
 0x3fa   :  { %v16817_v50 = vpop.f32.mrf.mxu0  ;;  %6913 = vmatmul.mubr.bf16.gmra.mxu0 %v21658_v17  ;;  %v16822_v52 = vpop.f32.mrf.mxu1  ;;  %7106 = vmatmul.mubr.bf16.gmra.mxu1 %v21658_v17 }
 0x3fb   :  { %21656 = vst [vmem:[#allocation126_spill] sm:$0xff] %v16813_v43  ;;  %11353 = vmatprep.mubr.msk.bf16.mxu0 %vm4049_vm0, %v21659_v38  ;;  %11369 = vmatprep.mubr.msk.bf16.mxu1 %vm4049_vm0, %v21659_v38 }
 0x3fc   :  { %v16827_v59 = vpop.f32.mrf.mxu0  ;;  %v16831_v56 = vpop.f32.mrf.mxu1 }
 0x3fe   :  { %v16835_v19 = vpop.f32.mrf.mxu0  ;;  %v16837_v23 = vpop.f32.mrf.mxu1 }
 0x3ff   :  { %v21669_v29 = vmax.f32 %v16835_v19, %v16837_v23 }
 0x400   :  { %v16841_v62 = vpop.f32.mrf.mxu0  ;;  %v16843_v49 = vpop.f32.mrf.mxu1 }
 0x402   :  { %v16847_v38 = vpop.f32.mrf.mxu0  ;;  %6923 = vmatmul.mubr.bf16.gmra.mxu0 %v21660_v45  ;;  %v16850_v0 = vpop.f32.mrf.mxu1  ;;  %7116 = vmatmul.mubr.bf16.gmra.mxu1 %v21660_v45  ;;  %v16903_v45 = vld [vmem:[#allocation4 + $0x270] sm:$0xff] }
 0x403   :  { %11354 = vmatprep.mubr.msk.bf16.mxu0 %vm4049_vm0, %v21661_v4  ;;  %11370 = vmatprep.mubr.msk.bf16.mxu1 %vm4049_vm0, %v21661_v4 }
 0x404   :  { %v16857_v17 = vpop.f32.mrf.mxu0  ;;  %v16861_v25 = vpop.f32.mrf.mxu1 }
 0x406   :  { %v16865_v26 = vpop.f32.mrf.mxu0  ;;  %v16867_v41 = vpop.f32.mrf.mxu1 }
 0x408   :  { %v16871_v32 = vpop.f32.mrf.mxu0  ;;  %v16873_v11 = vpop.f32.mrf.mxu1 }
 0x40a   :  { %v16877_v4 = vpop.f32.mrf.mxu0  ;;  %6933 = vmatmul.mubr.bf16.gmra.mxu0 %v21662_v53  ;;  %v16880_v58 = vpop.f32.mrf.mxu1  ;;  %7126 = vmatmul.mubr.bf16.gmra.mxu1 %v21662_v53 }
 0x40b   :  { %11355 = vmatprep.mubr.msk.bf16.mxu0 %vm4049_vm0, %v21663_v14  ;;  %11371 = vmatprep.mubr.msk.bf16.mxu1 %vm4049_vm0, %v21663_v14  ;;  %v16911_v14 = vcombine.high %v16903_v45, %v16905_v35 }
 0x40c   :  { %v16887_v6 = vpop.f32.mrf.mxu0  ;;  %v16891_v1 = vpop.f32.mrf.mxu1 }
 0x40d   :  { %7765 = vmatprep.subr.bf16.mxu1 %v16911_v14 }
 0x40e   :  { %v16895_v12 = vpop.f32.mrf.mxu0  ;;  %v16897_v24 = vpop.f32.mrf.mxu1 }
 0x410   :  { %v16901_v22 = vpop.f32.mrf.mxu0  ;;  %v16907_v60 = vpop.f32.mrf.mxu1 }
 0x412   :  { %v16915_v30 = vpop.f32.mrf.mxu0  ;;  %6943 = vmatmul.mubr.bf16.gmra.mxu0 %v21664_v13  ;;  %v16918_v53 = vpop.f32.mrf.mxu1  ;;  %7136 = vmatmul.mubr.bf16.gmra.mxu1 %v21664_v13 }
 0x413   :  { %11356 = vmatprep.mubr.msk.bf16.mxu0 %vm4049_vm0, %v21665_v44  ;;  %11372 = vmatprep.mubr.msk.bf16.mxu1 %vm4049_vm0, %v21665_v44  ;;  %v21668_v44 = vmax.f32 %v16827_v59, %v16831_v56 }
 0x414   :  { %v16925_v39 = vpop.f32.mrf.mxu0  ;;  %v16930_v28 = vpop.f32.mrf.mxu1 }
 0x416   :  { %v16934_v7 = vpop.f32.mrf.mxu0  ;;  %v16936_v13 = vpop.f32.mrf.mxu1 }
 0x418   :  { %v16940_v16 = vpop.f32.mrf.mxu0  ;;  %v16942_v5 = vpop.f32.mrf.mxu1 }
 0x41a   :  { %v16946_v2 = vpop.f32.mrf.mxu0  ;;  %6953 = vmatmul.mubr.bf16.gmra.mxu0 %v21666_v63  ;;  %v16951_v61 = vpop.f32.mrf.mxu1  ;;  %7146 = vmatmul.mubr.bf16.gmra.mxu1 %v21666_v63  ;;  %v21673_v63 = vld [vmem:[#allocation33_spill] sm:$0xff] }
 0x41b   :  { %11357 = vmatprep.mubr.msk.bf16.mxu0 %vm4049_vm0, %v21667_v20  ;;  %11373 = vmatprep.mubr.msk.bf16.mxu1 %vm4049_vm0, %v21667_v20 }
 0x41c   :  { %v6490_v42 = vpop.f32.mrf.mxu0  ;;  %v16965_v18 = vpop.f32.mrf.mxu1 }
 0x41d   :  { %v16963_v43 = vmax.f32 %v6490_v42, %v21668_v44  ;;  %v21672_v42 = vmax.f32 %v16841_v62, %v16843_v49  ;;  %v21675_v62 = vld [vmem:[#allocation35_spill] sm:$0xff] }
 0x41e   :  { %v6492_v37 = vpop.f32.mrf.mxu0  ;;  %v16974_v34 = vpop.f32.mrf.mxu1 }
 0x41f   :  { %v16972_v33 = vmax.f32 %v6492_v37, %v21669_v29  ;;  %21671 = vst [vmem:[#allocation17_spill] sm:$0xff] %v16974_v34  ;;  %v21674_v37 = vmax.f32 %v16847_v38, %v16850_v0 }
 0x420   :  { %v6494_v55 = vpop.f32.mrf.mxu0  ;;  %v16983_v56 = vpop.f32.mrf.mxu1 }
 0x421   :  { %21670 = vst [vmem:[#allocation16_spill] sm:$0xff] %v16972_v33  ;;  %v16981_v59 = vmax.f32 %v6494_v55, %v21672_v42  ;;  %v21676_v42 = vmax.f32 %v16857_v17, %v16861_v25  ;;  %v21678_v25 = vmax.f32 %v16871_v32, %v16873_v11  ;;  %v21681_v32 = vld [vmem:[#allocation32_spill] sm:$0xff]  ;;  %v315_v33 = vld [vmem:[#allocation4 + $0x338] sm:$0xff] }
 0x422   :  { %v6498_v44 = vpop.f32.mrf.mxu0  ;;  %6963 = vmatmul.mubr.bf16.gmra.mxu0 %v21673_v63  ;;  %v16993_v23 = vpop.f32.mrf.mxu1  ;;  %7156 = vmatmul.mubr.bf16.gmra.mxu1 %v21673_v63  ;;  %v21679_v63 = vld [vmem:[#allocation31_spill] sm:$0xff] }
 0x423   :  { %v16991_v19 = vmax.f32 %v6498_v44, %v21674_v37  ;;  %11358 = vmatprep.mubr.msk.bf16.mxu0 %vm4049_vm0, %v21675_v62  ;;  %11374 = vmatprep.mubr.msk.bf16.mxu1 %vm4049_vm0, %v21675_v62  ;;  %v21677_v37 = vmax.f32 %v16865_v26, %v16867_v41  ;;  %v21680_v26 = vmax.f32 %v16877_v4, %v16880_v58 }
 0x424   :  { %v6500_v55 = vpop.f32.mrf.mxu0  ;;  %v17007_v38 = vpop.f32.mrf.mxu1 }
 0x425   :  { %v17005_v0 = vmax.f32 %v6500_v55, %v21676_v42 }
 0x426   :  { %v6502_v44 = vpop.f32.mrf.mxu0  ;;  %v17016_v62 = vpop.f32.mrf.mxu1 }
 0x427   :  { %v17014_v20 = vmax.f32 %v6502_v44, %v21677_v37 }
 0x428   :  { %v6504_v29 = vpop.f32.mrf.mxu0  ;;  %v17025_v55 = vpop.f32.mrf.mxu1 }
 0x429   :  { %v17023_v17 = vmax.f32 %v6504_v29, %v21678_v25  ;;  %v21682_v25 = vmax.f32 %v16887_v6, %v16891_v1  ;;  %v21684_v1 = vmax.f32 %v16901_v22, %v16907_v60  ;;  %v21687_v22 = vld [vmem:[#allocation10_spill] sm:$0xff]  ;;  %v628_v29 = vld [vmem:[#allocation4 + $0xb0] sm:$0xff] }
 0x42a   :  { %v6508_v42 = vpop.f32.mrf.mxu0  ;;  %6973 = vmatmul.mubr.bf16.gmra.mxu0 %v21679_v63  ;;  %v17035_v37 = vpop.f32.mrf.mxu1  ;;  %7166 = vmatmul.mubr.bf16.gmra.mxu1 %v21679_v63  ;;  %v21685_v63 = vld [vmem:[#allocation12_spill] sm:$0xff] }
 0x42b   :  { %v17033_v44 = vmax.f32 %v6508_v42, %v21680_v26  ;;  %11359 = vmatprep.mubr.msk.bf16.mxu0 %vm4049_vm0, %v21681_v32  ;;  %11375 = vmatprep.mubr.msk.bf16.mxu1 %vm4049_vm0, %v21681_v32  ;;  %v21683_v26 = vmax.f32 %v16895_v12, %v16897_v24  ;;  %v21686_v24 = vmax.f32 %v16915_v30, %v16918_v53 }
 0x42c   :  { %v6510_v11 = vpop.f32.mrf.mxu0  ;;  %v17049_v4 = vpop.f32.mrf.mxu1 }
 0x42d   :  { %v17047_v58 = vmax.f32 %v6510_v11, %v21682_v25 }
 0x42e   :  { %v6512_v42 = vpop.f32.mrf.mxu0  ;;  %v17058_v32 = vpop.f32.mrf.mxu1 }
 0x42f   :  { %v17056_v41 = vmax.f32 %v6512_v42, %v21683_v26 }
 0x430   :  { %v6514_v49 = vpop.f32.mrf.mxu0  ;;  %v17067_v11 = vpop.f32.mrf.mxu1 }
 0x431   :  { %v17065_v6 = vmax.f32 %v6514_v49, %v21684_v1  ;;  %v21688_v1 = vmax.f32 %v16925_v39, %v16930_v28  ;;  %v652_v49 = vld [vmem:[#allocation4 + $0x190] sm:$0xff]  ;;  %v21690_v39 = vmax.f32 %v16940_v16, %v16942_v5  ;;  %v21696_v28 = vmax.f32 %v16983_v56, %v16981_v59 }
 0x432   :  { %v6518_v25 = vpop.f32.mrf.mxu0  ;;  %6983 = vmatmul.mubr.bf16.gmra.mxu0 %v21685_v63  ;;  %v17077_v26 = vpop.f32.mrf.mxu1  ;;  %7176 = vmatmul.mubr.bf16.gmra.mxu1 %v21685_v63  ;;  %v17136_v5 = vcombine.low %v628_v29, %v652_v49  ;;  %v21700_v56 = vmax.f32 %v17007_v38, %v17005_v0  ;;  %v21701_v0 = vmax.f32 %v17016_v62, %v17014_v20 }
 0x433   :  { %v17075_v42 = vmax.f32 %v6518_v25, %v21686_v24  ;;  %11376 = vmatprep.mubr.msk.bf16.mxu0 %vm4049_vm0, %v21687_v22  ;;  %11392 = vmatprep.mubr.msk.bf16.mxu1 %vm4049_vm0, %v21687_v22  ;;  %v21689_v24 = vmax.f32 %v16934_v7, %v16936_v13  ;;  %v17113_v7 = vcombine.low %v16903_v45, %v16905_v35 }
 0x434   :  { %v6520_v60 = vpop.f32.mrf.mxu0  ;;  %v17091_v53 = vpop.f32.mrf.mxu1  ;;  %21693 = vst [vmem:[#allocation18_spill] sm:$0xff] %v17136_v5 }
 0x435   :  { %v17089_v30 = vmax.f32 %v6520_v60, %v21688_v1 }
 0x436   :  { %v6522_v25 = vpop.f32.mrf.mxu0  ;;  %v17100_v22 = vpop.f32.mrf.mxu1 }
 0x437   :  { %v17098_v12 = vmax.f32 %v6522_v25, %v21689_v24  ;;  %v21691_v25 = vld [vmem:[#allocation40_spill] sm:$0xff]  ;;  %v17118_v24 = vcombine.high %v628_v29, %v652_v49 }
 0x438   :  { %v6524_v40 = vpop.f32.mrf.mxu0  ;;  %v17109_v1 = vpop.f32.mrf.mxu1 }
 0x439   :  { %v17107_v60 = vmax.f32 %v6524_v40, %v21690_v39  ;;  %v21692_v40 = vld [vmem:[#allocation21_spill] sm:$0xff] }
 0x43a   :  { %v17115_v13 = vpop.f32.mrf.mxu0  ;;  %7219 = vmatmul.mubr.bf16.vlgmr.msra.gmra.mxu0 %v21691_v25  ;;  %v17122_v63 = vpop.f32.mrf.mxu1  ;;  %7412 = vmatmul.mubr.bf16.vlgmr.msra.gmra.mxu1 %v21691_v25 }
 0x43b   :  { %11377 = vmatprep.mubr.msk.bf16.mxu0 %vm4049_vm0, %v21692_v40  ;;  %11393 = vmatprep.mubr.msk.bf16.mxu1 %vm4049_vm0, %v21692_v40 }
 0x43c   :  { %v17127_v16 = vpop.f32.mrf.mxu0  ;;  %7573 = vmatpush1.bf16.msra.mxu0 %v16599_v31  ;;  %v17132_v35 = vpop.f32.mrf.mxu1  ;;  %7766 = vmatpush1.bf16.msra.mxu1 %v17113_v7 }
 0x43d   :  { %7574 = vmatprep.subr.bf16.mxu0 %v16608_v9  ;;  %7767 = vmatprep.subr.bf16.mxu1 %v17118_v24 }
 0x43e   :  { %v17138_v45 = vpop.f32.mrf.mxu0  ;;  %v17141_v39 = vpop.f32.mrf.mxu1 }
 0x43f   :  { %21694 = vst [vmem:[#allocation19_spill] sm:$0xff] %v17141_v39  ;;  %v21699_v39 = vld [vmem:[#allocation14_spill] sm:$0xff] }
 0x440   :  { %v17143_v25 = vpop.f32.mrf.mxu0  ;;  %7575 = vmatpush1.bf16.msra.mxu0 %v16631_v36  ;;  %v6727_v40 = vpop.f32.mrf.mxu1  ;;  %7768 = vmatpush1.bf16.msra.mxu1 %v17136_v5 }
 0x441   :  { %21695 = vst [vmem:[#allocation24_spill] sm:$0xff] %v17143_v25  ;;  %7576 = vmatprep.subr.bf16.mxu0 %v16111_v10  ;;  %v17151_v29 = vmax.f32 %v6727_v40, %v21696_v28  ;;  %7769 = vmatprep.subr.bf16.mxu1 %v16578_v15  ;;  %v21698_v25 = vmax.f32 %v16993_v23, %v16991_v19 }
 0x442   :  { %v6538_v49 = vpop.f32.mrf.mxu0  ;;  %7229 = vmatmul.mubr.bf16.gmra.mxu0 %v21697_v3  ;;  %v17160_v5 = vpop.f32.mrf.mxu1  ;;  %7422 = vmatmul.mubr.bf16.gmra.mxu1 %v21697_v3  ;;  %v10821_v3 = vcombine.high %v291_v21, %v315_v33 }
 0x443   :  { %v17158_v34 = vmax.f32 %v6538_v49, %v21698_v25  ;;  %11378 = vmatprep.mubr.msk.bf16.mxu0 %vm4049_vm0, %v21699_v39  ;;  %11394 = vmatprep.mubr.msk.bf16.mxu1 %vm4049_vm0, %v21699_v39  ;;  %v243_v39 = vld [vmem:[#allocation4 + $0x98] sm:$0xff] }
 0x444   :  { %v6540_v59 = vpop.f32.mrf.mxu0  ;;  %7577 = vmatpush1.bf16.msra.mxu0 %v16363_v46  ;;  %v17175_v23 = vpop.f32.mrf.mxu1  ;;  %7770 = vmatpush1.bf16.msra.mxu1 %v16599_v31  ;;  %v267_v25 = vld [vmem:[#allocation4 + $0x178] sm:$0xff]  ;;  %v10820_v31 = vcombine.low %v291_v21, %v315_v33  ;;  %v21704_v33 = vmax.f32 %v17035_v37, %v17033_v44  ;;  %v21706_v44 = vmax.f32 %v17049_v4, %v17047_v58 }
 0x445   :  { %v17173_v19 = vmax.f32 %v6540_v59, %v21700_v56  ;;  %7578 = vmatprep.subr.bf16.mxu0 %v16373_v57  ;;  %7771 = vmatprep.subr.bf16.mxu1 %v16608_v9  ;;  %v21702_v9 = vmax.f32 %v17025_v55, %v17023_v17  ;;  %v10773_v20 = vcombine.high %v243_v39, %v267_v25 }
 0x446   :  { %v6542_v28 = vpop.f32.mrf.mxu0  ;;  %v17187_v49 = vpop.f32.mrf.mxu1 }
 0x447   :  { %v17185_v38 = vmax.f32 %v6542_v28, %v21701_v0  ;;  %v21703_v28 = vld [vmem:[#allocation20_spill] sm:$0xff] }
 0x448   :  { %v6544_v59 = vpop.f32.mrf.mxu0  ;;  %7579 = vmatpush1.bf16.msra.mxu0 %v16396_v47  ;;  %v17197_v40 = vpop.f32.mrf.mxu1  ;;  %7772 = vmatpush1.bf16.msra.mxu1 %v16631_v36  ;;  %v21705_v36 = vld [vmem:[#allocation63_spill] sm:$0xff] }
 0x449   :  { %v9284_v56 = vmax.f32 %v17187_v49, %v17185_v38  ;;  %v17195_v15 = vmax.f32 %v6544_v59, %v21702_v9  ;;  %7580 = vmatprep.subr.bf16.mxu0 %v10821_v3  ;;  %7773 = vmatprep.subr.bf16.mxu1 %v16111_v10  ;;  %v10772_v10 = vcombine.low %v243_v39, %v267_v25 }
 0x44a   :  { %v6548_v62 = vpop.f32.mrf.mxu0  ;;  %7239 = vmatmul.mubr.bf16.gmra.mxu0 %v21703_v28  ;;  %v17209_v55 = vpop.f32.mrf.mxu1  ;;  %7432 = vmatmul.mubr.bf16.gmra.mxu1 %v21703_v28  ;;  %v21707_v39 = vmax.f32 %v17058_v32, %v17056_v41 }
 0x44b   :  { %v9285_v21 = vmax.f32 %v17197_v40, %v17195_v15  ;;  %v17207_v17 = vmax.f32 %v6548_v62, %v21704_v33  ;;  %11379 = vmatprep.mubr.msk.bf16.mxu0 %vm4049_vm0, %v21705_v36  ;;  %11395 = vmatprep.mubr.msk.bf16.mxu1 %vm4049_vm0, %v21705_v36  ;;  %v21732_v15 = vld [vmem:[#allocation111_spill] sm:$0xff] }
 0x44c   :  { %v6550_v0 = vpop.f32.mrf.mxu0  ;;  %7581 = vmatpush1.bf16.msra.mxu0 %v10820_v31  ;;  %v17223_v9 = vpop.f32.mrf.mxu1  ;;  %7774 = vmatpush1.bf16.msra.mxu1 %v16363_v46  ;;  %v21708_v46 = vmax.f32 %v17067_v11, %v17065_v6  ;;  %v892_v11 = vld [vmem:[#allocation4 + $0x358] sm:$0xff] }
 0x44d   :  { %v9332_v59 = vmax.f32 %v17209_v55, %v17207_v17  ;;  %v17221_v37 = vmax.f32 %v6550_v0, %v21706_v44  ;;  %7582 = vmatprep.subr.bf16.mxu0 %v10773_v20  ;;  %7775 = vmatprep.subr.bf16.mxu1 %v16373_v57  ;;  %v21709_v0 = vld [vmem:[#allocation23_spill] sm:$0xff]  ;;  %v21710_v44 = vmax.f32 %v17077_v26, %v17075_v42 }
 0x44e   :  { %v6552_v62 = vpop.f32.mrf.mxu0  ;;  %v17234_v33 = vpop.f32.mrf.mxu1  ;;  %v21712_v26 = vmax.f32 %v17091_v53, %v17089_v30  ;;  %v820_v53 = vld [vmem:[#allocation4 + $0xb8] sm:$0xff] }
 0x44f   :  { %v9333_v28 = vmax.f32 %v17223_v9, %v17221_v37  ;;  %v17232_v25 = vmax.f32 %v6552_v62, %v21707_v39 }
 0x450   :  { %v6554_v58 = vpop.f32.mrf.mxu0  ;;  %7583 = vmatpush1.bf16.msra.mxu0 %v10772_v10  ;;  %v17243_v57 = vpop.f32.mrf.mxu1  ;;  %7776 = vmatpush1.bf16.msra.mxu1 %v16396_v47  ;;  %v868_v47 = vld [vmem:[#allocation4 + $0x278] sm:$0xff] }
 0x451   :  { %v9380_v4 = vmax.f32 %v17234_v33, %v17232_v25  ;;  %v17241_v36 = vmax.f32 %v6554_v58, %v21708_v46  ;;  %7584 = vmatprep.subr.bf16.mxu0 %v21709_v0  ;;  %7777 = vmatprep.subr.bf16.mxu1 %v10821_v3  ;;  %v21711_v3 = vld [vmem:[#allocation22_spill] sm:$0xff]  ;;  %v21713_v46 = vld [vmem:[#allocation15_spill] sm:$0xff] }
 0x452   :  { %v6558_v41 = vpop.f32.mrf.mxu0  ;;  %7249 = vmatmul.mubr.bf16.gmra.mxu0 %v16545_v8  ;;  %v17255_v6 = vpop.f32.mrf.mxu1  ;;  %7442 = vmatmul.mubr.bf16.gmra.mxu1 %v16545_v8 }
 0x453   :  { %v9381_v32 = vmax.f32 %v17243_v57, %v17241_v36  ;;  %v17253_v62 = vmax.f32 %v6558_v41, %v21710_v44  ;;  %11380 = vmatprep.mubr.msk.bf16.mxu0 %vm4049_vm0, %v16562_v48  ;;  %11396 = vmatprep.mubr.msk.bf16.mxu1 %vm4049_vm0, %v16562_v48  ;;  %v17273_v41 = vcombine.high %v868_v47, %v892_v11  ;;  %v21734_v36 = vld [vmem:[#allocation121_spill] sm:$0xff] }
 0x454   :  { %v6560_v39 = vpop.f32.mrf.mxu0  ;;  %7585 = vmatpush1.bf16.msra.mxu0 %v21711_v3  ;;  %v17270_v8 = vpop.f32.mrf.mxu1  ;;  %7778 = vmatpush1.bf16.msra.mxu1 %v10820_v31  ;;  %v21714_v44 = vmax.f32 %v17100_v22, %v17098_v12  ;;  %v17295_v12 = vcombine.low %v868_v47, %v892_v11  ;;  %v21717_v11 = vmax.f32 %v16817_v50, %v16946_v2 }
 0x455   :  { %v9428_v42 = vmax.f32 %v17255_v6, %v17253_v62  ;;  %v17268_v58 = vmax.f32 %v6560_v39, %v21712_v26  ;;  %7586 = vmatprep.subr.bf16.mxu0 %v21713_v46  ;;  %7779 = vmatprep.subr.bf16.mxu1 %v10773_v20  ;;  %v844_v39 = vld [vmem:[#allocation4 + $0x198] sm:$0xff]  ;;  %v21715_v20 = vmax.f32 %v17109_v1, %v17107_v60 }
 0x456   :  { %v6562_v0 = vpop.f32.mrf.mxu0  ;;  %v17282_v30 = vpop.f32.mrf.mxu1  ;;  %v21720_v2 = vmax.f32 %v16965_v18, %v16963_v43 }
 0x457   :  { %v17280_v3 = vmax.f32 %v6562_v0, %v21714_v44 }
 0x458   :  { %v6564_v26 = vpop.f32.mrf.mxu0  ;;  %7587 = vmatpush1.bf16.msra.mxu0 %v16510_v54  ;;  %v17292_v48 = vpop.f32.mrf.mxu1  ;;  %7780 = vmatpush1.bf16.msra.mxu1 %v10772_v10  ;;  %v17299_v54 = vcombine.high %v820_v53, %v844_v39 }
 0x459   :  { %v9476_v31 = vmax.f32 %v17282_v30, %v17280_v3  ;;  %v17290_v46 = vmax.f32 %v6564_v26, %v21715_v20  ;;  %7600 = vmatprep.subr.bf16.mxu0 %v16911_v14  ;;  %7793 = vmatprep.subr.bf16.mxu1 %v17273_v41  ;;  %v17482_v3 = vld [vmem:[%s20687_s1 + $0x80] ss:$8 sps:$4 sm:$0xff]  }
 0x45a   :  { %v6568_v22 = vpop.f32.mrf.mxu0  ;;  %7259 = vmatmul.mubr.bf16.gmra.mxu0 %v16604_v27  ;;  %21716 = vst [vmem:[#allocation25_spill] sm:$0xff] %v17299_v54  ;;  %v6761_v1 = vpop.f32.mrf.mxu1  ;;  %7452 = vmatmul.mubr.bf16.gmra.mxu1 %v16604_v27  ;;  %v17319_v27 = vcombine.low %v820_v53, %v844_v39  ;;  %v21721_v39 = vld [vmem:[#allocation19_spill] sm:$0xff]  ;;  %21736 = vst [vmem:[#allocation27_spill] sm:$0xff] %v17482_v3 }
 0x45b   :  { %v9477_v0 = vmax.f32 %v17292_v48, %v17290_v46  ;;  %v9138_v60 = vmax.f32 %v17115_v13, %v6568_v22  ;;  %11381 = vmatprep.mubr.msk.bf16.mxu0 %vm4049_vm0, %v16617_v51  ;;  %v9140_v10 = vmax.f32 %v17122_v63, %v6761_v1  ;;  %11397 = vmatprep.mubr.msk.bf16.mxu1 %vm4049_vm0, %v16617_v51  ;;  %v17493_v48 = vld [vmem:[%s20687_s1 + $0x94] ss:$8 sps:$4 sm:$0xff]  }
 0x45c   :  { %v6570_v47 = vpop.f32.mrf.mxu0  ;;  %7601 = vmatpush2.bf16.msra.mxu0 %v17113_v7  ;;  %v6763_v26 = vpop.f32.mrf.mxu1  ;;  %7794 = vmatpush2.bf16.msra.mxu1 %v17295_v12  ;;  %21718 = vst [vmem:[#allocation26_spill] sm:$0xff] %v17319_v27  ;;  %v21719_v63 = vmax.f32 %v16822_v52, %v16951_v61  ;;  %v21722_v52 = vld [vmem:[#allocation18_spill] sm:$0xff]  ;;  %21737 = vst [vmem:[#allocation28_spill] sm:$0xff] %v17493_v48 }
 0x45d   :  { %v17314_v44 = vmax.f32 %v21717_v11, %v9138_v60  ;;  %v9139_v13 = vmax.f32 %v17127_v16, %v6570_v47  ;;  %7602 = vmatprep.subr.bf16.mxu0 %v17118_v24  ;;  %v9141_v20 = vmax.f32 %v17132_v35, %v6763_v26  ;;  %7795 = vmatprep.subr.bf16.mxu1 %v17299_v54  ;;  %v21723_v35 = vld [vmem:[#allocation17_spill] sm:$0xff]  ;;  %v21724_v47 = vld [vmem:[#allocation16_spill] sm:$0xff] }
 0x45e   :  { %v17324_v51 = vmax.f32 %v21719_v63, %v9140_v10  ;;  %v6572_v22 = vpop.f32.mrf.mxu0  ;;  %v6765_v60 = vpop.f32.mrf.mxu1  ;;  %v21725_v11 = vmax.f32 %v21723_v35, %v21724_v47  ;;  %v21726_v63 = vld [vmem:[#allocation24_spill] sm:$0xff] }
 0x45f   :  { %v9525_v50 = vmax.f32 %v9139_v13, %v21720_v2  ;;  %v9186_v16 = vmax.f32 %v17138_v45, %v6572_v22  ;;  %v9188_v1 = vmax.f32 %v21721_v39, %v6765_v60  ;;  %v21727_v13 = vld [vmem:[#allocation92_spill] sm:$0xff]  ;;  %v21728_v2 = vmax.f32 %v17160_v5, %v17158_v34  ;;  %v21729_v60 = vld [vmem:[#allocation101_spill] sm:$0xff] }
 0x460   :  { %v6574_v61 = vpop.f32.mrf.mxu0  ;;  %7603 = vmatpush2.bf16.msra.mxu0 %v21722_v52  ;;  %v17342_v43 = vpop.f32.mrf.mxu1  ;;  %7796 = vmatpush2.bf16.msra.mxu1 %v17319_v27  ;;  %v21730_v34 = vmax.f32 %v17175_v23, %v17173_v19 }
 0x461   :  { %v17336_v10 = vmax.f32 %v9141_v20, %v9525_v50  ;;  %v9572_v26 = vmax.f32 %v9186_v16, %v21725_v11  ;;  %v9187_v18 = vmax.f32 %v21726_v63, %v6574_v61  ;;  %7958 = vmatprep.subr.bf16.mxu0 %v17273_v41 }
 0x462   :  { %v6578_v45 = vpop.f32.mrf.mxu0  ;;  %7269 = vmatmul.mubr.bf16.gmra.mxu0 %v21727_v13  ;;  %v17357_v16 = vpop.f32.mrf.mxu1  ;;  %7462 = vmatmul.mubr.bf16.gmra.mxu1 %v21727_v13  ;;  %v21731_v13 = vld [vmem:[#allocation108_spill] sm:$0xff] }
 0x463   :  { %v17347_v22 = vmax.f32 %v9188_v1, %v9572_v26  ;;  %v17350_v20 = vmax.f32 %v9187_v18, %v17151_v29  ;;  %v17355_v50 = vmax.f32 %v6578_v45, %v21728_v2  ;;  %11382 = vmatprep.mubr.msk.bf16.mxu0 %vm4049_vm0, %v21729_v60  ;;  %11398 = vmatprep.mubr.msk.bf16.mxu1 %vm4049_vm0, %v21729_v60 }
 0x464   :  { %v6580_v39 = vpop.f32.mrf.mxu0  ;;  %v17373_v61 = vpop.f32.mrf.mxu1 }
 0x465   :  { %v10077_v29 = vmax.f32 %v17342_v43, %v17350_v20  ;;  %v10078_v1 = vmax.f32 %v17357_v16, %v17355_v50  ;;  %v17371_v5 = vmax.f32 %v6580_v39, %v21730_v34  ;;  %v17531_v20 = vld [vmem:[%s20687_s1 + $0xa4] ss:$8 sps:$4 sm:$0xff]  }
 0x466   :  { %v6582_v35 = vpop.f32.mrf.mxu0  ;;  %v17382_v26 = vpop.f32.mrf.mxu1  ;;  %21739 = vst [vmem:[#allocation33_spill] sm:$0xff] %v17531_v20 }
 0x467   :  { %v10079_v47 = vmax.f32 %v17373_v61, %v17371_v5  ;;  %v17380_v11 = vmax.f32 %v6582_v35, %v9284_v56 }
 0x468   :  { %v6584_v63 = vpop.f32.mrf.mxu0  ;;  %v17391_v23 = vpop.f32.mrf.mxu1 }
 0x469   :  { %v10080_v18 = vmax.f32 %v17382_v26, %v17380_v11  ;;  %v17389_v19 = vmax.f32 %v6584_v63, %v9285_v21  ;;  %v21733_v63 = vld [vmem:[#allocation118_spill] sm:$0xff] }
 0x46a   :  { %v6588_v45 = vpop.f32.mrf.mxu0  ;;  %7279 = vmatmul.mubr.bf16.gmra.mxu0 %v21731_v13  ;;  %v17401_v56 = vpop.f32.mrf.mxu1  ;;  %7472 = vmatmul.mubr.bf16.gmra.mxu1 %v21731_v13  ;;  %v17567_v11 = vld [vmem:[%s20687_s1 + $0xa0] ss:$8 sps:$4 sm:$0xff]  }
 0x46b   :  { %v10081_v38 = vmax.f32 %v17391_v23, %v17389_v19  ;;  %v17399_v49 = vmax.f32 %v6588_v45, %v9332_v59  ;;  %11383 = vmatprep.mubr.msk.bf16.mxu0 %vm4049_vm0, %v21732_v15  ;;  %11399 = vmatprep.mubr.msk.bf16.mxu1 %vm4049_vm0, %v21732_v15  ;;  %v21735_v45 = vmax.f32 %v17270_v8, %v17268_v58  ;;  %v17583_v23 = vld [vmem:[%s20687_s1 + $0xb4] ss:$8 sps:$4 sm:$0xff]   ;;  %v17609_v26 = vld [vmem:[#allocation4 + $0x360] sm:$0xff] }
 0x46c   :  { %v6590_v40 = vpop.f32.mrf.mxu0  ;;  %v17415_v55 = vpop.f32.mrf.mxu1  ;;  %21740 = vst [vmem:[#allocation35_spill] sm:$0xff] %v17567_v11  ;;  %21741 = vst [vmem:[#allocation31_spill] sm:$0xff] %v17583_v23 }
 0x46d   :  { %v10082_v21 = vmax.f32 %v17401_v56, %v17399_v49  ;;  %v17413_v17 = vmax.f32 %v6590_v40, %v9333_v28  ;;  %v17607_v49 = vld [vmem:[#allocation4 + $0x280] sm:$0xff] }
 0x46e   :  { %v6592_v59 = vpop.f32.mrf.mxu0  ;;  %v17424_v39 = vpop.f32.mrf.mxu1 }
 0x46f   :  { %v10083_v2 = vmax.f32 %v17415_v55, %v17413_v17  ;;  %v17422_v60 = vmax.f32 %v6592_v59, %v9380_v4 }
 0x470   :  { %v6594_v34 = vpop.f32.mrf.mxu0  ;;  %v17433_v9 = vpop.f32.mrf.mxu1 }
 0x471   :  { %v10084_v35 = vmax.f32 %v17424_v39, %v17422_v60  ;;  %v17431_v37 = vmax.f32 %v6594_v34, %v9381_v32  ;;  %v17622_v60 = vcombine.high %v17607_v49, %v17609_v26 }
 0x472   :  { %v6598_v28 = vpop.f32.mrf.mxu0  ;;  %7289 = vmatmul.mubr.bf16.gmra.mxu0 %v21733_v63  ;;  %v17443_v4 = vpop.f32.mrf.mxu1  ;;  %7482 = vmatmul.mubr.bf16.gmra.mxu1 %v21733_v63 }
 0x473   :  { %v10085_v25 = vmax.f32 %v17433_v9, %v17431_v37  ;;  %v17441_v33 = vmax.f32 %v6598_v28, %v9428_v42  ;;  %11384 = vmatprep.mubr.msk.bf16.mxu0 %vm4049_vm0, %v21734_v36  ;;  %11400 = vmatprep.mubr.msk.bf16.mxu1 %vm4049_vm0, %v21734_v36 }
 0x474   :  { %v6600_v57 = vpop.f32.mrf.mxu0  ;;  %v17457_v6 = vpop.f32.mrf.mxu1  ;;  %8151 = vmatprep.subr.bf16.mxu1 %v17622_v60 }
 0x475   :  { %v10086_v32 = vmax.f32 %v17443_v4, %v17441_v33  ;;  %v17455_v62 = vmax.f32 %v6600_v57, %v21735_v45 }
 0x476   :  { %v6602_v42 = vpop.f32.mrf.mxu0  ;;  %v17466_v40 = vpop.f32.mrf.mxu1 }
 0x477   :  { %v17464_v15 = vmax.f32 %v6602_v42, %v9476_v31  ;;  %v21744_v4 = vmax.f32 %v17457_v6, %v17455_v62 }
 0x478   :  { %v6604_v59 = vpop.f32.mrf.mxu0  ;;  %v17475_v8 = vpop.f32.mrf.mxu1 }
 0x479   :  { %v17473_v58 = vmax.f32 %v6604_v59, %v9477_v0  ;;  %v21745_v17 = vmax.f32 %v17466_v40, %v17464_v15  ;;  %v17682_v15 = vld [vmem:[%s20687_s1 + $0xc0] ss:$8 sps:$4 sm:$0xff]  }
 0x47a   :  { %v17477_v28 = vpop.f32.mrf.mxu0  ;;  %7299 = vmatmul.mubr.bf16.gmra.mxu0 %v17482_v3  ;;  %v17487_v31 = vpop.f32.mrf.mxu1  ;;  %7492 = vmatmul.mubr.bf16.gmra.mxu1 %v17482_v3  ;;  %21747 = vst [vmem:[#allocation10_spill] sm:$0xff] %v17682_v15 }
 0x47b   :  { %11385 = vmatprep.mubr.msk.bf16.mxu0 %vm4049_vm0, %v17493_v48  ;;  %11401 = vmatprep.mubr.msk.bf16.mxu1 %vm4049_vm0, %v17493_v48  ;;  %v21746_v62 = vmax.f32 %v17475_v8, %v17473_v58  ;;  %v17695_v8 = vld [vmem:[%s20687_s1 + $0xd4] ss:$8 sps:$4 sm:$0xff]  }
 0x47c   :  { %v6836_v46 = vpop.f32.mrf.mxu0  ;;  %v7029_v63 = vpop.f32.mrf.mxu1  ;;  %21748 = vst [vmem:[#allocation40_spill] sm:$0xff] %v17695_v8 }
 0x47d   :  { %v8759_v0 = vmax.f32 %v6836_v46, %v17336_v10  ;;  %v17515_v10 = vld [vmem:[%s20687_s1 + $0x90] ss:$8 sps:$4 sm:$0xff]  }
 0x47e   :  { %v6838_v36 = vpop.f32.mrf.mxu0  ;;  %v7031_v42 = vpop.f32.mrf.mxu1  ;;  %21738 = vst [vmem:[#allocation30_spill] sm:$0xff] %v17515_v10 }
 0x47f   :  { %v17500_v57 = vmax.f32 %v7029_v63, %v8759_v0  ;;  %v8806_v45 = vmax.f32 %v6838_v36, %v17347_v22 }
 0x480   :  { %v6840_v59 = vpop.f32.mrf.mxu0  ;;  %v17510_v34 = vpop.f32.mrf.mxu1 }
 0x481   :  { %v17503_v53 = vmax.f32 %v7031_v42, %v8806_v45  ;;  %v17508_v30 = vmax.f32 %v6840_v59, %v10077_v29 }
 0x482   :  { %v6844_v13 = vpop.f32.mrf.mxu0  ;;  %7309 = vmatmul.mubr.bf16.gmra.mxu0 %v17515_v10  ;;  %v17525_v43 = vpop.f32.mrf.mxu1  ;;  %7502 = vmatmul.mubr.bf16.gmra.mxu1 %v17515_v10 }
 0x483   :  { %v17523_v46 = vmax.f32 %v6844_v13, %v10078_v1  ;;  %11386 = vmatprep.mubr.msk.bf16.mxu0 %vm4049_vm0, %v17531_v20  ;;  %11402 = vmatprep.mubr.msk.bf16.mxu1 %vm4049_vm0, %v17531_v20  ;;  %v318_v20 = vld [vmem:[#allocation4 + $0x350] sm:$0xff] }
 0x484   :  { %v6846_v29 = vpop.f32.mrf.mxu0  ;;  %v17544_v1 = vpop.f32.mrf.mxu1 }
 0x485   :  { %v17542_v16 = vmax.f32 %v6846_v29, %v10079_v47 }
 0x486   :  { %v6848_v13 = vpop.f32.mrf.mxu0  ;;  %v17553_v36 = vpop.f32.mrf.mxu1 }
 0x487   :  { %v17551_v63 = vmax.f32 %v6848_v13, %v10080_v18 }
 0x488   :  { %v6850_v45 = vpop.f32.mrf.mxu0  ;;  %v17562_v61 = vpop.f32.mrf.mxu1 }
 0x489   :  { %v17560_v5 = vmax.f32 %v6850_v45, %v10081_v38 }
 0x48a   :  { %v6854_v47 = vpop.f32.mrf.mxu0  ;;  %7319 = vmatmul.mubr.bf16.gmra.mxu0 %v17567_v11  ;;  %v17577_v19 = vpop.f32.mrf.mxu1  ;;  %7512 = vmatmul.mubr.bf16.gmra.mxu1 %v17567_v11  ;;  %v17944_v11 = vld [vmem:[%s20687_s1 + $0x24] ss:$8 sps:$4 sm:$0xff]  }
 0x48b   :  { %v17575_v18 = vmax.f32 %v6854_v47, %v10082_v21  ;;  %11387 = vmatprep.mubr.msk.bf16.mxu0 %vm4049_vm0, %v17583_v23  ;;  %11403 = vmatprep.mubr.msk.bf16.mxu1 %vm4049_vm0, %v17583_v23  ;;  %v293_v23 = vld [vmem:[#allocation4 + $0x268] sm:$0xff]  ;;  %21774 = vst [vmem:[#allocation17_spill] sm:$0xff] %v17944_v11 }
 0x48c   :  { %v6856_v38 = vpop.f32.mrf.mxu0  ;;  %v17596_v21 = vpop.f32.mrf.mxu1 }
 0x48d   :  { %v17594_v56 = vmax.f32 %v6856_v38, %v10083_v2 }
 0x48e   :  { %v6858_v59 = vpop.f32.mrf.mxu0  ;;  %v17605_v45 = vpop.f32.mrf.mxu1 }
 0x48f   :  { %v17603_v13 = vmax.f32 %v6858_v59, %v10084_v35  ;;  %v17627_v35 = vld [vmem:[%s20687_s1 + $0xb0] ss:$8 sps:$4 sm:$0xff]  }
 0x490   :  { %v6860_v47 = vpop.f32.mrf.mxu0  ;;  %v17618_v2 = vpop.f32.mrf.mxu1  ;;  %21742 = vst [vmem:[#allocation32_spill] sm:$0xff] %v17627_v35 }
 0x491   :  { %v17616_v55 = vmax.f32 %v6860_v47, %v10085_v25  ;;  %v17643_v25 = vld [vmem:[%s20687_s1 + $0xc4] ss:$8 sps:$4 sm:$0xff]  }
 0x492   :  { %v6864_v39 = vpop.f32.mrf.mxu0  ;;  %7329 = vmatmul.mubr.bf16.gmra.mxu0 %v17627_v35  ;;  %v17637_v9 = vpop.f32.mrf.mxu1  ;;  %7522 = vmatmul.mubr.bf16.gmra.mxu1 %v17627_v35  ;;  %21743 = vst [vmem:[#allocation12_spill] sm:$0xff] %v17643_v25 }
 0x493   :  { %v17635_v37 = vmax.f32 %v6864_v39, %v10086_v32  ;;  %11388 = vmatprep.mubr.msk.bf16.mxu0 %vm4049_vm0, %v17643_v25  ;;  %11404 = vmatprep.mubr.msk.bf16.mxu1 %vm4049_vm0, %v17643_v25  ;;  %v21749_v25 = vmax.f32 %v17510_v34, %v17508_v30  ;;  %v17735_v30 = vld [vmem:[%s20687_s1 + $0xe4] ss:$8 sps:$4 sm:$0xff]  }
 0x494   :  { %v6866_v59 = vpop.f32.mrf.mxu0  ;;  %v17657_v47 = vpop.f32.mrf.mxu1  ;;  %21752 = vst [vmem:[#allocation11_spill] sm:$0xff] %v17735_v30 }
 0x495   :  { %v17655_v32 = vmax.f32 %v6866_v59, %v21744_v4 }
 0x496   :  { %v6868_v39 = vpop.f32.mrf.mxu0  ;;  %v17666_v42 = vpop.f32.mrf.mxu1 }
 0x497   :  { %v17664_v29 = vmax.f32 %v6868_v39, %v21745_v17 }
 0x498   :  { %v6870_v0 = vpop.f32.mrf.mxu0  ;;  %v17675_v59 = vpop.f32.mrf.mxu1 }
 0x499   :  { %v17673_v6 = vmax.f32 %v6870_v0, %v21746_v62 }
 0x49a   :  { %v17677_v4 = vpop.f32.mrf.mxu0  ;;  %7339 = vmatmul.mubr.bf16.gmra.mxu0 %v17682_v15  ;;  %v17689_v58 = vpop.f32.mrf.mxu1  ;;  %7532 = vmatmul.mubr.bf16.gmra.mxu1 %v17682_v15 }
 0x49b   :  { %11389 = vmatprep.mubr.msk.bf16.mxu0 %vm4049_vm0, %v17695_v8  ;;  %11405 = vmatprep.mubr.msk.bf16.mxu1 %vm4049_vm0, %v17695_v8 }
 0x49c   :  { %v6876_v39 = vpop.f32.mrf.mxu0  ;;  %v7069_v17 = vpop.f32.mrf.mxu1 }
 0x49d   :  { %v9527_v62 = vmax.f32 %v6876_v39, %v17500_v57  ;;  %v17719_v57 = vld [vmem:[%s20687_s1 + $0xd0] ss:$8 sps:$4 sm:$0xff]   ;;  %v21754_v39 = vmax.f32 %v17553_v36, %v17551_v63  ;;  %v17771_v63 = vld [vmem:[%s20687_s1 + $0xe0] ss:$8 sps:$4 sm:$0xff]  }
 0x49e   :  { %v6878_v40 = vpop.f32.mrf.mxu0  ;;  %v7071_v50 = vpop.f32.mrf.mxu1  ;;  %21750 = vst [vmem:[#allocation21_spill] sm:$0xff] %v17719_v57  ;;  %21756 = vst [vmem:[#allocation14_spill] sm:$0xff] %v17771_v63 }
 0x49f   :  { %v17704_v33 = vmax.f32 %v7069_v17, %v9527_v62  ;;  %v9574_v38 = vmax.f32 %v6878_v40, %v17503_v53 }
 0x4a0   :  { %v6880_v22 = vpop.f32.mrf.mxu0  ;;  %v17714_v35 = vpop.f32.mrf.mxu1 }
 0x4a1   :  { %v17707_v15 = vmax.f32 %v7071_v50, %v9574_v38  ;;  %v17712_v0 = vmax.f32 %v6880_v22, %v21749_v25  ;;  %v21751_v50 = vmax.f32 %v17525_v43, %v17523_v46  ;;  %v21753_v43 = vmax.f32 %v17544_v1, %v17542_v16 }
 0x4a2   :  { %v6884_v8 = vpop.f32.mrf.mxu0  ;;  %7349 = vmatmul.mubr.bf16.gmra.mxu0 %v17719_v57  ;;  %v17729_v34 = vpop.f32.mrf.mxu1  ;;  %7542 = vmatmul.mubr.bf16.gmra.mxu1 %v17719_v57  ;;  %v21755_v16 = vmax.f32 %v17562_v61, %v17560_v5  ;;  %v17787_v61 = vld [vmem:[%s20687_s1 + $0xf4] ss:$8 sps:$4 sm:$0xff]   ;;  %v21760_v46 = vmax.f32 %v17605_v45, %v17603_v13  ;;  %v17823_v13 = vld [vmem:[%s20687_s1 + $0xf0] ss:$8 sps:$4 sm:$0xff]  }
 0x4a3   :  { %v17727_v38 = vmax.f32 %v6884_v8, %v21751_v50  ;;  %11390 = vmatprep.mubr.msk.bf16.mxu0 %vm4049_vm0, %v17735_v30  ;;  %11406 = vmatprep.mubr.msk.bf16.mxu1 %vm4049_vm0, %v17735_v30  ;;  %21758 = vst [vmem:[#allocation20_spill] sm:$0xff] %v17787_v61  ;;  %21762 = vst [vmem:[#allocation63_spill] sm:$0xff] %v17823_v13 }
 0x4a4   :  { %v6886_v22 = vpop.f32.mrf.mxu0  ;;  %v17748_v40 = vpop.f32.mrf.mxu1 }
 0x4a5   :  { %v17746_v25 = vmax.f32 %v6886_v22, %v21753_v43 }
 0x4a6   :  { %v6888_v17 = vpop.f32.mrf.mxu0  ;;  %v17757_v50 = vpop.f32.mrf.mxu1 }
 0x4a7   :  { %v17755_v62 = vmax.f32 %v6888_v17, %v21754_v39  ;;  %v21757_v17 = vmax.f32 %v17577_v19, %v17575_v18  ;;  %v21759_v19 = vmax.f32 %v17596_v21, %v17594_v56  ;;  %v21761_v56 = vmax.f32 %v17618_v2, %v17616_v55  ;;  %v17839_v2 = vld [vmem:[%s20687_s1 + $0x4] ss:$8 sps:$4 sm:$0xff]  }
 0x4a8   :  { %v6890_v53 = vpop.f32.mrf.mxu0  ;;  %v17766_v22 = vpop.f32.mrf.mxu1  ;;  %21764 = vst [vmem:[#allocation23_spill] sm:$0xff] %v17839_v2  ;;  %v21766_v18 = vmax.f32 %v17666_v42, %v17664_v29  ;;  %v17874_v42 = vcombine.low %v17607_v49, %v17609_v26  ;;  %v17894_v26 = vld [vmem:[%s20687_s1 + $0x14] ss:$8 sps:$4 sm:$0xff]  }
 0x4a9   :  { %v17764_v1 = vmax.f32 %v6890_v53, %v21755_v16  ;;  %21769 = vst [vmem:[#allocation15_spill] sm:$0xff] %v17894_v26 }
 0x4aa   :  { %v6894_v43 = vpop.f32.mrf.mxu0  ;;  %7359 = vmatmul.mubr.bf16.gmra.mxu0 %v17771_v63  ;;  %v17781_v5 = vpop.f32.mrf.mxu1  ;;  %7552 = vmatmul.mubr.bf16.gmra.mxu1 %v17771_v63 }
 0x4ab   :  { %v17779_v39 = vmax.f32 %v6894_v43, %v21757_v17  ;;  %11391 = vmatprep.mubr.msk.bf16.mxu0 %vm4049_vm0, %v17787_v61  ;;  %11407 = vmatprep.mubr.msk.bf16.mxu1 %vm4049_vm0, %v17787_v61 }
 0x4ac   :  { %v6896_v53 = vpop.f32.mrf.mxu0  ;;  %v17800_v43 = vpop.f32.mrf.mxu1 }
 0x4ad   :  { %v17798_v16 = vmax.f32 %v6896_v53, %v21759_v19 }
 0x4ae   :  { %v6898_v17 = vpop.f32.mrf.mxu0  ;;  %v17809_v61 = vpop.f32.mrf.mxu1 }
 0x4af   :  { %v17807_v8 = vmax.f32 %v6898_v17, %v21760_v46  ;;  %v21763_v46 = vmax.f32 %v17637_v9, %v17635_v37  ;;  %v21765_v9 = vmax.f32 %v17657_v47, %v17655_v32  ;;  %v654_v37 = vld [vmem:[#allocation4 + $0x1a0] sm:$0xff]  ;;  %v21767_v47 = vmax.f32 %v17675_v59, %v17673_v6 }
 0x4b0   :  { %v6900_v63 = vpop.f32.mrf.mxu0  ;;  %v17818_v53 = vpop.f32.mrf.mxu1 }
 0x4b1   :  { %v17816_v21 = vmax.f32 %v6900_v63, %v21761_v56 }
 0x4b2   :  { %v6904_v19 = vpop.f32.mrf.mxu0  ;;  %7369 = vmatmul.mubr.bf16.gmra.mxu0 %v17823_v13  ;;  %v17833_v55 = vpop.f32.mrf.mxu1  ;;  %7562 = vmatmul.mubr.bf16.gmra.mxu1 %v17823_v13  ;;  %v630_v13 = vld [vmem:[#allocation4 + $0xc0] sm:$0xff] }
 0x4b3   :  { %v17831_v17 = vmax.f32 %v6904_v19, %v21763_v46  ;;  %11408 = vmatprep.mubr.msk.bf16.mxu0 %vm4049_vm0, %v17839_v2  ;;  %11424 = vmatprep.mubr.msk.bf16.mxu1 %vm4049_vm0, %v17839_v2 }
 0x4b4   :  { %v6906_v63 = vpop.f32.mrf.mxu0  ;;  %v17852_v19 = vpop.f32.mrf.mxu1 }
 0x4b5   :  { %v17850_v56 = vmax.f32 %v6906_v63, %v21765_v9 }
 0x4b6   :  { %v6908_v46 = vpop.f32.mrf.mxu0  ;;  %v17861_v2 = vpop.f32.mrf.mxu1 }
 0x4b7   :  { %v17859_v36 = vmax.f32 %v6908_v46, %v21766_v18  ;;  %v17881_v18 = vld [vmem:[%s20687_s1] ss:$8 sps:$4 sm:$0xff]   ;;  %v17884_v46 = vcombine.high %v630_v13, %v654_v37 }
 0x4b8   :  { %v6910_v30 = vpop.f32.mrf.mxu0  ;;  %v17870_v9 = vpop.f32.mrf.mxu1  ;;  %21768 = vst [vmem:[#allocation22_spill] sm:$0xff] %v17881_v18 }
 0x4b9   :  { %v17868_v63 = vmax.f32 %v6910_v30, %v21767_v47  ;;  %v17907_v47 = vcombine.low %v630_v13, %v654_v37  ;;  %v17927_v37 = vld [vmem:[%s20687_s1 + $0x10] ss:$8 sps:$4 sm:$0xff]  }
 0x4ba   :  { %v17876_v29 = vpop.f32.mrf.mxu0  ;;  %7605 = vmatmul.mubr.bf16.vlgmr.msra.gmra.mxu0 %v17881_v18  ;;  %v17888_v59 = vpop.f32.mrf.mxu1  ;;  %7798 = vmatmul.mubr.bf16.vlgmr.msra.gmra.mxu1 %v17881_v18  ;;  %21771 = vst [vmem:[#allocation19_spill] sm:$0xff] %v17927_v37 }
 0x4bb   :  { %11409 = vmatprep.mubr.msk.bf16.mxu0 %vm4049_vm0, %v17894_v26  ;;  %11425 = vmatprep.mubr.msk.bf16.mxu1 %vm4049_vm0, %v17894_v26  ;;  %v21770_v26 = vmax.f32 %v17714_v35, %v17712_v0  ;;  %v317_v35 = vld [vmem:[#allocation4 + $0x348] sm:$0xff] }
 0x4bc   :  { %v17898_v49 = vpop.f32.mrf.mxu0  ;;  %7959 = vmatpush1.bf16.msra.mxu0 %v17295_v12  ;;  %v17903_v30 = vpop.f32.mrf.mxu1  ;;  %8152 = vmatpush1.bf16.msra.mxu1 %v17874_v42 }
 0x4bd   :  { %7960 = vmatprep.subr.bf16.mxu0 %v17299_v54  ;;  %8153 = vmatprep.subr.bf16.mxu1 %v17884_v46 }
 0x4be   :  { %v17909_v6 = vpop.f32.mrf.mxu0  ;;  %v17912_v32 = vpop.f32.mrf.mxu1 }
 0x4c0   :  { %v6920_v45 = vpop.f32.mrf.mxu0  ;;  %7961 = vmatpush1.bf16.msra.mxu0 %v17319_v27  ;;  %v17920_v57 = vpop.f32.mrf.mxu1  ;;  %8154 = vmatpush1.bf16.msra.mxu1 %v17907_v47 }
 0x4c1   :  { %v17918_v18 = vmax.f32 %v6920_v45, %v21770_v26  ;;  %7962 = vmatprep.subr.bf16.mxu0 %v16911_v14  ;;  %8155 = vmatprep.subr.bf16.mxu1 %v17273_v41  ;;  %v21772_v45 = vmax.f32 %v17729_v34, %v17727_v38  ;;  %v294_v41 = vld [vmem:[#allocation4 + $0x270] sm:$0xff]  ;;  %v21775_v34 = vmax.f32 %v17748_v40, %v17746_v25  ;;  %v269_v38 = vld [vmem:[#allocation4 + $0x188] sm:$0xff] }
 0x4c2   :  { %v6924_v13 = vpop.f32.mrf.mxu0  ;;  %7615 = vmatmul.mubr.bf16.gmra.mxu0 %v17927_v37  ;;  %v17938_v14 = vpop.f32.mrf.mxu1  ;;  %7808 = vmatmul.mubr.bf16.gmra.mxu1 %v17927_v37  ;;  %v17962_v37 = vcombine.high %v293_v23, %v317_v35  ;;  %v21777_v40 = vmax.f32 %v17757_v50, %v17755_v62  ;;  %v17979_v3 = vcombine.low %v294_v41, %v318_v20 }
 0x4c3   :  { %v17936_v26 = vmax.f32 %v6924_v13, %v21772_v45  ;;  %11410 = vmatprep.mubr.msk.bf16.mxu0 %vm4049_vm0, %v17944_v11  ;;  %11426 = vmatprep.mubr.msk.bf16.mxu1 %vm4049_vm0, %v17944_v11  ;;  %v245_v11 = vld [vmem:[#allocation4 + $0xa8] sm:$0xff]  ;;  %v21779_v25 = vmax.f32 %v17766_v22, %v17764_v1  ;;  %v125_v1 = vld [vmem:[#allocation4 + $0x340] sm:$0xff] }
 0x4c4   :  { %v6926_v0 = vpop.f32.mrf.mxu0  ;;  %7963 = vmatpush1.bf16.msra.mxu0 %v17113_v7  ;;  %v17958_v45 = vpop.f32.mrf.mxu1  ;;  %8156 = vmatpush1.bf16.msra.mxu1 %v17295_v12  ;;  %v17965_v7 = vcombine.high %v294_v41, %v318_v20  ;;  %21778 = vst [vmem:[#allocation24_spill] sm:$0xff] %v17979_v3  ;;  %v10777_v50 = vcombine.high %v245_v11, %v269_v38  ;;  %v17995_v20 = vld [vmem:[%s20687_s1 + $0x20] ss:$8 sps:$4 sm:$0xff]  }
 0x4c5   :  { %21773 = vst [vmem:[#allocation18_spill] sm:$0xff] %v17936_v26  ;;  %v17956_v13 = vmax.f32 %v6926_v0, %v21775_v34  ;;  %7964 = vmatprep.subr.bf16.mxu0 %v17118_v24  ;;  %8157 = vmatprep.subr.bf16.mxu1 %v17299_v54  ;;  %v246_v24 = vld [vmem:[#allocation4 + $0xb0] sm:$0xff]  ;;  %v17977_v54 = vcombine.low %v293_v23, %v317_v35  ;;  %21780 = vst [vmem:[#allocation92_spill] sm:$0xff] %v17995_v20 }
 0x4c6   :  { %v6928_v10 = vpop.f32.mrf.mxu0  ;;  %21776 = vst [vmem:[#allocation16_spill] sm:$0xff] %v17965_v7  ;;  %v17974_v12 = vpop.f32.mrf.mxu1  ;;  %v270_v34 = vld [vmem:[#allocation4 + $0x190] sm:$0xff]  ;;  %v21782_v35 = vmax.f32 %v17781_v5, %v17779_v39  ;;  %v10776_v39 = vcombine.low %v245_v11, %v269_v38  ;;  %v53_v11 = vld [vmem:[#allocation4 + $0xa0] sm:$0xff] }
 0x4c7   :  { %v17972_v0 = vmax.f32 %v6928_v10, %v21777_v40  ;;  %v17999_v23 = vcombine.high %v246_v24, %v270_v34  ;;  %v18014_v40 = vld [vmem:[%s20687_s1 + $0x34] ss:$8 sps:$4 sm:$0xff]   ;;  %v18021_v5 = vcombine.low %v246_v24, %v270_v34  ;;  %v77_v38 = vld [vmem:[#allocation4 + $0x180] sm:$0xff]  ;;  %v21785_v34 = vmax.f32 %v17809_v61, %v17807_v8  ;;  %v822_v24 = vld [vmem:[#allocation4 + $0xc8] sm:$0xff] }
 0x4c8   :  { %v6930_v48 = vpop.f32.mrf.mxu0  ;;  %7965 = vmatpush1.bf16.msra.mxu0 %v21722_v52  ;;  %v17988_v10 = vpop.f32.mrf.mxu1  ;;  %8158 = vmatpush1.bf16.msra.mxu1 %v17319_v27  ;;  %21783 = vst [vmem:[#allocation108_spill] sm:$0xff] %v18014_v40  ;;  %v10681_v8 = vcombine.high %v53_v11, %v77_v38 }
 0x4c9   :  { %v17986_v62 = vmax.f32 %v6930_v48, %v21779_v25  ;;  %7966 = vmatprep.subr.bf16.mxu0 %v17962_v37  ;;  %8159 = vmatprep.subr.bf16.mxu1 %v17965_v7  ;;  %21781 = vst [vmem:[#allocation101_spill] sm:$0xff] %v17999_v23  ;;  %v101_v48 = vld [vmem:[#allocation4 + $0x260] sm:$0xff] }
 0x4ca   :  { %v6934_v52 = vpop.f32.mrf.mxu0  ;;  %7625 = vmatmul.mubr.bf16.gmra.mxu0 %v17995_v20  ;;  %v18008_v25 = vpop.f32.mrf.mxu1  ;;  %7818 = vmatmul.mubr.bf16.gmra.mxu1 %v17995_v20  ;;  %v10729_v27 = vcombine.high %v101_v48, %v125_v1 }
 0x4cb   :  { %v18006_v41 = vmax.f32 %v6934_v52, %v21782_v35  ;;  %11411 = vmatprep.mubr.msk.bf16.mxu0 %vm4049_vm0, %v18014_v40  ;;  %11427 = vmatprep.mubr.msk.bf16.mxu1 %vm4049_vm0, %v18014_v40  ;;  %v21784_v35 = vmax.f32 %v17800_v43, %v17798_v16 }
 0x4cc   :  { %v6936_v26 = vpop.f32.mrf.mxu0  ;;  %7967 = vmatpush1.bf16.msra.mxu0 %v17977_v54  ;;  %v18030_v7 = vpop.f32.mrf.mxu1  ;;  %8160 = vmatpush1.bf16.msra.mxu1 %v17979_v3 }
 0x4cd   :  { %v18028_v22 = vmax.f32 %v6936_v26, %v21784_v35  ;;  %7968 = vmatprep.subr.bf16.mxu0 %v10777_v50  ;;  %8161 = vmatprep.subr.bf16.mxu1 %v17999_v23  ;;  %v10728_v35 = vcombine.low %v101_v48, %v125_v1  ;;  %v21786_v23 = vmax.f32 %v17818_v53, %v17816_v21  ;;  %v18073_v48 = vld [vmem:[%s20687_s1 + $0x44] ss:$8 sps:$4 sm:$0xff]  }
 0x4ce   :  { %v6938_v40 = vpop.f32.mrf.mxu0  ;;  %v18041_v43 = vpop.f32.mrf.mxu1  ;;  %v21787_v53 = vmax.f32 %v17833_v55, %v17831_v17  ;;  %v894_v1 = vld [vmem:[#allocation4 + $0x368] sm:$0xff]  ;;  %v10680_v17 = vcombine.low %v53_v11, %v77_v38  ;;  %v21789_v38 = vmax.f32 %v17861_v2, %v17859_v36  ;;  %v21790_v11 = vmax.f32 %v17870_v9, %v17868_v63 }
 0x4cf   :  { %v18039_v16 = vmax.f32 %v6938_v40, %v21785_v34  ;;  %v18056_v40 = vld [vmem:[%s20687_s1 + $0x30] ss:$8 sps:$4 sm:$0xff]  }
 0x4d0   :  { %v6940_v26 = vpop.f32.mrf.mxu0  ;;  %7969 = vmatpush1.bf16.msra.mxu0 %v10776_v39  ;;  %v18050_v20 = vpop.f32.mrf.mxu1  ;;  %8162 = vmatpush1.bf16.msra.mxu1 %v18021_v5 }
 0x4d1   :  { %v18048_v3 = vmax.f32 %v6940_v26, %v21786_v23  ;;  %7970 = vmatprep.subr.bf16.mxu0 %v10729_v27  ;;  %8163 = vmatprep.subr.bf16.mxu1 %v17962_v37  ;;  %v870_v37 = vld [vmem:[#allocation4 + $0x288] sm:$0xff]  ;;  %v21788_v26 = vmax.f32 %v17852_v19, %v17850_v56 }
 0x4d2   :  { %v6944_v61 = vpop.f32.mrf.mxu0  ;;  %7635 = vmatmul.mubr.bf16.gmra.mxu0 %v18056_v40  ;;  %v18067_v27 = vpop.f32.mrf.mxu1  ;;  %7828 = vmatmul.mubr.bf16.gmra.mxu1 %v18056_v40  ;;  %v18089_v52 = vcombine.high %v870_v37, %v894_v1  ;;  %v846_v19 = vld [vmem:[#allocation4 + $0x1a8] sm:$0xff] }
 0x4d3   :  { %v18065_v23 = vmax.f32 %v6944_v61, %v21787_v53  ;;  %11412 = vmatprep.mubr.msk.bf16.mxu0 %vm4049_vm0, %v18073_v48  ;;  %11428 = vmatprep.mubr.msk.bf16.mxu1 %vm4049_vm0, %v18073_v48  ;;  %v18121_v63 = vcombine.high %v822_v24, %v846_v19 }
 0x4d4   :  { %v6946_v34 = vpop.f32.mrf.mxu0  ;;  %7971 = vmatpush1.bf16.msra.mxu0 %v10728_v35  ;;  %v18086_v53 = vpop.f32.mrf.mxu1  ;;  %8164 = vmatpush1.bf16.msra.mxu1 %v17977_v54 }
 0x4d5   :  { %v18084_v61 = vmax.f32 %v6946_v34, %v21788_v26  ;;  %7972 = vmatprep.subr.bf16.mxu0 %v10681_v8  ;;  %8165 = vmatprep.subr.bf16.mxu1 %v10777_v50  ;;  %v871_v34 = vld [vmem:[#allocation4 + $0x290] sm:$0xff]  ;;  %v18100_v8 = vcombine.low %v870_v37, %v894_v1  ;;  %v18117_v37 = vld [vmem:[%s20687_s1 + $0x40] ss:$8 sps:$4 sm:$0xff]   ;;  %v18144_v50 = vcombine.low %v822_v24, %v846_v19 }
 0x4d6   :  { %v6948_v21 = vpop.f32.mrf.mxu0  ;;  %v18098_v56 = vpop.f32.mrf.mxu1  ;;  %v895_v26 = vld [vmem:[#allocation4 + $0x370] sm:$0xff]  ;;  %21791 = vst [vmem:[#allocation111_spill] sm:$0xff] %v18117_v37 }
 0x4d7   :  { %v18096_v35 = vmax.f32 %v6948_v21, %v21789_v38  ;;  %v18112_v2 = vcombine.low %v871_v34, %v895_v26  ;;  %v18155_v24 = vcombine.high %v871_v34, %v895_v26  ;;  %v21802_v26 = vld [vmem:[#allocation18_spill] sm:$0xff] }
 0x4d8   :  { %v6950_v54 = vpop.f32.mrf.mxu0  ;;  %7973 = vmatpush1.bf16.msra.mxu0 %v10680_v17  ;;  %v18109_v36 = vpop.f32.mrf.mxu1  ;;  %8166 = vmatpush1.bf16.msra.mxu1 %v10776_v39  ;;  %v18130_v17 = vld [vmem:[%s20687_s1 + $0x54] ss:$8 sps:$4 sm:$0xff]  }
 0x4d9   :  { %v18107_v55 = vmax.f32 %v6950_v54, %v21790_v11  ;;  %7986 = vmatprep.subr.bf16.mxu0 %v17622_v60  ;;  %8179 = vmatprep.subr.bf16.mxu1 %v18089_v52  ;;  %21792 = vst [vmem:[#allocation118_spill] sm:$0xff] %v18130_v17 }
 0x4da   :  { %v6954_v21 = vpop.f32.mrf.mxu0  ;;  %7645 = vmatmul.mubr.bf16.gmra.mxu0 %v18117_v37  ;;  %v7147_v1 = vpop.f32.mrf.mxu1  ;;  %7838 = vmatmul.mubr.bf16.gmra.mxu1 %v18117_v37 }
 0x4db   :  { %v9142_v39 = vmax.f32 %v17876_v29, %v6954_v21  ;;  %11413 = vmatprep.mubr.msk.bf16.mxu0 %vm4049_vm0, %v18130_v17  ;;  %v9144_v11 = vmax.f32 %v17888_v59, %v7147_v1  ;;  %11429 = vmatprep.mubr.msk.bf16.mxu1 %vm4049_vm0, %v18130_v17  ;;  %v21793_v29 = vmax.f32 %v17477_v28, %v17677_v4 }
 0x4dc   :  { %v6956_v38 = vpop.f32.mrf.mxu0  ;;  %7987 = vmatpush2.bf16.msra.mxu0 %v17874_v42  ;;  %v7149_v9 = vpop.f32.mrf.mxu1  ;;  %8180 = vmatpush2.bf16.msra.mxu1 %v18100_v8  ;;  %v21794_v59 = vmax.f32 %v17487_v31, %v17689_v58 }
 0x4dd   :  { %v9526_v54 = vmax.f32 %v21793_v29, %v9142_v39  ;;  %v9143_v21 = vmax.f32 %v17898_v49, %v6956_v38  ;;  %7988 = vmatprep.subr.bf16.mxu0 %v17884_v46  ;;  %v9145_v17 = vmax.f32 %v17903_v30, %v7149_v9  ;;  %8181 = vmatprep.subr.bf16.mxu1 %v18121_v63  ;;  %v18196_v9 = vld [vmem:[%s20687_s1 + $0x64] ss:$8 sps:$4 sm:$0xff]  }
 0x4de   :  { %v9528_v1 = vmax.f32 %v21794_v59, %v9144_v11  ;;  %v6958_v37 = vpop.f32.mrf.mxu0  ;;  %v7151_v49 = vpop.f32.mrf.mxu1  ;;  %v21796_v30 = vmax.f32 %v17920_v57, %v17918_v18  ;;  %v21806_v11 = vmax.f32 %v17958_v45, %v17956_v13  ;;  %v21812_v13 = vmax.f32 %v17988_v10, %v17986_v62  ;;  %v18248_v10 = vld [vmem:[%s20687_s1 + $0x74] ss:$8 sps:$4 sm:$0xff]  }
 0x4df   :  { %v10091_v28 = vmax.f32 %v9143_v21, %v17704_v33  ;;  %v9190_v4 = vmax.f32 %v17909_v6, %v6958_v37  ;;  %v9192_v38 = vmax.f32 %v17912_v32, %v7151_v49  ;;  %v21799_v32 = vmax.f32 %v17314_v44, %v17324_v51 }
 0x4e0   :  { %v10090_v39 = vmax.f32 %v9526_v54, %v9528_v1  ;;  %v6960_v29 = vpop.f32.mrf.mxu0  ;;  %7989 = vmatpush2.bf16.msra.mxu0 %v17907_v47  ;;  %v18165_v33 = vpop.f32.mrf.mxu1  ;;  %8182 = vmatpush2.bf16.msra.mxu1 %v18144_v50  ;;  %v21803_v44 = vmax.f32 %v17938_v14, %v21802_v26  ;;  %v21833_v18 = vmax.f32 %v18098_v56, %v18096_v35 }
 0x4e1   :  { %v18157_v31 = vmax.f32 %v9145_v17, %v10091_v28  ;;  %v10092_v58 = vmax.f32 %v9190_v4, %v17707_v15  ;;  %v18163_v19 = vmax.f32 %v6960_v29, %v21796_v30  ;;  %21798 = vst [vmem:[#allocation129_spill] sm:$0xff] %v18165_v33  ;;  %8344 = vmatprep.subr.bf16.mxu0 %v18089_v52  ;;  %v18177_v15 = vld [vmem:[%s20687_s1 + $0x50] ss:$8 sps:$4 sm:$0xff]  }
 0x4e2   :  { %v18172_v6 = vmax.f32 %v21799_v32, %v10090_v39  ;;  %v6964_v34 = vpop.f32.mrf.mxu0  ;;  %7655 = vmatmul.mubr.bf16.gmra.mxu0 %v18177_v15  ;;  %8537 = vmatprep.subr.bf16.mxu1 %v18155_v24  ;;  %v18190_v37 = vpop.f32.mrf.mxu1  ;;  %v21809_v28 = vmax.f32 %v17974_v12, %v17972_v0  ;;  %v18232_v0 = vld [vmem:[%s20687_s1 + $0x60] ss:$8 sps:$4 sm:$0xff]   ;;  %v21815_v30 = vmax.f32 %v18008_v25, %v18006_v41 }
 0x4e3   :  { %21795 = vst [vmem:[#allocation121_spill] sm:$0xff] %v18157_v31  ;;  %21797 = vst [vmem:[#allocation128_spill] sm:$0xff] %v18163_v19  ;;  %v18181_v57 = vmax.f32 %v9192_v38, %v10092_v58  ;;  %v18188_v51 = vmax.f32 %v6964_v34, %v21803_v44  ;;  %7848 = vmatmul.mubr.bf16.gmra.mxu1 %v18177_v15  ;;  %11414 = vmatprep.mubr.msk.bf16.mxu0 %vm4049_vm0, %v18196_v9  ;;  %v21839_v41 = vld [vmem:[#allocation27_spill] sm:$0xff] }
 0x4e4   :  { %21800 = vst [vmem:[#allocation130_spill] sm:$0xff] %v18172_v6  ;;  %21805 = vst [vmem:[#allocation132_spill] sm:$0xff] %v18190_v37  ;;  %v6966_v17 = vpop.f32.mrf.mxu0  ;;  %11430 = vmatprep.mubr.msk.bf16.mxu1 %vm4049_vm0, %v18196_v9  ;;  %v18209_v21 = vpop.f32.mrf.mxu1  ;;  %v21818_v25 = vmax.f32 %v18030_v7, %v18028_v22  ;;  %v21824_v7 = vmax.f32 %v18050_v20, %v18048_v3  ;;  %v18300_v20 = vld [vmem:[%s20687_s1 + $0x84] ss:$8 sps:$4 sm:$0xff]   ;;  %v21846_v37 = vld [vmem:[#allocation12_spill] sm:$0xff] }
 0x4e5   :  { %21801 = vst [vmem:[#allocation131_spill] sm:$0xff] %v18181_v57  ;;  %21804 = vst [vmem:[#allocation18_spill] sm:$0xff] %v18188_v51  ;;  %v18207_v54 = vmax.f32 %v6966_v17, %v21806_v11  ;;  %v21843_v19 = vld [vmem:[#allocation35_spill] sm:$0xff] }
 0x4e6   :  { %21808 = vst [vmem:[#allocation134_spill] sm:$0xff] %v18209_v21  ;;  %v6968_v59 = vpop.f32.mrf.mxu0  ;;  %v18218_v49 = vpop.f32.mrf.mxu1 }
 0x4e7   :  { %21807 = vst [vmem:[#allocation133_spill] sm:$0xff] %v18207_v54  ;;  %v18216_v4 = vmax.f32 %v6968_v59, %v21809_v28  ;;  %21811 = vst [vmem:[#allocation136_spill] sm:$0xff] %v18218_v49  ;;  %v21821_v59 = vmax.f32 %v18041_v43, %v18039_v16  ;;  %v18284_v16 = vld [vmem:[%s20687_s1 + $0x70] ss:$8 sps:$4 sm:$0xff]   ;;  %v21841_v43 = vld [vmem:[#allocation30_spill] sm:$0xff] }
 0x4e8   :  { %v6970_v39 = vpop.f32.mrf.mxu0  ;;  %v18227_v29 = vpop.f32.mrf.mxu1 }
 0x4e9   :  { %21810 = vst [vmem:[#allocation135_spill] sm:$0xff] %v18216_v4  ;;  %v18225_v45 = vmax.f32 %v6970_v39, %v21812_v13  ;;  %21814 = vst [vmem:[#allocation138_spill] sm:$0xff] %v18227_v29 }
 0x4ea   :  { %v6974_v58 = vpop.f32.mrf.mxu0  ;;  %7665 = vmatmul.mubr.bf16.gmra.mxu0 %v18232_v0  ;;  %v18242_v62 = vpop.f32.mrf.mxu1 }
 0x4eb   :  { %21813 = vst [vmem:[#allocation137_spill] sm:$0xff] %v18225_v45  ;;  %v18240_v32 = vmax.f32 %v6974_v58, %v21815_v30  ;;  %21817 = vst [vmem:[#allocation140_spill] sm:$0xff] %v18242_v62  ;;  %7858 = vmatmul.mubr.bf16.gmra.mxu1 %v18232_v0  ;;  %11415 = vmatprep.mubr.msk.bf16.mxu0 %vm4049_vm0, %v18248_v10  ;;  %v21845_v45 = vld [vmem:[#allocation32_spill] sm:$0xff] }
 0x4ec   :  { %v6976_v34 = vpop.f32.mrf.mxu0  ;;  %11431 = vmatprep.mubr.msk.bf16.mxu1 %vm4049_vm0, %v18248_v10  ;;  %v18261_v44 = vpop.f32.mrf.mxu1 }
 0x4ed   :  { %21816 = vst [vmem:[#allocation139_spill] sm:$0xff] %v18240_v32  ;;  %v18259_v26 = vmax.f32 %v6976_v34, %v21818_v25  ;;  %21820 = vst [vmem:[#allocation142_spill] sm:$0xff] %v18261_v44  ;;  %v21827_v25 = vmax.f32 %v18067_v27, %v18065_v23  ;;  %v21830_v27 = vmax.f32 %v18086_v53, %v18084_v61 }
 0x4ee   :  { %v6978_v17 = vpop.f32.mrf.mxu0  ;;  %v18270_v39 = vpop.f32.mrf.mxu1  ;;  %v21836_v61 = vmax.f32 %v18109_v36, %v18107_v55 }
 0x4ef   :  { %21819 = vst [vmem:[#allocation141_spill] sm:$0xff] %v18259_v26  ;;  %v18268_v28 = vmax.f32 %v6978_v17, %v21821_v59  ;;  %21823 = vst [vmem:[#allocation144_spill] sm:$0xff] %v18270_v39 }
 0x4f0   :  { %v6980_v13 = vpop.f32.mrf.mxu0  ;;  %v18279_v30 = vpop.f32.mrf.mxu1 }
 0x4f1   :  { %21822 = vst [vmem:[#allocation143_spill] sm:$0xff] %v18268_v28  ;;  %v18277_v22 = vmax.f32 %v6980_v13, %v21824_v7  ;;  %21826 = vst [vmem:[#allocation146_spill] sm:$0xff] %v18279_v30 }
 0x4f2   :  { %v6984_v34 = vpop.f32.mrf.mxu0  ;;  %7675 = vmatmul.mubr.bf16.gmra.mxu0 %v18284_v16  ;;  %v18294_v3 = vpop.f32.mrf.mxu1 }
 0x4f3   :  { %21825 = vst [vmem:[#allocation145_spill] sm:$0xff] %v18277_v22  ;;  %v18292_v17 = vmax.f32 %v6984_v34, %v21827_v25  ;;  %21829 = vst [vmem:[#allocation148_spill] sm:$0xff] %v18294_v3  ;;  %7868 = vmatmul.mubr.bf16.gmra.mxu1 %v18284_v16  ;;  %11416 = vmatprep.mubr.msk.bf16.mxu0 %vm4049_vm0, %v18300_v20  ;;  %v21842_v25 = vld [vmem:[#allocation33_spill] sm:$0xff]  ;;  %v21847_v22 = vld [vmem:[#allocation10_spill] sm:$0xff] }
 0x4f4   :  { %v6986_v59 = vpop.f32.mrf.mxu0  ;;  %11432 = vmatprep.mubr.msk.bf16.mxu1 %vm4049_vm0, %v18300_v20  ;;  %v18313_v7 = vpop.f32.mrf.mxu1 }
 0x4f5   :  { %21828 = vst [vmem:[#allocation147_spill] sm:$0xff] %v18292_v17  ;;  %v18311_v13 = vmax.f32 %v6986_v59, %v21830_v27  ;;  %21832 = vst [vmem:[#allocation150_spill] sm:$0xff] %v18313_v7  ;;  %v21848_v17 = vld [vmem:[#allocation40_spill] sm:$0xff] }
 0x4f6   :  { %v6988_v34 = vpop.f32.mrf.mxu0  ;;  %v18322_v1 = vpop.f32.mrf.mxu1 }
 0x4f7   :  { %21831 = vst [vmem:[#allocation149_spill] sm:$0xff] %v18311_v13  ;;  %v18320_v14 = vmax.f32 %v6988_v34, %v21833_v18  ;;  %21835 = vst [vmem:[#allocation152_spill] sm:$0xff] %v18322_v1  ;;  %v21840_v18 = vld [vmem:[#allocation28_spill] sm:$0xff] }
 0x4f8   :  { %v6990_v38 = vpop.f32.mrf.mxu0  ;;  %v18331_v59 = vpop.f32.mrf.mxu1 }
 0x4f9   :  { %21834 = vst [vmem:[#allocation151_spill] sm:$0xff] %v18320_v14  ;;  %v18329_v53 = vmax.f32 %v6990_v38, %v21836_v61  ;;  %21838 = vst [vmem:[#allocation154_spill] sm:$0xff] %v18331_v59  ;;  %v21870_v59 = vld [vmem:[#allocation22_spill] sm:$0xff] }
 0x4fa   :  { %v18333_v27 = vpop.f32.mrf.mxu0  ;;  %7685 = vmatmul.mubr.bf16.gmra.mxu0 %v21839_v41  ;;  %v18338_v56 = vpop.f32.mrf.mxu1 }
 0x4fb   :  { %21837 = vst [vmem:[#allocation153_spill] sm:$0xff] %v18329_v53  ;;  %7878 = vmatmul.mubr.bf16.gmra.mxu1 %v21839_v41  ;;  %11417 = vmatprep.mubr.msk.bf16.mxu0 %vm4049_vm0, %v21840_v18  ;;  %v8762_v55 = vmax.f32 %v18333_v27, %v18338_v56  ;;  %v21844_v41 = vld [vmem:[#allocation31_spill] sm:$0xff] }
 0x4fc   :  { %v18345_v36 = vpop.f32.mrf.mxu0  ;;  %11433 = vmatprep.mubr.msk.bf16.mxu1 %vm4049_vm0, %v21840_v18  ;;  %v18349_v38 = vpop.f32.mrf.mxu1 }
 0x4fd   :  { %v21849_v39 = vmax.f32 %v18345_v36, %v18349_v38 }
 0x4fe   :  { %v18353_v61 = vpop.f32.mrf.mxu0  ;;  %v18355_v11 = vpop.f32.mrf.mxu1 }
 0x4ff   :  { %v21850_v7 = vmax.f32 %v18353_v61, %v18355_v11 }
 0x500   :  { %v18359_v58 = vpop.f32.mrf.mxu0  ;;  %v18361_v27 = vpop.f32.mrf.mxu1 }
 0x502   :  { %v18365_v18 = vpop.f32.mrf.mxu0  ;;  %7695 = vmatmul.mubr.bf16.gmra.mxu0 %v21841_v43  ;;  %v18368_v23 = vpop.f32.mrf.mxu1 }
 0x503   :  { %7888 = vmatmul.mubr.bf16.gmra.mxu1 %v21841_v43  ;;  %11418 = vmatprep.mubr.msk.bf16.mxu0 %vm4049_vm0, %v21842_v25 }
 0x504   :  { %v18375_v35 = vpop.f32.mrf.mxu0  ;;  %11434 = vmatprep.mubr.msk.bf16.mxu1 %vm4049_vm0, %v21842_v25  ;;  %v18379_v56 = vpop.f32.mrf.mxu1 }
 0x506   :  { %v18383_v34 = vpop.f32.mrf.mxu0  ;;  %v18385_v6 = vpop.f32.mrf.mxu1 }
 0x508   :  { %v18389_v31 = vpop.f32.mrf.mxu0  ;;  %v18391_v12 = vpop.f32.mrf.mxu1 }
 0x50a   :  { %v18395_v25 = vpop.f32.mrf.mxu0  ;;  %7705 = vmatmul.mubr.bf16.gmra.mxu0 %v21843_v19  ;;  %v18398_v33 = vpop.f32.mrf.mxu1 }
 0x50b   :  { %7898 = vmatmul.mubr.bf16.gmra.mxu1 %v21843_v19  ;;  %11419 = vmatprep.mubr.msk.bf16.mxu0 %vm4049_vm0, %v21844_v41 }
 0x50c   :  { %v18405_v51 = vpop.f32.mrf.mxu0  ;;  %11435 = vmatprep.mubr.msk.bf16.mxu1 %vm4049_vm0, %v21844_v41  ;;  %v18409_v57 = vpop.f32.mrf.mxu1 }
 0x50e   :  { %v18413_v54 = vpop.f32.mrf.mxu0  ;;  %v18415_v21 = vpop.f32.mrf.mxu1 }
 0x510   :  { %v18419_v4 = vpop.f32.mrf.mxu0  ;;  %v18421_v43 = vpop.f32.mrf.mxu1 }
 0x512   :  { %v18425_v41 = vpop.f32.mrf.mxu0  ;;  %7715 = vmatmul.mubr.bf16.gmra.mxu0 %v21845_v45  ;;  %v18428_v29 = vpop.f32.mrf.mxu1 }
 0x513   :  { %7908 = vmatmul.mubr.bf16.gmra.mxu1 %v21845_v45  ;;  %11420 = vmatprep.mubr.msk.bf16.mxu0 %vm4049_vm0, %v21846_v37 }
 0x514   :  { %v18435_v32 = vpop.f32.mrf.mxu0  ;;  %11436 = vmatprep.mubr.msk.bf16.mxu1 %vm4049_vm0, %v21846_v37  ;;  %v18439_v49 = vpop.f32.mrf.mxu1 }
 0x516   :  { %v18443_v26 = vpop.f32.mrf.mxu0  ;;  %v18445_v44 = vpop.f32.mrf.mxu1 }
 0x518   :  { %v18449_v28 = vpop.f32.mrf.mxu0  ;;  %v18451_v19 = vpop.f32.mrf.mxu1 }
 0x51a   :  { %v7260_v37 = vpop.f32.mrf.mxu0  ;;  %7725 = vmatmul.mubr.bf16.gmra.mxu0 %v21847_v22  ;;  %v18458_v62 = vpop.f32.mrf.mxu1 }
 0x51b   :  { %v18456_v30 = vmax.f32 %v7260_v37, %v8762_v55  ;;  %7918 = vmatmul.mubr.bf16.gmra.mxu1 %v21847_v22  ;;  %11421 = vmatprep.mubr.msk.bf16.mxu0 %vm4049_vm0, %v21848_v17  ;;  %v21852_v22 = vld [vmem:[#allocation21_spill] sm:$0xff] }
 0x51c   :  { %v7262_v45 = vpop.f32.mrf.mxu0  ;;  %11437 = vmatprep.mubr.msk.bf16.mxu1 %vm4049_vm0, %v21848_v17  ;;  %v18472_v55 = vpop.f32.mrf.mxu1 }
 0x51d   :  { %v18470_v13 = vmax.f32 %v7262_v45, %v21849_v39  ;;  %v21851_v39 = vmax.f32 %v18359_v58, %v18361_v27  ;;  %v21854_v58 = vld [vmem:[#allocation11_spill] sm:$0xff] }
 0x51e   :  { %v7264_v37 = vpop.f32.mrf.mxu0  ;;  %v18481_v17 = vpop.f32.mrf.mxu1 }
 0x51f   :  { %v18479_v14 = vmax.f32 %v7264_v37, %v21850_v7  ;;  %v21853_v7 = vmax.f32 %v18365_v18, %v18368_v23 }
 0x520   :  { %v7266_v1 = vpop.f32.mrf.mxu0  ;;  %v18490_v38 = vpop.f32.mrf.mxu1 }
 0x521   :  { %v18488_v36 = vmax.f32 %v7266_v1, %v21851_v39  ;;  %v21855_v39 = vmax.f32 %v18375_v35, %v18379_v56  ;;  %v21857_v35 = vmax.f32 %v18389_v31, %v18391_v12  ;;  %v21860_v31 = vld [vmem:[#allocation20_spill] sm:$0xff] }
 0x522   :  { %v7270_v45 = vpop.f32.mrf.mxu0  ;;  %7735 = vmatmul.mubr.bf16.gmra.mxu0 %v21852_v22  ;;  %v18500_v37 = vpop.f32.mrf.mxu1 }
 0x523   :  { %v18498_v61 = vmax.f32 %v7270_v45, %v21853_v7  ;;  %7928 = vmatmul.mubr.bf16.gmra.mxu1 %v21852_v22  ;;  %11422 = vmatprep.mubr.msk.bf16.mxu0 %vm4049_vm0, %v21854_v58  ;;  %v21856_v7 = vmax.f32 %v18383_v34, %v18385_v6  ;;  %v21858_v22 = vld [vmem:[#allocation14_spill] sm:$0xff]  ;;  %v21859_v34 = vmax.f32 %v18395_v25, %v18398_v33 }
 0x524   :  { %v7272_v1 = vpop.f32.mrf.mxu0  ;;  %11438 = vmatprep.mubr.msk.bf16.mxu1 %vm4049_vm0, %v21854_v58  ;;  %v18514_v18 = vpop.f32.mrf.mxu1 }
 0x525   :  { %v18512_v23 = vmax.f32 %v7272_v1, %v21855_v39 }
 0x526   :  { %v7274_v45 = vpop.f32.mrf.mxu0  ;;  %v18523_v58 = vpop.f32.mrf.mxu1 }
 0x527   :  { %v18521_v11 = vmax.f32 %v7274_v45, %v21856_v7 }
 0x528   :  { %v7276_v3 = vpop.f32.mrf.mxu0  ;;  %v18532_v1 = vpop.f32.mrf.mxu1 }
 0x529   :  { %v18530_v56 = vmax.f32 %v7276_v3, %v21857_v35  ;;  %v21861_v35 = vmax.f32 %v18405_v51, %v18409_v57  ;;  %v21863_v57 = vmax.f32 %v18419_v4, %v18421_v43  ;;  %v21866_v4 = vld [vmem:[#allocation23_spill] sm:$0xff] }
 0x52a   :  { %v7280_v39 = vpop.f32.mrf.mxu0  ;;  %7745 = vmatmul.mubr.bf16.gmra.mxu0 %v21858_v22  ;;  %v18542_v7 = vpop.f32.mrf.mxu1 }
 0x52b   :  { %v18540_v45 = vmax.f32 %v7280_v39, %v21859_v34  ;;  %7938 = vmatmul.mubr.bf16.gmra.mxu1 %v21858_v22  ;;  %11423 = vmatprep.mubr.msk.bf16.mxu0 %vm4049_vm0, %v21860_v31  ;;  %v21862_v34 = vmax.f32 %v18413_v54, %v18415_v21  ;;  %v21864_v22 = vld [vmem:[#allocation63_spill] sm:$0xff]  ;;  %v21865_v21 = vmax.f32 %v18425_v41, %v18428_v29 }
 0x52c   :  { %v7282_v12 = vpop.f32.mrf.mxu0  ;;  %11439 = vmatprep.mubr.msk.bf16.mxu1 %vm4049_vm0, %v21860_v31  ;;  %v18556_v25 = vpop.f32.mrf.mxu1 }
 0x52d   :  { %v18554_v33 = vmax.f32 %v7282_v12, %v21861_v35 }
 0x52e   :  { %v7284_v39 = vpop.f32.mrf.mxu0  ;;  %v18565_v31 = vpop.f32.mrf.mxu1 }
 0x52f   :  { %v18563_v6 = vmax.f32 %v7284_v39, %v21862_v34 }
 0x530   :  { %v7286_v27 = vpop.f32.mrf.mxu0  ;;  %v18574_v12 = vpop.f32.mrf.mxu1 }
 0x531   :  { %v18572_v51 = vmax.f32 %v7286_v27, %v21863_v57  ;;  %v21867_v57 = vmax.f32 %v18435_v32, %v18439_v49  ;;  %v21869_v49 = vmax.f32 %v18449_v28, %v18451_v19  ;;  %v21872_v19 = vld [vmem:[#allocation15_spill] sm:$0xff] }
 0x532   :  { %v7290_v35 = vpop.f32.mrf.mxu0  ;;  %7755 = vmatmul.mubr.bf16.gmra.mxu0 %v21864_v22  ;;  %v18584_v34 = vpop.f32.mrf.mxu1 }
 0x533   :  { %v18582_v39 = vmax.f32 %v7290_v35, %v21865_v21  ;;  %7948 = vmatmul.mubr.bf16.gmra.mxu1 %v21864_v22  ;;  %11440 = vmatprep.mubr.msk.bf16.mxu0 %vm4049_vm0, %v21866_v4  ;;  %v21868_v21 = vmax.f32 %v18443_v26, %v18445_v44  ;;  %v847_v22 = vld [vmem:[#allocation4 + $0x1b0] sm:$0xff]  ;;  %v21871_v44 = vmax.f32 %v18458_v62, %v18456_v30 }
 0x534   :  { %v7292_v43 = vpop.f32.mrf.mxu0  ;;  %11456 = vmatprep.mubr.msk.bf16.mxu1 %vm4049_vm0, %v21866_v4  ;;  %v18598_v41 = vpop.f32.mrf.mxu1  ;;  %v21873_v62 = vmax.f32 %v18472_v55, %v18470_v13 }
 0x535   :  { %v18596_v29 = vmax.f32 %v7292_v43, %v21867_v57  ;;  %v823_v57 = vld [vmem:[#allocation4 + $0xd0] sm:$0xff] }
 0x536   :  { %v7294_v35 = vpop.f32.mrf.mxu0  ;;  %v18607_v4 = vpop.f32.mrf.mxu1  ;;  %v18658_v55 = vcombine.low %v823_v57, %v847_v22 }
 0x537   :  { %v18605_v54 = vmax.f32 %v7294_v35, %v21868_v21 }
 0x538   :  { %v7296_v3 = vpop.f32.mrf.mxu0  ;;  %v18616_v43 = vpop.f32.mrf.mxu1 }
 0x539   :  { %v18614_v32 = vmax.f32 %v7296_v3, %v21869_v49  ;;  %v18633_v3 = vcombine.high %v823_v57, %v847_v22  ;;  %v21874_v49 = vmax.f32 %v18481_v17, %v18479_v14  ;;  %v295_v17 = vld [vmem:[#allocation4 + $0x278] sm:$0xff]  ;;  %v21876_v22 = vld [vmem:[#allocation19_spill] sm:$0xff]  ;;  %v21877_v57 = vmax.f32 %v18500_v37, %v18498_v61 }
 0x53a   :  { %v7300_v53 = vpop.f32.mrf.mxu0  ;;  %7991 = vmatmul.mubr.bf16.vlgmr.msra.gmra.mxu0 %v21870_v59  ;;  %v18626_v21 = vpop.f32.mrf.mxu1  ;;  %v21879_v37 = vmax.f32 %v18514_v18, %v18512_v23  ;;  %v21880_v61 = vmax.f32 %v18523_v58, %v18521_v11 }
 0x53b   :  { %v18624_v35 = vmax.f32 %v7300_v53, %v21871_v44  ;;  %8184 = vmatmul.mubr.bf16.vlgmr.msra.gmra.mxu1 %v21870_v59  ;;  %8345 = vmatpush1.bf16.msra.mxu0 %v18100_v8 }
 0x53c   :  { %v7302_v28 = vpop.f32.mrf.mxu0  ;;  %8346 = vmatprep.subr.bf16.mxu0 %v18121_v63  ;;  %11441 = vmatprep.mubr.msk.bf16.mxu0 %vm4049_vm0, %v21872_v19  ;;  %v18642_v53 = vpop.f32.mrf.mxu1 }
 0x53d   :  { %v18640_v30 = vmax.f32 %v7302_v28, %v21873_v62  ;;  %11457 = vmatprep.mubr.msk.bf16.mxu1 %vm4049_vm0, %v21872_v19  ;;  %8538 = vmatpush1.bf16.msra.mxu1 %v18112_v2  ;;  %v21875_v62 = vmax.f32 %v18490_v38, %v18488_v36 }
 0x53e   :  { %v7304_v59 = vpop.f32.mrf.mxu0  ;;  %8539 = vmatprep.subr.bf16.mxu1 %v18633_v3  ;;  %v18655_v13 = vpop.f32.mrf.mxu1 }
 0x53f   :  { %v18653_v26 = vmax.f32 %v7304_v59, %v21874_v49  ;;  %8347 = vmatpush1.bf16.msra.mxu0 %v18144_v50  ;;  %v319_v49 = vld [vmem:[#allocation4 + $0x358] sm:$0xff] }
 0x540   :  { %v7306_v28 = vpop.f32.mrf.mxu0  ;;  %8348 = vmatprep.subr.bf16.mxu0 %v17622_v60  ;;  %v18668_v14 = vpop.f32.mrf.mxu1  ;;  %v10829_v60 = vcombine.high %v295_v17, %v319_v49 }
 0x541   :  { %v18666_v44 = vmax.f32 %v7306_v28, %v21875_v62  ;;  %8540 = vmatpush1.bf16.msra.mxu1 %v18658_v55  ;;  %v296_v28 = vld [vmem:[#allocation4 + $0x280] sm:$0xff] }
 0x542   :  { %v7310_v59 = vpop.f32.mrf.mxu0  ;;  %8001 = vmatmul.mubr.bf16.gmra.mxu0 %v21876_v22  ;;  %8541 = vmatprep.subr.bf16.mxu1 %v18089_v52  ;;  %v18680_v38 = vpop.f32.mrf.mxu1  ;;  %v320_v62 = vld [vmem:[#allocation4 + $0x360] sm:$0xff]  ;;  %v21878_v52 = vld [vmem:[#allocation17_spill] sm:$0xff] }
 0x543   :  { %v18678_v36 = vmax.f32 %v7310_v59, %v21877_v57  ;;  %8194 = vmatmul.mubr.bf16.gmra.mxu1 %v21876_v22  ;;  %8349 = vmatpush1.bf16.msra.mxu0 %v17874_v42  ;;  %v21881_v57 = vmax.f32 %v18532_v1, %v18530_v56  ;;  %v10830_v58 = vcombine.low %v296_v28, %v320_v62  ;;  %v21884_v1 = vld [vmem:[#allocation25_spill] sm:$0xff] }
 0x544   :  { %v7312_v19 = vpop.f32.mrf.mxu0  ;;  %8350 = vmatprep.subr.bf16.mxu0 %v17884_v46  ;;  %11442 = vmatprep.mubr.msk.bf16.mxu0 %vm4049_vm0, %v21878_v52  ;;  %v18694_v22 = vpop.f32.mrf.mxu1  ;;  %v10831_v46 = vcombine.high %v296_v28, %v320_v62  ;;  %v21885_v28 = vld [vmem:[#allocation108_spill] sm:$0xff] }
 0x545   :  { %v18692_v59 = vmax.f32 %v7312_v19, %v21879_v37  ;;  %11458 = vmatprep.mubr.msk.bf16.mxu1 %vm4049_vm0, %v21878_v52  ;;  %8542 = vmatpush1.bf16.msra.mxu1 %v18100_v8  ;;  %v10828_v19 = vcombine.low %v295_v17, %v319_v49  ;;  %v248_v52 = vld [vmem:[#allocation4 + $0xc0] sm:$0xff] }
 0x546   :  { %v7314_v42 = vpop.f32.mrf.mxu0  ;;  %8543 = vmatprep.subr.bf16.mxu1 %v18121_v63  ;;  %v18707_v18 = vpop.f32.mrf.mxu1  ;;  %v272_v37 = vld [vmem:[#allocation4 + $0x1a0] sm:$0xff] }
 0x547   :  { %v18705_v23 = vmax.f32 %v7314_v42, %v21880_v61  ;;  %8351 = vmatpush1.bf16.msra.mxu0 %v17907_v47  ;;  %v21882_v47 = vld [vmem:[#allocation92_spill] sm:$0xff]  ;;  %v10783_v17 = vcombine.high %v248_v52, %v272_v37  ;;  %v21883_v42 = vmax.f32 %v18542_v7, %v18540_v45 }
 0x548   :  { %v7316_v8 = vpop.f32.mrf.mxu0  ;;  %8352 = vmatprep.subr.bf16.mxu0 %v10829_v60  ;;  %v18717_v11 = vpop.f32.mrf.mxu1 }
 0x549   :  { %v18715_v27 = vmax.f32 %v7316_v8, %v21881_v57  ;;  %8544 = vmatpush1.bf16.msra.mxu1 %v18144_v50  ;;  %v10782_v57 = vcombine.low %v248_v52, %v272_v37  ;;  %v21890_v37 = vmax.f32 %v18574_v12, %v18572_v51  ;;  %v21892_v51 = vld [vmem:[#allocation24_spill] sm:$0xff]  ;;  %v872_v12 = vld [vmem:[#allocation4 + $0x298] sm:$0xff] }
 0x54a   :  { %v7320_v61 = vpop.f32.mrf.mxu0  ;;  %8011 = vmatmul.mubr.bf16.gmra.mxu0 %v21882_v47  ;;  %8545 = vmatprep.subr.bf16.mxu1 %v10831_v46  ;;  %v18728_v56 = vpop.f32.mrf.mxu1  ;;  %v21886_v46 = vmax.f32 %v18556_v25, %v18554_v33  ;;  %v21888_v25 = vld [vmem:[#allocation26_spill] sm:$0xff] }
 0x54b   :  { %v9293_v49 = vmax.f32 %v18717_v11, %v18715_v27  ;;  %v18726_v63 = vmax.f32 %v7320_v61, %v21883_v42  ;;  %8204 = vmatmul.mubr.bf16.gmra.mxu1 %v21882_v47  ;;  %8353 = vmatpush1.bf16.msra.mxu0 %v10828_v19  ;;  %v21887_v47 = vmax.f32 %v18565_v31, %v18563_v6 }
 0x54c   :  { %v7322_v50 = vpop.f32.mrf.mxu0  ;;  %8354 = vmatprep.subr.bf16.mxu0 %v21884_v1  ;;  %11443 = vmatprep.mubr.msk.bf16.mxu0 %vm4049_vm0, %v21885_v28  ;;  %v18741_v7 = vpop.f32.mrf.mxu1  ;;  %v80_v1 = vld [vmem:[#allocation4 + $0x198] sm:$0xff] }
 0x54d   :  { %v9340_v62 = vmax.f32 %v18728_v56, %v18726_v63  ;;  %v18739_v45 = vmax.f32 %v7322_v50, %v21886_v46  ;;  %11459 = vmatprep.mubr.msk.bf16.mxu1 %vm4049_vm0, %v21885_v28  ;;  %8546 = vmatpush1.bf16.msra.mxu1 %v10830_v58  ;;  %v56_v50 = vld [vmem:[#allocation4 + $0xb8] sm:$0xff]  ;;  %v21889_v28 = vld [vmem:[#allocation16_spill] sm:$0xff] }
 0x54e   :  { %v7324_v8 = vpop.f32.mrf.mxu0  ;;  %8547 = vmatprep.subr.bf16.mxu1 %v10783_v17  ;;  %v18752_v33 = vpop.f32.mrf.mxu1  ;;  %v10687_v17 = vcombine.high %v56_v50, %v80_v1 }
 0x54f   :  { %v9341_v61 = vmax.f32 %v18741_v7, %v18739_v45  ;;  %v18750_v42 = vmax.f32 %v7324_v8, %v21887_v47  ;;  %8355 = vmatpush1.bf16.msra.mxu0 %v21888_v25  ;;  %v21891_v47 = vmax.f32 %v18584_v34, %v18582_v39  ;;  %v21894_v39 = vmax.f32 %v18598_v41, %v18596_v29  ;;  %v824_v41 = vld [vmem:[#allocation4 + $0xd8] sm:$0xff] }
 0x550   :  { %v7326_v46 = vpop.f32.mrf.mxu0  ;;  %8356 = vmatprep.subr.bf16.mxu0 %v21889_v28  ;;  %v18763_v6 = vpop.f32.mrf.mxu1 }
 0x551   :  { %v9388_v52 = vmax.f32 %v18752_v33, %v18750_v42  ;;  %v18761_v58 = vmax.f32 %v7326_v46, %v21890_v37  ;;  %8548 = vmatpush1.bf16.msra.mxu1 %v10782_v57  ;;  %v896_v57 = vld [vmem:[#allocation4 + $0x378] sm:$0xff] }
 0x552   :  { %v7330_v31 = vpop.f32.mrf.mxu0  ;;  %8021 = vmatmul.mubr.bf16.gmra.mxu0 %v18056_v40  ;;  %8549 = vmatprep.subr.bf16.mxu1 %v10829_v60  ;;  %v18773_v28 = vpop.f32.mrf.mxu1  ;;  %v21893_v37 = vld [vmem:[#allocation101_spill] sm:$0xff]  ;;  %v21895_v60 = vmax.f32 %v18607_v4, %v18605_v54  ;;  %v11118_v4 = vcombine.low %v872_v12, %v896_v57 }
 0x553   :  { %v18771_v25 = vmax.f32 %v7330_v31, %v21891_v47  ;;  %8214 = vmatmul.mubr.bf16.gmra.mxu1 %v18056_v40  ;;  %8357 = vmatpush1.bf16.msra.mxu0 %v21892_v51  ;;  %v10686_v40 = vcombine.low %v56_v50, %v80_v1  ;;  %v11119_v51 = vcombine.high %v872_v12, %v896_v57  ;;  %v21899_v12 = vld [vmem:[#allocation118_spill] sm:$0xff] }
 0x554   :  { %v7332_v46 = vpop.f32.mrf.mxu0  ;;  %8358 = vmatprep.subr.bf16.mxu0 %v21893_v37  ;;  %11444 = vmatprep.mubr.msk.bf16.mxu0 %vm4049_vm0, %v18073_v48  ;;  %v18787_v31 = vpop.f32.mrf.mxu1  ;;  %v21896_v50 = vmax.f32 %v18616_v43, %v18614_v32  ;;  %v21909_v45 = vmax.f32 %v18763_v6, %v18761_v58 }
 0x555   :  { %v18785_v34 = vmax.f32 %v7332_v46, %v21894_v39  ;;  %11460 = vmatprep.mubr.msk.bf16.mxu1 %vm4049_vm0, %v18073_v48  ;;  %8550 = vmatpush1.bf16.msra.mxu1 %v10828_v19  ;;  %v848_v46 = vld [vmem:[#allocation4 + $0x1b8] sm:$0xff]  ;;  %v21898_v39 = vmax.f32 %v18626_v21, %v18624_v35  ;;  %v21900_v35 = vmax.f32 %v18642_v53, %v18640_v30  ;;  %v21902_v53 = vld [vmem:[#allocation98_spill] sm:$0xff] }
 0x556   :  { %v7334_v47 = vpop.f32.mrf.mxu0  ;;  %8551 = vmatprep.subr.bf16.mxu1 %v10687_v17  ;;  %v18798_v29 = vpop.f32.mrf.mxu1  ;;  %v21910_v33 = vmax.f32 %v18773_v28, %v18771_v25 }
 0x557   :  { %v9437_v37 = vmax.f32 %v18787_v31, %v18785_v34  ;;  %v18796_v8 = vmax.f32 %v7334_v47, %v21895_v60  ;;  %8359 = vmatpush1.bf16.msra.mxu0 %v18021_v5  ;;  %v21897_v60 = vld [vmem:[#allocation111_spill] sm:$0xff]  ;;  %v11071_v5 = vcombine.high %v824_v41, %v848_v46 }
 0x558   :  { %v7336_v48 = vpop.f32.mrf.mxu0  ;;  %8372 = vmatprep.subr.bf16.mxu0 %v18155_v24  ;;  %v18809_v54 = vpop.f32.mrf.mxu1 }
 0x559   :  { %v9484_v19 = vmax.f32 %v18798_v29, %v18796_v8  ;;  %v18807_v1 = vmax.f32 %v7336_v48, %v21896_v50  ;;  %8552 = vmatpush1.bf16.msra.mxu1 %v10686_v40  ;;  %v21901_v48 = vmax.f32 %v18655_v13, %v18653_v26  ;;  %v18990_v8 = vld [vmem:[%s20687_s1 + $0x80] ss:$8 sps:$4 sm:$0xff]  }
 0x55a   :  { %v7340_v17 = vpop.f32.mrf.mxu0  ;;  %8031 = vmatmul.mubr.bf16.gmra.mxu0 %v21897_v60  ;;  %8565 = vmatprep.subr.bf16.mxu1 %v11119_v51  ;;  %v18819_v32 = vpop.f32.mrf.mxu1 }
 0x55b   :  { %v9485_v24 = vmax.f32 %v18809_v54, %v18807_v1  ;;  %v18817_v47 = vmax.f32 %v7340_v17, %v21898_v39  ;;  %8224 = vmatmul.mubr.bf16.gmra.mxu1 %v21897_v60  ;;  %8373 = vmatpush2.bf16.msra.mxu0 %v18112_v2  ;;  %v11070_v2 = vcombine.low %v824_v41, %v848_v46  ;;  %v21903_v17 = vld [vmem:[#allocation97_spill] sm:$0xff] }
 0x55c   :  { %v7342_v43 = vpop.f32.mrf.mxu0  ;;  %8374 = vmatprep.subr.bf16.mxu0 %v18633_v3  ;;  %11445 = vmatprep.mubr.msk.bf16.mxu0 %vm4049_vm0, %v21899_v12  ;;  %v18833_v40 = vpop.f32.mrf.mxu1  ;;  %v21904_v60 = vmax.f32 %v21902_v53, %v21903_v17  ;;  %v21905_v46 = vmax.f32 %v18668_v14, %v18666_v44  ;;  %v21906_v39 = vmax.f32 %v18680_v38, %v18678_v36  ;;  %v19001_v1 = vld [vmem:[%s20687_s1 + $0x94] ss:$8 sps:$4 sm:$0xff]  }
 0x55d   :  { %v18831_v21 = vmax.f32 %v7342_v43, %v21900_v35  ;;  %11461 = vmatprep.mubr.msk.bf16.mxu1 %vm4049_vm0, %v21899_v12  ;;  %8566 = vmatpush2.bf16.msra.mxu1 %v11118_v4  ;;  %v21907_v35 = vmax.f32 %v18694_v22, %v18692_v59 }
 0x55e   :  { %v7344_v51 = vpop.f32.mrf.mxu0  ;;  %8567 = vmatprep.subr.bf16.mxu1 %v11071_v5  ;;  %v18844_v30 = vpop.f32.mrf.mxu1 }
 0x55f   :  { %v18842_v50 = vmax.f32 %v7344_v51, %v21901_v48  ;;  %8375 = vmatpush2.bf16.msra.mxu0 %v18658_v55  ;;  %v21908_v51 = vmax.f32 %v18707_v18, %v18705_v23 }
 0x560   :  { %10380 = vmatprep.subr.mxu0 %v21904_v60  ;;  %v7346_v4 = vpop.f32.mrf.mxu0  ;;  %v18857_v26 = vpop.f32.mrf.mxu1 }
 0x561   :  { %v18855_v5 = vmax.f32 %v7346_v4, %v21905_v46  ;;  %8568 = vmatpush2.bf16.msra.mxu1 %v11070_v2 }
 0x562   :  { %v7350_v13 = vpop.f32.mrf.mxu0  ;;  %8041 = vmatmul.mubr.bf16.gmra.mxu0 %v18177_v15  ;;  %v18867_v12 = vpop.f32.mrf.mxu1 }
 0x563   :  { %v18865_v43 = vmax.f32 %v7350_v13, %v21906_v39  ;;  %8234 = vmatmul.mubr.bf16.gmra.mxu1 %v18177_v15  ;;  %11446 = vmatprep.mubr.msk.bf16.mxu0 %vm4049_vm0, %v18196_v9 }
 0x564   :  { %v7352_v44 = vpop.f32.mrf.mxu0  ;;  %11462 = vmatprep.mubr.msk.bf16.mxu1 %vm4049_vm0, %v18196_v9  ;;  %v18881_v38 = vpop.f32.mrf.mxu1 }
 0x565   :  { %v10142_v14 = vmax.f32 %v18867_v12, %v18865_v43  ;;  %v18879_v36 = vmax.f32 %v7352_v44, %v21907_v35 }
 0x566   :  { %v7354_v2 = vpop.f32.mrf.mxu0  ;;  %v18890_v9 = vpop.f32.mrf.mxu1 }
 0x567   :  { %v10143_v15 = vmax.f32 %v18881_v38, %v18879_v36  ;;  %v18888_v48 = vmax.f32 %v7354_v2, %v21908_v51 }
 0x568   :  { %v7356_v53 = vpop.f32.mrf.mxu0  ;;  %v18899_v22 = vpop.f32.mrf.mxu1 }
 0x569   :  { %v10144_v17 = vmax.f32 %v18890_v9, %v18888_v48  ;;  %v18897_v59 = vmax.f32 %v7356_v53, %v9293_v49  ;;  %v19070_v48 = vld [vmem:[%s20687_s1 + $0xa0] ss:$8 sps:$4 sm:$0xff]  }
 0x56a   :  { %v7360_v60 = vpop.f32.mrf.mxu0  ;;  %8051 = vmatmul.mubr.bf16.gmra.mxu0 %v18232_v0  ;;  %v18909_v4 = vpop.f32.mrf.mxu1 }
 0x56b   :  { %v10145_v23 = vmax.f32 %v18899_v22, %v18897_v59  ;;  %v18907_v18 = vmax.f32 %v7360_v60, %v9340_v62  ;;  %8244 = vmatmul.mubr.bf16.gmra.mxu1 %v18232_v0  ;;  %11447 = vmatprep.mubr.msk.bf16.mxu0 %vm4049_vm0, %v18248_v10  ;;  %v19086_v59 = vld [vmem:[%s20687_s1 + $0xb4] ss:$8 sps:$4 sm:$0xff]  }
 0x56c   :  { %v7362_v27 = vpop.f32.mrf.mxu0  ;;  %11463 = vmatprep.mubr.msk.bf16.mxu1 %vm4049_vm0, %v18248_v10  ;;  %v18923_v49 = vpop.f32.mrf.mxu1 }
 0x56d   :  { %v10146_v11 = vmax.f32 %v18909_v4, %v18907_v18  ;;  %v18921_v63 = vmax.f32 %v7362_v27, %v9341_v61 }
 0x56e   :  { %v7364_v56 = vpop.f32.mrf.mxu0  ;;  %v18932_v10 = vpop.f32.mrf.mxu1 }
 0x56f   :  { %v10147_v0 = vmax.f32 %v18923_v49, %v18921_v63  ;;  %v18930_v62 = vmax.f32 %v7364_v56, %v9388_v52 }
 0x570   :  { %v7366_v46 = vpop.f32.mrf.mxu0  ;;  %v18941_v61 = vpop.f32.mrf.mxu1 }
 0x571   :  { %v10148_v13 = vmax.f32 %v18932_v10, %v18930_v62  ;;  %v18939_v7 = vmax.f32 %v7366_v46, %v21909_v45  ;;  %v19122_v62 = vld [vmem:[%s20687_s1 + $0xb0] ss:$8 sps:$4 sm:$0xff]  }
 0x572   :  { %v7370_v39 = vpop.f32.mrf.mxu0  ;;  %8061 = vmatmul.mubr.bf16.gmra.mxu0 %v18284_v16  ;;  %v18951_v44 = vpop.f32.mrf.mxu1 }
 0x573   :  { %v10149_v42 = vmax.f32 %v18941_v61, %v18939_v7  ;;  %v18949_v52 = vmax.f32 %v7370_v39, %v21910_v33  ;;  %8254 = vmatmul.mubr.bf16.gmra.mxu1 %v18284_v16  ;;  %11448 = vmatprep.mubr.msk.bf16.mxu0 %vm4049_vm0, %v18300_v20  ;;  %v19024_v39 = vld [vmem:[%s20687_s1 + $0x90] ss:$8 sps:$4 sm:$0xff]   ;;  %v19138_v61 = vld [vmem:[%s20687_s1 + $0xc4] ss:$8 sps:$4 sm:$0xff]  }
 0x574   :  { %v7372_v58 = vpop.f32.mrf.mxu0  ;;  %11464 = vmatprep.mubr.msk.bf16.mxu1 %vm4049_vm0, %v18300_v20  ;;  %v18965_v28 = vpop.f32.mrf.mxu1 }
 0x575   :  { %v10150_v6 = vmax.f32 %v18951_v44, %v18949_v52  ;;  %v18963_v25 = vmax.f32 %v7372_v58, %v9437_v37  ;;  %v19031_v58 = vld [vmem:[%s20687_s1 + $0xa4] ss:$8 sps:$4 sm:$0xff]  }
 0x576   :  { %v7374_v35 = vpop.f32.mrf.mxu0  ;;  %v18974_v20 = vpop.f32.mrf.mxu1 }
 0x577   :  { %v10151_v16 = vmax.f32 %v18965_v28, %v18963_v25  ;;  %v18972_v2 = vmax.f32 %v7374_v35, %v9484_v19 }
 0x578   :  { %v7376_v51 = vpop.f32.mrf.mxu0  ;;  %v18983_v31 = vpop.f32.mrf.mxu1 }
 0x579   :  { %v10152_v53 = vmax.f32 %v18974_v20, %v18972_v2  ;;  %v18981_v34 = vmax.f32 %v7376_v51, %v9485_v24  ;;  %v19174_v2 = vld [vmem:[%s20687_s1 + $0xc0] ss:$8 sps:$4 sm:$0xff]  }
 0x57a   :  { %v18985_v37 = vpop.f32.mrf.mxu0  ;;  %8071 = vmatmul.mubr.bf16.gmra.mxu0 %v18990_v8  ;;  %v18995_v19 = vpop.f32.mrf.mxu1 }
 0x57b   :  { %v10153_v29 = vmax.f32 %v18983_v31, %v18981_v34  ;;  %8264 = vmatmul.mubr.bf16.gmra.mxu1 %v18990_v8  ;;  %11449 = vmatprep.mubr.msk.bf16.mxu0 %vm4049_vm0, %v19001_v1  ;;  %v19184_v34 = vld [vmem:[%s20687_s1 + $0xd4] ss:$8 sps:$4 sm:$0xff]  }
 0x57c   :  { %v19005_v54 = vpop.f32.mrf.mxu0  ;;  %11465 = vmatprep.mubr.msk.bf16.mxu1 %vm4049_vm0, %v19001_v1  ;;  %v19009_v24 = vpop.f32.mrf.mxu1 }
 0x57e   :  { %v19011_v60 = vpop.f32.mrf.mxu0  ;;  %v19013_v27 = vpop.f32.mrf.mxu1 }
 0x580   :  { %v19015_v56 = vpop.f32.mrf.mxu0  ;;  %v19017_v46 = vpop.f32.mrf.mxu1 }
 0x582   :  { %v19019_v45 = vpop.f32.mrf.mxu0  ;;  %8081 = vmatmul.mubr.bf16.gmra.mxu0 %v19024_v39  ;;  %v7809_v33 = vpop.f32.mrf.mxu1 }
 0x583   :  { %8274 = vmatmul.mubr.bf16.gmra.mxu1 %v19024_v39  ;;  %11450 = vmatprep.mubr.msk.bf16.mxu0 %vm4049_vm0, %v19031_v58  ;;  %v19038_v35 = vmax.f32 %v7809_v33, %v10142_v14 }
 0x584   :  { %v7618_v51 = vpop.f32.mrf.mxu0  ;;  %11466 = vmatprep.mubr.msk.bf16.mxu1 %vm4049_vm0, %v19031_v58  ;;  %v19047_v41 = vpop.f32.mrf.mxu1 }
 0x585   :  { %v19045_v55 = vmax.f32 %v7618_v51, %v10143_v15 }
 0x586   :  { %v7620_v3 = vpop.f32.mrf.mxu0  ;;  %v19056_v12 = vpop.f32.mrf.mxu1 }
 0x587   :  { %v19054_v43 = vmax.f32 %v7620_v3, %v10144_v17 }
 0x588   :  { %v7622_v14 = vpop.f32.mrf.mxu0  ;;  %v19065_v38 = vpop.f32.mrf.mxu1 }
 0x589   :  { %v19063_v36 = vmax.f32 %v7622_v14, %v10145_v23  ;;  %v21912_v23 = vmax.f32 %v18833_v40, %v18831_v21  ;;  %v19213_v21 = vld [vmem:[%s20687_s1 + $0xd0] ss:$8 sps:$4 sm:$0xff]  }
 0x58a   :  { %v7626_v15 = vpop.f32.mrf.mxu0  ;;  %8091 = vmatmul.mubr.bf16.gmra.mxu0 %v19070_v48  ;;  %v19080_v17 = vpop.f32.mrf.mxu1 }
 0x58b   :  { %v19078_v9 = vmax.f32 %v7626_v15, %v10146_v11  ;;  %8284 = vmatmul.mubr.bf16.gmra.mxu1 %v19070_v48  ;;  %11451 = vmatprep.mubr.msk.bf16.mxu0 %vm4049_vm0, %v19086_v59 }
 0x58c   :  { %v7628_v22 = vpop.f32.mrf.mxu0  ;;  %11467 = vmatprep.mubr.msk.bf16.mxu1 %vm4049_vm0, %v19086_v59  ;;  %v19099_v4 = vpop.f32.mrf.mxu1 }
 0x58d   :  { %v19097_v18 = vmax.f32 %v7628_v22, %v10147_v0 }
 0x58e   :  { %v7630_v11 = vpop.f32.mrf.mxu0  ;;  %v19108_v15 = vpop.f32.mrf.mxu1 }
 0x58f   :  { %v19106_v14 = vmax.f32 %v7630_v11, %v10148_v13 }
 0x590   :  { %v7632_v3 = vpop.f32.mrf.mxu0  ;;  %v19117_v49 = vpop.f32.mrf.mxu1 }
 0x591   :  { %v19115_v63 = vmax.f32 %v7632_v3, %v10149_v42 }
 0x592   :  { %v7636_v0 = vpop.f32.mrf.mxu0  ;;  %8101 = vmatmul.mubr.bf16.gmra.mxu0 %v19122_v62  ;;  %v19132_v7 = vpop.f32.mrf.mxu1 }
 0x593   :  { %v19130_v13 = vmax.f32 %v7636_v0, %v10150_v6  ;;  %8294 = vmatmul.mubr.bf16.gmra.mxu1 %v19122_v62  ;;  %11452 = vmatprep.mubr.msk.bf16.mxu0 %vm4049_vm0, %v19138_v61 }
 0x594   :  { %v7638_v42 = vpop.f32.mrf.mxu0  ;;  %11468 = vmatprep.mubr.msk.bf16.mxu1 %vm4049_vm0, %v19138_v61  ;;  %v19151_v6 = vpop.f32.mrf.mxu1 }
 0x595   :  { %v19149_v44 = vmax.f32 %v7638_v42, %v10151_v16 }
 0x596   :  { %v7640_v3 = vpop.f32.mrf.mxu0  ;;  %v19160_v0 = vpop.f32.mrf.mxu1 }
 0x597   :  { %v19158_v11 = vmax.f32 %v7640_v3, %v10152_v53 }
 0x598   :  { %v7642_v10 = vpop.f32.mrf.mxu0  ;;  %v19169_v28 = vpop.f32.mrf.mxu1 }
 0x599   :  { %v19167_v25 = vmax.f32 %v7642_v10, %v10153_v29 }
 0x59a   :  { %v7646_v16 = vpop.f32.mrf.mxu0  ;;  %8111 = vmatmul.mubr.bf16.gmra.mxu0 %v19174_v2  ;;  %v7839_v42 = vpop.f32.mrf.mxu1 }
 0x59b   :  { %v8766_v53 = vmax.f32 %v18985_v37, %v7646_v16  ;;  %8304 = vmatmul.mubr.bf16.gmra.mxu1 %v19174_v2  ;;  %11453 = vmatprep.mubr.msk.bf16.mxu0 %vm4049_vm0, %v19184_v34  ;;  %v8768_v31 = vmax.f32 %v18995_v19, %v7839_v42  ;;  %v21911_v37 = vmax.f32 %v18819_v32, %v18817_v47 }
 0x59c   :  { %v7648_v29 = vpop.f32.mrf.mxu0  ;;  %11469 = vmatprep.mubr.msk.bf16.mxu1 %vm4049_vm0, %v19184_v34  ;;  %v7841_v16 = vpop.f32.mrf.mxu1  ;;  %v21913_v32 = vmax.f32 %v18844_v30, %v18842_v50 }
 0x59d   :  { %v9150_v10 = vmax.f32 %v8766_v53, %v21911_v37  ;;  %v8767_v3 = vmax.f32 %v19005_v54, %v7648_v29  ;;  %v8769_v20 = vmax.f32 %v19009_v24, %v7841_v16 }
 0x59e   :  { %v7650_v52 = vpop.f32.mrf.mxu0  ;;  %v7843_v51 = vpop.f32.mrf.mxu1 }
 0x59f   :  { %v19196_v22 = vmax.f32 %v8768_v31, %v9150_v10  ;;  %v9151_v19 = vmax.f32 %v8767_v3, %v21912_v23  ;;  %v8814_v42 = vmax.f32 %v19011_v60, %v7650_v52  ;;  %v8816_v33 = vmax.f32 %v19013_v27, %v7843_v51  ;;  %v19228_v27 = vld [vmem:[%s20687_s1 + $0xe4] ss:$8 sps:$4 sm:$0xff]  }
 0x5a0   :  { %v7652_v57 = vpop.f32.mrf.mxu0  ;;  %v7845_v53 = vpop.f32.mrf.mxu1  ;;  %v21914_v60 = vmax.f32 %v18857_v26, %v18855_v5 }
 0x5a1   :  { %v19203_v47 = vmax.f32 %v8769_v20, %v9151_v19  ;;  %v9198_v54 = vmax.f32 %v8814_v42, %v21913_v32  ;;  %v8815_v24 = vmax.f32 %v19015_v56, %v7652_v57  ;;  %v8817_v31 = vmax.f32 %v19017_v46, %v7845_v53 }
 0x5a2   :  { %v7656_v29 = vpop.f32.mrf.mxu0  ;;  %8121 = vmatmul.mubr.bf16.gmra.mxu0 %v19213_v21  ;;  %v21915_v46 = vmax.f32 %v19047_v41, %v19045_v55  ;;  %v21916_v20 = vmax.f32 %v19056_v12, %v19054_v43  ;;  %v21917_v55 = vmax.f32 %v19065_v38, %v19063_v36  ;;  %v19269_v43 = vld [vmem:[%s20687_s1 + $0xe0] ss:$8 sps:$4 sm:$0xff]   ;;  %v21918_v42 = vmax.f32 %v19080_v17, %v19078_v9  ;;  %v19285_v38 = vld [vmem:[%s20687_s1 + $0xf4] ss:$8 sps:$4 sm:$0xff]  }
 0x5a3   :  { %v19216_v40 = vmax.f32 %v8816_v33, %v9198_v54  ;;  %v9199_v50 = vmax.f32 %v8815_v24, %v21914_v60  ;;  %v8862_v30 = vmax.f32 %v19019_v45, %v7656_v29  ;;  %v19222_v57 = vpop.f32.mrf.mxu1  ;;  %8314 = vmatmul.mubr.bf16.gmra.mxu1 %v19213_v21  ;;  %11454 = vmatprep.mubr.msk.bf16.mxu0 %vm4049_vm0, %v19228_v27  ;;  %v21939_v29 = vld [vmem:[#allocation85_spill] sm:$0xff]  ;;  %v21942_v9 = vld [vmem:[#allocation83_spill] sm:$0xff] }
 0x5a4   :  { %v7658_v56 = vpop.f32.mrf.mxu0  ;;  %11470 = vmatprep.mubr.msk.bf16.mxu1 %vm4049_vm0, %v19228_v27  ;;  %v21919_v17 = vmax.f32 %v19099_v4, %v19097_v18  ;;  %v21920_v60 = vmax.f32 %v19108_v15, %v19106_v14  ;;  %v21921_v18 = vmax.f32 %v19117_v49, %v19115_v63  ;;  %v19321_v14 = vld [vmem:[%s20687_s1 + $0xf0] ss:$8 sps:$4 sm:$0xff]   ;;  %v11716_v49 = vld [vmem:[%s20687_s1 + $0x4] ss:$8 sps:$4 sm:$0xff]  }
 0x5a5   :  { %v19234_v5 = vmax.f32 %v8817_v31, %v9199_v50  ;;  %v19237_v26 = vmax.f32 %v8862_v30, %v19038_v35  ;;  %v19242_v45 = vmax.f32 %v7658_v56, %v21915_v46  ;;  %v19244_v33 = vpop.f32.mrf.mxu1  ;;  %v21933_v15 = vld [vmem:[#allocation90_spill] sm:$0xff] }
 0x5a6   :  { %v7660_v23 = vpop.f32.mrf.mxu0 }
 0x5a7   :  { %v9630_v51 = vmax.f32 %v19222_v57, %v19237_v26  ;;  %v9631_v52 = vmax.f32 %v19244_v33, %v19242_v45  ;;  %v19253_v37 = vmax.f32 %v7660_v23, %v21916_v20  ;;  %v19255_v35 = vpop.f32.mrf.mxu1 }
 0x5a8   :  { %v7662_v10 = vpop.f32.mrf.mxu0 }
 0x5a9   :  { %v9678_v41 = vmax.f32 %v19255_v35, %v19253_v37  ;;  %v19262_v3 = vmax.f32 %v7662_v10, %v21917_v55  ;;  %v19264_v16 = vpop.f32.mrf.mxu1  ;;  %v21922_v10 = vmax.f32 %v19132_v7, %v19130_v13  ;;  %v21923_v13 = vmax.f32 %v19151_v6, %v19149_v44  ;;  %v21964_v37 = vld [vmem:[#allocation60_spill] sm:$0xff]  ;;  %v21965_v35 = vld [vmem:[#allocation69_spill] sm:$0xff] }
 0x5aa   :  { %v7666_v19 = vpop.f32.mrf.mxu0  ;;  %8131 = vmatmul.mubr.bf16.gmra.mxu0 %v19269_v43  ;;  %v21925_v44 = vmax.f32 %v19169_v28, %v19167_v25  ;;  %v21929_v28 = vld [vmem:[#allocation94_spill] sm:$0xff] }
 0x5ab   :  { %v9679_v12 = vmax.f32 %v19264_v16, %v19262_v3  ;;  %v19277_v32 = vmax.f32 %v7666_v19, %v21918_v42  ;;  %v19279_v36 = vpop.f32.mrf.mxu1  ;;  %8324 = vmatmul.mubr.bf16.gmra.mxu1 %v19269_v43  ;;  %11455 = vmatprep.mubr.msk.bf16.mxu0 %vm4049_vm0, %v19285_v38  ;;  %v11718_v42 = vld [vmem:[%s20687_s1 + $0x14] ss:$8 sps:$4 sm:$0xff]  }
 0x5ac   :  { %v7668_v54 = vpop.f32.mrf.mxu0  ;;  %11471 = vmatprep.mubr.msk.bf16.mxu1 %vm4049_vm0, %v19285_v38 }
 0x5ad   :  { %v19296_v24 = vmax.f32 %v7668_v54, %v21919_v17  ;;  %v19298_v53 = vpop.f32.mrf.mxu1  ;;  %v21968_v3 = vmax.f32 %v19279_v36, %v19277_v32  ;;  %v22036_v32 = vld [vmem:[#allocation141_spill] sm:$0xff] }
 0x5ae   :  { %v7670_v31 = vpop.f32.mrf.mxu0 }
 0x5af   :  { %v19305_v50 = vmax.f32 %v7670_v31, %v21920_v60  ;;  %v19307_v30 = vpop.f32.mrf.mxu1  ;;  %v21924_v60 = vmax.f32 %v19160_v0, %v19158_v11  ;;  %v11717_v11 = vld [vmem:[%s20687_s1] ss:$8 sps:$4 sm:$0xff]   ;;  %v21975_v36 = vmax.f32 %v19298_v53, %v19296_v24 }
 0x5b0   :  { %v7672_v56 = vpop.f32.mrf.mxu0 }
 0x5b1   :  { %v19314_v4 = vmax.f32 %v7672_v56, %v21921_v18  ;;  %v19316_v23 = vpop.f32.mrf.mxu1  ;;  %v21982_v24 = vmax.f32 %v19307_v30, %v19305_v50 }
 0x5b2   :  { %v7676_v20 = vpop.f32.mrf.mxu0  ;;  %8141 = vmatmul.mubr.bf16.gmra.mxu0 %v19321_v14 }
 0x5b3   :  { %v19329_v55 = vmax.f32 %v7676_v20, %v21922_v10  ;;  %v19331_v63 = vpop.f32.mrf.mxu1  ;;  %8334 = vmatmul.mubr.bf16.gmra.mxu1 %v19321_v14  ;;  %11472 = vmatprep.mubr.msk.bf16.mxu0 %vm4049_vm0, %v11716_v49  ;;  %v21927_v10 = vld [vmem:[#allocation95_spill] sm:$0xff] }
 0x5b4   :  { %v7678_v19 = vpop.f32.mrf.mxu0  ;;  %11488 = vmatprep.mubr.msk.bf16.mxu1 %vm4049_vm0, %v11716_v49 }
 0x5b5   :  { %v19344_v7 = vmax.f32 %v7678_v19, %v21923_v13  ;;  %v19346_v54 = vpop.f32.mrf.mxu1 }
 0x5b6   :  { %v7680_v17 = vpop.f32.mrf.mxu0 }
 0x5b7   :  { %v19353_v56 = vmax.f32 %v7680_v17, %v21924_v60  ;;  %v19355_v18 = vpop.f32.mrf.mxu1  ;;  %v21926_v60 = vld [vmem:[#allocation96_spill] sm:$0xff] }
 0x5b8   :  { %v7682_v20 = vpop.f32.mrf.mxu0  ;;  %v21928_v25 = vmax.f32 %v21926_v60, %v21927_v10  ;;  %v21935_v60 = vld [vmem:[#allocation88_spill] sm:$0xff] }
 0x5b9   :  { %v19362_v6 = vmax.f32 %v7682_v20, %v21925_v44  ;;  %v19364_v49 = vpop.f32.mrf.mxu1  ;;  %v21930_v20 = vld [vmem:[#allocation93_spill] sm:$0xff] }
 0x5ba   :  { %v7686_v19 = vpop.f32.mrf.mxu0  ;;  %8377 = vmatmul.mubr.bf16.vlgmr.msra.gmra.mxu0 %v11717_v11  ;;  %v21931_v44 = vmax.f32 %v21929_v28, %v21930_v20 }
 0x5bb   :  { %v9152_v13 = vmax.f32 %v7686_v19, %v19196_v22  ;;  %v7879_v17 = vpop.f32.mrf.mxu1  ;;  %8570 = vmatmul.mubr.bf16.vlgmr.msra.gmra.mxu1 %v11717_v11  ;;  %10381 = vmatpush1.msra.mxu0 %v21928_v25  ;;  %v21932_v11 = vld [vmem:[#allocation91_spill] sm:$0xff] }
 0x5bc   :  { %10382 = vmatprep.subr.mxu0 %v21931_v44  ;;  %v7688_v31 = vpop.f32.mrf.mxu0  ;;  %11473 = vmatprep.mubr.msk.bf16.mxu0 %vm4049_vm0, %v11718_v42  ;;  %v21934_v10 = vmax.f32 %v21932_v11, %v21933_v15  ;;  %v21936_v25 = vld [vmem:[#allocation87_spill] sm:$0xff] }
 0x5bd   :  { %v19382_v0 = vmax.f32 %v7879_v17, %v9152_v13  ;;  %v9153_v22 = vmax.f32 %v7688_v31, %v19203_v47  ;;  %v7881_v19 = vpop.f32.mrf.mxu1  ;;  %11489 = vmatprep.mubr.msk.bf16.mxu1 %vm4049_vm0, %v11718_v42  ;;  %v21937_v28 = vmax.f32 %v21935_v60, %v21936_v25  ;;  %v21938_v17 = vld [vmem:[#allocation86_spill] sm:$0xff]  ;;  %v21941_v31 = vld [vmem:[#allocation84_spill] sm:$0xff]  ;;  %v21944_v25 = vld [vmem:[#allocation81_spill] sm:$0xff] }
 0x5be   :  { %10383 = vmatpush1.msra.mxu0 %v21934_v10  ;;  %v7690_v20 = vpop.f32.mrf.mxu0  ;;  %v21940_v47 = vmax.f32 %v21938_v17, %v21939_v29  ;;  %v21943_v15 = vmax.f32 %v21941_v31, %v21942_v9  ;;  %v11719_v9 = vld [vmem:[%s20687_s1 + $0x10] ss:$8 sps:$4 sm:$0xff]  }
 0x5bf   :  { %10384 = vmatprep.subr.mxu0 %v21937_v28  ;;  %v19392_v44 = vmax.f32 %v7881_v19, %v9153_v22  ;;  %v9200_v46 = vmax.f32 %v7690_v20, %v19216_v40  ;;  %v7883_v13 = vpop.f32.mrf.mxu1  ;;  %v21945_v22 = vld [vmem:[#allocation80_spill] sm:$0xff]  ;;  %v21947_v40 = vld [vmem:[#allocation78_spill] sm:$0xff]  ;;  %v21948_v28 = vld [vmem:[#allocation77_spill] sm:$0xff] }
 0x5c0   :  { %10385 = vmatpush1.msra.mxu0 %v21940_v47  ;;  %v7692_v11 = vpop.f32.mrf.mxu0  ;;  %v21946_v19 = vmax.f32 %v21944_v25, %v21945_v22  ;;  %v21949_v20 = vmax.f32 %v21947_v40, %v21948_v28  ;;  %v21951_v47 = vld [vmem:[#allocation75_spill] sm:$0xff]  ;;  %v21959_v28 = vld [vmem:[#allocation53_spill] sm:$0xff] }
 0x5c1   :  { %10386 = vmatprep.subr.mxu0 %v21943_v15  ;;  %v19401_v42 = vmax.f32 %v7883_v13, %v9200_v46  ;;  %v9201_v10 = vmax.f32 %v7692_v11, %v19234_v5  ;;  %v7885_v60 = vpop.f32.mrf.mxu1  ;;  %v21950_v13 = vld [vmem:[#allocation76_spill] sm:$0xff]  ;;  %v21953_v15 = vld [vmem:[#allocation74_spill] sm:$0xff]  ;;  %v21954_v11 = vld [vmem:[#allocation73_spill] sm:$0xff] }
 0x5c2   :  { %10387 = vmatpush1.msra.mxu0 %v21946_v19  ;;  %v7696_v29 = vpop.f32.mrf.mxu0  ;;  %v21952_v31 = vmax.f32 %v21950_v13, %v21951_v47  ;;  %v21955_v25 = vmax.f32 %v21953_v15, %v21954_v11  ;;  %v21957_v19 = vld [vmem:[#allocation34_spill] sm:$0xff]  ;;  %v21963_v47 = vld [vmem:[#allocation43_spill] sm:$0xff] }
 0x5c3   :  { %10388 = vmatprep.subr.mxu0 %v21949_v20  ;;  %8387 = vmatmul.mubr.bf16.gmra.mxu0 %v11719_v9  ;;  %v19413_v17 = vmax.f32 %v7885_v60, %v9201_v10  ;;  %v19418_v5 = vmax.f32 %v7696_v29, %v9630_v51  ;;  %v19420_v46 = vpop.f32.mrf.mxu1  ;;  %v11720_v10 = vld [vmem:[%s20687_s1 + $0x24] ss:$8 sps:$4 sm:$0xff]  }
 0x5c4   :  { %8580 = vmatmul.mubr.bf16.gmra.mxu1 %v11719_v9  ;;  %10389 = vmatpush1.msra.mxu0 %v21952_v31  ;;  %v7698_v22 = vpop.f32.mrf.mxu0  ;;  %v21956_v60 = vld [vmem:[#allocation71_spill] sm:$0xff]  ;;  %v21960_v20 = vld [vmem:[#allocation50_spill] sm:$0xff] }
 0x5c5   :  { %10390 = vmatprep.subr.mxu0 %v21955_v25  ;;  %11474 = vmatprep.mubr.msk.bf16.mxu0 %vm4049_vm0, %v11720_v10  ;;  %v9632_v57 = vmax.f32 %v19420_v46, %v19418_v5  ;;  %v19437_v26 = vmax.f32 %v7698_v22, %v9631_v52  ;;  %v19439_v51 = vpop.f32.mrf.mxu1  ;;  %v21958_v40 = vmax.f32 %v21956_v60, %v21957_v19  ;;  %v21962_v52 = vld [vmem:[#allocation70_spill] sm:$0xff] }
 0x5c6   :  { %11490 = vmatprep.mubr.msk.bf16.mxu1 %vm4049_vm0, %v11720_v10  ;;  %v21961_v29 = vmax.f32 %v21959_v28, %v21960_v20  ;;  %v7700_v9 = vpop.f32.mrf.mxu0  ;;  %v11721_v60 = vld [vmem:[%s20687_s1 + $0x20] ss:$8 sps:$4 sm:$0xff]  }
 0x5c7   :  { %10391 = vmatpush1.msra.mxu0 %v21958_v40  ;;  %v9633_v13 = vmax.f32 %v19439_v51, %v19437_v26  ;;  %v19453_v45 = vmax.f32 %v7700_v9, %v9678_v41  ;;  %v19455_v33 = vpop.f32.mrf.mxu1  ;;  %v21966_v41 = vld [vmem:[#allocation68_spill] sm:$0xff]  ;;  %v21969_v40 = vld [vmem:[#allocation67_spill] sm:$0xff]  ;;  %v21970_v28 = vld [vmem:[#allocation66_spill] sm:$0xff] }
 0x5c8   :  { %10392 = vmatprep.subr.mxu0 %v21961_v29  ;;  %v7702_v31 = vpop.f32.mrf.mxu0  ;;  %v21967_v22 = vmax.f32 %v21965_v35, %v21966_v41  ;;  %v21971_v20 = vmax.f32 %v21969_v40, %v21970_v28  ;;  %v21972_v29 = vld [vmem:[#allocation65_spill] sm:$0xff]  ;;  %v21973_v9 = vld [vmem:[#allocation64_spill] sm:$0xff]  ;;  %v21976_v41 = vld [vmem:[#allocation62_spill] sm:$0xff] }
 0x5c9   :  { %10393 = vmatpush1.msra.mxu0 %v21962_v52  ;;  %v9680_v15 = vmax.f32 %v19455_v33, %v19453_v45  ;;  %v19464_v11 = vmax.f32 %v7702_v31, %v9679_v12  ;;  %v19466_v25 = vpop.f32.mrf.mxu1  ;;  %v21974_v52 = vmax.f32 %v21972_v29, %v21973_v9  ;;  %v11722_v31 = vld [vmem:[%s20687_s1 + $0x34] ss:$8 sps:$4 sm:$0xff]   ;;  %v22068_v45 = vld [vmem:[#allocation130_spill] sm:$0xff]  ;;  %v22069_v33 = vld [vmem:[#allocation127_spill] sm:$0xff] }
 0x5ca   :  { %10394 = vmatprep.subr.mxu0 %v21963_v47  ;;  %v7706_v10 = vpop.f32.mrf.mxu0  ;;  %v21983_v9 = vld [vmem:[#allocation57_spill] sm:$0xff] }
 0x5cb   :  { %10395 = vmatpush1.msra.mxu0 %v21964_v37  ;;  %v9681_v19 = vmax.f32 %v19466_v25, %v19464_v11  ;;  %v19480_v16 = vmax.f32 %v7706_v10, %v21968_v3  ;;  %v19482_v12 = vpop.f32.mrf.mxu1  ;;  %v21980_v3 = vld [vmem:[#allocation58_spill] sm:$0xff] }
 0x5cc   :  { %10396 = vmatprep.subr.mxu0 %v21967_v22  ;;  %8397 = vmatmul.mubr.bf16.gmra.mxu0 %v11721_v60  ;;  %v7708_v47 = vpop.f32.mrf.mxu0  ;;  %v21977_v22 = vld [vmem:[#allocation61_spill] sm:$0xff] }
 0x5cd   :  { %8590 = vmatmul.mubr.bf16.gmra.mxu1 %v11721_v60  ;;  %10397 = vmatpush1.msra.mxu0 %v21971_v20  ;;  %v19499_v37 = vmax.f32 %v7708_v47, %v21975_v36  ;;  %v19501_v35 = vpop.f32.mrf.mxu1  ;;  %v21978_v10 = vmax.f32 %v21976_v41, %v21977_v22  ;;  %v21979_v60 = vld [vmem:[#allocation59_spill] sm:$0xff]  ;;  %v21987_v36 = vld [vmem:[#allocation54_spill] sm:$0xff]  ;;  %v22072_v11 = vmax.f32 %v19482_v12, %v19480_v16 }
 0x5ce   :  { %10398 = vmatprep.subr.mxu0 %v21974_v52  ;;  %11475 = vmatprep.mubr.msk.bf16.mxu0 %vm4049_vm0, %v11722_v31  ;;  %v21981_v40 = vmax.f32 %v21979_v60, %v21980_v3  ;;  %v7710_v28 = vpop.f32.mrf.mxu0  ;;  %v21984_v52 = vld [vmem:[#allocation56_spill] sm:$0xff]  ;;  %v21989_v60 = vmax.f32 %v19316_v23, %v19314_v4  ;;  %v21996_v23 = vmax.f32 %v19331_v63, %v19329_v55  ;;  %v22026_v4 = vld [vmem:[#allocation147_spill] sm:$0xff] }
 0x5cf   :  { %10399 = vmatpush1.msra.mxu0 %v21978_v10  ;;  %11491 = vmatprep.mubr.msk.bf16.mxu1 %vm4049_vm0, %v11722_v31  ;;  %v19515_v53 = vmax.f32 %v7710_v28, %v21982_v24  ;;  %v19517_v29 = vpop.f32.mrf.mxu1  ;;  %v21985_v47 = vmax.f32 %v21983_v9, %v21984_v52  ;;  %v21986_v31 = vld [vmem:[#allocation55_spill] sm:$0xff]  ;;  %v21990_v3 = vld [vmem:[#allocation52_spill] sm:$0xff]  ;;  %v21993_v24 = vld [vmem:[#allocation49_spill] sm:$0xff]  ;;  %v22003_v63 = vmax.f32 %v19346_v54, %v19344_v7 }
 0x5d0   :  { %10400 = vmatprep.subr.mxu0 %v21981_v40  ;;  %v21988_v41 = vmax.f32 %v21986_v31, %v21987_v36  ;;  %v7712_v22 = vpop.f32.mrf.mxu0  ;;  %v21991_v40 = vld [vmem:[#allocation51_spill] sm:$0xff]  ;;  %v21994_v9 = vld [vmem:[#allocation48_spill] sm:$0xff]  ;;  %v22010_v7 = vmax.f32 %v19355_v18, %v19353_v56  ;;  %v22015_v18 = vld [vmem:[#allocation154_spill] sm:$0xff]  ;;  %v22081_v12 = vmax.f32 %v19501_v35, %v19499_v37 }
 0x5d1   :  { %10401 = vmatpush1.msra.mxu0 %v21985_v47  ;;  %v19530_v50 = vmax.f32 %v7712_v22, %v21989_v60  ;;  %v19532_v30 = vpop.f32.mrf.mxu1  ;;  %v21992_v28 = vmax.f32 %v21990_v3, %v21991_v40  ;;  %v21995_v52 = vmax.f32 %v21993_v24, %v21994_v9  ;;  %v11723_v31 = vld [vmem:[%s20687_s1 + $0x30] ss:$8 sps:$4 sm:$0xff]   ;;  %v21997_v22 = vld [vmem:[#allocation47_spill] sm:$0xff]  ;;  %v21998_v60 = vld [vmem:[#allocation46_spill] sm:$0xff]  ;;  %v22090_v37 = vmax.f32 %v19517_v29, %v19515_v53 }
 0x5d2   :  { %10402 = vmatprep.subr.mxu0 %v21988_v41  ;;  %v7716_v47 = vpop.f32.mrf.mxu0  ;;  %v21999_v3 = vmax.f32 %v21997_v22, %v21998_v60  ;;  %v22000_v40 = vld [vmem:[#allocation45_spill] sm:$0xff]  ;;  %v22014_v56 = vld [vmem:[#allocation39_spill] sm:$0xff] }
 0x5d3   :  { %10403 = vmatpush1.msra.mxu0 %v21992_v28  ;;  %v19548_v36 = vmax.f32 %v7716_v47, %v21996_v23  ;;  %v19550_v41 = vpop.f32.mrf.mxu1  ;;  %v22001_v28 = vld [vmem:[#allocation44_spill] sm:$0xff]  ;;  %v22004_v23 = vld [vmem:[#allocation42_spill] sm:$0xff]  ;;  %v22005_v22 = vld [vmem:[#allocation29_spill] sm:$0xff] }
 0x5d4   :  { %10404 = vmatprep.subr.mxu0 %v21995_v52  ;;  %8407 = vmatmul.mubr.bf16.gmra.mxu0 %v11723_v31  ;;  %v22002_v24 = vmax.f32 %v22000_v40, %v22001_v28  ;;  %v7718_v9 = vpop.f32.mrf.mxu0  ;;  %v11724_v52 = vld [vmem:[%s20687_s1 + $0x44] ss:$8 sps:$4 sm:$0xff]   ;;  %v22006_v60 = vmax.f32 %v22004_v23, %v22005_v22  ;;  %v22008_v40 = vld [vmem:[#allocation37_spill] sm:$0xff]  ;;  %v22012_v23 = vld [vmem:[#allocation36_spill] sm:$0xff] }
 0x5d5   :  { %8600 = vmatmul.mubr.bf16.gmra.mxu1 %v11723_v31  ;;  %10405 = vmatpush1.msra.mxu0 %v21999_v3  ;;  %v19567_v47 = vmax.f32 %v7718_v9, %v22003_v63  ;;  %v19569_v31 = vpop.f32.mrf.mxu1  ;;  %v22007_v3 = vld [vmem:[#allocation38_spill] sm:$0xff]  ;;  %v22011_v63 = vld [vmem:[#allocation41_spill] sm:$0xff]  ;;  %v22033_v20 = vld [vmem:[#allocation143_spill] sm:$0xff] }
 0x5d6   :  { %10406 = vmatprep.subr.mxu0 %v22002_v24  ;;  %11476 = vmatprep.mubr.msk.bf16.mxu0 %vm4049_vm0, %v11724_v52  ;;  %v22009_v28 = vmax.f32 %v22007_v3, %v22008_v40  ;;  %v7720_v24 = vpop.f32.mrf.mxu0  ;;  %v22021_v22 = vld [vmem:[#allocation150_spill] sm:$0xff]  ;;  %v11726_v55 = vld [vmem:[%s20687_s1 + $0x54] ss:$8 sps:$4 sm:$0xff]  }
 0x5d7   :  { %10407 = vmatpush1.msra.mxu0 %v22006_v60  ;;  %11492 = vmatprep.mubr.msk.bf16.mxu1 %vm4049_vm0, %v11724_v52  ;;  %v19583_v54 = vmax.f32 %v7720_v24, %v22010_v7  ;;  %v19585_v9 = vpop.f32.mrf.mxu1  ;;  %v22013_v60 = vmax.f32 %v19364_v49, %v19362_v6 }
 0x5d8   :  { %10408 = vmatprep.subr.mxu0 %v22009_v28  ;;  %v7722_v52 = vpop.f32.mrf.mxu0  ;;  %v22016_v28 = vld [vmem:[#allocation153_spill] sm:$0xff] }
 0x5d9   :  { %10409 = vmatpush1.msra.mxu0 %v22011_v63  ;;  %v19594_v3 = vmax.f32 %v7722_v52, %v22013_v60  ;;  %v19596_v40 = vpop.f32.mrf.mxu1  ;;  %v22017_v24 = vmax.f32 %v22015_v18, %v22016_v28  ;;  %v11725_v63 = vld [vmem:[%s20687_s1 + $0x40] ss:$8 sps:$4 sm:$0xff]   ;;  %v22018_v52 = vld [vmem:[#allocation152_spill] sm:$0xff]  ;;  %v22022_v18 = vld [vmem:[#allocation149_spill] sm:$0xff] }
 0x5da   :  { %10410 = vmatprep.subr.mxu0 %v22012_v23  ;;  %v7726_v7 = vpop.f32.mrf.mxu0  ;;  %v22019_v60 = vld [vmem:[#allocation151_spill] sm:$0xff]  ;;  %v22023_v28 = vmax.f32 %v22021_v22, %v22022_v18  ;;  %v22028_v22 = vld [vmem:[#allocation146_spill] sm:$0xff] }
 0x5db   :  { %10411 = vmatpush1.msra.mxu0 %v22014_v56  ;;  %v10154_v6 = vmax.f32 %v7726_v7, %v19382_v0  ;;  %v7919_v49 = vpop.f32.mrf.mxu1  ;;  %v22020_v56 = vmax.f32 %v22018_v52, %v22019_v60  ;;  %v22029_v60 = vld [vmem:[#allocation145_spill] sm:$0xff] }
 0x5dc   :  { %10412 = vmatprep.subr.mxu0 %v22017_v24  ;;  %8417 = vmatmul.mubr.bf16.gmra.mxu0 %v11725_v63  ;;  %v7728_v24 = vpop.f32.mrf.mxu0 }
 0x5dd   :  { %8610 = vmatmul.mubr.bf16.gmra.mxu1 %v11725_v63  ;;  %10413 = vmatpush2.msra.mxu0 %v22020_v56  ;;  %v19618_v23 = vmax.f32 %v7919_v49, %v10154_v6  ;;  %v10155_v0 = vmax.f32 %v7728_v24, %v19392_v44  ;;  %v7921_v7 = vpop.f32.mrf.mxu1  ;;  %v22025_v63 = vld [vmem:[#allocation148_spill] sm:$0xff]  ;;  %v22030_v56 = vmax.f32 %v22028_v22, %v22029_v60  ;;  %v22035_v24 = vld [vmem:[#allocation142_spill] sm:$0xff] }
 0x5de   :  { %10414 = vmatprep.subr.mxu0 %v22023_v28  ;;  %11477 = vmatprep.mubr.msk.bf16.mxu0 %vm4049_vm0, %v11726_v55  ;;  %v22027_v52 = vmax.f32 %v22025_v63, %v22026_v4  ;;  %v7730_v18 = vpop.f32.mrf.mxu0  ;;  %v22032_v49 = vld [vmem:[#allocation144_spill] sm:$0xff]  ;;  %v22037_v4 = vmax.f32 %v22035_v24, %v22036_v32 }
 0x5df   :  { %22024 = vst [vmem:[#allocation27_spill] sm:$0xff] %v19618_v23  ;;  %11493 = vmatprep.mubr.msk.bf16.mxu1 %vm4049_vm0, %v11726_v55  ;;  %v19628_v28 = vmax.f32 %v7921_v7, %v10155_v0  ;;  %v10156_v10 = vmax.f32 %v7730_v18, %v19401_v42  ;;  %v7923_v6 = vpop.f32.mrf.mxu1  ;;  %v22034_v44 = vmax.f32 %v22032_v49, %v22033_v20  ;;  %v22039_v60 = vld [vmem:[#allocation140_spill] sm:$0xff]  ;;  %v22040_v0 = vld [vmem:[#allocation139_spill] sm:$0xff]  ;;  %v22042_v42 = vld [vmem:[#allocation138_spill] sm:$0xff] }
 0x5e0   :  { %10415 = vmatpush2.msra.mxu0 %v22027_v52  ;;  %v7732_v63 = vpop.f32.mrf.mxu0  ;;  %v22041_v7 = vmax.f32 %v22039_v60, %v22040_v0  ;;  %v11727_v32 = vld [vmem:[%s20687_s1 + $0x50] ss:$8 sps:$4 sm:$0xff]  }
 0x5e1   :  { %10416 = vmatprep.subr.mxu0 %v22030_v56  ;;  %22031 = vst [vmem:[#allocation28_spill] sm:$0xff] %v19628_v28  ;;  %v19637_v55 = vmax.f32 %v7923_v6, %v10156_v10  ;;  %v10157_v52 = vmax.f32 %v7732_v63, %v19413_v17  ;;  %v7925_v22 = vpop.f32.mrf.mxu1  ;;  %v22043_v56 = vld [vmem:[#allocation137_spill] sm:$0xff]  ;;  %v22048_v6 = vld [vmem:[#allocation136_spill] sm:$0xff] }
 0x5e2   :  { %10417 = vmatpush2.msra.mxu0 %v22034_v44  ;;  %v22044_v18 = vmax.f32 %v22042_v42, %v22043_v56  ;;  %v7736_v20 = vpop.f32.mrf.mxu0  ;;  %v22049_v44 = vld [vmem:[#allocation135_spill] sm:$0xff]  ;;  %v22052_v63 = vld [vmem:[#allocation133_spill] sm:$0xff] }
 0x5e3   :  { %10418 = vmatprep.subr.mxu0 %v22037_v4  ;;  %22038 = vst [vmem:[#allocation30_spill] sm:$0xff] %v19637_v55  ;;  %v19649_v49 = vmax.f32 %v7925_v22, %v10157_v52  ;;  %v19654_v17 = vmax.f32 %v7736_v20, %v9632_v57  ;;  %v19656_v10 = vpop.f32.mrf.mxu1  ;;  %v22050_v24 = vmax.f32 %v22048_v6, %v22049_v44  ;;  %v22051_v4 = vld [vmem:[#allocation134_spill] sm:$0xff]  ;;  %v22056_v22 = vld [vmem:[#allocation132_spill] sm:$0xff]  ;;  %v22059_v56 = vld [vmem:[#allocation129_spill] sm:$0xff] }
 0x5e4   :  { %10419 = vmatpush2.msra.mxu0 %v22041_v7  ;;  %22047 = vst [vmem:[#allocation31_spill] sm:$0xff] %v19656_v10  ;;  %v22053_v60 = vmax.f32 %v22051_v4, %v22052_v63  ;;  %v7738_v0 = vpop.f32.mrf.mxu0  ;;  %v11728_v52 = vld [vmem:[%s20687_s1 + $0x64] ss:$8 sps:$4 sm:$0xff]   ;;  %v22065_v44 = vld [vmem:[#allocation121_spill] sm:$0xff] }
 0x5e5   :  { %10420 = vmatprep.subr.mxu0 %v22044_v18  ;;  %8427 = vmatmul.mubr.bf16.gmra.mxu0 %v11727_v32  ;;  %22045 = vst [vmem:[#allocation33_spill] sm:$0xff] %v19649_v49  ;;  %22046 = vst [vmem:[#allocation35_spill] sm:$0xff] %v19654_v17  ;;  %v19673_v46 = vmax.f32 %v7738_v0, %v9633_v13  ;;  %v19675_v57 = vpop.f32.mrf.mxu1  ;;  %v22057_v7 = vld [vmem:[#allocation18_spill] sm:$0xff]  ;;  %v22060_v18 = vld [vmem:[#allocation128_spill] sm:$0xff] }
 0x5e6   :  { %8620 = vmatmul.mubr.bf16.gmra.mxu1 %v11727_v32  ;;  %10421 = vmatpush2.msra.mxu0 %v22050_v24  ;;  %22055 = vst [vmem:[#allocation12_spill] sm:$0xff] %v19675_v57  ;;  %v22058_v42 = vmax.f32 %v22056_v22, %v22057_v7  ;;  %v22061_v20 = vmax.f32 %v22059_v56, %v22060_v18  ;;  %v7740_v32 = vpop.f32.mrf.mxu0  ;;  %v22064_v13 = vld [vmem:[#allocation131_spill] sm:$0xff]  ;;  %v22076_v56 = vld [vmem:[#allocation124_spill] sm:$0xff] }
 0x5e7   :  { %10422 = vmatprep.subr.mxu0 %v22053_v60  ;;  %11478 = vmatprep.mubr.msk.bf16.mxu0 %vm4049_vm0, %v11728_v52  ;;  %22054 = vst [vmem:[#allocation32_spill] sm:$0xff] %v19673_v46  ;;  %v19689_v26 = vmax.f32 %v7740_v32, %v9680_v15  ;;  %v19691_v51 = vpop.f32.mrf.mxu1  ;;  %v22070_v15 = vld [vmem:[#allocation126_spill] sm:$0xff] }
 0x5e8   :  { %10423 = vmatpush2.msra.mxu0 %v22058_v42  ;;  %11494 = vmatprep.mubr.msk.bf16.mxu1 %vm4049_vm0, %v11728_v52  ;;  %22063 = vst [vmem:[#allocation40_spill] sm:$0xff] %v19691_v51  ;;  %v7742_v24 = vpop.f32.mrf.mxu0  ;;  %v22071_v0 = vmax.f32 %v22069_v33, %v22070_v15  ;;  %v11729_v22 = vld [vmem:[%s20687_s1 + $0x60] ss:$8 sps:$4 sm:$0xff]   ;;  %v22075_v42 = vld [vmem:[#allocation125_spill] sm:$0xff]  ;;  %v22084_v15 = vld [vmem:[#allocation120_spill] sm:$0xff] }
 0x5e9   :  { %10424 = vmatprep.subr.mxu0 %v22061_v20  ;;  %22062 = vst [vmem:[#allocation10_spill] sm:$0xff] %v19689_v26  ;;  %v19700_v63 = vmax.f32 %v7742_v24, %v9681_v19  ;;  %v19702_v60 = vpop.f32.mrf.mxu1  ;;  %v22077_v18 = vmax.f32 %v22075_v42, %v22076_v56  ;;  %v22078_v20 = vld [vmem:[#allocation123_spill] sm:$0xff]  ;;  %v22079_v32 = vld [vmem:[#allocation122_spill] sm:$0xff]  ;;  %v11730_v24 = vld [vmem:[%s20687_s1 + $0x74] ss:$8 sps:$4 sm:$0xff]  }
 0x5ea   :  { %10425 = vmatpush2.msra.mxu0 %v22064_v13  ;;  %22067 = vst [vmem:[#allocation11_spill] sm:$0xff] %v19702_v60  ;;  %v7746_v52 = vpop.f32.mrf.mxu0  ;;  %v22080_v13 = vmax.f32 %v22078_v20, %v22079_v32  ;;  %v22093_v32 = vld [vmem:[#allocation115_spill] sm:$0xff] }
 0x5eb   :  { %10426 = vmatprep.subr.mxu0 %v22065_v44  ;;  %22066 = vst [vmem:[#allocation21_spill] sm:$0xff] %v19700_v63  ;;  %v19716_v25 = vmax.f32 %v7746_v52, %v22072_v11  ;;  %v19718_v19 = vpop.f32.mrf.mxu1  ;;  %v22088_v11 = vld [vmem:[#allocation116_spill] sm:$0xff] }
 0x5ec   :  { %10427 = vmatpush2.msra.mxu0 %v22068_v45  ;;  %22074 = vst [vmem:[#allocation20_spill] sm:$0xff] %v19718_v19  ;;  %v7748_v44 = vpop.f32.mrf.mxu0 }
 0x5ed   :  { %10428 = vmatprep.subr.mxu0 %v22071_v0  ;;  %8437 = vmatmul.mubr.bf16.gmra.mxu0 %v11729_v22  ;;  %22073 = vst [vmem:[#allocation14_spill] sm:$0xff] %v19716_v25  ;;  %v19735_v45 = vmax.f32 %v7748_v44, %v22081_v12  ;;  %v19737_v33 = vpop.f32.mrf.mxu1  ;;  %v22085_v0 = vld [vmem:[#allocation119_spill] sm:$0xff]  ;;  %v22097_v12 = vld [vmem:[#allocation112_spill] sm:$0xff] }
 0x5ee   :  { %8630 = vmatmul.mubr.bf16.gmra.mxu1 %v11729_v22  ;;  %10429 = vmatpush2.msra.mxu0 %v22077_v18  ;;  %22083 = vst [vmem:[#allocation23_spill] sm:$0xff] %v19737_v33  ;;  %v22086_v52 = vmax.f32 %v22084_v15, %v22085_v0  ;;  %v22087_v22 = vld [vmem:[#allocation117_spill] sm:$0xff]  ;;  %v7750_v56 = vpop.f32.mrf.mxu0 }
 0x5ef   :  { %10430 = vmatprep.subr.mxu0 %v22080_v13  ;;  %11479 = vmatprep.mubr.msk.bf16.mxu0 %vm4049_vm0, %v11730_v24  ;;  %22082 = vst [vmem:[#allocation63_spill] sm:$0xff] %v19735_v45  ;;  %v22089_v42 = vmax.f32 %v22087_v22, %v22088_v11  ;;  %v19751_v35 = vmax.f32 %v7750_v56, %v22090_v37  ;;  %v19753_v20 = vpop.f32.mrf.mxu1  ;;  %v22094_v13 = vld [vmem:[#allocation114_spill] sm:$0xff]  ;;  %v22105_v37 = vld [vmem:[#allocation107_spill] sm:$0xff] }
 0x5f0   :  { %10431 = vmatpush2.msra.mxu0 %v22086_v52  ;;  %11495 = vmatprep.mubr.msk.bf16.mxu1 %vm4049_vm0, %v11730_v24  ;;  %22092 = vst [vmem:[#allocation15_spill] sm:$0xff] %v19753_v20  ;;  %v22095_v44 = vmax.f32 %v22093_v32, %v22094_v13  ;;  %v22096_v24 = vld [vmem:[#allocation113_spill] sm:$0xff]  ;;  %v7752_v0 = vpop.f32.mrf.mxu0  ;;  %v22099_v22 = vmax.f32 %v19532_v30, %v19530_v50  ;;  %v22102_v11 = vld [vmem:[#allocation110_spill] sm:$0xff] }
 0x5f1   :  { %10432 = vmatprep.subr.mxu0 %v22089_v42  ;;  %22091 = vst [vmem:[#allocation22_spill] sm:$0xff] %v19751_v35  ;;  %v22098_v15 = vmax.f32 %v22096_v24, %v22097_v12  ;;  %v19768_v29 = vpop.f32.mrf.mxu1  ;;  %v22103_v42 = vld [vmem:[#allocation109_spill] sm:$0xff]  ;;  %v22106_v32 = vld [vmem:[#allocation106_spill] sm:$0xff]  ;;  %v22108_v30 = vmax.f32 %v19550_v41, %v19548_v36  ;;  %v22117_v41 = vmax.f32 %v19569_v31, %v19567_v47 }
 0x5f2   :  { %10433 = vmatpush2.msra.mxu0 %v22095_v44  ;;  %v19766_v53 = vmax.f32 %v7752_v0, %v22099_v22  ;;  %22101 = vst [vmem:[#allocation17_spill] sm:$0xff] %v19768_v29  ;;  %v22104_v56 = vmax.f32 %v22102_v11, %v22103_v42  ;;  %v22107_v13 = vmax.f32 %v22105_v37, %v22106_v32  ;;  %v7756_v44 = vpop.f32.mrf.mxu0  ;;  %v11731_v24 = vld [vmem:[%s20687_s1 + $0x70] ss:$8 sps:$4 sm:$0xff]   ;;  %v22114_v42 = vld [vmem:[#allocation103_spill] sm:$0xff] }
 0x5f3   :  { %10434 = vmatprep.subr.mxu0 %v22098_v15  ;;  %v19784_v12 = vmax.f32 %v7756_v44, %v22108_v30  ;;  %v19786_v15 = vpop.f32.mrf.mxu1  ;;  %v22111_v0 = vld [vmem:[#allocation105_spill] sm:$0xff]  ;;  %v22112_v22 = vld [vmem:[#allocation104_spill] sm:$0xff]  ;;  %v22126_v47 = vmax.f32 %v19585_v9, %v19583_v54 }
 0x5f4   :  { %22100 = vst [vmem:[#allocation19_spill] sm:$0xff] %v19766_v53  ;;  %10435 = vmatpush2.msra.mxu0 %v22104_v56  ;;  %22110 = vst [vmem:[#allocation25_spill] sm:$0xff] %v19786_v15  ;;  %v22113_v11 = vmax.f32 %v22111_v0, %v22112_v22  ;;  %v22115_v56 = vld [vmem:[#allocation102_spill] sm:$0xff]  ;;  %v7758_v32 = vpop.f32.mrf.mxu0  ;;  %v22120_v30 = vld [vmem:[#allocation100_spill] sm:$0xff] }
 0x5f5   :  { %10436 = vmatprep.subr.mxu0 %v22107_v13  ;;  %8447 = vmatmul.mubr.bf16.gmra.mxu0 %v11731_v24  ;;  %22109 = vst [vmem:[#allocation92_spill] sm:$0xff] %v19784_v12  ;;  %v22116_v37 = vmax.f32 %v22114_v42, %v22115_v56  ;;  %v11732_v13 = vld [vmem:[%s20687_s1 + $0x84] ss:$8 sps:$4 sm:$0xff]   ;;  %v19803_v44 = vmax.f32 %v7758_v32, %v22117_v41  ;;  %v22121_v0 = vld [vmem:[#allocation13_spill] sm:$0xff] }
 0x5f6   :  { %8640 = vmatmul.mubr.bf16.gmra.mxu1 %v11731_v24  ;;  %10437 = vmatpush2.msra.mxu0 %v22113_v11  ;;  %v19805_v24 = vpop.f32.mrf.mxu1  ;;  %v22122_v22 = vmax.f32 %v22120_v30, %v22121_v0  ;;  %v22123_v11 = vld [vmem:[#allocation82_spill] sm:$0xff]  ;;  %v22124_v42 = vld [vmem:[#allocation79_spill] sm:$0xff]  ;;  %v22130_v30 = vld [vmem:[#allocation72_spill] sm:$0xff] }
 0x5f7   :  { %10438 = vmatprep.subr.mxu0 %v22116_v37  ;;  %11480 = vmatprep.mubr.msk.bf16.mxu0 %vm4049_vm0, %v11732_v13  ;;  %22118 = vst [vmem:[#allocation108_spill] sm:$0xff] %v19803_v44  ;;  %22119 = vst [vmem:[#allocation26_spill] sm:$0xff] %v19805_v24  ;;  %v22125_v56 = vmax.f32 %v22123_v11, %v22124_v42  ;;  %v7760_v37 = vpop.f32.mrf.mxu0  ;;  %v22129_v41 = vld [vmem:[#allocation99_spill] sm:$0xff]  ;;  %v22134_v54 = vld [vmem:[#allocation89_spill] sm:$0xff] }
 0x5f8   :  { %10439 = vmatpush2.msra.mxu0 %v22122_v22  ;;  %11496 = vmatprep.mubr.msk.bf16.mxu1 %vm4049_vm0, %v11732_v13  ;;  %v19819_v31 = vmax.f32 %v7760_v37, %v22126_v47  ;;  %v19821_v32 = vpop.f32.mrf.mxu1  ;;  %v22131_v22 = vmax.f32 %v19596_v40, %v19594_v3 }
 0x5f9   :  { %10440 = vmatprep.subr.mxu0 %v22125_v56  ;;  %22128 = vst [vmem:[#allocation24_spill] sm:$0xff] %v19821_v32  ;;  %v7762_v13 = vpop.f32.mrf.mxu0 }
 0x5fa   :  { %22127 = vst [vmem:[#allocation16_spill] sm:$0xff] %v19819_v31  ;;  %10441 = vmatpush2.msra.mxu0 %v22129_v41  ;;  %v19830_v11 = vmax.f32 %v7762_v13, %v22131_v22  ;;  %v19832_v42 = vpop.f32.mrf.mxu1 }
 0x5fb   :  { %10442 = vmatprep.subr.mxu0 %v22130_v30  ;;  %22133 = vst [vmem:[#allocation111_spill] sm:$0xff] %v19832_v42  ;;  %v19835_v9 = vpop.f32.mrf.mxu0 }
 0x5fc   :  { %22132 = vst [vmem:[#allocation101_spill] sm:$0xff] %v19830_v11  ;;  %10443 = vmatpush2.msra.mxu0 %v22134_v54  ;;  %v19840_v37 = vpop.f32.mrf.mxu1 }
 0x5fd   :  { %8457 = vmatmul.mubr.bf16.gmra.mxu0 %v18990_v8  ;;  %v19845_v3 = vpop.f32.mrf.mxu0 }
 0x5fe   :  { %8650 = vmatmul.mubr.bf16.gmra.mxu1 %v18990_v8  ;;  %11481 = vmatprep.mubr.msk.bf16.mxu0 %vm4049_vm0, %v19001_v1  ;;  %v19849_v40 = vpop.f32.mrf.mxu1 }
 0x5ff   :  { %11497 = vmatprep.mubr.msk.bf16.mxu1 %vm4049_vm0, %v19001_v1  ;;  %v19851_v47 = vpop.f32.mrf.mxu0 }
 0x600   :  { %v19853_v41 = vpop.f32.mrf.mxu1 }
 0x601   :  { %v19855_v30 = vpop.f32.mrf.mxu0 }
 0x602   :  { %v19857_v13 = vpop.f32.mrf.mxu1 }
 0x603   :  { %v19859_v22 = vpop.f32.mrf.mxu0 }
 0x604   :  { %v19862_v8 = vpop.f32.mrf.mxu1 }
 0x605   :  { %8467 = vmatmul.mubr.bf16.gmra.mxu0 %v19024_v39  ;;  %v19867_v1 = vpop.f32.mrf.mxu0 }
 0x606   :  { %8660 = vmatmul.mubr.bf16.gmra.mxu1 %v19024_v39  ;;  %11482 = vmatprep.mubr.msk.bf16.mxu0 %vm4049_vm0, %v19031_v58  ;;  %v19871_v54 = vpop.f32.mrf.mxu1 }
 0x607   :  { %11498 = vmatprep.mubr.msk.bf16.mxu1 %vm4049_vm0, %v19031_v58  ;;  %v19873_v6 = vpop.f32.mrf.mxu0 }
 0x608   :  { %v19875_v4 = vpop.f32.mrf.mxu1 }
 0x609   :  { %v19877_v7 = vpop.f32.mrf.mxu0 }
 0x60a   :  { %v19879_v16 = vpop.f32.mrf.mxu1 }
 0x60b   :  { %v19881_v18 = vpop.f32.mrf.mxu0 }
 0x60c   :  { %v19884_v39 = vpop.f32.mrf.mxu1 }
 0x60d   :  { %8477 = vmatmul.mubr.bf16.gmra.mxu0 %v19070_v48  ;;  %v19889_v58 = vpop.f32.mrf.mxu0 }
 0x60e   :  { %8670 = vmatmul.mubr.bf16.gmra.mxu1 %v19070_v48  ;;  %11483 = vmatprep.mubr.msk.bf16.mxu0 %vm4049_vm0, %v19086_v59  ;;  %v19893_v52 = vpop.f32.mrf.mxu1 }
 0x60f   :  { %11499 = vmatprep.mubr.msk.bf16.mxu1 %vm4049_vm0, %v19086_v59  ;;  %v19897_v36 = vpop.f32.mrf.mxu0 }
 0x610   :  { %v19899_v5 = vpop.f32.mrf.mxu1 }
 0x611   :  { %v19903_v0 = vpop.f32.mrf.mxu0 }
 0x612   :  { %v19905_v56 = vpop.f32.mrf.mxu1 }
 0x613   :  { %v19909_v59 = vpop.f32.mrf.mxu0 }
 0x614   :  { %v19912_v28 = vpop.f32.mrf.mxu1 }
 0x615   :  { %8487 = vmatmul.mubr.bf16.gmra.mxu0 %v19122_v62  ;;  %v19919_v50 = vpop.f32.mrf.mxu0 }
 0x616   :  { %8680 = vmatmul.mubr.bf16.gmra.mxu1 %v19122_v62  ;;  %11484 = vmatprep.mubr.msk.bf16.mxu0 %vm4049_vm0, %v19138_v61  ;;  %v19923_v23 = vpop.f32.mrf.mxu1 }
 0x617   :  { %11500 = vmatprep.mubr.msk.bf16.mxu1 %vm4049_vm0, %v19138_v61  ;;  %v19927_v49 = vpop.f32.mrf.mxu0 }
 0x618   :  { %v19929_v17 = vpop.f32.mrf.mxu1 }
 0x619   :  { %v19933_v10 = vpop.f32.mrf.mxu0 }
 0x61a   :  { %v19935_v48 = vpop.f32.mrf.mxu1 }
 0x61b   :  { %v19939_v61 = vpop.f32.mrf.mxu0 }
 0x61c   :  { %v19944_v57 = vpop.f32.mrf.mxu1 }
 0x61d   :  { %8497 = vmatmul.mubr.bf16.gmra.mxu0 %v19174_v2  ;;  %v19951_v26 = vpop.f32.mrf.mxu0 }
 0x61e   :  { %8690 = vmatmul.mubr.bf16.gmra.mxu1 %v19174_v2  ;;  %11485 = vmatprep.mubr.msk.bf16.mxu0 %vm4049_vm0, %v19184_v34  ;;  %v19955_v46 = vpop.f32.mrf.mxu1 }
 0x61f   :  { %11501 = vmatprep.mubr.msk.bf16.mxu1 %vm4049_vm0, %v19184_v34  ;;  %v19957_v51 = vpop.f32.mrf.mxu0 }
 0x620   :  { %v19961_v63 = vpop.f32.mrf.mxu1 }
 0x621   :  { %v19965_v60 = vpop.f32.mrf.mxu0 }
 0x622   :  { %v19967_v62 = vpop.f32.mrf.mxu1 }
 0x623   :  { %v19969_v25 = vpop.f32.mrf.mxu0 }
 0x624   :  { %v19974_v19 = vpop.f32.mrf.mxu1 }
 0x625   :  { %8507 = vmatmul.mubr.bf16.gmra.mxu0 %v19213_v21  ;;  %v19981_v55 = vpop.f32.mrf.mxu0 }
 0x626   :  { %8700 = vmatmul.mubr.bf16.gmra.mxu1 %v19213_v21  ;;  %11486 = vmatprep.mubr.msk.bf16.mxu0 %vm4049_vm0, %v19228_v27  ;;  %v19987_v33 = vpop.f32.mrf.mxu1 }
 0x627   :  { %11502 = vmatprep.mubr.msk.bf16.mxu1 %vm4049_vm0, %v19228_v27  ;;  %v19991_v21 = vpop.f32.mrf.mxu0 }
 0x628   :  { %v19995_v20 = vpop.f32.mrf.mxu1 }
 0x629   :  { %v8048_v53 = vpop.f32.mrf.mxu0 }
 0x62a   :  { %v8915_v27 = vmax.f32 %v19877_v7, %v8048_v53  ;;  %v8241_v29 = vpop.f32.mrf.mxu1 }
 0x62b   :  { %v8917_v45 = vmax.f32 %v19879_v16, %v8241_v29  ;;  %v8052_v12 = vpop.f32.mrf.mxu0  ;;  %v22135_v16 = vmax.f32 %v19889_v58, %v19893_v52 }
 0x62c   :  { %v8962_v34 = vmax.f32 %v19881_v18, %v8052_v12  ;;  %v8245_v15 = vpop.f32.mrf.mxu1 }
 0x62d   :  { %8517 = vmatmul.mubr.bf16.gmra.mxu0 %v19269_v43  ;;  %v9299_v35 = vmax.f32 %v8917_v45, %v8915_v27  ;;  %v8054_v44 = vpop.f32.mrf.mxu0 }
 0x62e   :  { %8710 = vmatmul.mubr.bf16.gmra.mxu1 %v19269_v43  ;;  %11487 = vmatprep.mubr.msk.bf16.mxu0 %vm4049_vm0, %v19285_v38  ;;  %v8964_v7 = vmax.f32 %v19884_v39, %v8962_v34  ;;  %v8965_v53 = vmax.f32 %v8054_v44, %v22135_v16  ;;  %v8247_v29 = vpop.f32.mrf.mxu1  ;;  %v22136_v43 = vmax.f32 %v19897_v36, %v19899_v5 }
 0x62f   :  { %11503 = vmatprep.mubr.msk.bf16.mxu1 %vm4049_vm0, %v19285_v38  ;;  %v8056_v2 = vpop.f32.mrf.mxu0  ;;  %v22137_v38 = vmax.f32 %v19903_v0, %v19905_v56 }
 0x630   :  { %v9346_v18 = vmax.f32 %v8245_v15, %v8964_v7  ;;  %v9347_v12 = vmax.f32 %v8247_v29, %v8965_v53  ;;  %v9012_v24 = vmax.f32 %v8056_v2, %v22136_v43  ;;  %v8249_v31 = vpop.f32.mrf.mxu1  ;;  %v22138_v15 = vmax.f32 %v19909_v59, %v19912_v28 }
 0x631   :  { %v8058_v45 = vpop.f32.mrf.mxu0  ;;  %v22140_v7 = vmax.f32 %v19927_v49, %v19929_v17  ;;  %v22141_v59 = vmax.f32 %v19933_v10, %v19935_v48 }
 0x632   :  { %v9394_v27 = vmax.f32 %v8249_v31, %v9012_v24  ;;  %v9013_v32 = vmax.f32 %v8058_v45, %v22137_v38  ;;  %v8251_v39 = vpop.f32.mrf.mxu1  ;;  %v22139_v24 = vmax.f32 %v19919_v50, %v19923_v23 }
 0x633   :  { %v8062_v34 = vpop.f32.mrf.mxu0 }
 0x634   :  { %v9395_v52 = vmax.f32 %v8251_v39, %v9013_v32  ;;  %v9060_v44 = vmax.f32 %v8062_v34, %v22138_v15  ;;  %v8255_v58 = vpop.f32.mrf.mxu1 }
 0x635   :  { %8527 = vmatmul.mubr.bf16.gmra.mxu0 %v19321_v14  ;;  %v8064_v5 = vpop.f32.mrf.mxu0 }
 0x636   :  { %8720 = vmatmul.mubr.bf16.gmra.mxu1 %v19321_v14  ;;  %v9442_v36 = vmax.f32 %v8255_v58, %v9060_v44  ;;  %v9061_v31 = vmax.f32 %v8064_v5, %v22139_v24  ;;  %v8257_v0 = vpop.f32.mrf.mxu1 }
 0x637   :  { %v8066_v56 = vpop.f32.mrf.mxu0 }
 0x638   :  { %v9443_v2 = vmax.f32 %v8257_v0, %v9061_v31  ;;  %v9108_v32 = vmax.f32 %v8066_v56, %v22140_v7  ;;  %v8259_v16 = vpop.f32.mrf.mxu1 }
 0x639   :  { %v8068_v53 = vpop.f32.mrf.mxu0 }
 0x63a   :  { %v9490_v28 = vmax.f32 %v8259_v16, %v9108_v32  ;;  %v9109_v14 = vmax.f32 %v8068_v53, %v22141_v59  ;;  %v8261_v29 = vpop.f32.mrf.mxu1 }
 0x63b   :  { %v8072_v43 = vpop.f32.mrf.mxu0 }
 0x63c   :  { %v9491_v45 = vmax.f32 %v8261_v29, %v9109_v14  ;;  %v8265_v38 = vpop.f32.mrf.mxu1 }
 0x63d   :  { %v8074_v23 = vpop.f32.mrf.mxu0 }
 0x63e   :  { %v20032_v50 = vpop.f32.mrf.mxu1 }
 0x63f   :  { %v20034_v39 = vpop.f32.mrf.mxu0 }
 0x640   :  { %v20036_v34 = vpop.f32.mrf.mxu1 }
 0x641   :  { %v20038_v49 = vpop.f32.mrf.mxu0 }
 0x642   :  { %v20040_v17 = vpop.f32.mrf.mxu1 }
 0x643   :  { %v20042_v15 = vpop.f32.mrf.mxu0 }
 0x644   :  { %v20044_v44 = vpop.f32.mrf.mxu1 }
 0x645   :  { %v20046_v10 = vpop.f32.mrf.mxu0 }
 0x646   :  { %v20048_v48 = vpop.f32.mrf.mxu1 }
 0x647   :  { %v20050_v58 = vpop.f32.mrf.mxu0 }
 0x648   :  { %v20052_v5 = vpop.f32.mrf.mxu1 }
 0x649   :  { %v8088_v24 = vpop.f32.mrf.mxu0 }
 0x64a   :  { %v9683_v31 = vmax.f32 %v8088_v24, %v9299_v35  ;;  %v8281_v0 = vpop.f32.mrf.mxu1 }
 0x64b   :  { %v8092_v56 = vpop.f32.mrf.mxu0 }
 0x64c   :  { %v20054_v7 = vmax.f32 %v8281_v0, %v9683_v31  ;;  %v20056_v32 = vmax.f32 %v8092_v56, %v9346_v18  ;;  %v20058_v16 = vpop.f32.mrf.mxu1 }
 0x64d   :  { %v8094_v53 = vpop.f32.mrf.mxu0 }
 0x64e   :  { %22142 = vst [vmem:[#allocation118_spill] sm:$0xff] %v20056_v32  ;;  %v20062_v14 = vmax.f32 %v8094_v53, %v9347_v12  ;;  %v20064_v29 = vpop.f32.mrf.mxu1 }
 0x64f   :  { %v8096_v11 = vpop.f32.mrf.mxu0 }
 0x650   :  { %22143 = vst [vmem:[#allocation98_spill] sm:$0xff] %v20062_v14  ;;  %v20068_v24 = vmax.f32 %v8096_v11, %v9394_v27  ;;  %v20070_v31 = vpop.f32.mrf.mxu1 }
 0x651   :  { %v8098_v18 = vpop.f32.mrf.mxu0 }
 0x652   :  { %22144 = vst [vmem:[#allocation97_spill] sm:$0xff] %v20068_v24  ;;  %v20074_v56 = vmax.f32 %v8098_v18, %v9395_v52  ;;  %v20076_v42 = vpop.f32.mrf.mxu1 }
 0x653   :  { %v8102_v12 = vpop.f32.mrf.mxu0 }
 0x654   :  { %22145 = vst [vmem:[#allocation96_spill] sm:$0xff] %v20074_v56  ;;  %v20080_v59 = vmax.f32 %v8102_v12, %v9442_v36  ;;  %v20082_v32 = vpop.f32.mrf.mxu1  ;;  %v8773_v12 = vmax.f32 %v19849_v40, %v19955_v46 }
 0x655   :  { %22147 = vst [vmem:[#allocation94_spill] sm:$0xff] %v20082_v32  ;;  %v8104_v11 = vpop.f32.mrf.mxu0 }
 0x656   :  { %22146 = vst [vmem:[#allocation95_spill] sm:$0xff] %v20080_v59  ;;  %v20086_v35 = vmax.f32 %v8104_v11, %v9443_v2  ;;  %v20088_v14 = vpop.f32.mrf.mxu1  ;;  %v22150_v11 = vmax.f32 %v19840_v37, %v19944_v57  ;;  %v8819_v57 = vmax.f32 %v19855_v30, %v19965_v60  ;;  %v22154_v37 = vmax.f32 %v19851_v47, %v19957_v51 }
 0x657   :  { %v8106_v52 = vpop.f32.mrf.mxu0 }
 0x658   :  { %22148 = vst [vmem:[#allocation93_spill] sm:$0xff] %v20086_v35  ;;  %v20092_v0 = vmax.f32 %v8106_v52, %v9490_v28  ;;  %v20094_v24 = vpop.f32.mrf.mxu1  ;;  %v8771_v28 = vmax.f32 %v19845_v3, %v19951_v26  ;;  %v22149_v52 = vmax.f32 %v19835_v9, %v19939_v61 }
 0x659   :  { %v8108_v36 = vpop.f32.mrf.mxu0 }
 0x65a   :  { %v20098_v53 = vmax.f32 %v8108_v36, %v9491_v45  ;;  %v20100_v56 = vpop.f32.mrf.mxu1 }
 0x65b   :  { %v8112_v2 = vpop.f32.mrf.mxu0 }
 0x65c   :  { %v9154_v27 = vmax.f32 %v8072_v43, %v8112_v2  ;;  %v8305_v59 = vpop.f32.mrf.mxu1 }
 0x65d   :  { %v9156_v32 = vmax.f32 %v8265_v38, %v8305_v59  ;;  %v8114_v18 = vpop.f32.mrf.mxu0 }
 0x65e   :  { %v20109_v35 = vmax.f32 %v22149_v52, %v9154_v27  ;;  %v9155_v45 = vmax.f32 %v8074_v23, %v8114_v18  ;;  %v8307_v36 = vpop.f32.mrf.mxu1  ;;  %v22162_v52 = vmax.f32 %v19862_v8, %v19974_v19 }
 0x65f   :  { %v20116_v43 = vmax.f32 %v22150_v11, %v9156_v32  ;;  %v9157_v38 = vmax.f32 %v20032_v50, %v8307_v36  ;;  %v8116_v59 = vpop.f32.mrf.mxu0  ;;  %v8821_v32 = vmax.f32 %v19857_v13, %v19967_v62 }
 0x660   :  { %v20119_v2 = vmax.f32 %v8771_v28, %v9155_v45  ;;  %v9202_v26 = vmax.f32 %v20034_v39, %v8116_v59  ;;  %v8309_v9 = vpop.f32.mrf.mxu1 }
 0x661   :  { %22151 = vst [vmem:[#allocation91_spill] sm:$0xff] %v20116_v43  ;;  %v20124_v61 = vmax.f32 %v8773_v12, %v9157_v38  ;;  %v9204_v46 = vmax.f32 %v20036_v34, %v8309_v9  ;;  %v8118_v40 = vpop.f32.mrf.mxu0  ;;  %v22156_v34 = vmax.f32 %v19853_v41, %v19961_v63  ;;  %v22160_v63 = vmax.f32 %v19859_v22, %v19969_v25 }
 0x662   :  { %22152 = vst [vmem:[#allocation90_spill] sm:$0xff] %v20119_v2  ;;  %v20132_v23 = vmax.f32 %v22154_v37, %v9202_v26  ;;  %v9203_v50 = vmax.f32 %v20038_v49, %v8118_v40  ;;  %v8311_v39 = vpop.f32.mrf.mxu1  ;;  %v22164_v38 = vmax.f32 %v19867_v1, %v19981_v55  ;;  %v22166_v26 = vmax.f32 %v19871_v54, %v19987_v33 }
 0x663   :  { %22153 = vst [vmem:[#allocation88_spill] sm:$0xff] %v20124_v61  ;;  %v20142_v18 = vmax.f32 %v22156_v34, %v9204_v46  ;;  %v9205_v60 = vmax.f32 %v20040_v17, %v8311_v39  ;;  %v8122_v30 = vpop.f32.mrf.mxu0  ;;  %v22168_v9 = vmax.f32 %v19873_v6, %v19991_v21  ;;  %v22170_v40 = vmax.f32 %v19875_v4, %v19995_v20  ;;  %v22174_v4 = vld [vmem:[#allocation98_spill] sm:$0xff] }
 0x664   :  { %22155 = vst [vmem:[#allocation87_spill] sm:$0xff] %v20132_v23  ;;  %v20145_v51 = vmax.f32 %v8819_v57, %v9203_v50  ;;  %v9250_v47 = vmax.f32 %v20042_v15, %v8122_v30  ;;  %v8315_v49 = vpop.f32.mrf.mxu1  ;;  %v22175_v20 = vmax.f32 %v20064_v29, %v22174_v4  ;;  %v22176_v30 = vld [vmem:[#allocation97_spill] sm:$0xff]  ;;  %v22178_v29 = vld [vmem:[#allocation96_spill] sm:$0xff]  ;;  %v10266_v39 = vld [vmem:[%s20688_s2] sm:$0xff]  ;;  %v11781_v43 = vmov 0  }
 0x665   :  { %22157 = vst [vmem:[#allocation86_spill] sm:$0xff] %v20142_v18  ;;  %v20150_v13 = vmax.f32 %v8821_v32, %v9205_v60  ;;  %v9252_v62 = vmax.f32 %v20044_v44, %v8315_v49  ;;  %v8124_v11 = vpop.f32.mrf.mxu0  ;;  %11512 = vset.pattern.permute.xlu0 %v11781_v43 }
 0x666   :  { %22158 = vst [vmem:[#allocation85_spill] sm:$0xff] %v20145_v51  ;;  %v20156_v41 = vmax.f32 %v22160_v63, %v9250_v47  ;;  %v9251_v17 = vmax.f32 %v20046_v10, %v8124_v11  ;;  %v8317_v28 = vpop.f32.mrf.mxu1  ;;  %v22177_v47 = vmax.f32 %v20070_v31, %v22176_v30  ;;  %v22180_v31 = vld [vmem:[#allocation94_spill] sm:$0xff]  ;;  %v10267_v63 = vld [vmem:[%s20688_s2 + $0x8] sm:$0xff]  ;;  %v21109_v51 = vmov 0.0  }
 0x667   :  { %22159 = vst [vmem:[#allocation84_spill] sm:$0xff] %v20150_v13  ;;  %v20164_v45 = vmax.f32 %v22162_v52, %v9252_v62  ;;  %v9253_v36 = vmax.f32 %v20048_v48, %v8317_v28  ;;  %v8126_v44 = vpop.f32.mrf.mxu0  ;;  %10444 = vmatprep.mubr.f32.mxu0 %v10267_v63  ;;  %10521 = vmatprep.mubr.f32.mxu1 %v21109_v51 }
 0x668   :  { %22161 = vst [vmem:[#allocation83_spill] sm:$0xff] %v20156_v41  ;;  %v20170_v25 = vmax.f32 %v22164_v38, %v9251_v17  ;;  %v9298_v22 = vmax.f32 %v20050_v58, %v8126_v44  ;;  %v8319_v10 = vpop.f32.mrf.mxu1  ;;  %v22179_v17 = vmax.f32 %v20076_v42, %v22178_v29  ;;  %v22181_v38 = vld [vmem:[#allocation95_spill] sm:$0xff]  ;;  %v22183_v42 = vld [vmem:[#allocation93_spill] sm:$0xff]  ;;  %10445 = vmatmul.mubr.f32.vlgmr.msra.gmra.mxu0 %v10266_v39 }
 0x669   :  { %22163 = vst [vmem:[#allocation81_spill] sm:$0xff] %v20164_v45  ;;  %v20178_v19 = vmax.f32 %v22166_v26, %v9253_v36  ;;  %v9300_v8 = vmax.f32 %v20052_v5, %v8319_v10  ;;  %v8128_v48 = vpop.f32.mrf.mxu0  ;;  %v22172_v5 = vld [vmem:[#allocation118_spill] sm:$0xff]  ;;  %v10269_v39 = vld [vmem:[%s20688_s2 + $0x18] sm:$0x3] }
 0x66a   :  { %22165 = vst [vmem:[#allocation80_spill] sm:$0xff] %v20170_v25  ;;  %v20184_v55 = vmax.f32 %v22168_v9, %v9298_v22  ;;  %v9685_v1 = vmax.f32 %v8128_v48, %v20054_v7  ;;  %v8321_v58 = vpop.f32.mrf.mxu1  ;;  %v22173_v37 = vmax.f32 %v20058_v16, %v22172_v5  ;;  %v22182_v22 = vmax.f32 %v22180_v31, %v22181_v38  ;;  %v10270_v45 = vld [vmem:[%s20688_s2 + $0x20] sm:$0x3] }
 0x66b   :  { %22167 = vst [vmem:[#allocation78_spill] sm:$0xff] %v20178_v19  ;;  %v20192_v33 = vmax.f32 %v22170_v40, %v9300_v8  ;;  %v8132_v54 = vpop.f32.mrf.mxu0  ;;  %v22184_v9 = vmax.f32 %v20088_v14, %v22183_v42  ;;  %v22185_v5 = vmax.f32 %v20094_v24, %v20092_v0  ;;  %v22186_v14 = vmax.f32 %v20100_v56, %v20098_v53 }
 0x66c   :  { %22169 = vst [vmem:[#allocation77_spill] sm:$0xff] %v20184_v55  ;;  %v20194_v57 = vmax.f32 %v8321_v58, %v9685_v1  ;;  %v20199_v6 = vmax.f32 %v8132_v54, %v22173_v37  ;;  %v20201_v21 = vpop.f32.mrf.mxu1  ;;  %10450 = vmatprep.mubr.f32.mxu0 %v10270_v45 }
 0x66d   :  { %22171 = vst [vmem:[#allocation76_spill] sm:$0xff] %v20192_v33  ;;  %v8134_v50 = vpop.f32.mrf.mxu0  ;;  %10451 = vmatmul.mubr.f32.gmra.mxu0 %v10269_v39  ;;  %v10369_v39 = vld [vmem:[%s20689_s3 + $0x8] sm:$0x3] }
 0x66e   :  { %v20210_v32 = vmax.f32 %v8134_v50, %v22175_v20  ;;  %v20212_v34 = vpop.f32.mrf.mxu1  ;;  %10377 = vperm.xlu0 %11512, %v10369_v39  }
 0x66f   :  { %v8136_v60 = vpop.f32.mrf.mxu0 }
 0x670   :  { %v20219_v49 = vmax.f32 %v8136_v60, %v22177_v47  ;;  %v20221_v62 = vpop.f32.mrf.mxu1 }
 0x671   :  { %v8138_v11 = vpop.f32.mrf.mxu0 }
 0x672   :  { %v20228_v28 = vmax.f32 %v8138_v11, %v22179_v17  ;;  %v20230_v52 = vpop.f32.mrf.mxu1 }
 0x673   :  { %v8142_v36 = vpop.f32.mrf.mxu0 }
 0x674   :  { %v20237_v10 = vmax.f32 %v8142_v36, %v22182_v22  ;;  %v20239_v26 = vpop.f32.mrf.mxu1 }
 0x675   :  { %v8144_v8 = vpop.f32.mrf.mxu0 }
 0x676   :  { %v20246_v1 = vmax.f32 %v8144_v8, %v22184_v9  ;;  %v20248_v58 = vpop.f32.mrf.mxu1 }
 0x677   :  { %v8146_v40 = vpop.f32.mrf.mxu0 }
 0x678   :  { %v20255_v37 = vmax.f32 %v8146_v40, %v22185_v5  ;;  %v20257_v50 = vpop.f32.mrf.mxu1 }
 0x679   :  { %v8148_v4 = vpop.f32.mrf.mxu0 }
 0x67a   :  { %v20264_v60 = vmax.f32 %v8148_v4, %v22186_v14  ;;  %v20266_v30 = vpop.f32.mrf.mxu1 }
 0x67b   :  { %v20268_v47 = vpop.f32.mrf.mxu0 }
 0x67c   :  { %v20272_v0 = vpop.f32.mrf.mxu1 }
 0x67d   :  { %v20274_v11 = vpop.f32.mrf.mxu0 }
 0x67e   :  { %v20276_v29 = vpop.f32.mrf.mxu1 }
 0x67f   :  { %v20278_v17 = vpop.f32.mrf.mxu0 }
 0x680   :  { %v20280_v36 = vpop.f32.mrf.mxu1 }
 0x681   :  { %v20282_v56 = vpop.f32.mrf.mxu0 }
 0x682   :  { %22187 = vst [vmem:[#allocation75_spill] sm:$0xff] %v20282_v56  ;;  %v20284_v53 = vpop.f32.mrf.mxu1  ;;  %v10368_v56 = vld [vmem:[%s20689_s3] sm:$0xff] }
 0x683   :  { %v20286_v31 = vpop.f32.mrf.mxu0  ;;  %10372 = vperm.xlu0 %11512, %v10368_v56   ;;  %v22202_v56 = vmax.f32 %v20201_v21, %v20199_v6 }
 0x684   :  { %v20288_v38 = vpop.f32.mrf.mxu1 }
 0x685   :  { %22188 = vst [vmem:[#allocation74_spill] sm:$0xff] %v20288_v38  ;;  %v20290_v22 = vpop.f32.mrf.mxu0 }
 0x686   :  { %22189 = vst [vmem:[#allocation73_spill] sm:$0xff] %v20290_v22  ;;  %v20292_v8 = vpop.f32.mrf.mxu1 }
 0x687   :  { %22190 = vst [vmem:[#allocation71_spill] sm:$0xff] %v20292_v8  ;;  %v20294_v42 = vpop.f32.mrf.mxu0 }
 0x688   :  { %22191 = vst [vmem:[#allocation34_spill] sm:$0xff] %v20294_v42  ;;  %v20296_v9 = vpop.f32.mrf.mxu1 }
 0x689   :  { %v20298_v40 = vpop.f32.mrf.mxu0 }
 0x68a   :  { %v20300_v5 = vpop.f32.mrf.mxu1 }
 0x68c   :  { %v20302_v4 = vpop.f32.mrf.mxu0 }
 0x68d   :  { %v20304_v14 = vpop.f32.mrf.mxu1 }
 0x68e   :  { %v20306_v7 = vpop.f32.mrf.mxu0 }
 0x68f   :  { %v20308_v46 = vpop.f32.mrf.mxu1 }
 0x690   :  { %v20310_v59 = vpop.f32.mrf.mxu0 }
 0x691   :  { %v20312_v15 = vpop.f32.mrf.mxu1 }
 0x692   :  { %v20314_v12 = vpop.f32.mrf.mxu0 }
 0x693   :  { %v20316_v27 = vpop.f32.mrf.mxu1 }
 0x694   :  { %v20318_v3 = vpop.f32.mrf.mxu0 }
 0x695   :  { %v20320_v24 = vpop.f32.mrf.mxu1 }
 0x696   :  { %v20322_v20 = vpop.f32.mrf.mxu0 }
 0x697   :  { %v20324_v54 = vpop.f32.mrf.mxu1 }
 0x698   :  { %v20326_v48 = vpop.f32.mrf.mxu0 }
 0x699   :  { %v20328_v44 = vpop.f32.mrf.mxu1 }
 0x69a   :  { %v20333_v16 = vpop.f32.mrf.mxu0 }
 0x69b   :  { %v20338_v33 = vpop.f32.mrf.mxu1 }
 0x69c   :  { %v20340_v55 = vpop.f32.mrf.mxu0 }
 0x69d   :  { %v20344_v25 = vpop.f32.mrf.mxu1 }
 0x69e   :  { %v20351_v41 = vpop.f32.mrf.mxu0 }
 0x69f   :  { %v20358_v19 = vpop.f32.mrf.mxu1 }
 0x6a0   :  { %v20363_v63 = vpop.f32.mrf.mxu0 }
 0x6a1   :  { %v20367_v23 = vpop.f32.mrf.mxu1 }
 0x6a2   :  { %22192 = vst [vmem:[#allocation53_spill] sm:$0xff] %v20367_v23  ;;  %v20371_v13 = vpop.f32.mrf.mxu0 }
 0x6a3   :  { %22193 = vst [vmem:[#allocation50_spill] sm:$0xff] %v20371_v13  ;;  %v20375_v51 = vpop.f32.mrf.mxu1 }
 0x6a4   :  { %22194 = vst [vmem:[#allocation70_spill] sm:$0xff] %v20375_v51 }
 0x6a5   :  { %v20382_v45 = vpop.f32.mrf.mxu0 }
 0x6a6   :  { %22195 = vst [vmem:[#allocation43_spill] sm:$0xff] %v20382_v45  ;;  %v20386_v23 = vpop.f32.mrf.mxu1 }
 0x6a7   :  { %22196 = vst [vmem:[#allocation60_spill] sm:$0xff] %v20386_v23  ;;  %v20390_v13 = vpop.f32.mrf.mxu0 }
 0x6a8   :  { %22197 = vst [vmem:[#allocation69_spill] sm:$0xff] %v20390_v13  ;;  %v20397_v51 = vpop.f32.mrf.mxu1 }
 0x6a9   :  { %22198 = vst [vmem:[#allocation68_spill] sm:$0xff] %v20397_v51  ;;  %v20401_v61 = vpop.f32.mrf.mxu0 }
 0x6aa   :  { %22199 = vst [vmem:[#allocation67_spill] sm:$0xff] %v20401_v61  ;;  %v20405_v2 = vpop.f32.mrf.mxu1 }
 0x6ab   :  { %22200 = vst [vmem:[#allocation66_spill] sm:$0xff] %v20405_v2  ;;  %v8434_v38 = vpop.f32.mrf.mxu0 }
 0x6ac   :  { %v8919_v45 = vmax.f32 %v20298_v40, %v8434_v38  ;;  %v8627_v18 = vpop.f32.mrf.mxu1 }
 0x6ad   :  { %v8921_v13 = vmax.f32 %v20300_v5, %v8627_v18  ;;  %v8438_v22 = vpop.f32.mrf.mxu0 }
 0x6ae   :  { %v9303_v43 = vmax.f32 %v8919_v45, %v20194_v57  ;;  %v8966_v51 = vmax.f32 %v20302_v4, %v8438_v22  ;;  %v8631_v8 = vpop.f32.mrf.mxu1  ;;  %v22203_v57 = vmax.f32 %v20212_v34, %v20210_v32 }
 0x6af   :  { %v8968_v39 = vmax.f32 %v20304_v14, %v8631_v8  ;;  %v8440_v61 = vpop.f32.mrf.mxu0 }
 0x6b0   :  { %v20414_v42 = vmax.f32 %v8921_v13, %v9303_v43  ;;  %v9350_v23 = vmax.f32 %v8966_v51, %v22202_v56  ;;  %v8967_v38 = vmax.f32 %v20306_v7, %v8440_v61  ;;  %v8633_v40 = vpop.f32.mrf.mxu1  ;;  %v22204_v61 = vmax.f32 %v20221_v62, %v20219_v49 }
 0x6b1   :  { %v8969_v18 = vmax.f32 %v20308_v46, %v8633_v40  ;;  %v8442_v5 = vpop.f32.mrf.mxu0  ;;  %v22206_v49 = vmax.f32 %v20239_v26, %v20237_v10  ;;  %v22208_v26 = vmax.f32 %v20257_v50, %v20255_v37 }
 0x6b2   :  { %22201 = vst [vmem:[#allocation65_spill] sm:$0xff] %v20414_v42  ;;  %v20421_v2 = vmax.f32 %v8968_v39, %v9350_v23  ;;  %v9351_v22 = vmax.f32 %v8967_v38, %v22203_v57  ;;  %v9014_v8 = vmax.f32 %v20310_v59, %v8442_v5  ;;  %v8635_v13 = vpop.f32.mrf.mxu1  ;;  %v22205_v59 = vmax.f32 %v20230_v52, %v20228_v28 }
 0x6b3   :  { %v9016_v4 = vmax.f32 %v20312_v15, %v8635_v13  ;;  %v8444_v14 = vpop.f32.mrf.mxu0  ;;  %v22207_v28 = vmax.f32 %v20248_v58, %v20246_v1  ;;  %v22209_v58 = vmax.f32 %v20266_v30, %v20264_v60 }
 0x6b4   :  { %v20428_v6 = vmax.f32 %v8969_v18, %v9351_v22  ;;  %v9398_v51 = vmax.f32 %v9014_v8, %v22204_v61  ;;  %v9015_v46 = vmax.f32 %v20314_v12, %v8444_v14  ;;  %v8637_v23 = vpop.f32.mrf.mxu1 }
 0x6b5   :  { %v9017_v21 = vmax.f32 %v20316_v27, %v8637_v23  ;;  %v8448_v7 = vpop.f32.mrf.mxu0 }
 0x6b6   :  { %v20435_v32 = vmax.f32 %v9016_v4, %v9398_v51  ;;  %v9399_v34 = vmax.f32 %v9015_v46, %v22205_v59  ;;  %v9062_v15 = vmax.f32 %v20318_v3, %v8448_v7  ;;  %v8641_v45 = vpop.f32.mrf.mxu1 }
 0x6b7   :  { %v8450_v43 = vpop.f32.mrf.mxu0  ;;  %v9064_v62 = vmax.f32 %v20320_v24, %v8641_v45 }
 0x6b8   :  { %v20441_v39 = vmax.f32 %v9017_v21, %v9399_v34  ;;  %v9446_v12 = vmax.f32 %v9062_v15, %v22206_v49  ;;  %v9063_v27 = vmax.f32 %v20322_v20, %v8450_v43  ;;  %v8643_v56 = vpop.f32.mrf.mxu1 }
 0x6b9   :  { %v8452_v38 = vpop.f32.mrf.mxu0  ;;  %v9065_v52 = vmax.f32 %v20324_v54, %v8643_v56 }
 0x6ba   :  { %v20448_v40 = vmax.f32 %v9064_v62, %v9446_v12  ;;  %v9447_v3 = vmax.f32 %v9063_v27, %v22207_v28  ;;  %v9110_v18 = vmax.f32 %v20326_v48, %v8452_v38  ;;  %v8645_v5 = vpop.f32.mrf.mxu1 }
 0x6bb   :  { %v8454_v57 = vpop.f32.mrf.mxu0  ;;  %v9112_v24 = vmax.f32 %v20328_v44, %v8645_v5 }
 0x6bc   :  { %v20455_v10 = vmax.f32 %v9065_v52, %v9447_v3  ;;  %v9494_v20 = vmax.f32 %v9110_v18, %v22208_v26  ;;  %v9111_v22 = vmax.f32 %v20333_v16, %v8454_v57  ;;  %v8647_v8 = vpop.f32.mrf.mxu1 }
 0x6bd   :  { %v8458_v13 = vpop.f32.mrf.mxu0  ;;  %v9113_v54 = vmax.f32 %v20338_v33, %v8647_v8 }
 0x6be   :  { %v20462_v1 = vmax.f32 %v9112_v24, %v9494_v20  ;;  %v9495_v48 = vmax.f32 %v9111_v22, %v22209_v58  ;;  %v8651_v4 = vpop.f32.mrf.mxu1  ;;  %v22216_v58 = vmax.f32 %v20268_v47, %v20340_v55 }
 0x6bf   :  { %v8460_v14 = vpop.f32.mrf.mxu0 }
 0x6c0   :  { %v20468_v61 = vmax.f32 %v9113_v54, %v9495_v48  ;;  %v8653_v37 = vpop.f32.mrf.mxu1 }
 0x6c1   :  { %v8462_v50 = vpop.f32.mrf.mxu0 }
 0x6c2   :  { %v8655_v51 = vpop.f32.mrf.mxu1 }
 0x6c3   :  { %v8464_v44 = vpop.f32.mrf.mxu0 }
 0x6c4   :  { %v8657_v46 = vpop.f32.mrf.mxu1 }
 0x6c5   :  { %v8468_v16 = vpop.f32.mrf.mxu0 }
 0x6c6   :  { %v20470_v23 = vpop.f32.mrf.mxu1 }
 0x6c7   :  { %v20472_v21 = vpop.f32.mrf.mxu0 }
 0x6c8   :  { %v20474_v7 = vpop.f32.mrf.mxu1 }
 0x6c9   :  { %v20476_v60 = vpop.f32.mrf.mxu0 }
 0x6ca   :  { %v20478_v30 = vpop.f32.mrf.mxu1 }
 0x6cb   :  { %v20480_v33 = vpop.f32.mrf.mxu0 }
 0x6cc   :  { %22210 = vst [vmem:[#allocation64_spill] sm:$0xff] %v20480_v33  ;;  %v20482_v59 = vpop.f32.mrf.mxu1  ;;  %v22218_v33 = vmax.f32 %v20274_v11, %v20351_v41 }
 0x6cd   :  { %22211 = vst [vmem:[#allocation62_spill] sm:$0xff] %v20482_v59  ;;  %v20484_v34 = vpop.f32.mrf.mxu0 }
 0x6ce   :  { %v20486_v15 = vpop.f32.mrf.mxu1 }
 0x6cf   :  { %22212 = vst [vmem:[#allocation61_spill] sm:$0xff] %v20486_v15  ;;  %v20488_v45 = vpop.f32.mrf.mxu0  ;;  %v22217_v15 = vmax.f32 %v20272_v0, %v20344_v25 }
 0x6d0   :  { %v20490_v43 = vpop.f32.mrf.mxu1 }
 0x6d1   :  { %22213 = vst [vmem:[#allocation59_spill] sm:$0xff] %v20490_v43  ;;  %v20492_v49 = vpop.f32.mrf.mxu0 }
 0x6d2   :  { %v20494_v12 = vpop.f32.mrf.mxu1 }
 0x6d3   :  { %22214 = vst [vmem:[#allocation58_spill] sm:$0xff] %v20494_v12  ;;  %v20496_v62 = vpop.f32.mrf.mxu0 }
 0x6d4   :  { %v20498_v27 = vpop.f32.mrf.mxu1 }
 0x6d5   :  { %22215 = vst [vmem:[#allocation57_spill] sm:$0xff] %v20498_v27  ;;  %v20500_v56 = vpop.f32.mrf.mxu0 }
 0x6d6   :  { %v20502_v38 = vpop.f32.mrf.mxu1 }
 0x6d7   :  { %v20504_v28 = vpop.f32.mrf.mxu0 }
 0x6d8   :  { %v20506_v3 = vpop.f32.mrf.mxu1 }
 0x6d9   :  { %v20508_v52 = vpop.f32.mrf.mxu0 }
 0x6da   :  { %v20510_v18 = vpop.f32.mrf.mxu1 }
 0x6db   :  { %v20512_v5 = vpop.f32.mrf.mxu0 }
 0x6dc   :  { %v20514_v57 = vpop.f32.mrf.mxu1 }
 0x6dd   :  { %v8498_v26 = vpop.f32.mrf.mxu0 }
 0x6de   :  { %v9158_v20 = vmax.f32 %v8458_v13, %v8498_v26  ;;  %v8691_v24 = vpop.f32.mrf.mxu1 }
 0x6df   :  { %v9160_v22 = vmax.f32 %v8651_v4, %v8691_v24  ;;  %v8500_v8 = vpop.f32.mrf.mxu0  ;;  %v22219_v24 = vmax.f32 %v20276_v29, %v20358_v19 }
 0x6e0   :  { %v9542_v48 = vmax.f32 %v22216_v58, %v9158_v20  ;;  %v9159_v54 = vmax.f32 %v8460_v14, %v8500_v8  ;;  %v8693_v59 = vpop.f32.mrf.mxu1  ;;  %v22220_v20 = vmax.f32 %v20278_v17, %v20363_v63  ;;  %v22228_v8 = vld [vmem:[#allocation70_spill] sm:$0xff] }
 0x6e1   :  { %v9544_v43 = vmax.f32 %v22217_v15, %v9160_v22  ;;  %v9161_v12 = vmax.f32 %v8653_v37, %v8693_v59  ;;  %v8502_v27 = vpop.f32.mrf.mxu0  ;;  %v22221_v59 = vld [vmem:[#allocation91_spill] sm:$0xff]  ;;  %v22229_v58 = vmax.f32 %v20284_v53, %v22228_v8  ;;  %v22248_v8 = vld [vmem:[#allocation84_spill] sm:$0xff] }
 0x6e2   :  { %v9543_v42 = vmax.f32 %v22218_v33, %v9159_v54  ;;  %v9206_v13 = vmax.f32 %v8462_v50, %v8502_v27  ;;  %v8695_v26 = vpop.f32.mrf.mxu1  ;;  %v22222_v15 = vmax.f32 %v20109_v35, %v22221_v59  ;;  %v22223_v50 = vld [vmem:[#allocation53_spill] sm:$0xff]  ;;  %v22230_v54 = vld [vmem:[#allocation90_spill] sm:$0xff] }
 0x6e3   :  { %v10218_v4 = vmax.f32 %v9542_v48, %v9544_v43  ;;  %v9545_v55 = vmax.f32 %v22219_v24, %v9161_v12  ;;  %v9208_v47 = vmax.f32 %v8655_v51, %v8695_v26  ;;  %v8504_v14 = vpop.f32.mrf.mxu0  ;;  %v22224_v33 = vmax.f32 %v20280_v36, %v22223_v50  ;;  %v22225_v51 = vld [vmem:[#allocation75_spill] sm:$0xff]  ;;  %v22226_v12 = vld [vmem:[#allocation50_spill] sm:$0xff]  ;;  %v22241_v50 = vld [vmem:[#allocation73_spill] sm:$0xff] }
 0x6e4   :  { %v9590_v25 = vmax.f32 %v22220_v20, %v9206_v13  ;;  %v9207_v0 = vmax.f32 %v8464_v44, %v8504_v14  ;;  %v8697_v37 = vpop.f32.mrf.mxu1  ;;  %v22227_v27 = vmax.f32 %v22225_v51, %v22226_v12  ;;  %v22231_v13 = vld [vmem:[#allocation88_spill] sm:$0xff]  ;;  %v22236_v14 = vld [vmem:[#allocation86_spill] sm:$0xff]  ;;  %v22244_v51 = vld [vmem:[#allocation71_spill] sm:$0xff] }
 0x6e5   :  { %v20534_v41 = vmax.f32 %v22222_v15, %v10218_v4  ;;  %v10219_v11 = vmax.f32 %v9543_v42, %v9545_v55  ;;  %v9592_v43 = vmax.f32 %v22224_v33, %v9208_v47  ;;  %v9209_v19 = vmax.f32 %v8657_v46, %v8697_v37  ;;  %v8508_v29 = vpop.f32.mrf.mxu0  ;;  %v22233_v46 = vld [vmem:[#allocation43_spill] sm:$0xff]  ;;  %v22242_v33 = vld [vmem:[#allocation69_spill] sm:$0xff]  ;;  %v22245_v12 = vld [vmem:[#allocation68_spill] sm:$0xff] }
 0x6e6   :  { %v9591_v22 = vmax.f32 %v22227_v27, %v9207_v0  ;;  %v9254_v17 = vmax.f32 %v8468_v16, %v8508_v29  ;;  %v8701_v63 = vpop.f32.mrf.mxu1  ;;  %v22232_v36 = vmax.f32 %v22230_v54, %v22231_v13  ;;  %v22234_v4 = vmax.f32 %v20286_v31, %v22233_v46  ;;  %v22235_v47 = vld [vmem:[#allocation87_spill] sm:$0xff]  ;;  %v22239_v0 = vld [vmem:[#allocation60_spill] sm:$0xff] }
 0x6e7   :  { %v10220_v44 = vmax.f32 %v9590_v25, %v9592_v43  ;;  %v9593_v35 = vmax.f32 %v22229_v58, %v9209_v19  ;;  %v9256_v48 = vmax.f32 %v20470_v23, %v8701_v63  ;;  %v8510_v42 = vpop.f32.mrf.mxu0  ;;  %v22237_v20 = vmax.f32 %v22235_v47, %v22236_v14  ;;  %v22238_v23 = vld [vmem:[#allocation74_spill] sm:$0xff]  ;;  %v22253_v13 = vld [vmem:[#allocation83_spill] sm:$0xff] }
 0x6e8   :  { %v20549_v26 = vmax.f32 %v22232_v36, %v10219_v11  ;;  %v9638_v24 = vmax.f32 %v22234_v4, %v9254_v17  ;;  %v9255_v16 = vmax.f32 %v20472_v21, %v8510_v42  ;;  %v8703_v55 = vpop.f32.mrf.mxu1  ;;  %v22240_v37 = vmax.f32 %v22238_v23, %v22239_v0  ;;  %v22254_v36 = vld [vmem:[#allocation81_spill] sm:$0xff]  ;;  %v22258_v23 = vld [vmem:[#allocation80_spill] sm:$0xff]  ;;  %v22259_v0 = vld [vmem:[#allocation78_spill] sm:$0xff] }
 0x6e9   :  { %v20558_v53 = vmax.f32 %v22237_v20, %v10220_v44  ;;  %v10221_v25 = vmax.f32 %v9591_v22, %v9593_v35  ;;  %v9257_v15 = vmax.f32 %v20474_v7, %v8703_v55  ;;  %v8512_v11 = vpop.f32.mrf.mxu0  ;;  %v22243_v31 = vmax.f32 %v22241_v50, %v22242_v33  ;;  %v22247_v44 = vld [vmem:[#allocation85_spill] sm:$0xff]  ;;  %v22250_v35 = vld [vmem:[#allocation34_spill] sm:$0xff]  ;;  %v22262_v50 = vld [vmem:[#allocation76_spill] sm:$0xff] }
 0x6ea   :  { %v9640_v59 = vmax.f32 %v22240_v37, %v9256_v48  ;;  %v9302_v21 = vmax.f32 %v20476_v60, %v8512_v11  ;;  %v8705_v19 = vpop.f32.mrf.mxu1  ;;  %v22246_v27 = vmax.f32 %v22244_v51, %v22245_v12  ;;  %v22249_v7 = vmax.f32 %v22247_v44, %v22248_v8  ;;  %v22251_v48 = vld [vmem:[#allocation67_spill] sm:$0xff]  ;;  %v22261_v11 = vld [vmem:[#allocation77_spill] sm:$0xff] }
 0x6eb   :  { %v9639_v43 = vmax.f32 %v22243_v31, %v9255_v16  ;;  %v9304_v22 = vmax.f32 %v20478_v30, %v8705_v19  ;;  %v20572_v63 = vpop.f32.mrf.mxu0  ;;  %v22252_v42 = vmax.f32 %v22250_v35, %v22251_v48  ;;  %v22255_v46 = vmax.f32 %v22253_v13, %v22254_v36  ;;  %v22256_v30 = vld [vmem:[#allocation66_spill] sm:$0xff]  ;;  %v22264_v48 = vld [vmem:[#allocation65_spill] sm:$0xff] }
 0x6ec   :  { %v10222_v29 = vmax.f32 %v9638_v24, %v9640_v59  ;;  %v9641_v17 = vmax.f32 %v22246_v27, %v9257_v15  ;;  %v20577_v58 = vmax.f32 %v22249_v7, %v10221_v25  ;;  %v20582_v60 = vpop.f32.mrf.mxu1  ;;  %v22257_v16 = vmax.f32 %v20296_v9, %v22256_v30 }
 0x6ed   :  { %v9686_v54 = vmax.f32 %v22252_v42, %v9302_v21  ;;  %v8518_v47 = vpop.f32.mrf.mxu0  ;;  %v22260_v37 = vmax.f32 %v22258_v23, %v22259_v0  ;;  %v22263_v33 = vmax.f32 %v22261_v11, %v22262_v50  ;;  %v9496_v9 = vmax.f32 %v20508_v52, %v20462_v1 }
 0x6ee   :  { %v20587_v4 = vmax.f32 %v22255_v46, %v10222_v29  ;;  %v10223_v24 = vmax.f32 %v9639_v43, %v9641_v17  ;;  %v9688_v55 = vmax.f32 %v22257_v16, %v9304_v22  ;;  %v8711_v14 = vpop.f32.mrf.mxu1  ;;  %v9449_v12 = vmax.f32 %v20504_v28, %v20455_v10 }
 0x6ef   :  { %v8520_v25 = vpop.f32.mrf.mxu0  ;;  %v9497_v27 = vmax.f32 %v20512_v5, %v20468_v61  ;;  %v9448_v22 = vmax.f32 %v20500_v56, %v20448_v40  ;;  %v9401_v8 = vmax.f32 %v20496_v62, %v20441_v39  ;;  %v9400_v35 = vmax.f32 %v20492_v49, %v20435_v32  ;;  %v22265_v32 = vld [vmem:[#allocation64_spill] sm:$0xff] }
 0x6f0   :  { %v10224_v20 = vmax.f32 %v9686_v54, %v9688_v55  ;;  %v10239_v59 = vmax.f32 %v22260_v37, %v10223_v24  ;;  %v8713_v15 = vpop.f32.mrf.mxu1  ;;  %v9880_v1 = vmax.f32 %v20510_v18, %v9496_v9  ;;  %v9353_v10 = vmax.f32 %v20488_v45, %v20428_v6  ;;  %v22266_v18 = vld [vmem:[#allocation57_spill] sm:$0xff]  ;;  %v22267_v6 = vld [vmem:[#allocation58_spill] sm:$0xff] }
 0x6f1   :  { %v8522_v21 = vpop.f32.mrf.mxu0  ;;  %v9833_v61 = vmax.f32 %v20506_v3, %v9449_v12  ;;  %v9881_v28 = vmax.f32 %v20514_v57, %v9497_v27  ;;  %v9352_v40 = vmax.f32 %v20484_v34, %v20421_v2  ;;  %v9832_v39 = vmax.f32 %v20502_v38, %v9448_v22  ;;  %v22268_v57 = vld [vmem:[#allocation59_spill] sm:$0xff]  ;;  %v22269_v2 = vld [vmem:[#allocation61_spill] sm:$0xff]  ;;  %v22270_v55 = vld [vmem:[#allocation62_spill] sm:$0xff] }
 0x6f2   :  { %v10240_v31 = vmax.f32 %v22263_v33, %v10224_v20  ;;  %v8715_v19 = vpop.f32.mrf.mxu1  ;;  %v9305_v49 = vmax.f32 %v22265_v32, %v22264_v48  ;;  %v9785_v42 = vmax.f32 %v22266_v18, %v9401_v8  ;;  %v9784_v45 = vmax.f32 %v22267_v6, %v9400_v35  ;;  %v22287_v27 = vld [vmem:[#allocation22_spill] sm:$0xff]  ;;  %v22289_v22 = vld [vmem:[#allocation23_spill] sm:$0xff]  ;;  %v22307_v18 = vld [vmem:[#allocation33_spill] sm:$0xff] }
 0x6f3   :  { %v8524_v43 = vpop.f32.mrf.mxu0  ;;  %v9737_v46 = vmax.f32 %v22268_v57, %v9353_v10  ;;  %v9736_v34 = vmax.f32 %v22269_v2, %v9352_v40  ;;  %v22293_v35 = vld [vmem:[#allocation14_spill] sm:$0xff]  ;;  %v22296_v10 = vld [vmem:[#allocation21_spill] sm:$0xff]  ;;  %v22304_v48 = vld [vmem:[#allocation31_spill] sm:$0xff]  ;;  %v10378_v57 = vpop.permute.xlu0 %10377 }
 0x6f4   :  { %v8717_v29 = vpop.f32.mrf.mxu1  ;;  %v10229_v24 = vmax.f32 %v8524_v43, %v9785_v42  ;;  %v10228_v38 = vmax.f32 %v8522_v21, %v9784_v45  ;;  %v9689_v20 = vmax.f32 %v22270_v55, %v9305_v49  ;;  %v22305_v32 = vld [vmem:[#allocation35_spill] sm:$0xff]  ;;  %v22308_v42 = vld [vmem:[#allocation30_spill] sm:$0xff]  ;;  %v22311_v45 = vmov 0.0  }
 0x6f5   :  { %v8528_v51 = vpop.f32.mrf.mxu0  ;;  %v10227_v23 = vmax.f32 %v8520_v25, %v9737_v46  ;;  %v10226_v37 = vmax.f32 %v8518_v47, %v9736_v34  ;;  %v22272_v47 = vld [vmem:[#allocation101_spill] sm:$0xff]  ;;  %v22275_v25 = vld [vmem:[#allocation16_spill] sm:$0xff]  ;;  %v22306_v49 = vmax.f32 %v22304_v48, %v22305_v32  ;;  %v22310_v6 = vld [vmem:[#allocation27_spill] sm:$0xff] }
 0x6f6   :  { %v8721_v17 = vpop.f32.mrf.mxu1  ;;  %v10230_v3 = vmax.f32 %v8528_v51, %v9832_v39  ;;  %v10225_v50 = vmax.f32 %v20572_v63, %v9689_v20  ;;  %v10245_v33 = vmax.f32 %v8717_v29, %v10229_v24  ;;  %v10244_v9 = vmax.f32 %v8715_v19, %v10228_v38  ;;  %v22271_v63 = vld [vmem:[#allocation111_spill] sm:$0xff]  ;;  %v22301_v39 = vld [vmem:[#allocation12_spill] sm:$0xff] }
 0x6f7   :  { %v8530_v44 = vpop.f32.mrf.mxu0  ;;  %v10243_v43 = vmax.f32 %v8713_v15, %v10227_v23  ;;  %v10242_v51 = vmax.f32 %v8711_v14, %v10226_v37  ;;  %v22273_v14 = vmax.f32 %v22271_v63, %v22272_v47 }
 0x6f8   :  { %v8723_v7 = vpop.f32.mrf.mxu1  ;;  %v10231_v54 = vmax.f32 %v8530_v44, %v9833_v61  ;;  %v10246_v11 = vmax.f32 %v8721_v17, %v10230_v3  ;;  %v10241_v21 = vmax.f32 %v20582_v60, %v10225_v50  ;;  %v22274_v60 = vld [vmem:[#allocation24_spill] sm:$0xff]  ;;  %v22290_v44 = vld [vmem:[#allocation63_spill] sm:$0xff] }
 0x6f9   :  { %v8532_v52 = vpop.f32.mrf.mxu0  ;;  %v22276_v15 = vmax.f32 %v22274_v60, %v22275_v25  ;;  %v22291_v8 = vmax.f32 %v22289_v22, %v22290_v44  ;;  %v10271_v3 = vld [vmem:[%s20688_s2 + $0x28] sm:$0x3] }
 0x6fa   :  { %v8725_v5 = vpop.f32.mrf.mxu1  ;;  %v10232_v62 = vmax.f32 %v8532_v52, %v9880_v1  ;;  %v10247_v0 = vmax.f32 %v8723_v7, %v10231_v54  ;;  %v22292_v7 = vld [vmem:[#allocation20_spill] sm:$0xff]  ;;  %v22295_v52 = vld [vmem:[#allocation11_spill] sm:$0xff] }
 0x6fb   :  { %v8534_v56 = vpop.f32.mrf.mxu0  ;;  %v22294_v1 = vmax.f32 %v22292_v7, %v22293_v35  ;;  %v22297_v61 = vmax.f32 %v22295_v52, %v22296_v10  ;;  %v10268_v54 = vld [vmem:[%s20688_s2 + $0x10] sm:$0xff]  ;;  %s11782_s2 = smov [#allocation7]  }
 0x6fc   :  { %v10233_v13 = vmax.f32 %v8534_v56, %v9881_v28  ;;  %v8727_v36 = vpop.f32.mrf.mxu1  ;;  %v10248_v16 = vmax.f32 %v8725_v5, %v10232_v62  ;;  %v22298_v28 = vld [vmem:[#allocation40_spill] sm:$0xff]  ;;  %v22299_v5 = vld [vmem:[#allocation10_spill] sm:$0xff]  ;;  %s10596_s15 = sshll.u32 %s11782_s2, 4  ;;  %s10597_s15 = int_to_ptr.vmem [resolvable:$true] %s10596_s15 }
 0x6fd   :  { %v22300_v40 = vmax.f32 %v22298_v28, %v22299_v5  ;;  %v22302_v62 = vld [vmem:[#allocation32_spill] sm:$0xff]  ;;  %s11753_s16 = scalar_lea.vmem %s10597_s15, 512  ;;  %p11758_p6 = scmp.lt.s32.totalorder %s10597_s15, %s10597_s15 }
 0x6fe   :  { %v10249_v30 = vmax.f32 %v8727_v36, %v10233_v13  ;;  %v22303_v56 = vmax.f32 %v22301_v39, %v22302_v62  ;;  %v22309_v13 = vld [vmem:[#allocation28_spill] sm:$0xff]  ;;  %p11754_p5 = scmp.ne.s32.totalorder %s10597_s15, %s11753_s16  ;;  %p11759_p7 = scmp.lt.s32.totalorder %s11753_s16, %s11753_s16 }
 0x700   :  { %10457 = vmatprep.subr.mxu1 %v10249_v30  ;;  %v10373_v30 = vpop.permute.xlu0 %10372  ;;  %p11760_p8 = por %p11759_p7, %p11758_p6 }
 0x701   :  { %10458 = vmatpush1.msra.mxu1 %v10248_v16 }
 0x702   :  { %10459 = vmatprep.subr.mxu1 %v10247_v0  ;;  %p11761_p9 = pnand %p11760_p8, %p11754_p5 }
 0x703   :  { %10460 = vmatpush1.msra.mxu1 %v10246_v11 }
 0x704   :  { %10461 = vmatprep.subr.mxu1 %v10245_v33 }
 0x705   :  { %10462 = vmatpush1.msra.mxu1 %v10244_v9 }
 0x706   :  { %10463 = vmatprep.subr.mxu1 %v10243_v43 }
 0x707   :  { %10464 = vmatpush1.msra.mxu1 %v10242_v51 }
 0x708   :  { %10465 = vmatprep.subr.mxu1 %v10241_v21 }
 0x709   :  { %10466 = vmatpush1.msra.mxu1 %v10240_v31  ;;  %v22277_v31 = vld [vmem:[#allocation26_spill] sm:$0xff] }
 0x70a   :  { %10467 = vmatprep.subr.mxu1 %v10239_v59  ;;  %v22278_v59 = vld [vmem:[#allocation108_spill] sm:$0xff] }
 0x70b   :  { %10468 = vmatpush1.msra.mxu1 %v20587_v4  ;;  %v22279_v19 = vmax.f32 %v22277_v31, %v22278_v59  ;;  %v22280_v4 = vld [vmem:[#allocation25_spill] sm:$0xff] }
 0x70c   :  { %10469 = vmatprep.subr.mxu1 %v20577_v58  ;;  %v22281_v58 = vld [vmem:[#allocation92_spill] sm:$0xff] }
 0x70d   :  { %10470 = vmatpush1.msra.mxu1 %v20558_v53  ;;  %v22282_v29 = vmax.f32 %v22280_v4, %v22281_v58  ;;  %v22283_v53 = vld [vmem:[#allocation17_spill] sm:$0xff] }
 0x70e   :  { %10471 = vmatprep.subr.mxu1 %v20549_v26  ;;  %v22284_v26 = vld [vmem:[#allocation19_spill] sm:$0xff] }
 0x70f   :  { %10472 = vmatpush1.msra.mxu1 %v20534_v41  ;;  %v22285_v12 = vmax.f32 %v22283_v53, %v22284_v26  ;;  %v22286_v41 = vld [vmem:[#allocation15_spill] sm:$0xff] }
 0x710   :  { %10473 = vmatprep.subr.mxu1 %v22273_v14  ;;  %v22288_v17 = vmax.f32 %v22286_v41, %v22287_v27 }
 0x711   :  { %10474 = vmatpush1.msra.mxu1 %v22276_v15 }
 0x712   :  { %10475 = vmatprep.subr.mxu1 %v22279_v19 }
 0x713   :  { %10476 = vmatpush1.msra.mxu1 %v22282_v29 }
 0x714   :  { %10477 = vmatprep.subr.mxu1 %v22285_v12 }
 0x715   :  { %10478 = vmatpush1.msra.mxu1 %v22288_v17 }
 0x716   :  { %10479 = vmatprep.subr.mxu1 %v22291_v8 }
 0x717   :  { %10480 = vmatpush1.msra.mxu1 %v22294_v1 }
 0x718   :  { %10481 = vmatprep.subr.mxu1 %v22297_v61 }
 0x719   :  { %10482 = vmatpush1.msra.mxu1 %v22300_v40 }
 0x71a   :  { %10483 = vmatprep.subr.mxu1 %v22303_v56 }
 0x71b   :  { %10484 = vmatpush1.msra.mxu1 %v22306_v49 }
 0x71c   :  { %10485 = vmatprep.subr.mxu1 %v22307_v18 }
 0x71d   :  { %10486 = vmatpush1.msra.mxu1 %v22308_v42 }
 0x71e   :  { %10487 = vmatprep.subr.mxu1 %v22309_v13 }
 0x71f   :  { %10488 = vmatpush1.msra.mxu1 %v22310_v6 }
 0x720   :  { %10522 = vmatmul.mubr.f32.vlgmr.msra.gmra.mxu1 %v10268_v54 }
 0x721   :  { %10527 = vmatprep.mubr.f32.mxu1 %v22311_v45 }
 0x724   :  { %10528 = vmatmul.mubr.f32.gmra.mxu1 %v10271_v3 }
 0x728   :  { %v10446_v36 = vpop.f32.mrf.mxu0 }
 0x729   :  { %v10447_v55 = vadd.f32 %v10446_v36, %v10373_v30 }
 0x72a   :  { %v10448_v46 = vpop.f32.mrf.mxu0 }
 0x72b   :  { %v10449_v37 = vadd.f32 %v10448_v46, %v10373_v30 }
 0x72d   :  { %v10452_v24 = vpop.f32.mrf.mxu0 }
 0x72e   :  { %v10453_v34 = vadd.f32 %v10452_v24, %v10378_v57 }
 0x72f   :  { %v10454_v16 = vpop.f32.mrf.mxu0 }
 0x730   :  { %v10455_v23 = vadd.f32 %v10454_v16, %v10378_v57 }
 0x7e0   :  { %v10523_v2 = vpop.f32.mrf.mxu1 }
 0x7e1   :  { %v10524_v11 = vadd.f32 %v10523_v2, %v10447_v55 }
 0x7e2   :  { %v10525_v38 = vpop.f32.mrf.mxu1 }
 0x7e3   :  { %v10526_v43 = vadd.f32 %v10525_v38, %v10449_v37 }
 0x7e4   :  { %v10529_v20 = vpop.f32.mrf.mxu1 }
 0x7e5   :  { %v10530_v0 = vadd.f32 %v10529_v20, %v10453_v34 }
 0x7e6   :  { %v10531_v50 = vpop.f32.mrf.mxu1 }
 0x7e7   :  { %v10535_v33 = vsel %vm10534_vm1, %v10530_v0, -inf  ;;  %v10532_v9 = vadd.f32 %v10531_v50, %v10455_v23 }
 0x7e8   :  { %v10536_v51 = vmax.f32 %v10524_v11, %v10535_v33 }
 0x7e9   :  { %v10543_v21 = vsel %vm10534_vm1, %v10532_v9, -inf }
 0x7ea   :  { %v10537_v63 = vrot.slane %v10536_v51, 4  ;;  %v10544_v47 = vmax.f32 %v10526_v43, %v10543_v21 }
 0x7ec   :  { %v10538_v14 = vmax.f32 %v10536_v51, %v10537_v63  ;;  %v10545_v60 = vrot.slane %v10544_v47, 4 }
 0x7ee   :  { %v10539_v25 = vrot.slane %v10538_v14, 2  ;;  %v10546_v15 = vmax.f32 %v10544_v47, %v10545_v60 }
 0x7f0   :  { %v10540_v31 = vmax.f32 %v10538_v14, %v10539_v25  ;;  %v10547_v59 = vrot.slane %v10546_v15, 2 }
 0x7f2   :  { %v10541_v19 = vrot.slane %v10540_v31, 1  ;;  %v10548_v4 = vmax.f32 %v10546_v15, %v10547_v59 }
 0x7f4   :  { %v10542_v58 = vmax.f32 %v10540_v31, %v10541_v19  ;;  %v10549_v29 = vrot.slane %v10548_v4, 1 }
 0x7f6   :  { %v10551_v53 = vsub.f32 %v10524_v11, %v10542_v58  ;;  %v10553_v26 = vsub.f32 %v10530_v0, %v10542_v58  ;;  %v10550_v12 = vmax.f32 %v10548_v4, %v10549_v29 }
 0x7f8   :  { %v10555_v41 = vmul.f32 1.442695, %v10551_v53  ;;  %v10559_v27 = vmul.f32 1.442695, %v10553_v26  ;;  %v10552_v17 = vsub.f32 %v10526_v43, %v10550_v12  ;;  %v10554_v22 = vsub.f32 %v10532_v9, %v10550_v12 }
 0x7fa   :  { %11561 = vpow2.f32 %v10555_v41  ;;  %v10557_v44 = vmul.f32 1.442695, %v10552_v17  ;;  %v10561_v8 = vmul.f32 1.442695, %v10554_v22 }
 0x7fb   :  { %11563 = vpow2.f32 %v10559_v27 }
 0x7fc   :  { %11565 = vpow2.f32 %v10557_v44 }
 0x7fd   :  { %11567 = vpow2.f32 %v10561_v8 }
 0x807   :  { %v11562_v7 = vpop.eup %11561 }
 0x808   :  { %v11564_v35 = vpop.eup %11563 }
 0x809   :  { %v11566_v1 = vpop.eup %11565  ;;  %v10563_v52 = vsel %vm10534_vm1, %v11564_v35, 0.0 }
 0x80a   :  { %v11568_v10 = vpop.eup %11567  ;;  %v10564_v61 = vadd.f32 %v11562_v7, %v10563_v52 }
 0x80b   :  { %v10571_v28 = vsel %vm10534_vm1, %v11568_v10, 0.0 }
 0x80c   :  { %v10565_v5 = vrot.slane %v10564_v61, 4  ;;  %v10572_v40 = vadd.f32 %v11566_v1, %v10571_v28 }
 0x80e   :  { %v10566_v39 = vadd.f32 %v10565_v5, %v10564_v61  ;;  %v10573_v62 = vrot.slane %v10572_v40, 4 }
 0x810   :  { %v10567_v56 = vrot.slane %v10566_v39, 2  ;;  %v10574_v48 = vadd.f32 %v10573_v62, %v10572_v40 }
 0x812   :  { %v10568_v32 = vadd.f32 %v10567_v56, %v10566_v39  ;;  %v10575_v49 = vrot.slane %v10574_v48, 2 }
 0x814   :  { %v10569_v18 = vrot.slane %v10568_v32, 1  ;;  %v10576_v42 = vadd.f32 %v10575_v49, %v10574_v48 }
 0x816   :  { %v10570_v54 = vadd.f32 %v10569_v18, %v10568_v32  ;;  %v10577_v13 = vrot.slane %v10576_v42, 1 }
 0x818   :  { %11569 = vlog2.f32 %v10570_v54  ;;  %v10578_v6 = vadd.f32 %v10577_v13, %v10576_v42 }
 0x81a   :  { %11571 = vlog2.f32 %v10578_v6 }
 0x825   :  { %v11570_v45 = vpop.eup %11569 }
 0x826   :  { %v10580_v3 = vmul.f32 0.6931472, %v11570_v45 }
 0x827   :  { %v11572_v36 = vpop.eup %11571 }
 0x828   :  { %v10583_v57 = vsub.f32 %v10551_v53, %v10580_v3  ;;  %v10585_v46 = vsub.f32 %v10553_v26, %v10580_v3  ;;  %v10582_v24 = vmul.f32 0.6931472, %v11572_v36 }
 0x82a   :  { %10587 = vst [vmem:[#allocation7] sm:$0xff] %v10583_v57  ;;  %10589 = vst [vmem:[#allocation7 + $0x10] sm:$0x3] %v10585_v46  ;;  %v10584_v30 = vsub.f32 %v10552_v17, %v10582_v24  ;;  %v10586_v2 = vsub.f32 %v10554_v22, %v10582_v24 }
 0x82c   :  { %10588 = vst [vmem:[#allocation7 + $0x8] sm:$0xff] %v10584_v30  ;;  %10590 = vst [vmem:[#allocation7 + $0x18] sm:$0x3] %v10586_v2 }
 0x82d   :  { %11764 = shalt.err (!%p11761_p9)
}
 0x82e   :  { %s11783_s17 = smov 256   ;;  %s11784_s18 = smov 16  }
 0x82f   :  { %10602 = dma.vmem_to_hbm [thread:$0]  %s10597_s15, 512, %s20690_s4, [#allocation6], %s11783_s17, %s11783_s17, %s11784_s18  }
 0x830   :  { %11775 = dma.done.wait [#allocation6], 512  }
 0x831   :  { %11776 = vsyncadd [#allocation6], 4294966784 }
 0x832   :  { %10606 = vsyncpa [#allocation5], 1 }
 0x833   :  { %10607 = vsyncpa [#allocation6], 1 }

</bundles_post_ra>
